<compile_context>
chip_gen: v7x
topology: tpu7x:2x2x1
jax: 0.10.0
libtpu: 0.0.40
codegen_flags: <defaults>
</compile_context>

<pallas_src>
import functools

import jax
import jax.numpy as jnp
from jax.experimental import pallas as pl
from jax.experimental.pallas import tpu as pltpu


def _round_up(x, m):
    return (x + m - 1) // m * m


def _dense_conv_kernel(x_ref, w_ref, b_ref, o_ref, *,
                       th, wo, kh_sz, kw_sz, stride, cin, cin_pad, ctot_pad):
    """One (batch, row-tile) grid step.

    x_ref: (1, Hp, Wp, cin_pad)            zero-padded NHWC image (VMEM resident)
    w_ref: (kh_sz*kw_sz, cin_pad, ctot_pad) augmented weights (identity on centre tap)
    b_ref: (1, ctot_pad)                    augmented bias (zero on pass-through lanes)
    o_ref: (1, th, wo, ctot_pad)            fused [x, relu(conv)] output tile
    """
    r = pl.program_id(1)

    # Rows of the padded image needed for this output row tile (incl. halo).
    row0 = r * th * stride
    n_rows = (th - 1) * stride + kh_sz
    x_slab = x_ref[0, pl.ds(row0, n_rows)]          # (n_rows, Wp, cin_pad)

    # In-kernel im2col: Kh*Kw shifted views, Kh*Kw accumulating MXU matmuls.
    acc = jnp.zeros((th * wo, ctot_pad), jnp.float32)
    for kh in range(kh_sz):
        for kw in range(kw_sz):
            v = x_slab[kh:kh + (th - 1) * stride + 1:stride,
                       kw:kw + (wo - 1) * stride + 1:stride, :]   # (th, wo, cin_pad)
            acc = acc + jnp.dot(
                v.reshape(th * wo, cin_pad),
                w_ref[kh * kw_sz + kw],
                preferred_element_type=jnp.float32,
                precision=jax.lax.Precision.HIGHEST,
            )
    acc = acc + b_ref[...]

    # ReLU only on the conv lanes; lanes [0, cin) are the fused x pass-through.
    lane = jax.lax.broadcasted_iota(jnp.int32, acc.shape, dimension=1)
    out = jnp.where(lane >= cin, jnp.maximum(acc, 0.0), acc)
    o_ref[0] = out.reshape(th, wo, ctot_pad).astype(o_ref.dtype)


def _pick_row_tile(ho, wo, ctot_pad, budget_bytes=2 * 1024 * 1024):
    """Largest divisor of ho whose double-buffered output tile fits the budget."""
    best = 1
    for th in range(1, ho + 1):
        if ho % th:
            continue
        if 2 * th * wo * ctot_pad * 4 <= budget_bytes:
            best = th
    return best


@functools.partial(jax.jit, static_argnames=("stride", "padding"))
def dense_conv2d(x_nchw, weight, bias, stride=1, padding=1):
    """Pallas implementation of DenseConv2d.forward.

    x_nchw: (N, Cin, H, W) f32, weight: (Cout, Cin, Kh, Kw) f32, bias: (Cout,) f32
    returns (N, Cin + Cout, H, W) f32
    """
    N, Cin, H, W = x_nchw.shape
    Cout, _, Kh, Kw = weight.shape

    Ho = (H + 2 * padding - Kh) // stride + 1
    Wo = (W + 2 * padding - Kw) // stride + 1
    # torch.cat([x, out], 1) requires matching spatial dims (DenseNet config).
    if Ho != H or Wo != W or stride != 1 or padding >= Kh or padding >= Kw:
        raise ValueError(
            "dense_conv2d fused kernel requires the DenseNet config: "
            "stride=1 and 'same' padding so that Ho==H, Wo==W.")

    cin_pad = _round_up(Cin, 128)
    ctot_pad = _round_up(Cin + Cout, 128)
    Hp, Wp = H + 2 * padding, W + 2 * padding

    # --- glue: layout + padding (single pass each) --------------------------
    x_nhwc = jnp.transpose(x_nchw, (0, 2, 3, 1)).astype(jnp.float32)
    xp = jnp.pad(x_nhwc, ((0, 0), (padding, padding), (padding, padding),
                          (0, cin_pad - Cin)))

    # Augmented weights: conv weights in output lanes [Cin:Cin+Cout), identity
    # pass-through of x in lanes [0:Cin) on the centre tap (stride==1).
    w_t = jnp.transpose(weight, (2, 3, 1, 0)).astype(jnp.float32)  # (Kh,Kw,Cin,Cout)
    w_aug = jnp.zeros((Kh, Kw, cin_pad, ctot_pad), jnp.float32)
    w_aug = w_aug.at[:, :, :Cin, Cin:Cin + Cout].set(w_t)
    w_aug = w_aug.at[padding, padding, :Cin, :Cin].set(jnp.eye(Cin, dtype=jnp.float32))
    w_aug = w_aug.reshape(Kh * Kw, cin_pad, ctot_pad)
    b_aug = jnp.zeros((ctot_pad,), jnp.float32).at[Cin:Cin + Cout].set(
        bias.astype(jnp.float32)).reshape(1, ctot_pad)

    # --- tiling --------------------------------------------------------------
    th = _pick_row_tile(Ho, Wo, ctot_pad)
    grid = (N, Ho // th)

    kernel = functools.partial(
        _dense_conv_kernel, th=th, wo=Wo, kh_sz=Kh, kw_sz=Kw, stride=stride,
        cin=Cin, cin_pad=cin_pad, ctot_pad=ctot_pad)

    vmem_bytes = 4 * (
        2 * Hp * Wp * cin_pad            # resident padded image (double-buffered)
        + 2 * th * Wo * ctot_pad         # output tile (double-buffered)
        + Kh * Kw * cin_pad * ctot_pad   # resident augmented weights
        + ctot_pad                       # bias
        + 2 * th * Wo * ctot_pad         # accumulator / temporaries headroom
    )
    vmem_limit = int(min(64 * 1024 * 1024, max(2 * vmem_bytes, 16 * 1024 * 1024)))

    out_padded = pl.pallas_call(
        kernel,
        out_shape=jax.ShapeDtypeStruct((N, Ho, Wo, ctot_pad), jnp.float32),
        grid_spec=pltpu.PrefetchScalarGridSpec(
            num_scalar_prefetch=0,
            grid=grid,
            in_specs=[
                # padded image: same block for all row tiles -> stays VMEM resident
                pl.BlockSpec((1, Hp, Wp, cin_pad), lambda n, r: (n, 0, 0, 0)),
                # weights / bias: resident across the whole grid
                pl.BlockSpec((Kh * Kw, cin_pad, ctot_pad), lambda n, r: (0, 0, 0)),
                pl.BlockSpec((1, ctot_pad), lambda n, r: (0, 0)),
            ],
            out_specs=pl.BlockSpec((1, th, Wo, ctot_pad),
                                   lambda n, r: (n, r, 0, 0)),
        ),
        compiler_params=pltpu.CompilerParams(
            dimension_semantics=("parallel", "parallel"),
            vmem_limit_bytes=vmem_limit,
        ),
        cost_estimate=pl.CostEstimate(
            flops=2 * N * Ho * Wo * Kh * Kw * Cin * (Cin + Cout),
            transcendentals=0,
            bytes_accessed=4 * (xp.size + w_aug.size + b_aug.size
                                + N * Ho * Wo * ctot_pad),
        ),
    )(xp, w_aug, b_aug)

    # Slice the lane padding off and return NCHW (glue; fold into the consumer
    # / keep NHWC in a full model).
    out_nhwc = out_padded[..., :Cin + Cout]
    return jnp.transpose(out_nhwc, (0, 3, 1, 2))


def _reference(x_nchw, weight, bias, stride=1, padding=1):
    out = jax.lax.conv_general_dilated(
        x_nchw, weight,
        window_strides=(stride, stride),
        padding=((padding, padding), (padding, padding)),
        dimension_numbers=("NCHW", "OIHW", "NCHW"),
        precision=jax.lax.Precision.HIGHEST,
    )
    out = out + bias.reshape(1, -1, 1, 1)
    out = jnp.maximum(out, 0.0)
    return jnp.concatenate([x_nchw, out], axis=1)


if __name__ == "__main__":
    # DenseConv2d(in_channels=4, out_channels=4, kernel_size=3, stride=1)
    N, Cin, H, W = 2, 4, 16, 16
    Cout, Kh, Kw = 4, 3, 3
    stride, padding = 1, 1

    key = jax.random.PRNGKey(0)
    kx, kw_, kb = jax.random.split(key, 3)
    x = jax.random.normal(kx, (N, Cin, H, W), dtype=jnp.float32)
    fan_in = Cin * Kh * Kw
    weight = jax.random.normal(kw_, (Cout, Cin, Kh, Kw), dtype=jnp.float32) / jnp.sqrt(fan_in)
    bias = jax.random.normal(kb, (Cout,), dtype=jnp.float32) * 0.1

    y = dense_conv2d(x, weight, bias, stride=stride, padding=padding)
    y = jax.block_until_ready(y)

    y_ref = _reference(x, weight, bias, stride=stride, padding=padding)
    assert y.shape == (N, Cin + Cout, H, W), y.shape
    err = float(jnp.max(jnp.abs(y - y_ref)))
    assert jnp.allclose(y, y_ref, atol=1e-4, rtol=1e-4), err

    print("KERNEL_OK")
</pallas_src>

<mosaic_0001>
module attributes {stable_mosaic.version = 11 : i64} {
  func.func @_dense_conv_kernel(%arg0: i32, %arg1: i32, %arg2: memref<1x18x18x128xf32, #tpu.memory_space<vmem>>, %arg3: memref<9x128x128xf32, #tpu.memory_space<vmem>>, %arg4: memref<1x128xf32, #tpu.memory_space<vmem>>, %arg5: memref<1x16x16x128xf32, #tpu.memory_space<vmem>>) attributes {dimension_semantics = [#tpu.dimension_semantics<parallel>, #tpu.dimension_semantics<parallel>], iteration_bounds = array<i64: 2, 1>, scalar_prefetch = 0 : i64, scratch_operands = 0 : i64, tpu.core_type = #tpu.core_type<tc>, window_params = [{transform_indices = @transform_0, window_bounds = array<i64: 1, 18, 18, 128>}, {pipeline_mode = #tpu.pipeline_mode<synchronous>, transform_indices = @transform_1, window_bounds = array<i64: 9, 128, 128>}, {pipeline_mode = #tpu.pipeline_mode<synchronous>, transform_indices = @transform_2, window_bounds = array<i64: 1, 128>}, {transform_indices = @transform_3, window_bounds = array<i64: 1, 16, 16, 128>}]} {
    %c16_i32 = arith.constant 16 : i32
    %0 = arith.muli %arg1, %c16_i32 : i32
    %c1_i32 = arith.constant 1 : i32
    %1 = arith.muli %0, %c1_i32 : i32
    %c0 = arith.constant 0 : index
    %2 = arith.index_cast %1 : i32 to index
    %c0_0 = arith.constant 0 : index
    %c0_1 = arith.constant 0 : index
    %3 = vector.load %arg2[%c0, %2, %c0_0, %c0_1] : memref<1x18x18x128xf32, #tpu.memory_space<vmem>>, vector<1x18x18x128xf32>
    %4 = vector.shape_cast %3 : vector<1x18x18x128xf32> to vector<18x18x128xf32>
    %cst = arith.constant 0.000000e+00 : f32
    %5 = vector.broadcast %cst : f32 to vector<256x128xf32>
    %6 = vector.extract_strided_slice %4 {offsets = [0, 0, 0], sizes = [16, 16, 128], strides = [1, 1, 1]} : vector<18x18x128xf32> to vector<16x16x128xf32>
    %7 = vector.shape_cast %6 : vector<16x16x128xf32> to vector<256x128xf32>
    %c0_2 = arith.constant 0 : index
    %c0_3 = arith.constant 0 : index
    %c0_4 = arith.constant 0 : index
    %8 = vector.load %arg3[%c0_2, %c0_3, %c0_4] : memref<9x128x128xf32, #tpu.memory_space<vmem>>, vector<1x128x128xf32>
    %9 = vector.shape_cast %8 : vector<1x128x128xf32> to vector<128x128xf32>
    %cst_5 = arith.constant dense<0.000000e+00> : vector<256x128xf32>
    %10 = tpu.matmul %7, %9, %cst_5 {dimension_numbers = #tpu.dot_dimension_numbers<[1], [0], [0], [1], [0, 0, 1, 1], [], []>, precision = #tpu.contract_precision<fp32>} : vector<256x128xf32>, vector<128x128xf32>, vector<256x128xf32> -> vector<256x128xf32>
    %11 = arith.addf %5, %10 : vector<256x128xf32>
    %12 = vector.extract_strided_slice %4 {offsets = [0, 1, 0], sizes = [16, 16, 128], strides = [1, 1, 1]} : vector<18x18x128xf32> to vector<16x16x128xf32>
    %13 = vector.shape_cast %12 : vector<16x16x128xf32> to vector<256x128xf32>
    %c1 = arith.constant 1 : index
    %c0_6 = arith.constant 0 : index
    %c0_7 = arith.constant 0 : index
    %14 = vector.load %arg3[%c1, %c0_6, %c0_7] : memref<9x128x128xf32, #tpu.memory_space<vmem>>, vector<1x128x128xf32>
    %15 = vector.shape_cast %14 : vector<1x128x128xf32> to vector<128x128xf32>
    %cst_8 = arith.constant dense<0.000000e+00> : vector<256x128xf32>
    %16 = tpu.matmul %13, %15, %cst_8 {dimension_numbers = #tpu.dot_dimension_numbers<[1], [0], [0], [1], [0, 0, 1, 1], [], []>, precision = #tpu.contract_precision<fp32>} : vector<256x128xf32>, vector<128x128xf32>, vector<256x128xf32> -> vector<256x128xf32>
    %17 = arith.addf %11, %16 : vector<256x128xf32>
    %18 = vector.extract_strided_slice %4 {offsets = [0, 2, 0], sizes = [16, 16, 128], strides = [1, 1, 1]} : vector<18x18x128xf32> to vector<16x16x128xf32>
    %19 = vector.shape_cast %18 : vector<16x16x128xf32> to vector<256x128xf32>
    %c2 = arith.constant 2 : index
    %c0_9 = arith.constant 0 : index
    %c0_10 = arith.constant 0 : index
    %20 = vector.load %arg3[%c2, %c0_9, %c0_10] : memref<9x128x128xf32, #tpu.memory_space<vmem>>, vector<1x128x128xf32>
    %21 = vector.shape_cast %20 : vector<1x128x128xf32> to vector<128x128xf32>
    %cst_11 = arith.constant dense<0.000000e+00> : vector<256x128xf32>
    %22 = tpu.matmul %19, %21, %cst_11 {dimension_numbers = #tpu.dot_dimension_numbers<[1], [0], [0], [1], [0, 0, 1, 1], [], []>, precision = #tpu.contract_precision<fp32>} : vector<256x128xf32>, vector<128x128xf32>, vector<256x128xf32> -> vector<256x128xf32>
    %23 = arith.addf %17, %22 : vector<256x128xf32>
    %24 = vector.extract_strided_slice %4 {offsets = [1, 0, 0], sizes = [16, 16, 128], strides = [1, 1, 1]} : vector<18x18x128xf32> to vector<16x16x128xf32>
    %25 = vector.shape_cast %24 : vector<16x16x128xf32> to vector<256x128xf32>
    %c3 = arith.constant 3 : index
    %c0_12 = arith.constant 0 : index
    %c0_13 = arith.constant 0 : index
    %26 = vector.load %arg3[%c3, %c0_12, %c0_13] : memref<9x128x128xf32, #tpu.memory_space<vmem>>, vector<1x128x128xf32>
    %27 = vector.shape_cast %26 : vector<1x128x128xf32> to vector<128x128xf32>
    %cst_14 = arith.constant dense<0.000000e+00> : vector<256x128xf32>
    %28 = tpu.matmul %25, %27, %cst_14 {dimension_numbers = #tpu.dot_dimension_numbers<[1], [0], [0], [1], [0, 0, 1, 1], [], []>, precision = #tpu.contract_precision<fp32>} : vector<256x128xf32>, vector<128x128xf32>, vector<256x128xf32> -> vector<256x128xf32>
    %29 = arith.addf %23, %28 : vector<256x128xf32>
    %30 = vector.extract_strided_slice %4 {offsets = [1, 1, 0], sizes = [16, 16, 128], strides = [1, 1, 1]} : vector<18x18x128xf32> to vector<16x16x128xf32>
    %31 = vector.shape_cast %30 : vector<16x16x128xf32> to vector<256x128xf32>
    %c4 = arith.constant 4 : index
    %c0_15 = arith.constant 0 : index
    %c0_16 = arith.constant 0 : index
    %32 = vector.load %arg3[%c4, %c0_15, %c0_16] : memref<9x128x128xf32, #tpu.memory_space<vmem>>, vector<1x128x128xf32>
    %33 = vector.shape_cast %32 : vector<1x128x128xf32> to vector<128x128xf32>
    %cst_17 = arith.constant dense<0.000000e+00> : vector<256x128xf32>
    %34 = tpu.matmul %31, %33, %cst_17 {dimension_numbers = #tpu.dot_dimension_numbers<[1], [0], [0], [1], [0, 0, 1, 1], [], []>, precision = #tpu.contract_precision<fp32>} : vector<256x128xf32>, vector<128x128xf32>, vector<256x128xf32> -> vector<256x128xf32>
    %35 = arith.addf %29, %34 : vector<256x128xf32>
    %36 = vector.extract_strided_slice %4 {offsets = [1, 2, 0], sizes = [16, 16, 128], strides = [1, 1, 1]} : vector<18x18x128xf32> to vector<16x16x128xf32>
    %37 = vector.shape_cast %36 : vector<16x16x128xf32> to vector<256x128xf32>
    %c5 = arith.constant 5 : index
    %c0_18 = arith.constant 0 : index
    %c0_19 = arith.constant 0 : index
    %38 = vector.load %arg3[%c5, %c0_18, %c0_19] : memref<9x128x128xf32, #tpu.memory_space<vmem>>, vector<1x128x128xf32>
    %39 = vector.shape_cast %38 : vector<1x128x128xf32> to vector<128x128xf32>
    %cst_20 = arith.constant dense<0.000000e+00> : vector<256x128xf32>
    %40 = tpu.matmul %37, %39, %cst_20 {dimension_numbers = #tpu.dot_dimension_numbers<[1], [0], [0], [1], [0, 0, 1, 1], [], []>, precision = #tpu.contract_precision<fp32>} : vector<256x128xf32>, vector<128x128xf32>, vector<256x128xf32> -> vector<256x128xf32>
    %41 = arith.addf %35, %40 : vector<256x128xf32>
    %42 = vector.extract_strided_slice %4 {offsets = [2, 0, 0], sizes = [16, 16, 128], strides = [1, 1, 1]} : vector<18x18x128xf32> to vector<16x16x128xf32>
    %43 = vector.shape_cast %42 : vector<16x16x128xf32> to vector<256x128xf32>
    %c6 = arith.constant 6 : index
    %c0_21 = arith.constant 0 : index
    %c0_22 = arith.constant 0 : index
    %44 = vector.load %arg3[%c6, %c0_21, %c0_22] : memref<9x128x128xf32, #tpu.memory_space<vmem>>, vector<1x128x128xf32>
    %45 = vector.shape_cast %44 : vector<1x128x128xf32> to vector<128x128xf32>
    %cst_23 = arith.constant dense<0.000000e+00> : vector<256x128xf32>
    %46 = tpu.matmul %43, %45, %cst_23 {dimension_numbers = #tpu.dot_dimension_numbers<[1], [0], [0], [1], [0, 0, 1, 1], [], []>, precision = #tpu.contract_precision<fp32>} : vector<256x128xf32>, vector<128x128xf32>, vector<256x128xf32> -> vector<256x128xf32>
    %47 = arith.addf %41, %46 : vector<256x128xf32>
    %48 = vector.extract_strided_slice %4 {offsets = [2, 1, 0], sizes = [16, 16, 128], strides = [1, 1, 1]} : vector<18x18x128xf32> to vector<16x16x128xf32>
    %49 = vector.shape_cast %48 : vector<16x16x128xf32> to vector<256x128xf32>
    %c7 = arith.constant 7 : index
    %c0_24 = arith.constant 0 : index
    %c0_25 = arith.constant 0 : index
    %50 = vector.load %arg3[%c7, %c0_24, %c0_25] : memref<9x128x128xf32, #tpu.memory_space<vmem>>, vector<1x128x128xf32>
    %51 = vector.shape_cast %50 : vector<1x128x128xf32> to vector<128x128xf32>
    %cst_26 = arith.constant dense<0.000000e+00> : vector<256x128xf32>
    %52 = tpu.matmul %49, %51, %cst_26 {dimension_numbers = #tpu.dot_dimension_numbers<[1], [0], [0], [1], [0, 0, 1, 1], [], []>, precision = #tpu.contract_precision<fp32>} : vector<256x128xf32>, vector<128x128xf32>, vector<256x128xf32> -> vector<256x128xf32>
    %53 = arith.addf %47, %52 : vector<256x128xf32>
    %54 = vector.extract_strided_slice %4 {offsets = [2, 2, 0], sizes = [16, 16, 128], strides = [1, 1, 1]} : vector<18x18x128xf32> to vector<16x16x128xf32>
    %55 = vector.shape_cast %54 : vector<16x16x128xf32> to vector<256x128xf32>
    %c8 = arith.constant 8 : index
    %c0_27 = arith.constant 0 : index
    %c0_28 = arith.constant 0 : index
    %56 = vector.load %arg3[%c8, %c0_27, %c0_28] : memref<9x128x128xf32, #tpu.memory_space<vmem>>, vector<1x128x128xf32>
    %57 = vector.shape_cast %56 : vector<1x128x128xf32> to vector<128x128xf32>
    %cst_29 = arith.constant dense<0.000000e+00> : vector<256x128xf32>
    %58 = tpu.matmul %55, %57, %cst_29 {dimension_numbers = #tpu.dot_dimension_numbers<[1], [0], [0], [1], [0, 0, 1, 1], [], []>, precision = #tpu.contract_precision<fp32>} : vector<256x128xf32>, vector<128x128xf32>, vector<256x128xf32> -> vector<256x128xf32>
    %59 = arith.addf %53, %58 : vector<256x128xf32>
    %c0_30 = arith.constant 0 : index
    %c0_31 = arith.constant 0 : index
    %60 = vector.load %arg4[%c0_30, %c0_31] : memref<1x128xf32, #tpu.memory_space<vmem>>, vector<1x128xf32>
    %61 = vector.broadcast %60 : vector<1x128xf32> to vector<256x128xf32>
    %62 = arith.addf %59, %61 : vector<256x128xf32>
    %63 = tpu.iota {dimensions = array<i32: 1>} : vector<256x128xi32>
    %c4_i32 = arith.constant 4 : i32
    %64 = vector.broadcast %c4_i32 : i32 to vector<256x128xi32>
    %65 = arith.cmpi sge, %63, %64 : vector<256x128xi32>
    %cst_32 = arith.constant 0.000000e+00 : f32
    %66 = vector.broadcast %cst_32 : f32 to vector<256x128xf32>
    %67 = arith.maximumf %62, %66 : vector<256x128xf32>
    %68 = arith.select %65, %67, %62 : vector<256x128xi1>, vector<256x128xf32>
    %69 = vector.shape_cast %68 : vector<256x128xf32> to vector<16x16x128xf32>
    %c0_33 = arith.constant 0 : index
    %c0_34 = arith.constant 0 : index
    %c0_35 = arith.constant 0 : index
    %c0_36 = arith.constant 0 : index
    %70 = vector.load %arg5[%c0_33, %c0_34, %c0_35, %c0_36] : memref<1x16x16x128xf32, #tpu.memory_space<vmem>>, vector<1x16x16x128xf32>
    %71 = vector.shape_cast %70 : vector<1x16x16x128xf32> to vector<16x16x128xf32>
    %72 = vector.shape_cast %69 : vector<16x16x128xf32> to vector<1x16x16x128xf32>
    tpu.vector_store %arg5[%c0_33, %c0_34, %c0_35, %c0_36], %72 {strides = array<i32>} : memref<1x16x16x128xf32, #tpu.memory_space<vmem>>, vector<1x16x16x128xf32>,
    return
  }
  func.func @transform_0(%arg0: i32, %arg1: i32) -> (i32, i32, i32, i32) {
    %c0_i32 = arith.constant 0 : i32
    %c0_i32_0 = arith.constant 0 : i32
    %c0_i32_1 = arith.constant 0 : i32
    %c0_i32_2 = arith.constant 0 : i32
    return %arg0, %c0_i32, %c0_i32_0, %c0_i32_1 : i32, i32, i32, i32
  }
  func.func @transform_1(%arg0: i32, %arg1: i32) -> (i32, i32, i32) {
    %c0_i32 = arith.constant 0 : i32
    %c0_i32_0 = arith.constant 0 : i32
    %c0_i32_1 = arith.constant 0 : i32
    %c0_i32_2 = arith.constant 0 : i32
    return %c0_i32, %c0_i32_0, %c0_i32_1 : i32, i32, i32
  }
  func.func @transform_2(%arg0: i32, %arg1: i32) -> (i32, i32) {
    %c0_i32 = arith.constant 0 : i32
    %c0_i32_0 = arith.constant 0 : i32
    %c0_i32_1 = arith.constant 0 : i32
    return %c0_i32, %c0_i32_0 : i32, i32
  }
  func.func @transform_3(%arg0: i32, %arg1: i32) -> (i32, i32, i32, i32) {
    %c0_i32 = arith.constant 0 : i32
    %c0_i32_0 = arith.constant 0 : i32
    %c0_i32_1 = arith.constant 0 : i32
    return %arg0, %arg1, %c0_i32, %c0_i32_0 : i32, i32, i32, i32
  }
}

</mosaic_0001>

<bundles_post_ra>
// kernel: dense_conv2d.1
= control target key start
LH: loop header
LB: loop body
LE: loop exit
PB: predicated region body
PF: predicated region fallthrough
CT: control target
= control target key end

     0   :  { %s29565_s12 = smov 0   ;;  %s29567_s13 = smov 0   ;;  %s36497_s0 = inlined_call_operand.vmem [shape: f32[2,18,18,128], index: 0, kind: input, shape index: {}]   ;;  %s36498_s1 = inlined_call_operand.vmem [shape: f32[9,128,128], index: 1, kind: input, shape index: {}]   ;;  %s36499_s2 = inlined_call_operand.vmem [shape: f32[1,128], index: 2, kind: input, shape index: {}]   ;;  %s36500_s3 = inlined_call_operand.vmem [shape: f32[2,16,16,128], index: 3, kind: output, shape index: {}]  }
   0x1   :  { %s29569_s14 = smov 0  }
   0x2 LB: > { %s25_s15 = sadd.s32 1, %s29539_s13  ;;  %p18934_p0 = scmp.ge.s32.totalorder %s29543_s14, 1  ;;  %s29543_s14 = sphi %s29569_s14, %s13_s14   ;;  %s29539_s13 = sphi %s29567_s13, %s40107_s13   ;;  %s29535_s12 = sphi %s29565_s12, %s40106_s12  }
   0x3   : > { %p27_p1 = scmp.ge.s32.totalorder %s25_s15, 2  ;;  %p151_p2 = scmp.lt.s32.totalorder %s29543_s14, 3 }
   0x5   : > { %s40109_s15 = smov (%p27_p1, %s25_s15), 0  ;;  %p152_p3 = pnand %p18934_p0, %p151_p2 }
   0x7   : > { %155 = sbr.rel (%p152_p3) target bundleno = 2031 (0x7ef), region = 32 }
   0xe   : > { %v29588_v0 = vld [vmem:[%s36498_s1 + $0x80] sm:$0xff]  ;;  %v29593_v1 = vld [vmem:[%s36498_s1 + $0x88] sm:$0xff]  ;;  %p180_p4 = scmp.lt.s32.totalorder %s29535_s12, 1  ;;  %v29612_v7 = vld [vmem:[%s36498_s1 + $0x90] sm:$0xff]  ;;  %vm317_vm0 = vcmask 1046528   ;;  %vm4395_vm1 = vcmask 1045504  }
   0xf   : > { %v29598_v2 = vld [vmem:[%s36498_s1 + $0x200] sm:$0xff]  ;;  %v448_v3 = vand.u32 4294901760, %v29588_v0  ;;  %v451_v4 = vand.u32 4294901760, %v29593_v1  ;;  %v29606_v5 = vld [vmem:[%s36498_s1 + $0x208] sm:$0xff]  ;;  %v29617_v8 = vld [vmem:[%s36498_s1 + $0x98] sm:$0xff]  ;;  %v36520_v10 = vand.u32 4294901760, %v29612_v7 }
  0x10   : > { %v8582_v6 = vand.u32 4294901760, %v29598_v2  ;;  %v8585_v9 = vand.u32 4294901760, %v29606_v5  ;;  %v36517_v11 = vand.u32 4294901760, %v29617_v8  ;;  %v29625_v12 = vld [vmem:[%s36498_s1 + $0x210] sm:$0xff]  ;;  %v29630_v13 = vld [vmem:[%s36498_s1 + $0x218] sm:$0xff]  ;;  %v29635_v14 = vld [vmem:[%s36498_s1 + $0xa0] sm:$0xff] }
  0x11   : > { %v29641_v15 = vpack.c.bf16 %v451_v4, %v448_v3  ;;  %v36516_v16 = vand.u32 4294901760, %v29625_v12  ;;  %v36509_v17 = vand.u32 4294901760, %v29630_v13  ;;  %v29648_v18 = vld [vmem:[%s36498_s1 + $0xa8] sm:$0xff]  ;;  %v36506_v19 = vand.u32 4294901760, %v29635_v14  ;;  %v29654_v20 = vld [vmem:[%s36498_s1 + $0x220] sm:$0xff]  ;;  %v29678_v26 = vld [vmem:[%s36498_s1 + $0xb0] sm:$0xff] }
  0x12   : > { %v29659_v21 = vld [vmem:[%s36498_s1 + $0x228] sm:$0xff]  ;;  %v29665_v22 = vpack.c.bf16 %v8585_v9, %v8582_v6  ;;  %v29671_v23 = vpack.c.bf16 %v36517_v11, %v36520_v10  ;;  %v36503_v24 = vand.u32 4294901760, %v29648_v18  ;;  %v36502_v25 = vand.u32 4294901760, %v29654_v20  ;;  %v29683_v27 = vld [vmem:[%s36498_s1 + $0xb8] sm:$0xff]  ;;  %v29688_v28 = vld [vmem:[%s36498_s1 + $0x230] sm:$0xff]  ;;  %s40111_s12 = smov (!%p180_p4, %s29535_s12), 1 }
  0x13   : > { %37836 = vst [vmem:[#allocation2_spill] sm:$0xff] %v29641_v15  ;;  %25983 = vmatprep.subr.bf16.mxu1 %v29641_v15  ;;  %v29700_v29 = vpack.c.bf16 %v36509_v17, %v36516_v16  ;;  %v36501_v30 = vand.u32 4294901760, %v29659_v21  ;;  %v29706_v31 = vld [vmem:[%s36498_s1 + $0x238] sm:$0xff]  ;;  %v29711_v32 = vld [vmem:[%s36498_s1 + $0xc0] sm:$0xff]  ;;  %v29716_v33 = vld [vmem:[%s36498_s1 + $0xc8] sm:$0xff]  ;;  %v36505_v34 = vand.u32 4294901760, %v29678_v26 }
  0x14   : > { %37837 = vst [vmem:[#allocation3_spill] sm:$0xff] %v29665_v22  ;;  %37838 = vst [vmem:[#allocation4_spill] sm:$0xff] %v29671_v23  ;;  %26847 = vmatprep.subr.bf16.mxu0 %v29665_v22  ;;  %25985 = vmatpush3.bf16.msra.mxu1 %v29641_v15  ;;  %v36504_v35 = vand.u32 4294901760, %v29683_v27  ;;  %v36508_v36 = vand.u32 4294901760, %v29688_v28  ;;  %v29726_v37 = vld [vmem:[%s36498_s1 + $0x240] sm:$0xff]  ;;  %v29731_v38 = vld [vmem:[%s36498_s1 + $0x248] sm:$0xff]  ;;  %v29744_v40 = vpack.c.bf16 %v36503_v24, %v36506_v19 }
  0x15   : > { %37839 = vst [vmem:[#allocation5_spill] sm:$0xff] %v29700_v29  ;;  %v29736_v39 = vld [vmem:[%s36498_s1 + $0xd0] sm:$0xff]  ;;  %26849 = vmatpush3.bf16.msra.mxu0 %v29665_v22  ;;  %25987 = vmatprep.subr.bf16.mxu1 %v29671_v23  ;;  %v36507_v41 = vand.u32 4294901760, %v29706_v31  ;;  %v36513_v42 = vand.u32 4294901760, %v29711_v32  ;;  %v29751_v43 = vld [vmem:[%s36498_s1 + $0xd8] sm:$0xff]  ;;  %s29406_s18 = smul.u32 432, %s40111_s12  ;;  %v29769_v46 = vpack.c.bf16 %v36501_v30, %v36502_v25 }
  0x16   : > { %37840 = vst [vmem:[#allocation6_spill] sm:$0xff] %v29744_v40  ;;  %v29756_v44 = vld [vmem:[%s36498_s1 + $0x250] sm:$0xff]  ;;  %v29761_v45 = vld [vmem:[%s36498_s1 + $0x258] sm:$0xff]  ;;  %26851 = vmatprep.subr.bf16.mxu0 %v29700_v29  ;;  %v36510_v47 = vand.u32 4294901760, %v29716_v33  ;;  %v36512_v48 = vand.u32 4294901760, %v29726_v37  ;;  %v36511_v49 = vand.u32 4294901760, %v29731_v38  ;;  %v29816_v60 = vpack.c.bf16 %v36504_v35, %v36505_v34 }
  0x17   : > { %37841 = vst [vmem:[#allocation7_spill] sm:$0xff] %v29769_v46  ;;  %v29777_v50 = vld [vmem:[%s36498_s1 + $0xe0] sm:$0xff]  ;;  %v29782_v51 = vld [vmem:[%s36498_s1 + $0xe8] sm:$0xff]  ;;  %v36515_v52 = vand.u32 4294901760, %v29736_v39  ;;  %v36514_v53 = vand.u32 4294901760, %v29751_v43  ;;  %v36519_v54 = vand.u32 4294901760, %v29756_v44  ;;  %s29796_s27 = scalar_lea.vmem %s36497_s0, %s29406_s18  ;;  %v29828_v24 = vpack.c.bf16 %v36507_v41, %v36508_v36 }
  0x18   : > { %v36518_v55 = vand.u32 4294901760, %v29761_v45  ;;  %v29791_v56 = vld [vmem:[%s36498_s1 + $0x260] sm:$0xff]  ;;  %25989 = vmatpush3.bf16.msra.mxu1 %v29671_v23  ;;  %v29802_v57 = vld [vmem:[%s36498_s1 + $0x268] sm:$0xff]  ;;  %v29807_v58 = vld [vmem:[%s36498_s1 + $0xf0] sm:$0xff]  ;;  %37842 = vst [vmem:[#allocation8_spill] sm:$0xff] %v29816_v60  ;;  %v36522_v61 = vand.u32 4294901760, %v29777_v50  ;;  %v29834_v35 = vpack.c.bf16 %v36510_v47, %v36513_v42  ;;  %v29840_v34 = vpack.c.bf16 %v36511_v49, %v36512_v48 }
  0x19   : > { %v199_v59 = vld [vmem:[%s29796_s27] sm:$0xff]  ;;  %26853 = vmatpush3.bf16.msra.mxu0 %v29700_v29  ;;  %25991 = vmatprep.subr.bf16.mxu1 %v29744_v40  ;;  %v36521_v62 = vand.u32 4294901760, %v29782_v51  ;;  %v200_v63 = vld [vmem:[%s29796_s27 + $0x8] sm:$0xff]  ;;  %v202_v30 = vld [vmem:[%s29796_s27 + $0x18] sm:$0xff]  ;;  %37843 = vst [vmem:[#allocation9_spill] sm:$0xff] %v29828_v24  ;;  %v29852_v17 = vpack.c.bf16 %v36514_v53, %v36515_v52  ;;  %s19069_s20 = sshll.u32 %s40111_s12, 8 }
  0x1a   : > { %v203_v25 = vld [vmem:[%s29796_s27 + $0x20] sm:$0xff]  ;;  %26855 = vmatprep.subr.bf16.mxu0 %v29769_v46  ;;  %37844 = vst [vmem:[#allocation10_spill] sm:$0xff] %v29834_v35  ;;  %37845 = vst [vmem:[#allocation11_spill] sm:$0xff] %v29840_v34  ;;  %v29845_v19 = vld [vmem:[%s36498_s1 + $0xf8] sm:$0xff]  ;;  %v318_v41 = vrot.slane %v199_v59, 1  ;;  %v29858_v47 = vpack.c.bf16 %v36518_v55, %v36519_v54  ;;  %v319_v59 = vrot.slane %v200_v63, 1  ;;  %s36360_s23 = scalar_lea.vmem %s36500_s3, %s19069_s20 }
  0x1b   : > { %v201_v36 = vld [vmem:[%s29796_s27 + $0x10] sm:$0x3]  ;;  %37846 = vst [vmem:[#allocation12_spill] sm:$0xff] %v29852_v17  ;;  %v323_v52 = vrot.slane %v202_v30, 1  ;;  %v324_v16 = vrot.slane %v203_v25, 1  ;;  %v29876_v55 = vpack.c.bf16 %v36521_v62, %v36522_v61  ;;  %v29884_v25 = vld [vmem:[%s36498_s1 + $0x278] sm:$0xff]  ;;  %v29892_v62 = vsub.f32 %v29588_v0, %v448_v3 }
  0x1c   : > { %37847 = vst [vmem:[#allocation13_spill] sm:$0xff] %v29858_v47  ;;  %v29864_v48 = vld [vmem:[%s36498_s1 + $0x270] sm:$0xff]  ;;  %25993 = vmatpush3.bf16.msra.mxu1 %v29744_v40  ;;  %v204_v11 = vld [vmem:[%s29796_s27 + $0x28] sm:$0x3]  ;;  %v320_v54 = vsel %vm317_vm0, %v318_v41, %v319_v59  ;;  %v321_v10 = vrot.slane %v201_v36, 1  ;;  %v29897_v36 = vsub.f32 %v29593_v1, %v451_v4 }
  0x1d   : > { %26857 = vmatpush3.bf16.msra.mxu0 %v29769_v46  ;;  %25995 = vmatprep.subr.bf16.mxu1 %v29816_v60  ;;  %37848 = vst [vmem:[#allocation14_spill] sm:$0xff] %v29876_v55  ;;  %v29886_v30 = vand.u32 4294901760, %v320_v54  ;;  %v325_v53 = vsel %vm317_vm0, %v323_v52, %v324_v16  ;;  %v326_v42 = vrot.slane %v204_v11, 1  ;;  %v36523_v3 = vand.u32 4294901760, %v29892_v62  ;;  %v205_v4 = vld [vmem:[%s29796_s27 + $0x30] sm:$0xff] }
  0x1e   : > { %26859 = vmatprep.subr.bf16.mxu0 %v29828_v24  ;;  %v29900_v61 = vand.u32 4294901760, %v325_v53  ;;  %v322_v63 = vsel %vm317_vm0, %v319_v59, %v321_v10  ;;  %v36524_v1 = vand.u32 4294901760, %v29897_v36  ;;  %v29922_v59 = vsub.f32 %v29598_v2, %v8582_v6  ;;  %v207_v23 = vld [vmem:[%s29796_s27 + $0x40] sm:$0x3] }
  0x1f   : > { %37849 = vst [vmem:[#allocation15_spill] sm:$0xff] %v29886_v30  ;;  %v29905_v52 = vsub.f32 %v320_v54, %v29886_v30  ;;  %v29907_v0 = vand.u32 4294901760, %v322_v63  ;;  %v327_v54 = vsel %vm317_vm0, %v324_v16, %v326_v42  ;;  %v852_v10 = vsub.f32 %v29892_v62, %v36523_v3  ;;  %v206_v42 = vld [vmem:[%s29796_s27 + $0x38] sm:$0xff] }
  0x20   : > { %37850 = vst [vmem:[#allocation16_spill] sm:$0xff] %v29900_v61  ;;  %25997 = vmatpush3.bf16.msra.mxu1 %v29816_v60  ;;  %v29916_v11 = vsub.f32 %v325_v53, %v29900_v61  ;;  %37854 = vst [vmem:[#allocation20_spill] sm:$0xff] %v29922_v59  ;;  %v859_v16 = vsub.f32 %v29897_v36, %v36524_v1  ;;  %v29939_v6 = vand.u32 4294901760, %v327_v54 }
  0x21   : > { %37851 = vst [vmem:[#allocation17_spill] sm:$0xff] %v29905_v52  ;;  %37852 = vst [vmem:[#allocation18_spill] sm:$0xff] %v29907_v0  ;;  %26861 = vmatpush3.bf16.msra.mxu0 %v29828_v24  ;;  %25999 = vmatprep.subr.bf16.mxu1 %v29834_v35  ;;  %v36533_v41 = vand.u32 4294901760, %v29905_v52  ;;  %v29927_v49 = vsub.f32 %v322_v63, %v29907_v0  ;;  %v29944_v53 = vsub.f32 %v29606_v5, %v8585_v9  ;;  %v209_v9 = vld [vmem:[%s29796_s27 + $0x50] sm:$0xff] }
  0x22   : > { %37853 = vst [vmem:[#allocation19_spill] sm:$0xff] %v29916_v11  ;;  %26863 = vmatprep.subr.bf16.mxu0 %v29840_v34  ;;  %v29937_v2 = vand.u32 4294901760, %v29916_v11  ;;  %37857 = vst [vmem:[#allocation23_spill] sm:$0xff] %v29939_v6  ;;  %v328_v63 = vrot.slane %v205_v4, 1  ;;  %v853_v60 = vand.u32 4294901760, %v852_v10  ;;  %v860_v40 = vand.u32 4294901760, %v859_v16 }
  0x23   : > { %37855 = vst [vmem:[#allocation21_spill] sm:$0xff] %v29927_v49  ;;  %37858 = vst [vmem:[#allocation24_spill] sm:$0xff] %v29944_v53  ;;  %v531_v3 = vsub.f32 %v29905_v52, %v36533_v41  ;;  %v29954_v5 = vsub.f32 %v327_v54, %v29939_v6  ;;  %v37860_v41 = vand.u32 4294901760, %v29791_v56  ;;  %v37861_v10 = vand.u32 4294901760, %v29802_v57  ;;  %v208_v52 = vld [vmem:[%s29796_s27 + $0x48] sm:$0xff] }
  0x24   : > { %37856 = vst [vmem:[#allocation22_spill] sm:$0xff] %v29937_v2  ;;  %26001 = vmatpush3.bf16.msra.mxu1 %v29834_v35  ;;  %v329_v35 = vrot.slane %v206_v42, 1  ;;  %23854 = vmatprep.mubr.f32.mxu0 %v29937_v2  ;;  %v551_v54 = vsub.f32 %v29916_v11, %v29937_v2  ;;  %v37863_v4 = vand.u32 4294901760, %v29807_v58  ;;  %v37864_v42 = vand.u32 4294901760, %v29845_v19 }
  0x25   : > { %26865 = vmatpush3.bf16.msra.mxu0 %v29840_v34  ;;  %26003 = vmatprep.subr.bf16.mxu1 %v29852_v17  ;;  %37859 = vst [vmem:[#allocation25_spill] sm:$0xff] %v29954_v5  ;;  %v29964_v16 = vpack.c.bf16 %v37861_v10, %v37860_v41  ;;  %v532_v1 = vand.u32 4294901760, %v531_v3  ;;  %v37866_v34 = vand.u32 4294901760, %v29927_v49  ;;  %v37867_v10 = vand.u32 4294901760, %v29864_v48 }
  0x26   : > { %26867 = vmatprep.subr.bf16.mxu0 %v29858_v47  ;;  %v29975_v15 = vpack.c.bf16 %v37864_v42, %v37863_v4  ;;  %v330_v3 = vsel %vm317_vm0, %v328_v63, %v329_v35  ;;  %v37868_v2 = vand.u32 4294901760, %v29884_v25  ;;  %v29990_v24 = vpack.c.bf16 %v860_v40, %v853_v60 }
  0x27   : > { %37862 = vst [vmem:[#allocation26_spill] sm:$0xff] %v29964_v16  ;;  %v29980_v41 = vsub.f32 %v29927_v49, %v37866_v34  ;;  %21694 = vmatprep.mubr.f32.mxu1 %v532_v1  ;;  %v29992_v4 = vand.u32 4294901760, %v330_v3  ;;  %v331_v42 = vrot.slane %v207_v23, 1  ;;  %v29997_v34 = vand.u32 4294901760, %v29954_v5  ;;  %v210_v1 = vld [vmem:[%s29796_s27 + $0x58] sm:$0x3] }
  0x28   : > { %37865 = vst [vmem:[#allocation27_spill] sm:$0xff] %v29975_v15  ;;  %26005 = vmatpush3.bf16.msra.mxu1 %v29852_v17  ;;  %v29988_v11 = vpack.c.bf16 %v37868_v2, %v37867_v10  ;;  %v37872_v63 = vand.u32 4294901760, %v29922_v59  ;;  %v37873_v17 = vand.u32 4294901760, %v29944_v53  ;;  %v333_v2 = vrot.slane %v208_v52, 1 }
  0x29   : > { %37870 = vst [vmem:[#allocation29_spill] sm:$0xff] %v29992_v4  ;;  %26869 = vmatpush3.bf16.msra.mxu0 %v29858_v47  ;;  %26007 = vmatprep.subr.bf16.mxu1 %v29876_v55  ;;  %37871 = vst [vmem:[#allocation30_spill] sm:$0xff] %v29997_v34  ;;  %v334_v10 = vrot.slane %v209_v9, 1  ;;  %v30005_v40 = vand.u32 4294901760, %v551_v54  ;;  %v30008_v23 = vsub.f32 %v330_v3, %v29992_v4  ;;  %v37876_v47 = vand.u32 4294901760, %v29612_v7 }
  0x2a   : > { %37869 = vst [vmem:[#allocation28_spill] sm:$0xff] %v29988_v11  ;;  %v26878_v49 = vpack.c.bf16 %v37873_v17, %v37872_v63  ;;  %26871 = vmatprep.subr.bf16.mxu0 %v29964_v16  ;;  %v332_v60 = vsel %vm317_vm0, %v329_v35, %v331_v42  ;;  %v542_v53 = vand.u32 4294901760, %v29980_v41  ;;  %v37878_v9 = vand.u32 4294901760, %v29617_v8 }
  0x2b   : > { %37874 = vst [vmem:[#allocation31_spill] sm:$0xff] %v30005_v40  ;;  %37875 = vst [vmem:[#allocation32_spill] sm:$0xff] %v30008_v23  ;;  %v30014_v46 = vsub.f32 %v29612_v7, %v37876_v47  ;;  %v30017_v17 = vand.u32 4294901760, %v332_v60  ;;  %v335_v52 = vsel %vm317_vm0, %v333_v2, %v334_v10  ;;  %v30027_v35 = vand.u32 4294901760, %v30008_v23 }
  0x2c   : > { %v30023_v54 = vsub.f32 %v29617_v8, %v37878_v9  ;;  %26009 = vmatpush3.bf16.msra.mxu1 %v29876_v55  ;;  %v30029_v3 = vand.u32 4294901760, %v335_v52  ;;  %v336_v47 = vrot.slane %v210_v1, 1  ;;  %v37882_v42 = vand.u32 4294901760, %v29625_v12 }
  0x2d   : > { %37877 = vst [vmem:[#allocation33_spill] sm:$0xff] %v30017_v17  ;;  %37879 = vst [vmem:[#allocation34_spill] sm:$0xff] %v30027_v35  ;;  %v36561_v7 = vand.u32 4294901760, %v30014_v46  ;;  %26873 = vmatpush3.bf16.msra.mxu0 %v29964_v16  ;;  %26011 = vmatprep.subr.bf16.mxu1 %v29975_v15  ;;  %v30035_v41 = vsub.f32 %v332_v60, %v30017_v17  ;;  %v37884_v2 = vand.u32 4294901760, %v29630_v13  ;;  %v213_v17 = vld [vmem:[%s29796_s27 + $0x70] sm:$0x3] }
  0x2e   : > { %37880 = vst [vmem:[#allocation35_spill] sm:$0xff] %v30029_v3  ;;  %v30041_v63 = vsub.f32 %v29625_v12, %v37882_v42  ;;  %26875 = vmatprep.subr.bf16.mxu0 %v29988_v11  ;;  %v561_v1 = vsub.f32 %v29954_v5, %v29997_v34  ;;  %v30052_v60 = vsub.f32 %v335_v52, %v30029_v3  ;;  %v211_v42 = vld [vmem:[%s29796_s27 + $0x60] sm:$0xff]  ;;  %v212_v5 = vld [vmem:[%s29796_s27 + $0x68] sm:$0xff] }
  0x2f   : > { %37881 = vst [vmem:[#allocation36_spill] sm:$0xff] %v30035_v41  ;;  %v30046_v9 = vsub.f32 %v29630_v13, %v37884_v2  ;;  %v866_v8 = vsub.f32 %v30014_v46, %v36561_v7  ;;  %v337_v12 = vsel %vm317_vm0, %v334_v10, %v336_v47  ;;  %v30060_v59 = vand.u32 4294901760, %v30035_v41  ;;  %v215_v16 = vld [vmem:[%s29796_s27 + $0x80] sm:$0xff] }
  0x30   : > { %37883 = vst [vmem:[#allocation37_spill] sm:$0xff] %v30041_v63  ;;  %37886 = vst [vmem:[#allocation39_spill] sm:$0xff] %v30052_v60  ;;  %v37888_v13 = vand.u32 4294901760, %v30023_v54  ;;  %v30065_v55 = vand.u32 4294901760, %v337_v12  ;;  %26013 = vmatpush3.bf16.msra.mxu1 %v29975_v15  ;;  %v571_v10 = vsub.f32 %v30008_v23, %v30027_v35  ;;  %v30073_v47 = vand.u32 4294901760, %v30052_v60  ;;  %v214_v23 = vld [vmem:[%s29796_s27 + $0x78] sm:$0xff] }
  0x31   : > { %37885 = vst [vmem:[#allocation38_spill] sm:$0xff] %v30046_v9  ;;  %37887 = vst [vmem:[#allocation40_spill] sm:$0xff] %v30060_v59  ;;  %v867_v7 = vand.u32 4294901760, %v866_v8  ;;  %26877 = vmatpush3.bf16.msra.mxu0 %v29988_v11  ;;  %26015 = vmatprep.subr.bf16.mxu1 %v29990_v24  ;;  %v338_v3 = vrot.slane %v211_v42, 1  ;;  %v339_v29 = vrot.slane %v212_v5, 1  ;;  %v30088_v11 = vand.u32 4294901760, %v561_v1 }
  0x32   : > { %v873_v2 = vsub.f32 %v30023_v54, %v37888_v13  ;;  %37889 = vst [vmem:[#allocation41_spill] sm:$0xff] %v30065_v55  ;;  %37890 = vst [vmem:[#allocation42_spill] sm:$0xff] %v30073_v47  ;;  %v581_v13 = vsub.f32 %v30035_v41, %v30060_v59  ;;  %v30081_v15 = vsub.f32 %v337_v12, %v30065_v55  ;;  %26879 = vmatprep.subr.bf16.mxu0 %v26878_v49 }
  0x33   : > { %v591_v8 = vsub.f32 %v30052_v60, %v30073_v47  ;;  %21695 = vmatmul.mubr.f32.vlgmr.msra.gmra.mrb[0].mxu1 %v542_v53  ;;  %37892 = vst [vmem:[#allocation44_spill] sm:$0xff] %v30088_v11  ;;  %v37894_v12 = vand.u32 4294901760, %v30041_v63  ;;  %v37895_v42 = vand.u32 4294901760, %v30046_v9  ;;  %v30099_v60 = vand.u32 4294901760, %v571_v10  ;;  %v216_v9 = vld [vmem:[%s29796_s27 + $0x88] sm:$0x3] }
  0x34   : > { %v874_v52 = vand.u32 4294901760, %v873_v2  ;;  %37891 = vst [vmem:[#allocation43_spill] sm:$0xff] %v30081_v15  ;;  %v30091_v41 = vand.u32 4294901760, %v30081_v15  ;;  %23855 = vmatmul.mubr.f32.vlgmr.msra.gmra.mrb[0].mxu0 %v29997_v34  ;;  %26017 = vmatpush3.bf16.msra.mxu1 %v29990_v24  ;;  %v340_v53 = vsel %vm317_vm0, %v338_v3, %v339_v29  ;;  %v341_v5 = vrot.slane %v213_v17, 1 }
  0x35   : > { %v26882_v2 = vpack.c.bf16 %v37895_v42, %v37894_v12  ;;  %37896 = vst [vmem:[#allocation46_spill] sm:$0xff] %v30099_v60  ;;  %v343_v1 = vrot.slane %v214_v23, 1  ;;  %26881 = vmatpush3.bf16.msra.mxu0 %v26878_v49  ;;  %21697 = vmatprep.mubr.f32.mxu1 %v30005_v40  ;;  %v344_v42 = vrot.slane %v215_v16, 1  ;;  %v30111_v24 = vand.u32 4294901760, %v591_v8 }
  0x36   : > { %v26018_v4 = vpack.c.bf16 %v874_v52, %v867_v7  ;;  %37893 = vst [vmem:[#allocation45_spill] sm:$0xff] %v30091_v41  ;;  %v30103_v7 = vand.u32 4294901760, %v581_v13  ;;  %v30105_v52 = vand.u32 4294901760, %v340_v53  ;;  %v601_v12 = vsub.f32 %v30081_v15, %v30091_v41  ;;  %23857 = vmatprep.mubr.f32.mxu0 %v30027_v35 }
  0x37   : > { %37899 = vst [vmem:[#allocation49_spill] sm:$0xff] %v30111_v24  ;;  %v342_v17 = vsel %vm317_vm0, %v339_v29, %v341_v5  ;;  %v37900_v49 = vand.u32 4294901760, %v29635_v14  ;;  %v37901_v3 = vand.u32 4294901760, %v29648_v18  ;;  %21698 = vmatmul.mubr.f32.gmra.mrb[2].mxu1 %v30088_v11  ;;  %26883 = vmatprep.subr.bf16.mxu0 %v26882_v2  ;;  %v345_v29 = vsel %vm317_vm0, %v343_v1, %v344_v42 }
  0x38   : > { %37897 = vst [vmem:[#allocation47_spill] sm:$0xff] %v30103_v7  ;;  %37898 = vst [vmem:[#allocation48_spill] sm:$0xff] %v30105_v52  ;;  %26019 = vmatprep.subr.bf16.mxu1 %v26018_v4  ;;  %v30126_v16 = vsub.f32 %v340_v53, %v30105_v52  ;;  %v30128_v13 = vand.u32 4294901760, %v601_v12  ;;  %v30130_v8 = vand.u32 4294901760, %v342_v17  ;;  %23858 = vmatmul.mubr.f32.gmra.mrb[2].mxu0 %v30060_v59  ;;  %v37908_v12 = vand.u32 4294901760, %v29654_v20 }
  0x39   : > { %v30117_v23 = vsub.f32 %v29635_v14, %v37900_v49  ;;  %v30122_v10 = vsub.f32 %v29648_v18, %v37901_v3  ;;  %21700 = vmatprep.mubr.f32.mxu1 %v30099_v60  ;;  %v30135_v14 = vand.u32 4294901760, %v345_v29  ;;  %v346_v49 = vrot.slane %v216_v9, 1  ;;  %23860 = vmatprep.mubr.f32.mxu0 %v30073_v47  ;;  %v220_v47 = vld [vmem:[%s29796_s27 + $0xa8] sm:$0xff] }
  0x3a   : > { %37902 = vst [vmem:[#allocation50_spill] sm:$0xff] %v30126_v16  ;;  %37903 = vst [vmem:[#allocation51_spill] sm:$0xff] %v30128_v13  ;;  %26021 = vmatpush3.bf16.msra.mxu1 %v26018_v4  ;;  %v30141_v53 = vand.u32 4294901760, %v30126_v16  ;;  %v30144_v1 = vsub.f32 %v342_v17, %v30130_v8  ;;  %v30149_v3 = vsub.f32 %v29654_v20, %v37908_v12  ;;  %v37910_v18 = vand.u32 4294901760, %v29659_v21  ;;  %v217_v12 = vld [vmem:[%s29796_s27 + $0x90] sm:$0xff] }
  0x3b   : > { %37904 = vst [vmem:[#allocation52_spill] sm:$0xff] %v30130_v8  ;;  %37905 = vst [vmem:[#allocation53_spill] sm:$0xff] %v30135_v14  ;;  %26885 = vmatpush3.bf16.msra.mxu0 %v26882_v2  ;;  %v30157_v4 = vsub.f32 %v345_v29, %v30135_v14  ;;  %v37913_v9 = vand.u32 4294901760, %v30117_v23  ;;  %v37914_v17 = vand.u32 4294901760, %v30122_v10  ;;  %v347_v20 = vsel %vm317_vm0, %v344_v42, %v346_v49 }
  0x3c   : > { %37906 = vst [vmem:[#allocation54_spill] sm:$0xff] %v30141_v53  ;;  %37907 = vst [vmem:[#allocation55_spill] sm:$0xff] %v30144_v1  ;;  %v30154_v5 = vsub.f32 %v29659_v21, %v37910_v18  ;;  %21701 = vmatmul.mubr.f32.gmra.mrb[4].mxu1 %v30103_v7  ;;  %v30169_v21 = vand.u32 4294901760, %v30144_v1  ;;  %v611_v2 = vsub.f32 %v30126_v16, %v30141_v53  ;;  %v30173_v29 = vand.u32 4294901760, %v347_v20 }
  0x3d   : > { %37909 = vst [vmem:[#allocation56_spill] sm:$0xff] %v30149_v3  ;;  %37912 = vst [vmem:[#allocation58_spill] sm:$0xff] %v30157_v4  ;;  %v880_v11 = vsub.f32 %v30117_v23, %v37913_v9  ;;  %v887_v40 = vsub.f32 %v30122_v10, %v37914_v17  ;;  %v218_v9 = vld [vmem:[%s29796_s27 + $0x98] sm:$0xff]  ;;  %23861 = vmatmul.mubr.f32.gmra.mrb[4].mxu0 %v30091_v41  ;;  %21703 = vmatprep.mubr.f32.mxu1 %v30111_v24  ;;  %v30180_v42 = vand.u32 4294901760, %v30157_v4  ;;  %v219_v24 = vld [vmem:[%s29796_s27 + $0xa0] sm:$0x3] }
  0x3e   : > { %37911 = vst [vmem:[#allocation57_spill] sm:$0xff] %v30154_v5  ;;  %37915 = vst [vmem:[#allocation59_spill] sm:$0xff] %v30169_v21  ;;  %v36605_v63 = vand.u32 4294901760, %v30154_v5  ;;  %23863 = vmatprep.mubr.f32.mxu0 %v30141_v53  ;;  %v30184_v7 = vand.u32 4294901760, %v611_v2  ;;  %v621_v18 = vsub.f32 %v30144_v1, %v30169_v21  ;;  %v30189_v60 = vsub.f32 %v347_v20, %v30173_v29  ;;  %v221_v53 = vld [vmem:[%s29796_s27 + $0xb0] sm:$0xff] }
  0x3f   : > { %37916 = vst [vmem:[#allocation60_spill] sm:$0xff] %v30173_v29  ;;  %37917 = vst [vmem:[#allocation61_spill] sm:$0xff] %v30180_v42  ;;  %v881_v49 = vand.u32 4294901760, %v880_v11  ;;  %v888_v17 = vand.u32 4294901760, %v887_v40  ;;  %v348_v41 = vrot.slane %v217_v12, 1  ;;  %v37920_v35 = vand.u32 4294901760, %v30149_v3 }
  0x40   : > { %37918 = vst [vmem:[#allocation62_spill] sm:$0xff] %v30184_v7  ;;  %37919 = vst [vmem:[#allocation63_spill] sm:$0xff] %v30189_v60  ;;  %v631_v40 = vsub.f32 %v30157_v4, %v30180_v42  ;;  %v349_v2 = vrot.slane %v218_v9, 1  ;;  %21704 = vmatmul.mubr.f32.gmra.mrb[6].mxu1 %v30128_v13  ;;  %v30201_v34 = vand.u32 4294901760, %v621_v18  ;;  %v30204_v20 = vand.u32 4294901760, %v30189_v60 }
  0x41   : > { %v26022_v59 = vpack.c.bf16 %v888_v17, %v881_v49  ;;  %v26886_v11 = vpack.c.bf16 %v36605_v63, %v37920_v35  ;;  %23864 = vmatmul.mubr.f32.gmra.mrb[6].mxu0 %v30169_v21  ;;  %21706 = vmatprep.mubr.f32.mxu1 %v30184_v7  ;;  %v351_v49 = vrot.slane %v219_v24, 1  ;;  %v353_v17 = vrot.slane %v220_v47, 1  ;;  %v222_v5 = vld [vmem:[%s29796_s27 + $0xb8] sm:$0x3]  ;;  %v225_v21 = vld [vmem:[%s29796_s27 + $0xd0] sm:$0x3] }
  0x42   : > { %37921 = vst [vmem:[#allocation64_spill] sm:$0xff] %v30201_v34  ;;  %37922 = vst [vmem:[#allocation65_spill] sm:$0xff] %v30204_v20  ;;  %v30208_v12 = vand.u32 4294901760, %v631_v40  ;;  %v350_v35 = vsel %vm317_vm0, %v348_v41, %v349_v2  ;;  %23866 = vmatprep.mubr.f32.mxu0 %v30180_v42  ;;  %v641_v18 = vsub.f32 %v30189_v60, %v30204_v20  ;;  %v354_v63 = vrot.slane %v221_v53, 1 }
  0x43   : > { %26023 = vmatprep.subr.bf16.mxu1 %v26022_v59  ;;  %v30212_v9 = vand.u32 4294901760, %v350_v35  ;;  %26887 = vmatprep.subr.bf16.mxu0 %v26886_v11  ;;  %v352_v3 = vsel %vm317_vm0, %v349_v2, %v351_v49  ;;  %v37925_v40 = vand.u32 4294901760, %v29678_v26  ;;  %v37926_v47 = vand.u32 4294901760, %v29683_v27 }
  0x44   : > { %37923 = vst [vmem:[#allocation66_spill] sm:$0xff] %v30208_v12  ;;  %26025 = vmatpush3.bf16.msra.mxu1 %v26022_v59  ;;  %26889 = vmatpush3.bf16.msra.mxu0 %v26886_v11  ;;  %v30232_v7 = vand.u32 4294901760, %v641_v18  ;;  %v30234_v59 = vand.u32 4294901760, %v352_v3  ;;  %v355_v2 = vsel %vm317_vm0, %v353_v17, %v354_v63  ;;  %v356_v49 = vrot.slane %v222_v5, 1 }
  0x45   : > { %37924 = vst [vmem:[#allocation67_spill] sm:$0xff] %v30212_v9  ;;  %v30221_v41 = vsub.f32 %v29678_v26, %v37925_v40  ;;  %v30226_v24 = vsub.f32 %v29683_v27, %v37926_v47  ;;  %21707 = vmatmul.mubr.f32.gmra.mrb[8].mxu1 %v30201_v34  ;;  %v30230_v53 = vsub.f32 %v350_v35, %v30212_v9  ;;  %v30239_v26 = vand.u32 4294901760, %v355_v2 }
  0x46   : > { %37929 = vst [vmem:[#allocation70_spill] sm:$0xff] %v30232_v7  ;;  %37930 = vst [vmem:[#allocation71_spill] sm:$0xff] %v30234_v59  ;;  %23867 = vmatmul.mubr.f32.gmra.mrb[8].mxu0 %v30204_v20  ;;  %21709 = vmatprep.mubr.f32.mxu1 %v30208_v12  ;;  %v30247_v18 = vsub.f32 %v352_v3, %v30234_v59  ;;  %v37934_v17 = vand.u32 4294901760, %v29688_v28  ;;  %v37936_v47 = vand.u32 4294901760, %v29706_v31 }
  0x47   : > { %37927 = vst [vmem:[#allocation68_spill] sm:$0xff] %v30226_v24  ;;  %37928 = vst [vmem:[#allocation69_spill] sm:$0xff] %v30230_v53  ;;  %v36618_v27 = vand.u32 4294901760, %v30221_v41  ;;  %v30244_v35 = vand.u32 4294901760, %v30230_v53  ;;  %v30260_v11 = vsub.f32 %v355_v2, %v30239_v26  ;;  %v37939_v3 = vand.u32 4294901760, %v30226_v24 }
  0x48   : > { %37931 = vst [vmem:[#allocation72_spill] sm:$0xff] %v30239_v26  ;;  %37933 = vst [vmem:[#allocation74_spill] sm:$0xff] %v30247_v18  ;;  %v30252_v40 = vsub.f32 %v29688_v28, %v37934_v17  ;;  %v30257_v12 = vsub.f32 %v29706_v31, %v37936_v47  ;;  %v357_v13 = vsel %vm317_vm0, %v354_v63, %v356_v49  ;;  %v223_v28 = vld [vmem:[%s29796_s27 + $0xc0] sm:$0xff]  ;;  %v30273_v31 = vand.u32 4294901760, %v30247_v18 }
  0x49   : > { %37932 = vst [vmem:[#allocation73_spill] sm:$0xff] %v30244_v35  ;;  %37938 = vst [vmem:[#allocation77_spill] sm:$0xff] %v30260_v11  ;;  %v894_v5 = vsub.f32 %v30221_v41, %v36618_v27  ;;  %v901_v34 = vsub.f32 %v30226_v24, %v37939_v3  ;;  %23869 = vmatprep.mubr.f32.mxu0 %v30244_v35  ;;  %21710 = vmatmul.mubr.f32.gmra.mrb[10].mxu1 %v30232_v7  ;;  %v30277_v17 = vand.u32 4294901760, %v357_v13  ;;  %v224_v3 = vld [vmem:[%s29796_s27 + $0xc8] sm:$0xff] }
  0x4a   : > { %37935 = vst [vmem:[#allocation75_spill] sm:$0xff] %v30252_v40  ;;  %37937 = vst [vmem:[#allocation76_spill] sm:$0xff] %v30257_v12  ;;  %v651_v2 = vsub.f32 %v30230_v53, %v30244_v35  ;;  %v30282_v63 = vand.u32 4294901760, %v30260_v11  ;;  %v36637_v7 = vand.u32 4294901760, %v30257_v12  ;;  %23870 = vmatmul.mubr.f32.gmra.mrb[10].mxu0 %v30273_v31  ;;  %v661_v35 = vsub.f32 %v30247_v18, %v30273_v31  ;;  %v226_v53 = vld [vmem:[%s29796_s27 + $0xd8] sm:$0xff]  ;;  %v232_v18 = vld [vmem:[%s29796_s27 + $0x108] sm:$0xff] }
  0x4b   : > { %37940 = vst [vmem:[#allocation78_spill] sm:$0xff] %v30273_v31  ;;  %37941 = vst [vmem:[#allocation79_spill] sm:$0xff] %v30277_v17  ;;  %v895_v49 = vand.u32 4294901760, %v894_v5  ;;  %v902_v27 = vand.u32 4294901760, %v901_v34  ;;  %v30291_v42 = vsub.f32 %v357_v13, %v30277_v17  ;;  %v358_v47 = vrot.slane %v223_v28, 1  ;;  %v227_v31 = vld [vmem:[%s29796_s27 + $0xe0] sm:$0xff] }
  0x4c   : > { %37942 = vst [vmem:[#allocation80_spill] sm:$0xff] %v30282_v63  ;;  %v30286_v20 = vand.u32 4294901760, %v651_v2  ;;  %23872 = vmatprep.mubr.f32.mxu0 %v30282_v63  ;;  %v37945_v34 = vand.u32 4294901760, %v30252_v40  ;;  %v671_v2 = vsub.f32 %v30260_v11, %v30282_v63  ;;  %v359_v4 = vrot.slane %v224_v3, 1  ;;  %v228_v40 = vld [vmem:[%s29796_s27 + $0xe8] sm:$0x3] }
  0x4d   : > { %37944 = vst [vmem:[#allocation82_spill] sm:$0xff] %v30291_v42  ;;  %v26026_v60 = vpack.c.bf16 %v902_v27, %v895_v49  ;;  %v30304_v13 = vand.u32 4294901760, %v661_v35  ;;  %v30307_v28 = vand.u32 4294901760, %v30291_v42  ;;  %v364_v12 = vrot.slane %v227_v31, 1  ;;  %v231_v11 = vld [vmem:[%s29796_s27 + $0x100] sm:$0x3] }
  0x4e   : > { %37943 = vst [vmem:[#allocation81_spill] sm:$0xff] %v30286_v20  ;;  %v26890_v5 = vpack.c.bf16 %v36637_v7, %v37945_v34  ;;  %21712 = vmatprep.mubr.f32.mxu1 %v30286_v20  ;;  %v30309_v27 = vand.u32 4294901760, %v671_v2  ;;  %v360_v49 = vsel %vm317_vm0, %v358_v47, %v359_v4  ;;  %v361_v34 = vrot.slane %v225_v21, 1 }
  0x4f   : > { %37946 = vst [vmem:[#allocation83_spill] sm:$0xff] %v30304_v13  ;;  %37947 = vst [vmem:[#allocation84_spill] sm:$0xff] %v30307_v28  ;;  %26027 = vmatprep.subr.bf16.mxu1 %v26026_v60  ;;  %v363_v7 = vrot.slane %v226_v53, 1  ;;  %21713 = vmatmul.mubr.f32.gmra.mrb[12].mxu1 %v30304_v13  ;;  %v30314_v3 = vand.u32 4294901760, %v360_v49  ;;  %v681_v35 = vsub.f32 %v30291_v42, %v30307_v28  ;;  %v37950_v20 = vand.u32 4294901760, %v29711_v32 }
  0x50   : > { %26891 = vmatprep.subr.bf16.mxu0 %v26890_v5  ;;  %37948 = vst [vmem:[#allocation85_spill] sm:$0xff] %v30309_v27  ;;  %23873 = vmatmul.mubr.f32.gmra.mrb[12].mxu0 %v30307_v28  ;;  %v362_v2 = vsel %vm317_vm0, %v359_v4, %v361_v34  ;;  %v37952_v53 = vand.u32 4294901760, %v29716_v33 }
  0x51   : > { %37949 = vst [vmem:[#allocation86_spill] sm:$0xff] %v30314_v3  ;;  %26029 = vmatpush3.bf16.msra.mxu1 %v26026_v60  ;;  %26893 = vmatpush3.bf16.msra.mxu0 %v26890_v5  ;;  %v30323_v21 = vsub.f32 %v29711_v32, %v37950_v20  ;;  %v30332_v13 = vsub.f32 %v360_v49, %v30314_v3  ;;  %v30334_v31 = vand.u32 4294901760, %v681_v35  ;;  %v30336_v60 = vand.u32 4294901760, %v362_v2 }
  0x52   : > { %v30328_v47 = vsub.f32 %v29716_v33, %v37952_v53  ;;  %21715 = vmatprep.mubr.f32.mxu1 %v30309_v27  ;;  %v365_v4 = vsel %vm317_vm0, %v363_v7, %v364_v12  ;;  %v366_v33 = vrot.slane %v228_v40, 1  ;;  %v37960_v35 = vand.u32 4294901760, %v29726_v37 }
  0x53   : > { %37951 = vst [vmem:[#allocation87_spill] sm:$0xff] %v30323_v21  ;;  %37954 = vst [vmem:[#allocation89_spill] sm:$0xff] %v30332_v13  ;;  %v30339_v5 = vand.u32 4294901760, %v365_v4  ;;  %v30344_v34 = vand.u32 4294901760, %v30332_v13  ;;  %21716 = vmatmul.mubr.f32.gmra.mrb[14].mxu1 %v30334_v31  ;;  %v30348_v49 = vsub.f32 %v362_v2, %v30336_v60  ;;  %v37962_v53 = vand.u32 4294901760, %v29731_v38 }
  0x54   : > { %37953 = vst [vmem:[#allocation88_spill] sm:$0xff] %v30328_v47  ;;  %37955 = vst [vmem:[#allocation90_spill] sm:$0xff] %v30334_v31  ;;  %v30353_v7 = vsub.f32 %v29726_v37, %v37960_v35  ;;  %v37965_v20 = vand.u32 4294901760, %v30323_v21  ;;  %v37966_v2 = vand.u32 4294901760, %v30328_v47  ;;  %v367_v28 = vsel %vm317_vm0, %v364_v12, %v366_v33  ;;  %v229_v37 = vld [vmem:[%s29796_s27 + $0xf0] sm:$0xff] }
  0x55   : > { %37956 = vst [vmem:[#allocation91_spill] sm:$0xff] %v30336_v60  ;;  %37957 = vst [vmem:[#allocation92_spill] sm:$0xff] %v30339_v5  ;;  %v30358_v32 = vsub.f32 %v29731_v38, %v37962_v53  ;;  %v30361_v40 = vsub.f32 %v365_v4, %v30339_v5  ;;  %23875 = vmatprep.mubr.f32.mxu0 %v30344_v34  ;;  %v30373_v38 = vand.u32 4294901760, %v30348_v49  ;;  %v30377_v35 = vand.u32 4294901760, %v367_v28  ;;  %v230_v53 = vld [vmem:[%s29796_s27 + $0xf8] sm:$0xff] }
  0x56   : > { %37958 = vst [vmem:[#allocation93_spill] sm:$0xff] %v30344_v34  ;;  %37959 = vst [vmem:[#allocation94_spill] sm:$0xff] %v30348_v49  ;;  %v908_v31 = vsub.f32 %v30323_v21, %v37965_v20  ;;  %v915_v27 = vsub.f32 %v30328_v47, %v37966_v2  ;;  %v691_v4 = vsub.f32 %v30332_v13, %v30344_v34  ;;  %v368_v20 = vrot.slane %v229_v37, 1 }
  0x57   : > { %37961 = vst [vmem:[#allocation95_spill] sm:$0xff] %v30353_v7  ;;  %37963 = vst [vmem:[#allocation96_spill] sm:$0xff] %v30358_v32  ;;  %v30382_v2 = vand.u32 4294901760, %v30361_v40  ;;  %v36670_v63 = vand.u32 4294901760, %v30358_v32  ;;  %23876 = vmatmul.mubr.f32.gmra.mrb[14].mxu0 %v30373_v38  ;;  %v701_v34 = vsub.f32 %v30348_v49, %v30373_v38  ;;  %v30391_v13 = vsub.f32 %v367_v28, %v30377_v35  ;;  %v238_v49 = vld [vmem:[%s29796_s27 + $0x138] sm:$0xff] }
  0x58   : > { %37964 = vst [vmem:[#allocation97_spill] sm:$0xff] %v30361_v40  ;;  %37967 = vst [vmem:[#allocation98_spill] sm:$0xff] %v30373_v38  ;;  %v909_v12 = vand.u32 4294901760, %v908_v31  ;;  %v916_v33 = vand.u32 4294901760, %v915_v27  ;;  %v30386_v42 = vand.u32 4294901760, %v691_v4  ;;  %v37972_v27 = vand.u32 4294901760, %v30353_v7 }
  0x59   : > { %37968 = vst [vmem:[#allocation99_spill] sm:$0xff] %v30377_v35  ;;  %37969 = vst [vmem:[#allocation100_spill] sm:$0xff] %v30382_v2  ;;  %23878 = vmatprep.mubr.f32.mxu0 %v30382_v2  ;;  %v711_v4 = vsub.f32 %v30361_v40, %v30382_v2  ;;  %v369_v16 = vrot.slane %v230_v53, 1  ;;  %v233_v38 = vld [vmem:[%s29796_s27 + $0x110] sm:$0xff]  ;;  %v30404_v28 = vand.u32 4294901760, %v701_v34  ;;  %v30407_v37 = vand.u32 4294901760, %v30391_v13 }
  0x5a   : > { %37970 = vst [vmem:[#allocation101_spill] sm:$0xff] %v30386_v42  ;;  %37971 = vst [vmem:[#allocation102_spill] sm:$0xff] %v30391_v13  ;;  %v26030_v1 = vpack.c.bf16 %v916_v33, %v909_v12  ;;  %v26894_v31 = vpack.c.bf16 %v36670_v63, %v37972_v27  ;;  %21718 = vmatprep.mubr.f32.mxu1 %v30386_v42  ;;  %v371_v27 = vrot.slane %v231_v11, 1  ;;  %v373_v63 = vrot.slane %v232_v18, 1  ;;  %v234_v7 = vld [vmem:[%s29796_s27 + $0x118] sm:$0x3] }
  0x5b   : > { %37973 = vst [vmem:[#allocation103_spill] sm:$0xff] %v30404_v28  ;;  %37974 = vst [vmem:[#allocation104_spill] sm:$0xff] %v30407_v37  ;;  %v30409_v12 = vand.u32 4294901760, %v711_v4  ;;  %v370_v33 = vsel %vm317_vm0, %v368_v20, %v369_v16  ;;  %21719 = vmatmul.mubr.f32.gmra.mrb[16].mxu1 %v30404_v28  ;;  %23879 = vmatmul.mubr.f32.gmra.mrb[16].mxu0 %v30407_v37  ;;  %v721_v34 = vsub.f32 %v30391_v13, %v30407_v37  ;;  %v237_v40 = vld [vmem:[%s29796_s27 + $0x130] sm:$0x3] }
  0x5c   : > { %26031 = vmatprep.subr.bf16.mxu1 %v26030_v1  ;;  %26895 = vmatprep.subr.bf16.mxu0 %v26894_v31  ;;  %v30414_v53 = vand.u32 4294901760, %v370_v33  ;;  %v374_v32 = vrot.slane %v233_v38, 1  ;;  %v372_v4 = vsel %vm317_vm0, %v369_v16, %v371_v27  ;;  %v37977_v42 = vand.u32 4294901760, %v29736_v39 }
  0x5d   : > { %37975 = vst [vmem:[#allocation105_spill] sm:$0xff] %v30409_v12  ;;  %26033 = vmatpush3.bf16.msra.mxu1 %v26030_v1  ;;  %26897 = vmatpush3.bf16.msra.mxu0 %v26894_v31  ;;  %v37979_v18 = vand.u32 4294901760, %v29751_v43  ;;  %v30434_v38 = vand.u32 4294901760, %v721_v34  ;;  %v30436_v1 = vand.u32 4294901760, %v372_v4  ;;  %v37987_v34 = vand.u32 4294901760, %v29756_v44 }
  0x5e   : > { %37976 = vst [vmem:[#allocation106_spill] sm:$0xff] %v30414_v53  ;;  %v30423_v11 = vsub.f32 %v29736_v39, %v37977_v42  ;;  %21721 = vmatprep.mubr.f32.mxu1 %v30409_v12  ;;  %v30432_v28 = vsub.f32 %v370_v33, %v30414_v53  ;;  %v375_v16 = vsel %vm317_vm0, %v373_v63, %v374_v32 }
  0x5f   : > { %v30428_v20 = vsub.f32 %v29751_v43, %v37979_v18  ;;  %37982 = vst [vmem:[#allocation110_spill] sm:$0xff] %v30434_v38  ;;  %37983 = vst [vmem:[#allocation111_spill] sm:$0xff] %v30436_v1  ;;  %v30439_v31 = vand.u32 4294901760, %v375_v16  ;;  %v376_v43 = vrot.slane %v234_v7, 1  ;;  %21722 = vmatmul.mubr.f32.gmra.mrb[18].mxu1 %v30434_v38  ;;  %v30448_v33 = vsub.f32 %v372_v4, %v30436_v1 }
  0x60   : > { %37978 = vst [vmem:[#allocation107_spill] sm:$0xff] %v30423_v11  ;;  %37981 = vst [vmem:[#allocation109_spill] sm:$0xff] %v30432_v28  ;;  %v30444_v27 = vand.u32 4294901760, %v30432_v28  ;;  %v30453_v63 = vsub.f32 %v29756_v44, %v37987_v34  ;;  %v37989_v18 = vand.u32 4294901760, %v29761_v45  ;;  %v37992_v42 = vand.u32 4294901760, %v30423_v11  ;;  %v235_v44 = vld [vmem:[%s29796_s27 + $0x120] sm:$0xff] }
  0x61   : > { %37980 = vst [vmem:[#allocation108_spill] sm:$0xff] %v30428_v20  ;;  %37984 = vst [vmem:[#allocation112_spill] sm:$0xff] %v30439_v31  ;;  %v30461_v7 = vsub.f32 %v375_v16, %v30439_v31  ;;  %v37993_v4 = vand.u32 4294901760, %v30428_v20  ;;  %v377_v37 = vsel %vm317_vm0, %v374_v32, %v376_v43 }
  0x62   : > { %37985 = vst [vmem:[#allocation113_spill] sm:$0xff] %v30444_v27  ;;  %37986 = vst [vmem:[#allocation114_spill] sm:$0xff] %v30448_v33  ;;  %v30458_v39 = vsub.f32 %v29761_v45, %v37989_v18  ;;  %v922_v38 = vsub.f32 %v30423_v11, %v37992_v42  ;;  %23881 = vmatprep.mubr.f32.mxu0 %v30444_v27  ;;  %v30473_v45 = vand.u32 4294901760, %v30448_v33  ;;  %v30477_v34 = vand.u32 4294901760, %v377_v37  ;;  %v236_v18 = vld [vmem:[%s29796_s27 + $0x128] sm:$0xff] }
  0x63   : > { %37988 = vst [vmem:[#allocation115_spill] sm:$0xff] %v30453_v63  ;;  %37991 = vst [vmem:[#allocation117_spill] sm:$0xff] %v30461_v7  ;;  %v929_v12 = vsub.f32 %v30428_v20, %v37993_v4  ;;  %v731_v16 = vsub.f32 %v30432_v28, %v30444_v27  ;;  %v30482_v4 = vand.u32 4294901760, %v30461_v7  ;;  %v378_v42 = vrot.slane %v235_v44, 1 }
  0x64   : > { %37990 = vst [vmem:[#allocation116_spill] sm:$0xff] %v30458_v39  ;;  %37994 = vst [vmem:[#allocation118_spill] sm:$0xff] %v30473_v45  ;;  %v923_v32 = vand.u32 4294901760, %v922_v38  ;;  %v36703_v2 = vand.u32 4294901760, %v30458_v39  ;;  %23882 = vmatmul.mubr.f32.gmra.mrb[18].mxu0 %v30473_v45  ;;  %v741_v27 = vsub.f32 %v30448_v33, %v30473_v45  ;;  %v30491_v28 = vsub.f32 %v377_v37, %v30477_v34  ;;  %v239_v45 = vld [vmem:[%s29796_s27 + $0x140] sm:$0xff]  ;;  %v244_v33 = vld [vmem:[%s29796_s27 + $0x168] sm:$0xff] }
  0x65   : > { %37995 = vst [vmem:[#allocation119_spill] sm:$0xff] %v30477_v34  ;;  %37996 = vst [vmem:[#allocation120_spill] sm:$0xff] %v30482_v4  ;;  %v930_v43 = vand.u32 4294901760, %v929_v12  ;;  %v30486_v13 = vand.u32 4294901760, %v731_v16  ;;  %23884 = vmatprep.mubr.f32.mxu0 %v30482_v4  ;;  %v37999_v12 = vand.u32 4294901760, %v30453_v63  ;;  %v751_v16 = vsub.f32 %v30461_v7, %v30482_v4 }
  0x66   : > { %37998 = vst [vmem:[#allocation122_spill] sm:$0xff] %v30491_v28  ;;  %v379_v31 = vrot.slane %v236_v18, 1  ;;  %v30504_v37 = vand.u32 4294901760, %v741_v27  ;;  %v30507_v44 = vand.u32 4294901760, %v30491_v28  ;;  %v384_v39 = vrot.slane %v239_v45, 1 }
  0x67   : > { %37997 = vst [vmem:[#allocation121_spill] sm:$0xff] %v30486_v13  ;;  %v26034_v15 = vpack.c.bf16 %v930_v43, %v923_v32  ;;  %v26898_v38 = vpack.c.bf16 %v36703_v2, %v37999_v12  ;;  %21724 = vmatprep.mubr.f32.mxu1 %v30486_v13  ;;  %v30509_v32 = vand.u32 4294901760, %v751_v16  ;;  %v381_v12 = vrot.slane %v237_v40, 1  ;;  %v240_v63 = vld [vmem:[%s29796_s27 + $0x148] sm:$0x3] }
  0x68   : > { %38000 = vst [vmem:[#allocation123_spill] sm:$0xff] %v30504_v37  ;;  %38001 = vst [vmem:[#allocation124_spill] sm:$0xff] %v30507_v44  ;;  %v380_v43 = vsel %vm317_vm0, %v378_v42, %v379_v31  ;;  %v383_v2 = vrot.slane %v238_v49, 1  ;;  %21725 = vmatmul.mubr.f32.gmra.mrb[20].mxu1 %v30504_v37  ;;  %23885 = vmatmul.mubr.f32.gmra.mrb[20].mxu0 %v30507_v44  ;;  %v761_v27 = vsub.f32 %v30491_v28, %v30507_v44  ;;  %v243_v7 = vld [vmem:[%s29796_s27 + $0x160] sm:$0x3] }
  0x69   : > { %26035 = vmatprep.subr.bf16.mxu1 %v26034_v15  ;;  %26899 = vmatprep.subr.bf16.mxu0 %v26898_v38  ;;  %38002 = vst [vmem:[#allocation125_spill] sm:$0xff] %v30509_v32  ;;  %v30514_v18 = vand.u32 4294901760, %v380_v43  ;;  %v382_v16 = vsel %vm317_vm0, %v379_v31, %v381_v12  ;;  %v38004_v13 = vand.u32 4294901760, %v29777_v50  ;;  %v38006_v49 = vand.u32 4294901760, %v29782_v51 }
  0x6a   : > { %26037 = vmatpush3.bf16.msra.mxu1 %v26034_v15  ;;  %26901 = vmatpush3.bf16.msra.mxu0 %v26898_v38  ;;  %v30534_v45 = vand.u32 4294901760, %v761_v27  ;;  %v30536_v15 = vand.u32 4294901760, %v382_v16  ;;  %v385_v31 = vsel %vm317_vm0, %v383_v2, %v384_v39  ;;  %v38014_v27 = vand.u32 4294901760, %v29791_v56 }
  0x6b   : > { %38003 = vst [vmem:[#allocation126_spill] sm:$0xff] %v30514_v18  ;;  %v30523_v40 = vsub.f32 %v29777_v50, %v38004_v13  ;;  %v30528_v42 = vsub.f32 %v29782_v51, %v38006_v49  ;;  %21727 = vmatprep.mubr.f32.mxu1 %v30509_v32  ;;  %v30532_v37 = vsub.f32 %v380_v43, %v30514_v18  ;;  %v30539_v38 = vand.u32 4294901760, %v385_v31 }
  0x6c   : > { %38009 = vst [vmem:[#allocation130_spill] sm:$0xff] %v30534_v45  ;;  %38010 = vst [vmem:[#allocation131_spill] sm:$0xff] %v30536_v15  ;;  %v386_v51 = vrot.slane %v240_v63, 1  ;;  %21728 = vmatmul.mubr.f32.gmra.mrb[22].mxu1 %v30534_v45  ;;  %v30548_v43 = vsub.f32 %v382_v16, %v30536_v15  ;;  %v30553_v2 = vsub.f32 %v29791_v56, %v38014_v27  ;;  %v38016_v49 = vand.u32 4294901760, %v29802_v57  ;;  %v241_v56 = vld [vmem:[%s29796_s27 + $0x150] sm:$0xff] }
  0x6d   : > { %38005 = vst [vmem:[#allocation127_spill] sm:$0xff] %v30523_v40  ;;  %38007 = vst [vmem:[#allocation128_spill] sm:$0xff] %v30528_v42  ;;  %v30544_v12 = vand.u32 4294901760, %v30532_v37  ;;  %v30561_v63 = vsub.f32 %v385_v31, %v30539_v38  ;;  %v38019_v13 = vand.u32 4294901760, %v30523_v40  ;;  %v38020_v16 = vand.u32 4294901760, %v30528_v42 }
  0x6e   : > { %38008 = vst [vmem:[#allocation129_spill] sm:$0xff] %v30532_v37  ;;  %38011 = vst [vmem:[#allocation132_spill] sm:$0xff] %v30539_v38  ;;  %v30558_v50 = vsub.f32 %v29802_v57, %v38016_v49  ;;  %v387_v44 = vsel %vm317_vm0, %v384_v39, %v386_v51  ;;  %v30573_v57 = vand.u32 4294901760, %v30548_v43  ;;  %v242_v49 = vld [vmem:[%s29796_s27 + $0x158] sm:$0xff] }
  0x6f   : > { %38012 = vst [vmem:[#allocation133_spill] sm:$0xff] %v30544_v12  ;;  %38013 = vst [vmem:[#allocation134_spill] sm:$0xff] %v30548_v43  ;;  %v936_v45 = vsub.f32 %v30523_v40, %v38019_v13  ;;  %v943_v32 = vsub.f32 %v30528_v42, %v38020_v16  ;;  %23887 = vmatprep.mubr.f32.mxu0 %v30544_v12  ;;  %v771_v31 = vsub.f32 %v30532_v37, %v30544_v12 }
  0x70   : > { %38015 = vst [vmem:[#allocation135_spill] sm:$0xff] %v30553_v2  ;;  %38017 = vst [vmem:[#allocation136_spill] sm:$0xff] %v30558_v50  ;;  %v30577_v27 = vand.u32 4294901760, %v387_v44  ;;  %v30582_v16 = vand.u32 4294901760, %v30561_v63  ;;  %v36736_v4 = vand.u32 4294901760, %v30558_v50  ;;  %23888 = vmatmul.mubr.f32.gmra.mrb[22].mxu0 %v30573_v57  ;;  %v781_v12 = vsub.f32 %v30548_v43, %v30573_v57 }
  0x71   : > { %38018 = vst [vmem:[#allocation137_spill] sm:$0xff] %v30561_v63  ;;  %38021 = vst [vmem:[#allocation138_spill] sm:$0xff] %v30573_v57  ;;  %v937_v39 = vand.u32 4294901760, %v936_v45  ;;  %v944_v51 = vand.u32 4294901760, %v943_v32  ;;  %v30586_v28 = vand.u32 4294901760, %v771_v31  ;;  %v388_v13 = vrot.slane %v241_v56, 1 }
  0x72   : > { %38022 = vst [vmem:[#allocation139_spill] sm:$0xff] %v30577_v27  ;;  %38023 = vst [vmem:[#allocation140_spill] sm:$0xff] %v30582_v16  ;;  %v30591_v37 = vsub.f32 %v387_v44, %v30577_v27  ;;  %23890 = vmatprep.mubr.f32.mxu0 %v30582_v16  ;;  %v38026_v32 = vand.u32 4294901760, %v30553_v2  ;;  %v791_v31 = vsub.f32 %v30561_v63, %v30582_v16  ;;  %v389_v15 = vrot.slane %v242_v49, 1  ;;  %v245_v57 = vld [vmem:[%s29796_s27 + $0x170] sm:$0xff]  ;;  %v248_v16 = vld [vmem:[%s29796_s27 + $0x188] sm:$0xff] }
  0x73   : > { %38024 = vst [vmem:[#allocation141_spill] sm:$0xff] %v30586_v28  ;;  %v26038_v38 = vpack.c.bf16 %v944_v51, %v937_v39  ;;  %21730 = vmatprep.mubr.f32.mxu1 %v30586_v28  ;;  %v30604_v44 = vand.u32 4294901760, %v781_v12  ;;  %v394_v50 = vrot.slane %v245_v57, 1  ;;  %v246_v2 = vld [vmem:[%s29796_s27 + $0x178] sm:$0x3]  ;;  %v38031_v28 = vand.u32 4294901760, %v29807_v58 }
  0x74   : > { %38025 = vst [vmem:[#allocation142_spill] sm:$0xff] %v30591_v37  ;;  %v26902_v45 = vpack.c.bf16 %v36736_v4, %v38026_v32  ;;  %v30607_v56 = vand.u32 4294901760, %v30591_v37  ;;  %v30609_v39 = vand.u32 4294901760, %v791_v31  ;;  %v390_v51 = vsel %vm317_vm0, %v388_v13, %v389_v15 }
  0x75   : > { %38027 = vst [vmem:[#allocation143_spill] sm:$0xff] %v30604_v44  ;;  %26039 = vmatprep.subr.bf16.mxu1 %v26038_v38  ;;  %v391_v32 = vrot.slane %v243_v7, 1  ;;  %v393_v4 = vrot.slane %v244_v33, 1  ;;  %21731 = vmatmul.mubr.f32.gmra.mrb[24].mxu1 %v30604_v44  ;;  %v30614_v49 = vand.u32 4294901760, %v390_v51  ;;  %v30623_v7 = vsub.f32 %v29807_v58, %v38031_v28 }
  0x76   : > { %38028 = vst [vmem:[#allocation144_spill] sm:$0xff] %v30607_v56  ;;  %26903 = vmatprep.subr.bf16.mxu0 %v26902_v45  ;;  %38029 = vst [vmem:[#allocation145_spill] sm:$0xff] %v30609_v39  ;;  %23891 = vmatmul.mubr.f32.gmra.mrb[24].mxu0 %v30607_v56  ;;  %v801_v12 = vsub.f32 %v30591_v37, %v30607_v56  ;;  %v38033_v33 = vand.u32 4294901760, %v29845_v19 }
  0x77   : > { %38030 = vst [vmem:[#allocation146_spill] sm:$0xff] %v30614_v49  ;;  %26041 = vmatpush3.bf16.msra.mxu1 %v26038_v38  ;;  %26905 = vmatpush3.bf16.msra.mxu0 %v26902_v45  ;;  %v392_v31 = vsel %vm317_vm0, %v389_v15, %v391_v32  ;;  %38032 = vst [vmem:[#allocation147_spill] sm:$0xff] %v30623_v7  ;;  %v30632_v44 = vsub.f32 %v390_v51, %v30614_v49  ;;  %v36749_v58 = vand.u32 4294901760, %v30623_v7 }
  0x78   : > { %v30628_v13 = vsub.f32 %v29845_v19, %v38033_v33  ;;  %21733 = vmatprep.mubr.f32.mxu1 %v30609_v39  ;;  %v30634_v57 = vand.u32 4294901760, %v801_v12  ;;  %v30636_v38 = vand.u32 4294901760, %v392_v31  ;;  %v395_v15 = vsel %vm317_vm0, %v393_v4, %v394_v50 }
  0x79   : > { %38035 = vst [vmem:[#allocation149_spill] sm:$0xff] %v30632_v44  ;;  %v30639_v45 = vand.u32 4294901760, %v395_v15  ;;  %v396_v32 = vrot.slane %v246_v2, 1  ;;  %v30644_v19 = vand.u32 4294901760, %v30632_v44  ;;  %v38041_v12 = vand.u32 4294901760, %v29864_v48 }
  0x7a   : > { %38034 = vst [vmem:[#allocation148_spill] sm:$0xff] %v30628_v13  ;;  %38036 = vst [vmem:[#allocation150_spill] sm:$0xff] %v30634_v57  ;;  %21734 = vmatmul.mubr.f32.gmra.mrb[26].mxu1 %v30634_v57  ;;  %v30648_v51 = vsub.f32 %v392_v31, %v30636_v38  ;;  %v38043_v33 = vand.u32 4294901760, %v29884_v25  ;;  %v950_v31 = vsub.f32 %v30623_v7, %v36749_v58  ;;  %v38046_v57 = vand.u32 4294901760, %v30628_v13 }
  0x7b   : > { %38037 = vst [vmem:[#allocation151_spill] sm:$0xff] %v30636_v38  ;;  %38038 = vst [vmem:[#allocation152_spill] sm:$0xff] %v30639_v45  ;;  %v30653_v4 = vsub.f32 %v29864_v48, %v38041_v12  ;;  %v30661_v2 = vsub.f32 %v395_v15, %v30639_v45  ;;  %v397_v48 = vsel %vm317_vm0, %v394_v50, %v396_v32  ;;  %23893 = vmatprep.mubr.f32.mxu0 %v30644_v19  ;;  %v247_v32 = vld [vmem:[%s29796_s27 + $0x180] sm:$0xff] }
  0x7c   : > { %38039 = vst [vmem:[#allocation153_spill] sm:$0xff] %v30644_v19  ;;  %38040 = vst [vmem:[#allocation154_spill] sm:$0xff] %v30648_v51  ;;  %v30658_v28 = vsub.f32 %v29884_v25, %v38043_v33  ;;  %v957_v39 = vsub.f32 %v30628_v13, %v38046_v57  ;;  %v30672_v12 = vand.u32 4294901760, %v30648_v51  ;;  %v811_v25 = vsub.f32 %v30632_v44, %v30644_v19  ;;  %v249_v33 = vld [vmem:[%s29796_s27 + $0x190] sm:$0x3] }
  0x7d   : > { %38042 = vst [vmem:[#allocation155_spill] sm:$0xff] %v30653_v4  ;;  %38045 = vst [vmem:[#allocation157_spill] sm:$0xff] %v30661_v2  ;;  %v30676_v15 = vand.u32 4294901760, %v397_v48  ;;  %v30680_v58 = vand.u32 4294901760, %v30661_v2  ;;  %v951_v56 = vand.u32 4294901760, %v950_v31 }
  0x7e   : > { %38044 = vst [vmem:[#allocation156_spill] sm:$0xff] %v30658_v28  ;;  %38047 = vst [vmem:[#allocation158_spill] sm:$0xff] %v30672_v12  ;;  %v958_v57 = vand.u32 4294901760, %v957_v39  ;;  %v36768_v50 = vand.u32 4294901760, %v30658_v28  ;;  %23894 = vmatmul.mubr.f32.gmra.mrb[26].mxu0 %v30672_v12  ;;  %v30686_v37 = vand.u32 4294901760, %v811_v25  ;;  %v821_v19 = vsub.f32 %v30648_v51, %v30672_v12 }
  0x7f   : > { %38048 = vst [vmem:[#allocation159_spill] sm:$0xff] %v30676_v15  ;;  %38049 = vst [vmem:[#allocation160_spill] sm:$0xff] %v30680_v58  ;;  %v30691_v44 = vsub.f32 %v397_v48, %v30676_v15  ;;  %23896 = vmatprep.mubr.f32.mxu0 %v30680_v58  ;;  %v38052_v39 = vand.u32 4294901760, %v30653_v4  ;;  %v831_v43 = vsub.f32 %v30661_v2, %v30680_v58  ;;  %v8557_v48 = vrot.slane %v247_v32, 1 }
  0x80   : > { %38050 = vst [vmem:[#allocation161_spill] sm:$0xff] %v30686_v37  ;;  %v26042_v63 = vpack.c.bf16 %v958_v57, %v951_v56  ;;  %21736 = vmatprep.mubr.f32.mxu1 %v30686_v37  ;;  %v30702_v25 = vand.u32 4294901760, %v821_v19  ;;  %v8558_v51 = vrot.slane %v248_v16, 1  ;;  %v8560_v57 = vrot.slane %v249_v33, 1  ;;  %v38079_v37 = vld [vmem:[#allocation21_spill] sm:$0xff] }
  0x81   : > { %38051 = vst [vmem:[#allocation162_spill] sm:$0xff] %v30691_v44  ;;  %v26906_v31 = vpack.c.bf16 %v36768_v50, %v38052_v39  ;;  %v30705_v12 = vand.u32 4294901760, %v30691_v44  ;;  %v30707_v56 = vand.u32 4294901760, %v831_v43  ;;  %v26046_v39 = vpack.c.bf16 %v29897_v36, %v29892_v62 }
  0x82   : > { %38053 = vst [vmem:[#allocation163_spill] sm:$0xff] %v30702_v25  ;;  %26043 = vmatprep.subr.bf16.mxu1 %v26042_v63  ;;  %21737 = vmatmul.mubr.f32.gmra.mrb[28].mxu1 %v30702_v25  ;;  %v8559_v19 = vsel %vm317_vm0, %v8557_v48, %v8558_v51  ;;  %v8561_v43 = vsel %vm317_vm0, %v8558_v51, %v8560_v57  ;;  %v38078_v25 = vld [vmem:[#allocation17_spill] sm:$0xff] }
  0x83   : > { %38054 = vst [vmem:[#allocation164_spill] sm:$0xff] %v30705_v12  ;;  %26907 = vmatprep.subr.bf16.mxu0 %v26906_v31  ;;  %38055 = vst [vmem:[#allocation165_spill] sm:$0xff] %v30707_v56  ;;  %23897 = vmatmul.mubr.f32.gmra.mrb[28].mxu0 %v30705_v12  ;;  %v841_v50 = vsub.f32 %v30691_v44, %v30705_v12  ;;  %v30716_v16 = vand.u32 4294901760, %v8559_v19  ;;  %v26058_v33 = vpack.c.bf16 %v30226_v24, %v30221_v41  ;;  %v38080_v12 = vld [vmem:[#allocation19_spill] sm:$0xff] }
  0x84   : > { %26045 = vmatpush3.bf16.msra.mxu1 %v26042_v63  ;;  %26909 = vmatpush3.bf16.msra.mxu0 %v26906_v31  ;;  %v26062_v32 = vpack.c.bf16 %v30328_v47, %v30323_v21  ;;  %v30726_v48 = vand.u32 4294901760, %v8561_v43  ;;  %v30730_v63 = vpack.c.bf16 %v30528_v42, %v30523_v40  ;;  %v26050_v4 = vpack.c.bf16 %v30023_v54, %v30014_v46  ;;  %v38085_v40 = vld [vmem:[#allocation25_spill] sm:$0xff] }
  0x85   : > { %38056 = vst [vmem:[#allocation166_spill] sm:$0xff] %v30716_v16  ;;  %21739 = vmatprep.mubr.f32.mxu1 %v30707_v56  ;;  %v30724_v28 = vand.u32 4294901760, %v841_v50  ;;  %26047 = vmatprep.subr.bf16.mxu1 %v26046_v39  ;;  %v30733_v31 = vsub.f32 %v8559_v19, %v30716_v16  ;;  %v38063_v19 = vld [vmem:[#allocation29_spill] sm:$0xff]  ;;  %v38066_v56 = vld [vmem:[#allocation35_spill] sm:$0xff] }
  0x86   : > { %38058 = vst [vmem:[#allocation168_spill] sm:$0xff] %v30726_v48  ;;  %26911 = vmatprep.subr.bf16.mxu0 %v29665_v22  ;;  %v30738_v51 = vsub.f32 %v8561_v43, %v30726_v48  ;;  %v38064_v43 = vld [vmem:[#allocation5_spill] sm:$0xff] }
  0x87   : > { %38057 = vst [vmem:[#allocation167_spill] sm:$0xff] %v30724_v28  ;;  %38059 = vst [vmem:[#allocation169_spill] sm:$0xff] %v30733_v31  ;;  %21740 = vmatmul.mubr.f32.gmra.mrb[30].mxu1 %v30724_v28  ;;  %v30741_v50 = vand.u32 4294901760, %v30733_v31  ;;  %v26054_v28 = vpack.c.bf16 %v30122_v10, %v30117_v23  ;;  %v38081_v31 = vld [vmem:[#allocation4_spill] sm:$0xff]  ;;  %v38120_v47 = vld [vmem:[#allocation77_spill] sm:$0xff] }
  0x88   : > { %38060 = vst [vmem:[#allocation170_spill] sm:$0xff] %v30738_v51  ;;  %21774 = vmatprep.mubr.f32.mxu1 %v29886_v30  ;;  %v30745_v57 = vand.u32 4294901760, %v30738_v51  ;;  %v19007_v30 = vld [vmem:[%s36498_s1 + $0x2a8] sm:$0xff]  ;;  %v29435_v21 = vld [vmem:[%s29796_s27 + $0x38] sm:$0xff] }
  0x89   : > { %38061 = vst [vmem:[#allocation171_spill] sm:$0xff] %v30741_v50  ;;  %23899 = vmatprep.mubr.f32.mxu0 %v30741_v50  ;;  %v10627_v42 = vand.u32 4294901760, %v19007_v30  ;;  %v4407_v24 = vrot.slane %v29435_v21, 2 }
  0x8a   : > { %38062 = vst [vmem:[#allocation172_spill] sm:$0xff] %v30745_v57  ;;  %23900 = vmatmul.mubr.f32.gmra.mrb[30].mxu0 %v30745_v57  ;;  %v30861_v57 = vld [vmem:[%s36498_s1 + $0x298] sm:$0xff] }
  0x8b   : > { %21775 = vmatmul.mubr.f32.vlgmr.msra.gmra.mrb[0].mxu1 %v29907_v0  ;;  %23934 = vmatprep.mubr.f32.mxu0 %v29900_v61  ;;  %v19006_v0 = vld [vmem:[%s36498_s1 + $0x2a0] sm:$0xff]  ;;  %v38083_v58 = vand.u32 4294901760, %v30861_v57 }
  0x8c   : > { %26049 = vmatpush3.bf16.msra.mxu1 %v26046_v39  ;;  %21777 = vmatprep.mubr.f32.mxu1 %v29900_v61  ;;  %v38065_v39 = vld [vmem:[#allocation33_spill] sm:$0xff] }
  0x8d   : > { %26051 = vmatprep.subr.bf16.mxu1 %v26050_v4 }
  0x8e   : > { %23935 = vmatmul.mubr.f32.vlgmr.msra.gmra.mrb[0].mxu0 %v29939_v6 }
  0x8f   : > { %21778 = vmatmul.mubr.f32.gmra.mrb[2].mxu1 %v29939_v6  ;;  %26913 = vmatpush3.bf16.msra.mxu0 %v29665_v22  ;;  %v38067_v22 = vld [vmem:[#allocation7_spill] sm:$0xff] }
  0x90   : > { %23937 = vmatprep.mubr.f32.mxu0 %v38063_v19  ;;  %21780 = vmatprep.mubr.f32.mxu1 %v38063_v19 }
  0x91   : > { %26915 = vmatprep.subr.bf16.mxu0 %v38064_v43  ;;  %26053 = vmatpush3.bf16.msra.mxu1 %v26050_v4  ;;  %v38068_v4 = vld [vmem:[#allocation9_spill] sm:$0xff] }
  0x92   : > { %23938 = vmatmul.mubr.f32.gmra.mrb[2].mxu0 %v38065_v39  ;;  %26055 = vmatprep.subr.bf16.mxu1 %v26054_v28 }
  0x93   : > { %21781 = vmatmul.mubr.f32.gmra.mrb[4].mxu1 %v38065_v39  ;;  %23940 = vmatprep.mubr.f32.mxu0 %v38066_v56 }
  0x94   : > { %26917 = vmatpush3.bf16.msra.mxu0 %v38064_v43  ;;  %21783 = vmatprep.mubr.f32.mxu1 %v38066_v56  ;;  %v38069_v43 = vld [vmem:[#allocation11_spill] sm:$0xff] }
  0x95   : > { %26919 = vmatprep.subr.bf16.mxu0 %v38067_v22  ;;  %26057 = vmatpush3.bf16.msra.mxu1 %v26054_v28  ;;  %v26066_v28 = vpack.c.bf16 %v30428_v20, %v30423_v11 }
  0x96   : > { %23941 = vmatmul.mubr.f32.gmra.mrb[4].mxu0 %v30065_v55  ;;  %26059 = vmatprep.subr.bf16.mxu1 %v26058_v33 }
  0x97   : > { %21784 = vmatmul.mubr.f32.gmra.mrb[6].mxu1 %v30065_v55  ;;  %23943 = vmatprep.mubr.f32.mxu0 %v30105_v52 }
  0x98   : > { %21786 = vmatprep.mubr.f32.mxu1 %v30105_v52  ;;  %26921 = vmatpush3.bf16.msra.mxu0 %v38067_v22 }
  0x99   : > { %26923 = vmatprep.subr.bf16.mxu0 %v38068_v4  ;;  %26061 = vmatpush3.bf16.msra.mxu1 %v26058_v33  ;;  %v38070_v33 = vld [vmem:[#allocation13_spill] sm:$0xff] }
  0x9a   : > { %23944 = vmatmul.mubr.f32.gmra.mrb[6].mxu0 %v30130_v8  ;;  %26063 = vmatprep.subr.bf16.mxu1 %v26062_v32 }
  0x9b   : > { %21787 = vmatmul.mubr.f32.gmra.mrb[8].mxu1 %v30130_v8  ;;  %23946 = vmatprep.mubr.f32.mxu0 %v30135_v14 }
  0x9c   : > { %21789 = vmatprep.mubr.f32.mxu1 %v30135_v14  ;;  %26925 = vmatpush3.bf16.msra.mxu0 %v38068_v4  ;;  %v30798_v4 = vld [vmem:[%s36498_s1 + $0x288] sm:$0xff] }
  0x9d   : > { %26927 = vmatprep.subr.bf16.mxu0 %v38069_v43  ;;  %26065 = vmatpush3.bf16.msra.mxu1 %v26062_v32  ;;  %v30793_v32 = vld [vmem:[%s36498_s1 + $0x280] sm:$0xff]  ;;  %v36787_v51 = vand.u32 4294901760, %v30798_v4 }
  0x9e   : > { %23947 = vmatmul.mubr.f32.gmra.mrb[8].mxu0 %v30173_v29  ;;  %26067 = vmatprep.subr.bf16.mxu1 %v26066_v28  ;;  %v36788_v22 = vand.u32 4294901760, %v30793_v32 }
  0x9f   : > { %21790 = vmatmul.mubr.f32.gmra.mrb[10].mxu1 %v30173_v29  ;;  %23949 = vmatprep.mubr.f32.mxu0 %v30212_v9 }
  0xa0   : > { %21792 = vmatprep.mubr.f32.mxu1 %v30212_v9  ;;  %26929 = vmatpush3.bf16.msra.mxu0 %v38069_v43  ;;  %v38071_v43 = vld [vmem:[#allocation26_spill] sm:$0xff] }
  0xa1   : > { %26931 = vmatprep.subr.bf16.mxu0 %v38070_v33  ;;  %26069 = vmatpush3.bf16.msra.mxu1 %v26066_v28  ;;  %v26074_v28 = vpack.c.bf16 %v30628_v13, %v30623_v7  ;;  %v10624_v7 = vand.u32 4294901760, %v19006_v0 }
  0xa2   : > { %23950 = vmatmul.mubr.f32.gmra.mrb[10].mxu0 %v30234_v59  ;;  %26071 = vmatprep.subr.bf16.mxu1 %v30730_v63 }
  0xa3   : > { %21793 = vmatmul.mubr.f32.gmra.mrb[12].mxu1 %v30234_v59  ;;  %23952 = vmatprep.mubr.f32.mxu0 %v30239_v26 }
  0xa4   : > { %21795 = vmatprep.mubr.f32.mxu1 %v30239_v26  ;;  %26933 = vmatpush3.bf16.msra.mxu0 %v38070_v33  ;;  %v38072_v33 = vld [vmem:[#allocation28_spill] sm:$0xff] }
  0xa5   : > { %26935 = vmatprep.subr.bf16.mxu0 %v38071_v43  ;;  %26073 = vmatpush3.bf16.msra.mxu1 %v30730_v63  ;;  %v30820_v63 = vpack.c.bf16 %v36787_v51, %v36788_v22  ;;  %v38076_v51 = vld [vmem:[#allocation131_spill] sm:$0xff]  ;;  %v38077_v22 = vld [vmem:[#allocation132_spill] sm:$0xff] }
  0xa6   : > { %23953 = vmatmul.mubr.f32.gmra.mrb[12].mxu0 %v30277_v17  ;;  %26075 = vmatprep.subr.bf16.mxu1 %v26074_v28 }
  0xa7   : > { %21796 = vmatmul.mubr.f32.gmra.mrb[14].mxu1 %v30277_v17  ;;  %23955 = vmatprep.mubr.f32.mxu0 %v30314_v3  ;;  %38073 = vst [vmem:[#allocation173_spill] sm:$0xff] %v30820_v63 }
  0xa8   : > { %21798 = vmatprep.mubr.f32.mxu1 %v30314_v3  ;;  %26937 = vmatpush3.bf16.msra.mxu0 %v38071_v43  ;;  %v38074_v43 = vld [vmem:[#allocation2_spill] sm:$0xff] }
  0xa9   : > { %26939 = vmatprep.subr.bf16.mxu0 %v38072_v33  ;;  %26077 = vmatpush3.bf16.msra.mxu1 %v26074_v28  ;;  %v38075_v28 = vld [vmem:[#allocation112_spill] sm:$0xff] }
  0xaa   : > { %23956 = vmatmul.mubr.f32.gmra.mrb[14].mxu0 %v30336_v60  ;;  %26079 = vmatprep.subr.bf16.mxu1 %v38074_v43 }
  0xab   : > { %21799 = vmatmul.mubr.f32.gmra.mrb[16].mxu1 %v30336_v60  ;;  %23958 = vmatprep.mubr.f32.mxu0 %v30339_v5 }
  0xac   : > { %21801 = vmatprep.mubr.f32.mxu1 %v30339_v5  ;;  %26941 = vmatpush3.bf16.msra.mxu0 %v38072_v33  ;;  %v30856_v33 = vld [vmem:[%s36498_s1 + $0x290] sm:$0xff] }
  0xad   : > { %26943 = vmatprep.subr.bf16.mxu0 %v30820_v63  ;;  %v38082_v50 = vand.u32 4294901760, %v30856_v33 }
  0xae   : > { %23959 = vmatmul.mubr.f32.gmra.mrb[16].mxu0 %v30377_v35 }
  0xaf   : > { %21802 = vmatmul.mubr.f32.gmra.mrb[18].mxu1 %v30377_v35  ;;  %23961 = vmatprep.mubr.f32.mxu0 %v30414_v53  ;;  %v30885_v13 = vpack.c.bf16 %v38083_v58, %v38082_v50  ;;  %v38086_v58 = vld [vmem:[#allocation32_spill] sm:$0xff]  ;;  %v30904_v50 = vpack.c.bf16 %v10627_v42, %v10624_v7 }
  0xb0   : > { %21804 = vmatprep.mubr.f32.mxu1 %v30414_v53 }
  0xb1   : > { %38084 = vst [vmem:[#allocation17_spill] sm:$0xff] %v30885_v13  ;;  %38087 = vst [vmem:[#allocation21_spill] sm:$0xff] %v30904_v50 }
  0xb2   : > { %23962 = vmatmul.mubr.f32.gmra.mrb[18].mxu0 %v30436_v1 }
  0xb3   : > { %21805 = vmatmul.mubr.f32.gmra.mrb[20].mxu1 %v30436_v1  ;;  %23964 = vmatprep.mubr.f32.mxu0 %v38075_v28 }
  0xb4   : > { %21807 = vmatprep.mubr.f32.mxu1 %v38075_v28 }
  0xb6   : > { %23965 = vmatmul.mubr.f32.gmra.mrb[20].mxu0 %v30477_v34 }
  0xb7   : > { %21808 = vmatmul.mubr.f32.gmra.mrb[22].mxu1 %v30477_v34  ;;  %23967 = vmatprep.mubr.f32.mxu0 %v30514_v18 }
  0xb8   : > { %21810 = vmatprep.mubr.f32.mxu1 %v30514_v18 }
  0xba   : > { %23968 = vmatmul.mubr.f32.gmra.mrb[22].mxu0 %v38076_v51 }
  0xbb   : > { %21811 = vmatmul.mubr.f32.gmra.mrb[24].mxu1 %v38076_v51  ;;  %23970 = vmatprep.mubr.f32.mxu0 %v38077_v22 }
  0xbc   : > { %21813 = vmatprep.mubr.f32.mxu1 %v38077_v22 }
  0xbe   : > { %23971 = vmatmul.mubr.f32.gmra.mrb[24].mxu0 %v30577_v27 }
  0xbf   : > { %21814 = vmatmul.mubr.f32.gmra.mrb[26].mxu1 %v30577_v27  ;;  %23973 = vmatprep.mubr.f32.mxu0 %v30614_v49 }
  0xc0   : > { %21816 = vmatprep.mubr.f32.mxu1 %v30614_v49 }
  0xc2   : > { %23974 = vmatmul.mubr.f32.gmra.mrb[26].mxu0 %v30636_v38 }
  0xc3   : > { %21817 = vmatmul.mubr.f32.gmra.mrb[28].mxu1 %v30636_v38  ;;  %23976 = vmatprep.mubr.f32.mxu0 %v30639_v45 }
  0xc4   : > { %21819 = vmatprep.mubr.f32.mxu1 %v30639_v45 }
  0xc6   : > { %23977 = vmatmul.mubr.f32.gmra.mrb[28].mxu0 %v30676_v15 }
  0xc7   : > { %21820 = vmatmul.mubr.f32.gmra.mrb[30].mxu1 %v30676_v15  ;;  %23979 = vmatprep.mubr.f32.mxu0 %v30716_v16 }
  0xc8   : > { %21854 = vmatprep.mubr.f32.mxu1 %v38078_v25 }
  0xca   : > { %23980 = vmatmul.mubr.f32.gmra.mrb[30].mxu0 %v30726_v48 }
  0xcb   : > { %21855 = vmatmul.mubr.f32.vlgmr.msra.gmra.mrb[0].mxu1 %v38079_v37  ;;  %24014 = vmatprep.mubr.f32.mxu0 %v29900_v61  ;;  %v30892_v61 = vld [vmem:[%s36498_s1 + $0x2b0] sm:$0xff] }
  0xcc   : > { %26081 = vmatpush3.bf16.msra.mxu1 %v38074_v43  ;;  %21857 = vmatprep.mubr.f32.mxu1 %v38080_v12  ;;  %v30897_v12 = vld [vmem:[%s36498_s1 + $0x2b8] sm:$0xff]  ;;  %v38088_v43 = vld [vmem:[#allocation36_spill] sm:$0xff] }
  0xcd   : > { %26083 = vmatprep.subr.bf16.mxu1 %v38081_v31 }
  0xce   : > { %24015 = vmatmul.mubr.f32.vlgmr.msra.gmra.mrb[0].mxu0 %v29939_v6  ;;  %v38090_v6 = vld [vmem:[#allocation6_spill] sm:$0xff] }
  0xcf   : > { %21858 = vmatmul.mubr.f32.gmra.mrb[2].mxu1 %v38085_v40  ;;  %26945 = vmatpush3.bf16.msra.mxu0 %v30820_v63  ;;  %v30913_v63 = vld [vmem:[%s36498_s1 + $0x2c0] sm:$0xff]  ;;  %v38089_v40 = vld [vmem:[#allocation39_spill] sm:$0xff] }
  0xd0   : > { %24017 = vmatprep.mubr.f32.mxu0 %v38063_v19  ;;  %21860 = vmatprep.mubr.f32.mxu1 %v38086_v58  ;;  %v30918_v58 = vld [vmem:[%s36498_s1 + $0x2c8] sm:$0xff] }
  0xd1   : > { %26947 = vmatprep.subr.bf16.mxu0 %v30885_v13  ;;  %26085 = vmatpush3.bf16.msra.mxu1 %v38081_v31  ;;  %v36834_v31 = vand.u32 4294901760, %v30913_v63 }
  0xd2   : > { %24018 = vmatmul.mubr.f32.gmra.mrb[2].mxu0 %v38065_v39  ;;  %26087 = vmatprep.subr.bf16.mxu1 %v38090_v6  ;;  %v38092_v39 = vand.u32 4294901760, %v30897_v12 }
  0xd3   : > { %21861 = vmatmul.mubr.f32.gmra.mrb[4].mxu1 %v38088_v43  ;;  %24020 = vmatprep.mubr.f32.mxu0 %v38066_v56  ;;  %v38091_v43 = vand.u32 4294901760, %v30892_v61 }
  0xd4   : > { %26949 = vmatpush3.bf16.msra.mxu0 %v30885_v13  ;;  %21863 = vmatprep.mubr.f32.mxu1 %v38089_v40  ;;  %v30937_v40 = vld [vmem:[%s36498_s1 + $0x2d0] sm:$0xff]  ;;  %v38094_v13 = vld [vmem:[#allocation43_spill] sm:$0xff] }
  0xd5   : > { %26951 = vmatprep.subr.bf16.mxu0 %v30904_v50  ;;  %26089 = vmatpush3.bf16.msra.mxu1 %v38090_v6  ;;  %v30930_v19 = vpack.c.bf16 %v38092_v39, %v38091_v43  ;;  %v30944_v6 = vld [vmem:[%s36498_s1 + $0x2d8] sm:$0xff]  ;;  %v38095_v43 = vld [vmem:[#allocation50_spill] sm:$0xff]  ;;  %v38096_v39 = vld [vmem:[#allocation8_spill] sm:$0xff] }
  0xd6   : > { %24021 = vmatmul.mubr.f32.gmra.mrb[4].mxu0 %v30065_v55  ;;  %26091 = vmatprep.subr.bf16.mxu1 %v38096_v39 }
  0xd7   : > { %38093 = vst [vmem:[#allocation174_spill] sm:$0xff] %v30930_v19  ;;  %21864 = vmatmul.mubr.f32.gmra.mrb[6].mxu1 %v38094_v13  ;;  %24023 = vmatprep.mubr.f32.mxu0 %v30105_v52  ;;  %v38097_v13 = vand.u32 4294901760, %v30918_v58  ;;  %v38103_v52 = vld [vmem:[#allocation58_spill] sm:$0xff] }
  0xd8   : > { %21866 = vmatprep.mubr.f32.mxu1 %v38095_v43  ;;  %26953 = vmatpush3.bf16.msra.mxu0 %v30904_v50  ;;  %v30963_v43 = vld [vmem:[%s36498_s1 + $0x2e0] sm:$0xff]  ;;  %v38099_v50 = vand.u32 4294901760, %v30793_v32 }
  0xd9   : > { %26955 = vmatprep.subr.bf16.mxu0 %v30930_v19  ;;  %26093 = vmatpush3.bf16.msra.mxu1 %v38096_v39  ;;  %v30957_v55 = vpack.c.bf16 %v38097_v13, %v36834_v31  ;;  %v38100_v39 = vand.u32 4294901760, %v30798_v4  ;;  %v38102_v13 = vld [vmem:[#allocation55_spill] sm:$0xff] }
  0xda   : > { %v30968_v56 = vsub.f32 %v30793_v32, %v38099_v50  ;;  %24024 = vmatmul.mubr.f32.gmra.mrb[6].mxu0 %v30130_v8  ;;  %v30980_v31 = vld [vmem:[%s36498_s1 + $0x2e8] sm:$0xff]  ;;  %v38104_v32 = vld [vmem:[#allocation10_spill] sm:$0xff]  ;;  %v30987_v50 = vsub.f32 %v19006_v0, %v10624_v7  ;;  %v31003_v0 = vld [vmem:[%s36498_s1 + $0x2f0] sm:$0xff] }
  0xdb   : > { %38098 = vst [vmem:[#allocation175_spill] sm:$0xff] %v30957_v55  ;;  %v30973_v20 = vsub.f32 %v30798_v4, %v38100_v39  ;;  %21867 = vmatmul.mubr.f32.gmra.mrb[8].mxu1 %v38102_v13  ;;  %24026 = vmatprep.mubr.f32.mxu0 %v30135_v14  ;;  %v30989_v39 = vsub.f32 %v19007_v30, %v10627_v42  ;;  %v38107_v13 = vand.u32 4294901760, %v30937_v40  ;;  %v38108_v14 = vand.u32 4294901760, %v30944_v6  ;;  %v31008_v30 = vld [vmem:[%s36498_s1 + $0x2f8] sm:$0xff]  ;;  %v38113_v4 = vld [vmem:[#allocation12_spill] sm:$0xff] }
  0xdc   : > { %21869 = vmatprep.mubr.f32.mxu1 %v38103_v52  ;;  %26957 = vmatpush3.bf16.msra.mxu0 %v30930_v19  ;;  %38105 = vst [vmem:[#allocation177_spill] sm:$0xff] %v30987_v50  ;;  %v38112_v19 = vld [vmem:[#allocation69_spill] sm:$0xff]  ;;  %v38117_v42 = vand.u32 4294901760, %v30968_v56  ;;  %v38126_v21 = vand.u32 4294901760, %v31003_v0 }
  0xdd   : > { %38101 = vst [vmem:[#allocation176_spill] sm:$0xff] %v30973_v20  ;;  %26095 = vmatprep.subr.bf16.mxu1 %v38104_v32  ;;  %38106 = vst [vmem:[#allocation178_spill] sm:$0xff] %v30989_v39  ;;  %26959 = vmatprep.subr.bf16.mxu0 %v30957_v55  ;;  %v30997_v52 = vpack.c.bf16 %v38108_v14, %v38107_v13  ;;  %v38110_v14 = vld [vmem:[#allocation63_spill] sm:$0xff]  ;;  %v31016_v13 = vpack.c.bf16 %v30989_v39, %v30987_v50 }
  0xde   : > { %26097 = vmatpush3.bf16.msra.mxu1 %v38104_v32  ;;  %24027 = vmatmul.mubr.f32.gmra.mrb[8].mxu0 %v30173_v29  ;;  %v29431_v29 = vld [vmem:[%s29796_s27 + $0x18] sm:$0xff]  ;;  %v29432_v32 = vld [vmem:[%s29796_s27 + $0x20] sm:$0xff]  ;;  %v11016_v7 = vsub.f32 %v30968_v56, %v38117_v42 }
  0xdf   : > { %38109 = vst [vmem:[#allocation179_spill] sm:$0xff] %v30997_v52  ;;  %21870 = vmatmul.mubr.f32.gmra.mrb[10].mxu1 %v38110_v14  ;;  %38111 = vst [vmem:[#allocation180_spill] sm:$0xff] %v31016_v13  ;;  %24029 = vmatprep.mubr.f32.mxu0 %v30212_v9  ;;  %v4401_v14 = vrot.slane %v29431_v29, 2  ;;  %v4402_v8 = vrot.slane %v29432_v32, 2  ;;  %v38118_v29 = vand.u32 4294901760, %v30973_v20  ;;  %v38121_v42 = vld [vmem:[#allocation14_spill] sm:$0xff] }
  0xe0   : > { %21872 = vmatprep.mubr.f32.mxu1 %v38112_v19  ;;  %26961 = vmatpush3.bf16.msra.mxu0 %v30957_v55  ;;  %v38114_v19 = vand.u32 4294901760, %v30963_v43  ;;  %v38115_v55 = vand.u32 4294901760, %v30980_v31  ;;  %v29433_v32 = vld [vmem:[%s29796_s27 + $0x28] sm:$0x3] }
  0xe1   : > { %26099 = vmatprep.subr.bf16.mxu1 %v38113_v4  ;;  %26963 = vmatprep.subr.bf16.mxu0 %v30997_v52  ;;  %v11023_v13 = vsub.f32 %v30973_v20, %v38118_v29  ;;  %v4404_v11 = vrot.slane %v29433_v32, 2  ;;  %v4403_v29 = vsel %vm4395_vm1, %v4401_v14, %v4402_v8  ;;  %v38122_v32 = vand.u32 4294901760, %v30892_v61  ;;  %v38131_v20 = vld [vmem:[#allocation89_spill] sm:$0xff] }
  0xe2   : > { %26101 = vmatpush3.bf16.msra.mxu1 %v38113_v4  ;;  %v31032_v9 = vpack.c.bf16 %v38115_v55, %v38114_v19  ;;  %24030 = vmatmul.mubr.f32.gmra.mrb[10].mxu0 %v30234_v59  ;;  %v38119_v4 = vld [vmem:[#allocation74_spill] sm:$0xff]  ;;  %v29434_v55 = vld [vmem:[%s29796_s27 + $0x30] sm:$0xff] }
  0xe3   : > { %21873 = vmatmul.mubr.f32.gmra.mrb[12].mxu1 %v38119_v4  ;;  %24032 = vmatprep.mubr.f32.mxu0 %v30239_v26  ;;  %v4406_v19 = vrot.slane %v29434_v55, 2  ;;  %v31053_v59 = vsub.f32 %v30892_v61, %v38122_v32  ;;  %v38124_v4 = vand.u32 4294901760, %v30897_v12  ;;  %v38127_v55 = vand.u32 4294901760, %v31008_v30  ;;  %v38129_v32 = vld [vmem:[#allocation82_spill] sm:$0xff] }
  0xe4   : > { %38116 = vst [vmem:[#allocation181_spill] sm:$0xff] %v31032_v9  ;;  %21875 = vmatprep.mubr.f32.mxu1 %v38120_v47  ;;  %26965 = vmatpush3.bf16.msra.mxu0 %v30997_v52  ;;  %v11017_v52 = vand.u32 4294901760, %v11016_v7  ;;  %v11024_v61 = vand.u32 4294901760, %v11023_v13  ;;  %v29437_v13 = vld [vmem:[%s29796_s27 + $0x48] sm:$0xff] }
  0xe5   : > { %26103 = vmatprep.subr.bf16.mxu1 %v38121_v42  ;;  %38123 = vst [vmem:[#allocation182_spill] sm:$0xff] %v31053_v59  ;;  %v31058_v47 = vsub.f32 %v30897_v12, %v38124_v4  ;;  %26967 = vmatprep.subr.bf16.mxu0 %v31032_v9  ;;  %v31066_v14 = vpack.c.bf16 %v38127_v55, %v38126_v21  ;;  %v29436_v4 = vld [vmem:[%s29796_s27 + $0x40] sm:$0x3]  ;;  %v31078_v21 = vand.u32 4294901760, %v4403_v29  ;;  %v4411_v55 = vrot.slane %v29437_v13, 2 }
  0xe6   : > { %26105 = vmatpush3.bf16.msra.mxu1 %v38121_v42  ;;  %24033 = vmatmul.mubr.f32.gmra.mrb[12].mxu0 %v30277_v17  ;;  %v4405_v12 = vsel %vm4395_vm1, %v4402_v8, %v4404_v11  ;;  %v4409_v26 = vrot.slane %v29436_v4, 2  ;;  %v4408_v7 = vsel %vm4395_vm1, %v4406_v19, %v4407_v24  ;;  %v29438_v17 = vld [vmem:[%s29796_s27 + $0x50] sm:$0xff]  ;;  %v38133_v8 = vld [vmem:[#allocation27_spill] sm:$0xff]  ;;  %v38134_v11 = vand.u32 4294901760, %v29892_v62 }
  0xe7   : > { %38125 = vst [vmem:[#allocation183_spill] sm:$0xff] %v31058_v47  ;;  %38128 = vst [vmem:[#allocation184_spill] sm:$0xff] %v31066_v14  ;;  %21876 = vmatmul.mubr.f32.gmra.mrb[14].mxu1 %v38129_v32  ;;  %v31074_v42 = vpack.c.bf16 %v31058_v47, %v31053_v59  ;;  %24035 = vmatprep.mubr.f32.mxu0 %v30314_v3  ;;  %v4412_v32 = vrot.slane %v29438_v17, 2  ;;  %v38135_v4 = vand.u32 4294901760, %v29897_v36  ;;  %v31093_v19 = vand.u32 4294901760, %v4405_v12  ;;  %v38137_v17 = vld [vmem:[#allocation94_spill] sm:$0xff] }
  0xe8   : > { %21878 = vmatprep.mubr.f32.mxu1 %v38131_v20  ;;  %38132 = vst [vmem:[#allocation186_spill] sm:$0xff] %v31078_v21  ;;  %26969 = vmatpush3.bf16.msra.mxu0 %v31032_v9  ;;  %v31095_v13 = vpack.c.bf16 %v11024_v61, %v11017_v52  ;;  %v31099_v20 = vand.u32 4294901760, %v4408_v7  ;;  %v4410_v62 = vsel %vm4395_vm1, %v4407_v24, %v4409_v26  ;;  %v38139_v36 = vld [vmem:[#allocation97_spill] sm:$0xff]  ;;  %v38143_v24 = vand.u32 4294901760, %v30918_v58 }
  0xe9   : > { %38130 = vst [vmem:[#allocation185_spill] sm:$0xff] %v31074_v42  ;;  %26107 = vmatprep.subr.bf16.mxu1 %v38133_v8  ;;  %v31089_v3 = vpack.c.bf16 %v38135_v4, %v38134_v11  ;;  %26971 = vmatprep.subr.bf16.mxu0 %v31066_v14  ;;  %38136 = vst [vmem:[#allocation187_spill] sm:$0xff] %v31093_v19  ;;  %v31105_v11 = vsub.f32 %v4403_v29, %v31078_v21  ;;  %v29439_v52 = vld [vmem:[%s29796_s27 + $0x58] sm:$0x3] }
  0xea   : > { %26109 = vmatpush3.bf16.msra.mxu1 %v38133_v8  ;;  %24036 = vmatmul.mubr.f32.gmra.mrb[14].mxu0 %v30336_v60  ;;  %38138 = vst [vmem:[#allocation188_spill] sm:$0xff] %v31099_v20  ;;  %v4413_v4 = vsel %vm4395_vm1, %v4411_v55, %v4412_v32  ;;  %v4414_v61 = vrot.slane %v29439_v52, 2  ;;  %v31119_v26 = vsub.f32 %v30918_v58, %v38143_v24  ;;  %v31125_v55 = vand.u32 4294901760, %v4410_v62  ;;  %v38147_v52 = vld [vmem:[#allocation102_spill] sm:$0xff]  ;;  %v29443_v42 = vld [vmem:[%s29796_s27 + $0x78] sm:$0xff] }
  0xeb   : > { %21879 = vmatmul.mubr.f32.gmra.mrb[16].mxu1 %v38137_v17  ;;  %24038 = vmatprep.mubr.f32.mxu0 %v30339_v5  ;;  %38140 = vst [vmem:[#allocation189_spill] sm:$0xff] %v31105_v11  ;;  %v38141_v17 = vand.u32 4294901760, %v30913_v63  ;;  %v31122_v29 = vsub.f32 %v4405_v12, %v31093_v19  ;;  %v38151_v12 = vld [vmem:[#allocation109_spill] sm:$0xff]  ;;  %v31141_v24 = vand.u32 4294901760, %v31105_v11 }
  0xec   : > { %21881 = vmatprep.mubr.f32.mxu1 %v38139_v36  ;;  %26973 = vmatpush3.bf16.msra.mxu0 %v31066_v14  ;;  %38144 = vst [vmem:[#allocation191_spill] sm:$0xff] %v31119_v26  ;;  %38146 = vst [vmem:[#allocation193_spill] sm:$0xff] %v31125_v55  ;;  %v4415_v36 = vsel %vm4395_vm1, %v4412_v32, %v4414_v61  ;;  %v38155_v14 = vld [vmem:[#allocation114_spill] sm:$0xff] }
  0xed   : > { %26111 = vmatprep.subr.bf16.mxu1 %v31089_v3  ;;  %v31114_v9 = vsub.f32 %v30913_v63, %v38141_v17  ;;  %38145 = vst [vmem:[#allocation192_spill] sm:$0xff] %v31122_v29  ;;  %26975 = vmatprep.subr.bf16.mxu0 %v31095_v13  ;;  %v31130_v63 = vsub.f32 %v4408_v7, %v31099_v20  ;;  %v31132_v17 = vand.u32 4294901760, %v4413_v4  ;;  %38152 = vst [vmem:[#allocation197_spill] sm:$0xff] %v31141_v24  ;;  %v29440_v32 = vld [vmem:[%s29796_s27 + $0x60] sm:$0xff] }
  0xee   : > { %24039 = vmatmul.mubr.f32.gmra.mrb[16].mxu0 %v30377_v35  ;;  %v31148_v7 = vsub.f32 %v4410_v62, %v31125_v55  ;;  %v4416_v61 = vrot.slane %v29440_v32, 2  ;;  %v29441_v35 = vld [vmem:[%s29796_s27 + $0x68] sm:$0xff]  ;;  %v38158_v62 = vld [vmem:[#allocation117_spill] sm:$0xff]  ;;  %v31164_v60 = vand.u32 4294901760, %v4415_v36  ;;  %v4421_v32 = vrot.slane %v29443_v42, 2 }
  0xef   : > { %38142 = vst [vmem:[#allocation190_spill] sm:$0xff] %v31114_v9  ;;  %21882 = vmatmul.mubr.f32.gmra.mrb[18].mxu1 %v38147_v52  ;;  %38148 = vst [vmem:[#allocation194_spill] sm:$0xff] %v31130_v63  ;;  %v31136_v58 = vpack.c.bf16 %v31119_v26, %v31114_v9  ;;  %24041 = vmatprep.mubr.f32.mxu0 %v30414_v53  ;;  %v31145_v52 = vand.u32 4294901760, %v31122_v29  ;;  %v31156_v53 = vsub.f32 %v4413_v4, %v31132_v17  ;;  %v29442_v4 = vld [vmem:[%s29796_s27 + $0x70] sm:$0x3] }
  0xf0   : > { %38149 = vst [vmem:[#allocation195_spill] sm:$0xff] %v31132_v17  ;;  %21884 = vmatprep.mubr.f32.mxu1 %v38151_v12  ;;  %38154 = vst [vmem:[#allocation199_spill] sm:$0xff] %v31148_v7  ;;  %v31153_v12 = vand.u32 4294901760, %v31130_v63  ;;  %v4417_v5 = vrot.slane %v29441_v35, 2  ;;  %v29444_v17 = vld [vmem:[%s29796_s27 + $0x80] sm:$0xff]  ;;  %v38166_v55 = vand.u32 4294901760, %v30014_v46 }
  0xf1   : > { %38150 = vst [vmem:[#allocation196_spill] sm:$0xff] %v31136_v58  ;;  %38153 = vst [vmem:[#allocation198_spill] sm:$0xff] %v31145_v52  ;;  %v4419_v58 = vrot.slane %v29442_v4, 2  ;;  %v4422_v35 = vrot.slane %v29444_v17, 2  ;;  %v38168_v42 = vand.u32 4294901760, %v30861_v57  ;;  %v31214_v4 = vand.u32 4294901760, %v31156_v53 }
  0xf2   : > { %24042 = vmatmul.mubr.f32.gmra.mrb[18].mxu0 %v30436_v1  ;;  %38156 = vst [vmem:[#allocation200_spill] sm:$0xff] %v31153_v12  ;;  %38157 = vst [vmem:[#allocation201_spill] sm:$0xff] %v31156_v53  ;;  %v4629_v1 = vsub.f32 %v31105_v11, %v31141_v24  ;;  %v38164_v24 = vand.u32 4294901760, %v30944_v6  ;;  %v4418_v46 = vsel %vm4395_vm1, %v4416_v61, %v4417_v5 }
  0xf3   : > { %21885 = vmatmul.mubr.f32.gmra.mrb[20].mxu1 %v38155_v14  ;;  %24044 = vmatprep.mubr.f32.mxu0 %v38075_v28  ;;  %38159 = vst [vmem:[#allocation202_spill] sm:$0xff] %v31164_v60  ;;  %v38160_v14 = vand.u32 4294901760, %v30856_v33  ;;  %v38162_v28 = vand.u32 4294901760, %v30937_v40  ;;  %v31193_v17 = vsub.f32 %v30861_v57, %v38168_v42  ;;  %v38173_v57 = vld [vmem:[#allocation129_spill] sm:$0xff]  ;;  %38175 = vst [vmem:[#allocation210_spill] sm:$0xff] %v31214_v4 }
  0xf4   : > { %21887 = vmatprep.mubr.f32.mxu1 %v38158_v62  ;;  %v31182_v11 = vsub.f32 %v30944_v6, %v38164_v24  ;;  %v4639_v6 = vsub.f32 %v31122_v29, %v31145_v52  ;;  %v4649_v24 = vsub.f32 %v31130_v63, %v31153_v12  ;;  %v31218_v61 = vsub.f32 %v4415_v36, %v31164_v60  ;;  %v29445_v52 = vld [vmem:[%s29796_s27 + $0x88] sm:$0x3]  ;;  %v29446_v12 = vld [vmem:[%s29796_s27 + $0x90] sm:$0xff]  ;;  %v38178_v36 = vld [vmem:[#allocation134_spill] sm:$0xff] }
  0xf5   : > { %v31169_v8 = vsub.f32 %v30856_v33, %v38160_v14  ;;  %v31177_v62 = vsub.f32 %v30937_v40, %v38162_v28  ;;  %v38167_v33 = vand.u32 4294901760, %v30023_v54  ;;  %38169 = vst [vmem:[#allocation206_spill] sm:$0xff] %v31193_v17  ;;  %v38170_v40 = vld [vmem:[#allocation122_spill] sm:$0xff]  ;;  %v31200_v28 = vand.u32 4294901760, %v31148_v7 }
  0xf6   : > { %38165 = vst [vmem:[#allocation205_spill] sm:$0xff] %v31182_v11  ;;  %24045 = vmatmul.mubr.f32.gmra.mrb[20].mxu0 %v30477_v34  ;;  %38176 = vst [vmem:[#allocation211_spill] sm:$0xff] %v31218_v61  ;;  %v31224_v29 = vand.u32 4294901760, %v4418_v46  ;;  %v4426_v63 = vrot.slane %v29446_v12, 2  ;;  %v38181_v34 = vld [vmem:[#allocation137_spill] sm:$0xff] }
  0xf7   : > { %38161 = vst [vmem:[#allocation203_spill] sm:$0xff] %v31169_v8  ;;  %38163 = vst [vmem:[#allocation204_spill] sm:$0xff] %v31177_v62  ;;  %v31188_v14 = vpack.c.bf16 %v38167_v33, %v38166_v55  ;;  %21888 = vmatmul.mubr.f32.gmra.mrb[22].mxu1 %v38170_v40  ;;  %v31205_v54 = vpack.c.bf16 %v31182_v11, %v31177_v62  ;;  %24047 = vmatprep.mubr.f32.mxu0 %v30514_v18  ;;  %v31209_v55 = vand.u32 4294901760, %v4629_v1  ;;  %v29447_v18 = vld [vmem:[%s29796_s27 + $0x98] sm:$0xff]  ;;  %v29448_v1 = vld [vmem:[%s29796_s27 + $0xa0] sm:$0x3] }
  0xf8   : > { %38171 = vst [vmem:[#allocation207_spill] sm:$0xff] %v31200_v28  ;;  %21890 = vmatprep.mubr.f32.mxu1 %v38173_v57  ;;  %v4420_v33 = vsel %vm4395_vm1, %v4417_v5, %v4419_v58  ;;  %v4423_v40 = vsel %vm4395_vm1, %v4421_v32, %v4422_v35  ;;  %v4424_v57 = vrot.slane %v29445_v52, 2  ;;  %38177 = vst [vmem:[#allocation212_spill] sm:$0xff] %v31224_v29  ;;  %v4427_v5 = vrot.slane %v29447_v18, 2 }
  0xf9   : > { %38172 = vst [vmem:[#allocation208_spill] sm:$0xff] %v31205_v54  ;;  %38174 = vst [vmem:[#allocation209_spill] sm:$0xff] %v31209_v55  ;;  %v31230_v58 = vand.u32 4294901760, %v4639_v6  ;;  %v4659_v32 = vsub.f32 %v31148_v7, %v31200_v28  ;;  %v31234_v52 = vand.u32 4294901760, %v4420_v33  ;;  %v4429_v42 = vrot.slane %v29448_v1, 2 }
  0xfa   : > { %24048 = vmatmul.mubr.f32.gmra.mrb[22].mxu0 %v38076_v51  ;;  %v4669_v18 = vsub.f32 %v31156_v53, %v31214_v4  ;;  %v31241_v12 = vand.u32 4294901760, %v4423_v40  ;;  %v29449_v51 = vld [vmem:[%s29796_s27 + $0xa8] sm:$0xff]  ;;  %v38183_v28 = vand.u32 4294901760, %v31169_v8  ;;  %v4425_v1 = vsel %vm4395_vm1, %v4422_v35, %v4424_v57 }
  0xfb   : > { %21891 = vmatmul.mubr.f32.gmra.mrb[24].mxu1 %v38178_v36  ;;  %38179 = vst [vmem:[#allocation213_spill] sm:$0xff] %v31230_v58  ;;  %38180 = vst [vmem:[#allocation214_spill] sm:$0xff] %v31234_v52  ;;  %24050 = vmatprep.mubr.f32.mxu0 %v38077_v22  ;;  %v4431_v6 = vrot.slane %v29449_v51, 2  ;;  %v29450_v36 = vld [vmem:[%s29796_s27 + $0xb0] sm:$0xff]  ;;  %v38184_v22 = vand.u32 4294901760, %v30963_v43  ;;  %v38186_v4 = vand.u32 4294901760, %v30980_v31  ;;  %v31270_v35 = vsub.f32 %v4418_v46, %v31224_v29 }
  0xfc   : > { %21893 = vmatprep.mubr.f32.mxu1 %v38181_v34  ;;  %38182 = vst [vmem:[#allocation215_spill] sm:$0xff] %v31241_v12  ;;  %v4432_v54 = vrot.slane %v29450_v36, 2  ;;  %v31248_v7 = vsub.f32 %v31169_v8, %v38183_v28  ;;  %v31262_v51 = vand.u32 4294901760, %v31218_v61  ;;  %v38189_v36 = vand.u32 4294901760, %v31193_v17  ;;  %v38194_v46 = vld [vmem:[#allocation149_spill] sm:$0xff] }
  0xfd   : > { %v31254_v34 = vsub.f32 %v30963_v43, %v38184_v22  ;;  %v31259_v53 = vsub.f32 %v30980_v31, %v38186_v4  ;;  %38190 = vst [vmem:[#allocation219_spill] sm:$0xff] %v31270_v35  ;;  %v4428_v57 = vsel %vm4395_vm1, %v4426_v63, %v4427_v5  ;;  %v38191_v22 = vld [vmem:[#allocation142_spill] sm:$0xff]  ;;  %v31276_v31 = vsub.f32 %v4420_v33, %v31234_v52  ;;  %v29451_v4 = vld [vmem:[%s29796_s27 + $0xb8] sm:$0x3] }
  0xfe   : > { %38188 = vst [vmem:[#allocation218_spill] sm:$0xff] %v31262_v51  ;;  %v31267_v28 = vsub.f32 %v31193_v17, %v38189_v36  ;;  %24051 = vmatmul.mubr.f32.gmra.mrb[24].mxu0 %v30577_v27  ;;  %v4430_v43 = vsel %vm4395_vm1, %v4427_v5, %v4429_v42  ;;  %v4434_v60 = vrot.slane %v29451_v4, 2  ;;  %v31287_v63 = vsub.f32 %v4423_v40, %v31241_v12 }
  0xff   : > { %38185 = vst [vmem:[#allocation216_spill] sm:$0xff] %v31254_v34  ;;  %38187 = vst [vmem:[#allocation217_spill] sm:$0xff] %v31259_v53  ;;  %21894 = vmatmul.mubr.f32.gmra.mrb[26].mxu1 %v38191_v22  ;;  %v31282_v36 = vpack.c.bf16 %v31259_v53, %v31254_v34  ;;  %24053 = vmatprep.mubr.f32.mxu0 %v30614_v49  ;;  %v31289_v27 = vand.u32 4294901760, %v4425_v1  ;;  %v4433_v22 = vsel %vm4395_vm1, %v4431_v6, %v4432_v54  ;;  %v38202_v6 = vld [vmem:[#allocation154_spill] sm:$0xff] }
 0x100   : > { %38192 = vst [vmem:[#allocation220_spill] sm:$0xff] %v31276_v31  ;;  %21896 = vmatprep.mubr.f32.mxu1 %v38194_v46  ;;  %38195 = vst [vmem:[#allocation222_spill] sm:$0xff] %v31287_v63  ;;  %v31293_v42 = vand.u32 4294901760, %v4649_v24  ;;  %v31295_v5 = vand.u32 4294901760, %v4659_v32  ;;  %v31300_v49 = vand.u32 4294901760, %v4669_v18  ;;  %v4679_v40 = vsub.f32 %v31218_v61, %v31262_v51 }
 0x101   : > { %38193 = vst [vmem:[#allocation221_spill] sm:$0xff] %v31282_v36  ;;  %38196 = vst [vmem:[#allocation223_spill] sm:$0xff] %v31289_v27  ;;  %v31298_v36 = vand.u32 4294901760, %v4428_v57  ;;  %v11031_v46 = vand.u32 4294901760, %v31248_v7  ;;  %v31305_v12 = vand.u32 4294901760, %v4430_v43  ;;  %v11038_v24 = vand.u32 4294901760, %v31267_v28 }
 0x102   : > { %38197 = vst [vmem:[#allocation224_spill] sm:$0xff] %v31293_v42  ;;  %38198 = vst [vmem:[#allocation225_spill] sm:$0xff] %v31295_v5  ;;  %24054 = vmatmul.mubr.f32.gmra.mrb[26].mxu0 %v30636_v38  ;;  %v31311_v32 = vand.u32 4294901760, %v31270_v35  ;;  %v31313_v4 = vand.u32 4294901760, %v4433_v22  ;;  %v4435_v18 = vsel %vm4395_vm1, %v4432_v54, %v4434_v60  ;;  %v31319_v7 = vand.u32 4294901760, %v31276_v31 }
 0x103   : > { %38199 = vst [vmem:[#allocation226_spill] sm:$0xff] %v31298_v36  ;;  %38200 = vst [vmem:[#allocation227_spill] sm:$0xff] %v31300_v49  ;;  %21897 = vmatmul.mubr.f32.gmra.mrb[28].mxu1 %v38202_v6  ;;  %24056 = vmatprep.mubr.f32.mxu0 %v30639_v45  ;;  %v31322_v33 = vand.u32 4294901760, %v31287_v63  ;;  %v31325_v28 = vsub.f32 %v4425_v1, %v31289_v27  ;;  %v38208_v6 = vand.u32 4294901760, %v30987_v50  ;;  %v38209_v60 = vand.u32 4294901760, %v30989_v39 }
 0x104   : > { %38201 = vst [vmem:[#allocation228_spill] sm:$0xff] %v31305_v12  ;;  %38203 = vst [vmem:[#allocation229_spill] sm:$0xff] %v31311_v32  ;;  %21899 = vmatprep.mubr.f32.mxu1 %v30661_v2  ;;  %v31334_v2 = vsub.f32 %v4428_v57, %v31298_v36  ;;  %v38211_v61 = vand.u32 4294901760, %v31003_v0  ;;  %v38213_v38 = vand.u32 4294901760, %v31008_v30  ;;  %v31347_v27 = vsub.f32 %v4430_v43, %v31305_v12 }
 0x105   : > { %38204 = vst [vmem:[#allocation230_spill] sm:$0xff] %v31313_v4  ;;  %38205 = vst [vmem:[#allocation231_spill] sm:$0xff] %v31319_v7  ;;  %v11044_v51 = vsub.f32 %v30987_v50, %v38208_v6  ;;  %v11051_v54 = vsub.f32 %v30989_v39, %v38209_v60  ;;  %v31349_v6 = vand.u32 4294901760, %v4435_v18  ;;  %v29452_v39 = vld [vmem:[%s29796_s27 + $0xc0] sm:$0xff]  ;;  %v38218_v60 = vand.u32 4294901760, %v38078_v25 }
 0x106   : > { %38206 = vst [vmem:[#allocation232_spill] sm:$0xff] %v31322_v33  ;;  %38207 = vst [vmem:[#allocation233_spill] sm:$0xff] %v31325_v28  ;;  %v31339_v45 = vsub.f32 %v31003_v0, %v38211_v61  ;;  %v31344_v1 = vsub.f32 %v31008_v30, %v38213_v38  ;;  %v4436_v57 = vrot.slane %v29452_v39, 2  ;;  %24057 = vmatmul.mubr.f32.gmra.mrb[28].mxu0 %v30676_v15  ;;  %v29453_v38 = vld [vmem:[%s29796_s27 + $0xc8] sm:$0xff]  ;;  %v38220_v61 = vand.u32 4294901760, %v30122_v10 }
 0x107   : > { %38210 = vst [vmem:[#allocation234_spill] sm:$0xff] %v31334_v2  ;;  %38215 = vst [vmem:[#allocation237_spill] sm:$0xff] %v31347_v27  ;;  %21900 = vmatmul.mubr.f32.gmra.mrb[30].mxu1 %v30691_v44  ;;  %v31356_v0 = vsub.f32 %v4433_v22, %v31313_v4  ;;  %v4437_v30 = vrot.slane %v29453_v38, 2  ;;  %24059 = vmatprep.mubr.f32.mxu0 %v30716_v16  ;;  %v4689_v39 = vsub.f32 %v31270_v35, %v31311_v32 }
 0x108   : > { %38212 = vst [vmem:[#allocation235_spill] sm:$0xff] %v31339_v45  ;;  %38214 = vst [vmem:[#allocation236_spill] sm:$0xff] %v31344_v1  ;;  %v31362_v43 = vpack.c.bf16 %v31344_v1, %v31339_v45  ;;  %21934 = vmatprep.mubr.f32.mxu1 %v38218_v60  ;;  %v4699_v22 = vsub.f32 %v31276_v31, %v31319_v7  ;;  %v38219_v44 = vand.u32 4294901760, %v30117_v23  ;;  %v31378_v50 = vand.u32 4294901760, %v31325_v28 }
 0x109   : > { %38216 = vst [vmem:[#allocation238_spill] sm:$0xff] %v31349_v6  ;;  %38217 = vst [vmem:[#allocation239_spill] sm:$0xff] %v31356_v0  ;;  %v31380_v15 = vand.u32 4294901760, %v4679_v40  ;;  %v4709_v25 = vsub.f32 %v31287_v63, %v31322_v33  ;;  %v11045_v60 = vand.u32 4294901760, %v11044_v51  ;;  %v11052_v16 = vand.u32 4294901760, %v11051_v54 }
 0x10a   : > { %v31375_v38 = vpack.c.bf16 %v38220_v61, %v38219_v44  ;;  %38221 = vst [vmem:[#allocation240_spill] sm:$0xff] %v31378_v50  ;;  %v26978_v32 = vpack.c.bf16 %v11038_v24, %v11031_v46  ;;  %v31385_v7 = vand.u32 4294901760, %v31334_v2  ;;  %v31388_v23 = vand.u32 4294901760, %v31347_v27  ;;  %24060 = vmatmul.mubr.f32.gmra.mrb[30].mxu0 %v30726_v48  ;;  %v29454_v48 = vld [vmem:[%s29796_s27 + $0xd0] sm:$0x3] }
 0x10b   : > { %38222 = vst [vmem:[#allocation241_spill] sm:$0xff] %v31380_v15  ;;  %v31391_v10 = vsub.f32 %v4435_v18, %v31349_v6  ;;  %v38226_v44 = vand.u32 4294901760, %v38079_v37  ;;  %v31397_v40 = vand.u32 4294901760, %v31356_v0  ;;  %v38228_v51 = vand.u32 4294901760, %v31053_v59  ;;  %24094 = vmatprep.mubr.f32.mxu0 %v31209_v55 }
 0x10c   : > { %38223 = vst [vmem:[#allocation242_spill] sm:$0xff] %v31385_v7  ;;  %38224 = vst [vmem:[#allocation243_spill] sm:$0xff] %v31388_v23  ;;  %v38229_v24 = vand.u32 4294901760, %v31058_v47  ;;  %v4438_v61 = vsel %vm4395_vm1, %v4436_v57, %v4437_v30  ;;  %v31408_v18 = vand.u32 4294901760, %v4689_v39  ;;  %v31410_v37 = vand.u32 4294901760, %v4699_v22 }
 0x10d   : > { %38225 = vst [vmem:[#allocation244_spill] sm:$0xff] %v31391_v10  ;;  %21935 = vmatmul.mubr.f32.vlgmr.msra.gmra.mrb[0].mxu1 %v38226_v44  ;;  %38227 = vst [vmem:[#allocation245_spill] sm:$0xff] %v31397_v40  ;;  %v11058_v46 = vsub.f32 %v31053_v59, %v38228_v51  ;;  %v4719_v44 = vsub.f32 %v31325_v28, %v31378_v50  ;;  %v4439_v33 = vrot.slane %v29454_v48, 2  ;;  %v38232_v51 = vld [vmem:[#allocation22_spill] sm:$0xff]  ;;  %v31428_v22 = vand.u32 4294901760, %v31391_v10 }
 0x10e   : > { %v11065_v54 = vsub.f32 %v31058_v47, %v38229_v24  ;;  %26113 = vmatpush3.bf16.msra.mxu1 %v31089_v3  ;;  %38230 = vst [vmem:[#allocation246_spill] sm:$0xff] %v31408_v18  ;;  %38231 = vst [vmem:[#allocation247_spill] sm:$0xff] %v31410_v37  ;;  %21937 = vmatprep.mubr.f32.mxu1 %v38232_v51  ;;  %v31417_v24 = vand.u32 4294901760, %v4709_v25  ;;  %v31419_v57 = vpack.c.bf16 %v11052_v16, %v11045_v60  ;;  %v38236_v16 = vld [vmem:[#allocation30_spill] sm:$0xff]  ;;  %v38238_v3 = vld [vmem:[#allocation68_spill] sm:$0xff] }
 0x10f   : > { %26115 = vmatprep.subr.bf16.mxu1 %v31188_v14  ;;  %v4729_v39 = vsub.f32 %v31334_v2, %v31385_v7  ;;  %v4739_v48 = vsub.f32 %v31347_v27, %v31388_v23  ;;  %38234 = vst [vmem:[#allocation248_spill] sm:$0xff] %v31428_v22  ;;  %v31430_v51 = vand.u32 4294901760, %v4438_v61  ;;  %24095 = vmatmul.mubr.f32.vlgmr.msra.gmra.mrb[0].mxu0 %v31230_v58  ;;  %v38237_v60 = vand.u32 4294901760, %v30221_v41  ;;  %v29456_v27 = vld [vmem:[%s29796_s27 + $0xe0] sm:$0xff] }
 0x110   : > { %38233 = vst [vmem:[#allocation22_spill] sm:$0xff] %v31417_v24  ;;  %v4749_v25 = vsub.f32 %v31356_v0, %v31397_v40  ;;  %v38239_v55 = vand.u32 4294901760, %v38238_v3  ;;  %v11059_v50 = vand.u32 4294901760, %v11058_v46  ;;  %v11066_v23 = vand.u32 4294901760, %v11065_v54  ;;  %26977 = vmatpush3.bf16.msra.mxu0 %v31095_v13  ;;  %24097 = vmatprep.mubr.f32.mxu0 %v31293_v42  ;;  %v38241_v0 = vld [vmem:[#allocation34_spill] sm:$0xff]  ;;  %v29459_v54 = vld [vmem:[%s29796_s27 + $0xf8] sm:$0xff] }
 0x111   : > { %38235 = vst [vmem:[#allocation249_spill] sm:$0xff] %v31430_v51  ;;  %21938 = vmatmul.mubr.f32.gmra.mrb[2].mxu1 %v38236_v16  ;;  %v31444_v47 = vand.u32 4294901760, %v4719_v44  ;;  %v4440_v58 = vsel %vm4395_vm1, %v4437_v30, %v4439_v33  ;;  %v29455_v16 = vld [vmem:[%s29796_s27 + $0xd8] sm:$0xff]  ;;  %v4442_v40 = vrot.slane %v29456_v27, 2  ;;  %26979 = vmatprep.subr.bf16.mxu0 %v26978_v32  ;;  %v38242_v41 = vand.u32 4294901760, %v31114_v9  ;;  %v29458_v33 = vld [vmem:[%s29796_s27 + $0xf0] sm:$0xff] }
 0x112   : > { %v31440_v7 = vpack.c.bf16 %v38239_v55, %v38237_v60  ;;  %v4441_v59 = vrot.slane %v29455_v16, 2  ;;  %21940 = vmatprep.mubr.f32.mxu1 %v38241_v0  ;;  %v38243_v13 = vand.u32 4294901760, %v31119_v26  ;;  %26117 = vmatpush3.bf16.msra.mxu1 %v31188_v14  ;;  %v31459_v27 = vand.u32 4294901760, %v4729_v39  ;;  %v38247_v60 = vld [vmem:[#allocation40_spill] sm:$0xff]  ;;  %v29457_v39 = vld [vmem:[%s29796_s27 + $0xe8] sm:$0x3] }
 0x113   : > { %38240 = vst [vmem:[#allocation30_spill] sm:$0xff] %v31444_v47  ;;  %v11072_v55 = vsub.f32 %v31114_v9, %v38242_v41  ;;  %v31461_v30 = vand.u32 4294901760, %v4739_v48  ;;  %v4759_v44 = vsub.f32 %v31391_v10, %v31428_v22  ;;  %v31466_v3 = vsub.f32 %v4438_v61, %v31430_v51  ;;  %24098 = vmatmul.mubr.f32.gmra.mrb[2].mxu0 %v31295_v5  ;;  %v29460_v5 = vld [vmem:[%s29796_s27 + $0x100] sm:$0x3] }
 0x114   : > { %v11079_v46 = vsub.f32 %v31119_v26, %v38243_v13  ;;  %38244 = vst [vmem:[#allocation68_spill] sm:$0xff] %v31459_v27  ;;  %v31470_v16 = vand.u32 4294901760, %v4749_v25  ;;  %v31472_v41 = vpack.c.bf16 %v11066_v23, %v11059_v50  ;;  %v31474_v14 = vand.u32 4294901760, %v4440_v58  ;;  %24100 = vmatprep.mubr.f32.mxu0 %v31300_v49  ;;  %26981 = vmatpush3.bf16.msra.mxu0 %v26978_v32 }
 0x115   : > { %38245 = vst [vmem:[#allocation250_spill] sm:$0xff] %v31461_v30  ;;  %38246 = vst [vmem:[#allocation251_spill] sm:$0xff] %v31466_v3  ;;  %21941 = vmatmul.mubr.f32.gmra.mrb[4].mxu1 %v38247_v60  ;;  %v4444_v48 = vrot.slane %v29457_v39, 2  ;;  %v4443_v13 = vsel %vm4395_vm1, %v4441_v59, %v4442_v40  ;;  %v4446_v61 = vrot.slane %v29458_v33, 2  ;;  %v4447_v0 = vrot.slane %v29459_v54, 2  ;;  %v38250_v60 = vld [vmem:[#allocation42_spill] sm:$0xff]  ;;  %26119 = vmatprep.subr.bf16.mxu1 %v31375_v38 }
 0x116   : > { %38248 = vst [vmem:[#allocation252_spill] sm:$0xff] %v31470_v16  ;;  %38249 = vst [vmem:[#allocation253_spill] sm:$0xff] %v31474_v14  ;;  %v4449_v42 = vrot.slane %v29460_v5, 2  ;;  %21943 = vmatprep.mubr.f32.mxu1 %v38250_v60  ;;  %v11073_v50 = vand.u32 4294901760, %v11072_v55  ;;  %v11080_v23 = vand.u32 4294901760, %v11079_v46  ;;  %v38251_v25 = vand.u32 4294901760, %v31177_v62  ;;  %26983 = vmatprep.subr.bf16.mxu0 %v31419_v57 }
 0x117   : > { %v38252_v32 = vand.u32 4294901760, %v31182_v11  ;;  %26121 = vmatpush3.bf16.msra.mxu1 %v31375_v38  ;;  %v31492_v5 = vand.u32 4294901760, %v4759_v44  ;;  %v38254_v54 = vld [vmem:[#allocation87_spill] sm:$0xff]  ;;  %v38256_v60 = vld [vmem:[#allocation88_spill] sm:$0xff]  ;;  %24101 = vmatmul.mubr.f32.gmra.mrb[4].mxu0 %v31380_v15  ;;  %v31503_v22 = vand.u32 4294901760, %v31466_v3  ;;  %v31506_v38 = vsub.f32 %v4440_v58, %v31474_v14 }
 0x118   : > { %v11086_v39 = vsub.f32 %v31177_v62, %v38251_v25  ;;  %v38255_v33 = vand.u32 4294901760, %v38254_v54  ;;  %v38257_v55 = vand.u32 4294901760, %v38256_v60  ;;  %v31508_v44 = vand.u32 4294901760, %v4443_v13  ;;  %24103 = vmatprep.mubr.f32.mxu0 %v31408_v18  ;;  %v38262_v54 = vld [vmem:[#allocation54_spill] sm:$0xff]  ;;  %v29461_v25 = vld [vmem:[%s29796_s27 + $0x108] sm:$0xff]  ;;  %26985 = vmatpush3.bf16.msra.mxu0 %v31419_v57 }
 0x119   : > { %v11093_v59 = vsub.f32 %v31182_v11, %v38252_v32  ;;  %38253 = vst [vmem:[#allocation254_spill] sm:$0xff] %v31492_v5  ;;  %v38258_v32 = vld [vmem:[#allocation45_spill] sm:$0xff]  ;;  %38259 = vst [vmem:[#allocation87_spill] sm:$0xff] %v31503_v22  ;;  %v4445_v60 = vsel %vm4395_vm1, %v4442_v40, %v4444_v48  ;;  %v4451_v49 = vrot.slane %v29461_v25, 2  ;;  %26123 = vmatprep.subr.bf16.mxu1 %v31440_v7  ;;  %26987 = vmatprep.subr.bf16.mxu0 %v31472_v41 }
 0x11a   : > { %v26126_v46 = vpack.c.bf16 %v38257_v55, %v38255_v33  ;;  %21944 = vmatmul.mubr.f32.gmra.mrb[6].mxu1 %v38258_v32  ;;  %38260 = vst [vmem:[#allocation88_spill] sm:$0xff] %v31506_v38  ;;  %38261 = vst [vmem:[#allocation255_spill] sm:$0xff] %v31508_v44  ;;  %v4448_v33 = vsel %vm4395_vm1, %v4446_v61, %v4447_v0  ;;  %v4450_v55 = vsel %vm4395_vm1, %v4447_v0, %v4449_v42  ;;  %v29462_v32 = vld [vmem:[%s29796_s27 + $0x110] sm:$0xff]  ;;  %v29463_v11 = vld [vmem:[%s29796_s27 + $0x118] sm:$0x3] }
 0x11b   : > { %21946 = vmatprep.mubr.f32.mxu1 %v38262_v54  ;;  %v4452_v15 = vrot.slane %v29462_v32, 2  ;;  %v26990_v58 = vpack.c.bf16 %v11080_v23, %v11073_v50  ;;  %v4454_v40 = vrot.slane %v29463_v11, 2  ;;  %v11087_v48 = vand.u32 4294901760, %v11086_v39  ;;  %26125 = vmatpush3.bf16.msra.mxu1 %v31440_v7  ;;  %v38265_v11 = vld [vmem:[#allocation59_spill] sm:$0xff]  ;;  %v29464_v39 = vld [vmem:[%s29796_s27 + $0x120] sm:$0xff] }
 0x11c   : > { %v11094_v18 = vand.u32 4294901760, %v11093_v59  ;;  %v38263_v42 = vand.u32 4294901760, %v31254_v34  ;;  %v38264_v61 = vand.u32 4294901760, %v31259_v53  ;;  %24104 = vmatmul.mubr.f32.gmra.mrb[6].mxu0 %v31410_v37  ;;  %v4769_v23 = vsub.f32 %v31466_v3, %v31503_v22  ;;  %v29465_v32 = vld [vmem:[%s29796_s27 + $0x128] sm:$0xff]  ;;  %26127 = vmatprep.subr.bf16.mxu1 %v26126_v46  ;;  %v38274_v37 = vld [vmem:[#allocation108_spill] sm:$0xff] }
 0x11d   : > { %v31534_v7 = vand.u32 4294901760, %v4445_v60  ;;  %v4456_v59 = vrot.slane %v29464_v39, 2  ;;  %24106 = vmatprep.mubr.f32.mxu0 %v31417_v24  ;;  %v31541_v25 = vand.u32 4294901760, %v31506_v38  ;;  %v31544_v50 = vsub.f32 %v4443_v13, %v31508_v44  ;;  %26989 = vmatpush3.bf16.msra.mxu0 %v31472_v41 }
 0x11e   : > { %v11100_v0 = vsub.f32 %v31254_v34, %v38263_v42  ;;  %v11107_v57 = vsub.f32 %v31259_v53, %v38264_v61  ;;  %21947 = vmatmul.mubr.f32.gmra.mrb[8].mxu1 %v38265_v11  ;;  %v4457_v42 = vrot.slane %v29465_v32, 2  ;;  %v38267_v61 = vld [vmem:[#allocation61_spill] sm:$0xff]  ;;  %v31546_v11 = vand.u32 4294901760, %v4448_v33  ;;  %v38272_v32 = vld [vmem:[#allocation107_spill] sm:$0xff]  ;;  %26991 = vmatprep.subr.bf16.mxu0 %v26990_v58 }
 0x11f   : > { %38266 = vst [vmem:[#allocation256_spill] sm:$0xff] %v31534_v7  ;;  %21949 = vmatprep.mubr.f32.mxu1 %v38267_v61  ;;  %38268 = vst [vmem:[#allocation257_spill] sm:$0xff] %v31541_v25  ;;  %v4453_v54 = vsel %vm4395_vm1, %v4451_v49, %v4452_v15  ;;  %v31550_v39 = vand.u32 4294901760, %v4450_v55  ;;  %v38273_v24 = vand.u32 4294901760, %v38272_v32  ;;  %v38275_v61 = vand.u32 4294901760, %v38274_v37  ;;  %26129 = vmatpush3.bf16.msra.mxu1 %v26126_v46  ;;  %v38278_v37 = vld [vmem:[#allocation65_spill] sm:$0xff] }
 0x120   : > { %38269 = vst [vmem:[#allocation258_spill] sm:$0xff] %v31544_v50  ;;  %38270 = vst [vmem:[#allocation259_spill] sm:$0xff] %v31546_v11  ;;  %v4455_v53 = vsel %vm4395_vm1, %v4452_v15, %v4454_v40  ;;  %v26994_v34 = vpack.c.bf16 %v11094_v18, %v11087_v48  ;;  %v11101_v13 = vand.u32 4294901760, %v11100_v0  ;;  %v11108_v62 = vand.u32 4294901760, %v11107_v57  ;;  %24107 = vmatmul.mubr.f32.gmra.mrb[8].mxu0 %v31444_v47  ;;  %v29466_v46 = vld [vmem:[%s29796_s27 + $0x130] sm:$0x3] }
 0x121   : > { %38271 = vst [vmem:[#allocation260_spill] sm:$0xff] %v31550_v39  ;;  %v26130_v22 = vpack.c.bf16 %v38275_v61, %v38273_v24  ;;  %v38276_v49 = vand.u32 4294901760, %v31339_v45  ;;  %v38277_v26 = vand.u32 4294901760, %v31344_v1  ;;  %v31566_v15 = vsub.f32 %v4445_v60, %v31534_v7  ;;  %24109 = vmatprep.mubr.f32.mxu0 %v31459_v27  ;;  %v38281_v48 = vld [vmem:[#allocation73_spill] sm:$0xff]  ;;  %v29468_v60 = vld [vmem:[%s29796_s27 + $0x140] sm:$0xff]  ;;  %26993 = vmatpush3.bf16.msra.mxu0 %v26990_v58  ;;  %v38289_v47 = vld [vmem:[#allocation128_spill] sm:$0xff] }
 0x122   : > { %21950 = vmatmul.mubr.f32.gmra.mrb[10].mxu1 %v38278_v37  ;;  %v31568_v18 = vand.u32 4294901760, %v4453_v54  ;;  %v4458_v24 = vsel %vm4395_vm1, %v4456_v59, %v4457_v42  ;;  %v4459_v40 = vrot.slane %v29466_v46, 2  ;;  %v31575_v0 = vand.u32 4294901760, %v31544_v50  ;;  %v29467_v57 = vld [vmem:[%s29796_s27 + $0x138] sm:$0xff]  ;;  %26995 = vmatprep.subr.bf16.mxu0 %v26994_v34 }
 0x123   : > { %v11114_v41 = vsub.f32 %v31339_v45, %v38276_v49  ;;  %v11121_v32 = vsub.f32 %v31344_v1, %v38277_v26  ;;  %38279 = vst [vmem:[#allocation107_spill] sm:$0xff] %v31566_v15  ;;  %21952 = vmatprep.mubr.f32.mxu1 %v38281_v48  ;;  %v31578_v26 = vsub.f32 %v4448_v33, %v31546_v11  ;;  %v4461_v61 = vrot.slane %v29467_v57, 2  ;;  %v38287_v48 = vld [vmem:[#allocation127_spill] sm:$0xff] }
 0x124   : > { %38280 = vst [vmem:[#allocation108_spill] sm:$0xff] %v31568_v18  ;;  %38282 = vst [vmem:[#allocation261_spill] sm:$0xff] %v31575_v0  ;;  %v4462_v49 = vrot.slane %v29468_v60, 2  ;;  %v31582_v37 = vand.u32 4294901760, %v4769_v23  ;;  %v31585_v59 = vsub.f32 %v4450_v55, %v31550_v39  ;;  %26131 = vmatprep.subr.bf16.mxu1 %v26130_v22  ;;  %v31587_v46 = vand.u32 4294901760, %v4455_v53  ;;  %24110 = vmatmul.mubr.f32.gmra.mrb[10].mxu0 %v31461_v30  ;;  %v38292_v55 = vld [vmem:[#allocation78_spill] sm:$0xff] }
 0x125   : > { %38283 = vst [vmem:[#allocation262_spill] sm:$0xff] %v31578_v26  ;;  %v38288_v27 = vand.u32 4294901760, %v38287_v48  ;;  %v38290_v1 = vand.u32 4294901760, %v38289_v47  ;;  %26133 = vmatpush3.bf16.msra.mxu1 %v26130_v22  ;;  %v31593_v33 = vand.u32 4294901760, %v4458_v24  ;;  %v26998_v57 = vpack.c.bf16 %v11108_v62, %v11101_v13  ;;  %24112 = vmatprep.mubr.f32.mxu0 %v31470_v16  ;;  %v38295_v62 = vld [vmem:[#allocation80_spill] sm:$0xff] }
 0x126   : > { %38284 = vst [vmem:[#allocation263_spill] sm:$0xff] %v31582_v37  ;;  %38285 = vst [vmem:[#allocation264_spill] sm:$0xff] %v31585_v59  ;;  %v11115_v23 = vand.u32 4294901760, %v11114_v41  ;;  %v11122_v60 = vand.u32 4294901760, %v11121_v32  ;;  %21953 = vmatmul.mubr.f32.gmra.mrb[12].mxu1 %v38292_v55  ;;  %v4779_v58 = vsub.f32 %v31506_v38, %v31541_v25  ;;  %v31600_v47 = vand.u32 4294901760, %v31566_v15  ;;  %26997 = vmatpush3.bf16.msra.mxu0 %v26994_v34  ;;  %v38300_v25 = vld [vmem:[#allocation148_spill] sm:$0xff] }
 0x127   : > { %38286 = vst [vmem:[#allocation265_spill] sm:$0xff] %v31587_v46  ;;  %v26134_v45 = vpack.c.bf16 %v38290_v1, %v38288_v27  ;;  %38291 = vst [vmem:[#allocation127_spill] sm:$0xff] %v31593_v33  ;;  %v31603_v1 = vsub.f32 %v4453_v54, %v31568_v18  ;;  %v4460_v22 = vsel %vm4395_vm1, %v4457_v42, %v4459_v40  ;;  %21955 = vmatprep.mubr.f32.mxu1 %v38295_v62  ;;  %v29469_v32 = vld [vmem:[%s29796_s27 + $0x148] sm:$0x3]  ;;  %v29470_v54 = vld [vmem:[%s29796_s27 + $0x150] sm:$0xff] }
 0x128   : > { %38293 = vst [vmem:[#allocation128_spill] sm:$0xff] %v31600_v47  ;;  %v4789_v27 = vsub.f32 %v31544_v50, %v31575_v0  ;;  %v31611_v13 = vand.u32 4294901760, %v31578_v26  ;;  %v4463_v41 = vsel %vm4395_vm1, %v4461_v61, %v4462_v49  ;;  %v4464_v48 = vrot.slane %v29469_v32, 2  ;;  %v29471_v40 = vld [vmem:[%s29796_s27 + $0x158] sm:$0xff]  ;;  %v38298_v62 = vld [vmem:[#allocation147_spill] sm:$0xff]  ;;  %26999 = vmatprep.subr.bf16.mxu0 %v26998_v57  ;;  %24113 = vmatmul.mubr.f32.gmra.mrb[12].mxu0 %v31492_v5  ;;  %v38322_v38 = vld [vmem:[#allocation2_spill] sm:$0xff] }
 0x129   : > { %38294 = vst [vmem:[#allocation266_spill] sm:$0xff] %v31603_v1  ;;  %v31616_v55 = vand.u32 4294901760, %v31585_v59  ;;  %26135 = vmatprep.subr.bf16.mxu1 %v26134_v45  ;;  %v4466_v42 = vrot.slane %v29470_v54, 2  ;;  %v4467_v16 = vrot.slane %v29471_v40, 2  ;;  %v38299_v30 = vand.u32 4294901760, %v38298_v62  ;;  %v38305_v54 = vld [vmem:[#allocation84_spill] sm:$0xff]  ;;  %24115 = vmatprep.mubr.f32.mxu0 %v31582_v37 }
 0x12a   : > { %38296 = vst [vmem:[#allocation267_spill] sm:$0xff] %v31611_v13  ;;  %v38301_v0 = vand.u32 4294901760, %v38300_v25  ;;  %v31625_v50 = vsub.f32 %v4455_v53, %v31587_v46  ;;  %v31628_v61 = vsub.f32 %v4458_v24, %v31593_v33  ;;  %v31630_v32 = vand.u32 4294901760, %v4460_v22  ;;  %26137 = vmatpush3.bf16.msra.mxu1 %v26134_v45  ;;  %v38309_v45 = vld [vmem:[#allocation93_spill] sm:$0xff]  ;;  %27001 = vmatpush3.bf16.msra.mxu0 %v26998_v57  ;;  %v29473_v5 = vld [vmem:[%s29796_s27 + $0x168] sm:$0xff]  ;;  %v29474_v37 = vld [vmem:[%s29796_s27 + $0x170] sm:$0xff] }
 0x12b   : > { %38297 = vst [vmem:[#allocation268_spill] sm:$0xff] %v31616_v55  ;;  %v27002_v34 = vpack.c.bf16 %v11122_v60, %v11115_v23  ;;  %21956 = vmatmul.mubr.f32.gmra.mrb[14].mxu1 %v38305_v54  ;;  %v31634_v62 = vand.u32 4294901760, %v4779_v58  ;;  %v4799_v53 = vsub.f32 %v31566_v15, %v31600_v47  ;;  %v31641_v25 = vand.u32 4294901760, %v4463_v41  ;;  %v29472_v60 = vld [vmem:[%s29796_s27 + $0x160] sm:$0x3]  ;;  %v38314_v57 = vld [vmem:[#allocation176_spill] sm:$0xff] }
 0x12c   : > { %v26138_v9 = vpack.c.bf16 %v38301_v0, %v38299_v30  ;;  %38302 = vst [vmem:[#allocation147_spill] sm:$0xff] %v31625_v50  ;;  %38303 = vst [vmem:[#allocation148_spill] sm:$0xff] %v31628_v61  ;;  %v31639_v30 = vand.u32 4294901760, %v31603_v1  ;;  %21958 = vmatprep.mubr.f32.mxu1 %v38309_v45  ;;  %v31645_v24 = vand.u32 4294901760, %v4789_v27  ;;  %v4809_v0 = vsub.f32 %v31578_v26, %v31611_v13 }
 0x12d   : > { %38304 = vst [vmem:[#allocation269_spill] sm:$0xff] %v31630_v32  ;;  %38306 = vst [vmem:[#allocation270_spill] sm:$0xff] %v31634_v62  ;;  %v4465_v23 = vsel %vm4395_vm1, %v4462_v49, %v4464_v48  ;;  %v4469_v58 = vrot.slane %v29472_v60, 2  ;;  %v4819_v40 = vsub.f32 %v31585_v59, %v31616_v55  ;;  %v4468_v54 = vsel %vm4395_vm1, %v4466_v42, %v4467_v16 }
 0x12e   : > { %38307 = vst [vmem:[#allocation271_spill] sm:$0xff] %v31639_v30  ;;  %38308 = vst [vmem:[#allocation272_spill] sm:$0xff] %v31641_v25  ;;  %v4471_v47 = vrot.slane %v29473_v5, 2  ;;  %v4472_v15 = vrot.slane %v29474_v37, 2  ;;  %26139 = vmatprep.subr.bf16.mxu1 %v26138_v9  ;;  %v31657_v27 = vand.u32 4294901760, %v31625_v50  ;;  %v31660_v45 = vand.u32 4294901760, %v31628_v61  ;;  %27003 = vmatprep.subr.bf16.mxu0 %v27002_v34 }
 0x12f   : > { %38310 = vst [vmem:[#allocation273_spill] sm:$0xff] %v31645_v24  ;;  %v31663_v49 = vsub.f32 %v4460_v22, %v31630_v32  ;;  %26141 = vmatpush3.bf16.msra.mxu1 %v26138_v9  ;;  %v31667_v48 = vpack.c.bf16 %v38314_v57, %v30968_v56  ;;  %24116 = vmatmul.mubr.f32.gmra.mrb[14].mxu0 %v31634_v62  ;;  %v38315_v5 = vld [vmem:[#allocation98_spill] sm:$0xff]  ;;  %v31671_v37 = vand.u32 4294901760, %v4799_v53  ;;  %v31678_v60 = vand.u32 4294901760, %v4465_v23  ;;  %v38319_v9 = vld [vmem:[#allocation100_spill] sm:$0xff] }
 0x130   : > { %38311 = vst [vmem:[#allocation274_spill] sm:$0xff] %v31657_v27  ;;  %38312 = vst [vmem:[#allocation275_spill] sm:$0xff] %v31660_v45  ;;  %21959 = vmatmul.mubr.f32.gmra.mrb[16].mxu1 %v38315_v5  ;;  %v4829_v42 = vsub.f32 %v31603_v1, %v31639_v30  ;;  %v31676_v22 = vsub.f32 %v4463_v41, %v31641_v25  ;;  %24118 = vmatprep.mubr.f32.mxu0 %v31645_v24  ;;  %v31682_v55 = vand.u32 4294901760, %v4809_v0  ;;  %v29475_v53 = vld [vmem:[%s29796_s27 + $0x178] sm:$0x3]  ;;  %v29476_v30 = vld [vmem:[%s29796_s27 + $0x180] sm:$0xff] }
 0x131   : > { %38313 = vst [vmem:[#allocation276_spill] sm:$0xff] %v31663_v49  ;;  %38316 = vst [vmem:[#allocation176_spill] sm:$0xff] %v31671_v37  ;;  %21961 = vmatprep.mubr.f32.mxu1 %v38319_v9  ;;  %v31684_v62 = vand.u32 4294901760, %v4468_v54  ;;  %v4470_v5 = vsel %vm4395_vm1, %v4467_v16, %v4469_v58  ;;  %v4474_v13 = vrot.slane %v29475_v53, 2  ;;  %v4473_v59 = vsel %vm4395_vm1, %v4471_v47, %v4472_v15  ;;  %v29477_v1 = vld [vmem:[%s29796_s27 + $0x188] sm:$0xff]  ;;  %v38325_v47 = vld [vmem:[#allocation104_spill] sm:$0xff] }
 0x132   : > { %38317 = vst [vmem:[#allocation277_spill] sm:$0xff] %v31676_v22  ;;  %38318 = vst [vmem:[#allocation278_spill] sm:$0xff] %v31678_v60  ;;  %27005 = vmatpush3.bf16.msra.mxu0 %v27002_v34  ;;  %v10587_v41 = vrot.slane %v29476_v30, 2  ;;  %v10588_v26 = vrot.slane %v29477_v1, 2  ;;  %26143 = vmatprep.subr.bf16.mxu1 %v38322_v38  ;;  %v31692_v24 = vand.u32 4294901760, %v4819_v40  ;;  %v4839_v0 = vsub.f32 %v31625_v50, %v31657_v27  ;;  %v38330_v53 = vld [vmem:[#allocation113_spill] sm:$0xff] }
 0x133   : > { %38320 = vst [vmem:[#allocation279_spill] sm:$0xff] %v31682_v55  ;;  %38321 = vst [vmem:[#allocation280_spill] sm:$0xff] %v31684_v62  ;;  %v4849_v16 = vsub.f32 %v31628_v61, %v31660_v45  ;;  %v31699_v58 = vand.u32 4294901760, %v31663_v49  ;;  %27007 = vmatprep.subr.bf16.mxu0 %v31667_v48  ;;  %24119 = vmatmul.mubr.f32.gmra.mrb[16].mxu0 %v31671_v37  ;;  %v31704_v1 = vand.u32 4294901760, %v4829_v42  ;;  %v31707_v34 = vand.u32 4294901760, %v31676_v22 }
 0x134   : > { %38323 = vst [vmem:[#allocation2_spill] sm:$0xff] %v31692_v24  ;;  %21962 = vmatmul.mubr.f32.gmra.mrb[18].mxu1 %v38325_v47  ;;  %v31710_v30 = vsub.f32 %v4465_v23, %v31678_v60  ;;  %v31712_v40 = vand.u32 4294901760, %v4470_v5  ;;  %24121 = vmatprep.mubr.f32.mxu0 %v31682_v55  ;;  %v31717_v9 = vsub.f32 %v4468_v54, %v31684_v62  ;;  %v31719_v37 = vand.u32 4294901760, %v4473_v59  ;;  %v29478_v47 = vld [vmem:[%s29796_s27 + $0x190] sm:$0x3] }
 0x135   : > { %38324 = vst [vmem:[#allocation281_spill] sm:$0xff] %v31699_v58  ;;  %38326 = vst [vmem:[#allocation282_spill] sm:$0xff] %v31704_v1  ;;  %21964 = vmatprep.mubr.f32.mxu1 %v38330_v53  ;;  %v4475_v42 = vsel %vm4395_vm1, %v4472_v15, %v4474_v13  ;;  %v10590_v45 = vrot.slane %v29478_v47, 2  ;;  %v10589_v27 = vsel %vm4395_vm1, %v10587_v41, %v10588_v26  ;;  %v31724_v61 = vand.u32 4294901760, %v4839_v0  ;;  %v38335_v53 = vld [vmem:[#allocation118_spill] sm:$0xff]  ;;  %v38339_v0 = vld [vmem:[#allocation120_spill] sm:$0xff] }
 0x136   : > { %38327 = vst [vmem:[#allocation283_spill] sm:$0xff] %v31707_v34  ;;  %38328 = vst [vmem:[#allocation284_spill] sm:$0xff] %v31710_v30  ;;  %v31726_v23 = vand.u32 4294901760, %v4849_v16  ;;  %v4859_v55 = vsub.f32 %v31663_v49, %v31699_v58  ;;  %v4869_v54 = vsub.f32 %v31676_v22, %v31707_v34  ;;  %v31735_v15 = vand.u32 4294901760, %v31710_v30 }
 0x137   : > { %38329 = vst [vmem:[#allocation285_spill] sm:$0xff] %v31712_v40  ;;  %38331 = vst [vmem:[#allocation286_spill] sm:$0xff] %v31717_v9  ;;  %24122 = vmatmul.mubr.f32.gmra.mrb[18].mxu0 %v31692_v24  ;;  %v31738_v13 = vsub.f32 %v4470_v5, %v31712_v40  ;;  %v31740_v41 = vand.u32 4294901760, %v4475_v42  ;;  %v31745_v16 = vand.u32 4294901760, %v31717_v9  ;;  %v31748_v47 = vsub.f32 %v4473_v59, %v31719_v37  ;;  %v38344_v5 = vld [vmem:[#allocation124_spill] sm:$0xff] }
 0x138   : > { %38332 = vst [vmem:[#allocation287_spill] sm:$0xff] %v31719_v37  ;;  %38333 = vst [vmem:[#allocation288_spill] sm:$0xff] %v31724_v61  ;;  %21965 = vmatmul.mubr.f32.gmra.mrb[20].mxu1 %v38335_v53  ;;  %24124 = vmatprep.mubr.f32.mxu0 %v31704_v1  ;;  %v31750_v53 = vand.u32 4294901760, %v10589_v27  ;;  %v10591_v24 = vsel %vm4395_vm1, %v10588_v26, %v10590_v45  ;;  %v31753_v34 = vand.u32 4294901760, %v4859_v55  ;;  %v38348_v26 = vld [vmem:[#allocation133_spill] sm:$0xff]  ;;  %v31769_v55 = vand.u32 4294901760, %v4869_v54 }
 0x139   : > { %38334 = vst [vmem:[#allocation289_spill] sm:$0xff] %v31726_v23  ;;  %38336 = vst [vmem:[#allocation290_spill] sm:$0xff] %v31735_v15  ;;  %21967 = vmatprep.mubr.f32.mxu1 %v38339_v0  ;;  %v4879_v1 = vsub.f32 %v31710_v30, %v31735_v15  ;;  %v31760_v0 = vand.u32 4294901760, %v31738_v13  ;;  %v31763_v58 = vsub.f32 %v4475_v42, %v31740_v41  ;;  %v31765_v59 = vand.u32 4294901760, %v10591_v24  ;;  %v38352_v42 = vld [vmem:[#allocation138_spill] sm:$0xff] }
 0x13a   : > { %38337 = vst [vmem:[#allocation291_spill] sm:$0xff] %v31738_v13  ;;  %38338 = vst [vmem:[#allocation292_spill] sm:$0xff] %v31740_v41  ;;  %v4889_v45 = vsub.f32 %v31717_v9, %v31745_v16 }
 0x13b   : > { %38340 = vst [vmem:[#allocation293_spill] sm:$0xff] %v31745_v16  ;;  %38341 = vst [vmem:[#allocation294_spill] sm:$0xff] %v31748_v47  ;;  %24125 = vmatmul.mubr.f32.gmra.mrb[20].mxu0 %v31724_v61  ;;  %v31777_v61 = vsub.f32 %v10589_v27, %v31750_v53  ;;  %v31781_v15 = vand.u32 4294901760, %v4879_v1  ;;  %v31786_v54 = vand.u32 4294901760, %v31763_v58  ;;  %v38356_v16 = vld [vmem:[#allocation140_spill] sm:$0xff] }
 0x13c   : > { %38342 = vst [vmem:[#allocation295_spill] sm:$0xff] %v31750_v53  ;;  %38343 = vst [vmem:[#allocation296_spill] sm:$0xff] %v31753_v34  ;;  %21968 = vmatmul.mubr.f32.gmra.mrb[22].mxu1 %v38344_v5  ;;  %24127 = vmatprep.mubr.f32.mxu0 %v31726_v23  ;;  %v31774_v5 = vand.u32 4294901760, %v31748_v47  ;;  %v31789_v23 = vsub.f32 %v10591_v24, %v31765_v59  ;;  %v31793_v27 = vand.u32 4294901760, %v4889_v45  ;;  %v38362_v45 = vld [vmem:[#allocation153_spill] sm:$0xff] }
 0x13d   : > { %38345 = vst [vmem:[#allocation297_spill] sm:$0xff] %v31760_v0  ;;  %38346 = vst [vmem:[#allocation298_spill] sm:$0xff] %v31763_v58  ;;  %21970 = vmatprep.mubr.f32.mxu1 %v38348_v26  ;;  %v4899_v26 = vsub.f32 %v31738_v13, %v31760_v0  ;;  %v31798_v1 = vand.u32 4294901760, %v31777_v61  ;;  %v4919_v24 = vsub.f32 %v31763_v58, %v31786_v54 }
 0x13e   : > { %38347 = vst [vmem:[#allocation299_spill] sm:$0xff] %v31765_v59  ;;  %38349 = vst [vmem:[#allocation300_spill] sm:$0xff] %v31769_v55 }
 0x13f   : > { %38350 = vst [vmem:[#allocation301_spill] sm:$0xff] %v31774_v5  ;;  %38351 = vst [vmem:[#allocation302_spill] sm:$0xff] %v31777_v61  ;;  %24128 = vmatmul.mubr.f32.gmra.mrb[22].mxu0 %v31753_v34  ;;  %v38359_v34 = vld [vmem:[#allocation144_spill] sm:$0xff]  ;;  %v31802_v0 = vand.u32 4294901760, %v4899_v26  ;;  %v31817_v26 = vand.u32 4294901760, %v4919_v24  ;;  %v38371_v24 = vld [vmem:[#allocation18_spill] sm:$0xff] }
 0x140   : > { %21971 = vmatmul.mubr.f32.gmra.mrb[24].mxu1 %v38352_v42  ;;  %38353 = vst [vmem:[#allocation303_spill] sm:$0xff] %v31781_v15  ;;  %38354 = vst [vmem:[#allocation304_spill] sm:$0xff] %v31786_v54  ;;  %24130 = vmatprep.mubr.f32.mxu0 %v31769_v55  ;;  %v4909_v42 = vsub.f32 %v31748_v47, %v31774_v5  ;;  %v31807_v55 = vand.u32 4294901760, %v31789_v23  ;;  %v10995_v5 = vsub.f32 %v31777_v61, %v31798_v1  ;;  %v38366_v54 = vld [vmem:[#allocation160_spill] sm:$0xff]  ;;  %v38420_v61 = vld [vmem:[#allocation159_spill] sm:$0xff] }
 0x141   : > { %38355 = vst [vmem:[#allocation305_spill] sm:$0xff] %v31789_v23  ;;  %21973 = vmatprep.mubr.f32.mxu1 %v38356_v16  ;;  %38357 = vst [vmem:[#allocation306_spill] sm:$0xff] %v31793_v27 }
 0x142   : > { %38358 = vst [vmem:[#allocation307_spill] sm:$0xff] %v31798_v1  ;;  %38360 = vst [vmem:[#allocation308_spill] sm:$0xff] %v31802_v0  ;;  %v31811_v16 = vand.u32 4294901760, %v4909_v42  ;;  %v38368_v42 = vld [vmem:[#allocation164_spill] sm:$0xff] }
 0x143   : > { %24131 = vmatmul.mubr.f32.gmra.mrb[24].mxu0 %v31781_v15  ;;  %38361 = vst [vmem:[#allocation309_spill] sm:$0xff] %v31807_v55  ;;  %38365 = vst [vmem:[#allocation311_spill] sm:$0xff] %v31817_v26  ;;  %v11005_v15 = vsub.f32 %v31789_v23, %v31807_v55  ;;  %v38393_v55 = vld [vmem:[#allocation60_spill] sm:$0xff] }
 0x144   : > { %21974 = vmatmul.mubr.f32.gmra.mrb[26].mxu1 %v38359_v34  ;;  %24133 = vmatprep.mubr.f32.mxu0 %v31793_v27  ;;  %38363 = vst [vmem:[#allocation310_spill] sm:$0xff] %v31811_v16  ;;  %v38364_v34 = vld [vmem:[#allocation158_spill] sm:$0xff]  ;;  %v31823_v27 = vand.u32 4294901760, %v10995_v5  ;;  %v38372_v5 = vld [vmem:[#allocation16_spill] sm:$0xff] }
 0x145   : > { %21976 = vmatprep.mubr.f32.mxu1 %v38362_v45  ;;  %v31827_v45 = vand.u32 4294901760, %v11005_v15  ;;  %v27010_v15 = vpack.c.bf16 %v31193_v17, %v31169_v8  ;;  %v38400_v17 = vld [vmem:[#allocation221_spill] sm:$0xff] }
 0x146   : > { %38367 = vst [vmem:[#allocation312_spill] sm:$0xff] %v31823_v27 }
 0x147   : > { %24134 = vmatmul.mubr.f32.gmra.mrb[26].mxu0 %v31802_v0  ;;  %38369 = vst [vmem:[#allocation313_spill] sm:$0xff] %v31827_v45  ;;  %v38380_v0 = vld [vmem:[#allocation6_spill] sm:$0xff] }
 0x148   : > { %21977 = vmatmul.mubr.f32.gmra.mrb[28].mxu1 %v38364_v34  ;;  %24136 = vmatprep.mubr.f32.mxu0 %v31811_v16  ;;  %v38370_v34 = vld [vmem:[#allocation15_spill] sm:$0xff] }
 0x149   : > { %21979 = vmatprep.mubr.f32.mxu1 %v38366_v54  ;;  %v38373_v54 = vld [vmem:[#allocation4_spill] sm:$0xff]  ;;  %v38379_v16 = vld [vmem:[#allocation35_spill] sm:$0xff] }
 0x14b   : > { %24137 = vmatmul.mubr.f32.gmra.mrb[28].mxu0 %v31817_v26  ;;  %v38378_v26 = vld [vmem:[#allocation195_spill] sm:$0xff] }
 0x14c   : > { %21980 = vmatmul.mubr.f32.gmra.mrb[30].mxu1 %v38368_v42  ;;  %24139 = vmatprep.mubr.f32.mxu0 %v31823_v27  ;;  %v38374_v27 = vld [vmem:[#allocation23_spill] sm:$0xff]  ;;  %v38377_v42 = vld [vmem:[#allocation33_spill] sm:$0xff] }
 0x14d   : > { %22014 = vmatprep.mubr.f32.mxu1 %v38370_v34 }
 0x14f   : > { %24140 = vmatmul.mubr.f32.gmra.mrb[30].mxu0 %v31827_v45  ;;  %v38375_v45 = vld [vmem:[#allocation29_spill] sm:$0xff] }
 0x150   : > { %22015 = vmatmul.mubr.f32.vlgmr.msra.gmra.mrb[0].mxu1 %v38371_v24  ;;  %24174 = vmatprep.mubr.f32.mxu0 %v31078_v21  ;;  %v38391_v21 = vld [vmem:[#allocation196_spill] sm:$0xff] }
 0x151   : > { %26145 = vmatpush3.bf16.msra.mxu1 %v38322_v38  ;;  %22017 = vmatprep.mubr.f32.mxu1 %v38372_v5  ;;  %v38376_v38 = vld [vmem:[#allocation193_spill] sm:$0xff] }
 0x152   : > { %26147 = vmatprep.subr.bf16.mxu1 %v38373_v54 }
 0x153   : > { %24175 = vmatmul.mubr.f32.vlgmr.msra.gmra.mrb[0].mxu0 %v31093_v19  ;;  %v38381_v19 = vld [vmem:[#allocation180_spill] sm:$0xff] }
 0x154   : > { %22018 = vmatmul.mubr.f32.gmra.mrb[2].mxu1 %v38374_v27  ;;  %27009 = vmatpush3.bf16.msra.mxu0 %v31667_v48  ;;  %v38382_v48 = vld [vmem:[#allocation202_spill] sm:$0xff] }
 0x155   : > { %24177 = vmatprep.mubr.f32.mxu0 %v31099_v20  ;;  %22020 = vmatprep.mubr.f32.mxu1 %v38375_v45  ;;  %v38383_v20 = vld [vmem:[#allocation41_spill] sm:$0xff] }
 0x156   : > { %27011 = vmatprep.subr.bf16.mxu0 %v27010_v15  ;;  %26149 = vmatpush3.bf16.msra.mxu1 %v38373_v54  ;;  %v38384_v54 = vld [vmem:[#allocation48_spill] sm:$0xff] }
 0x157   : > { %24178 = vmatmul.mubr.f32.gmra.mrb[2].mxu0 %v38376_v38  ;;  %26151 = vmatprep.subr.bf16.mxu1 %v38380_v0  ;;  %v38387_v38 = vld [vmem:[#allocation52_spill] sm:$0xff] }
 0x158   : > { %22021 = vmatmul.mubr.f32.gmra.mrb[4].mxu1 %v38377_v42  ;;  %24180 = vmatprep.mubr.f32.mxu0 %v38378_v26  ;;  %v38385_v26 = vld [vmem:[#allocation8_spill] sm:$0xff] }
 0x159   : > { %27013 = vmatpush3.bf16.msra.mxu0 %v27010_v15  ;;  %22023 = vmatprep.mubr.f32.mxu1 %v38379_v16  ;;  %v38386_v15 = vld [vmem:[#allocation185_spill] sm:$0xff] }
 0x15a   : > { %27015 = vmatprep.subr.bf16.mxu0 %v38381_v19  ;;  %26153 = vmatpush3.bf16.msra.mxu1 %v38380_v0  ;;  %v38388_v0 = vld [vmem:[#allocation215_spill] sm:$0xff] }
 0x15b   : > { %24181 = vmatmul.mubr.f32.gmra.mrb[4].mxu0 %v38382_v48  ;;  %26155 = vmatprep.subr.bf16.mxu1 %v38385_v26  ;;  %v38389_v48 = vld [vmem:[#allocation53_spill] sm:$0xff] }
 0x15c   : > { %22024 = vmatmul.mubr.f32.gmra.mrb[6].mxu1 %v38383_v20  ;;  %24183 = vmatprep.mubr.f32.mxu0 %v31224_v29  ;;  %v38390_v29 = vld [vmem:[#allocation10_spill] sm:$0xff] }
 0x15d   : > { %22026 = vmatprep.mubr.f32.mxu1 %v38384_v54  ;;  %27017 = vmatpush3.bf16.msra.mxu0 %v38381_v19  ;;  %v38392_v19 = vld [vmem:[#allocation223_spill] sm:$0xff] }
 0x15e   : > { %27019 = vmatprep.subr.bf16.mxu0 %v38386_v15  ;;  %26157 = vmatpush3.bf16.msra.mxu1 %v38385_v26  ;;  %v38394_v26 = vld [vmem:[#allocation67_spill] sm:$0xff] }
 0x15f   : > { %24184 = vmatmul.mubr.f32.gmra.mrb[6].mxu0 %v31234_v52  ;;  %26159 = vmatprep.subr.bf16.mxu1 %v38390_v29  ;;  %v38396_v52 = vld [vmem:[#allocation208_spill] sm:$0xff] }
 0x160   : > { %22027 = vmatmul.mubr.f32.gmra.mrb[8].mxu1 %v38387_v38  ;;  %24186 = vmatprep.mubr.f32.mxu0 %v38388_v0  ;;  %v38395_v0 = vld [vmem:[#allocation12_spill] sm:$0xff] }
 0x161   : > { %22029 = vmatprep.mubr.f32.mxu1 %v38389_v48  ;;  %27021 = vmatpush3.bf16.msra.mxu0 %v38386_v15  ;;  %v31884_v15 = vld [vmem:[%s36498_s1 + $0x8] sm:$0xff] }
 0x162   : > { %27023 = vmatprep.subr.bf16.mxu0 %v38391_v21  ;;  %26161 = vmatpush3.bf16.msra.mxu1 %v38390_v29  ;;  %v31879_v29 = vld [vmem:[%s36498_s1] sm:$0xff]  ;;  %v2425_v1 = vand.u32 4294901760, %v31884_v15 }
 0x163   : > { %24187 = vmatmul.mubr.f32.gmra.mrb[8].mxu0 %v38392_v19  ;;  %26163 = vmatprep.subr.bf16.mxu1 %v38395_v0  ;;  %v2422_v19 = vand.u32 4294901760, %v31879_v29 }
 0x164   : > { %22030 = vmatmul.mubr.f32.gmra.mrb[10].mxu1 %v38393_v55  ;;  %24189 = vmatprep.mubr.f32.mxu0 %v31298_v36  ;;  %v38397_v36 = vld [vmem:[#allocation71_spill] sm:$0xff] }
 0x165   : > { %22032 = vmatprep.mubr.f32.mxu1 %v38394_v26  ;;  %27025 = vmatpush3.bf16.msra.mxu0 %v38391_v21  ;;  %v38398_v21 = vld [vmem:[#allocation72_spill] sm:$0xff]  ;;  %v31902_v8 = vpack.c.bf16 %v2425_v1, %v2422_v19 }
 0x166   : > { %27027 = vmatprep.subr.bf16.mxu0 %v38396_v52  ;;  %26165 = vmatpush3.bf16.msra.mxu1 %v38395_v0  ;;  %v38399_v0 = vld [vmem:[#allocation14_spill] sm:$0xff] }
 0x167   : > { %24190 = vmatmul.mubr.f32.gmra.mrb[10].mxu0 %v31305_v12  ;;  %26167 = vmatprep.subr.bf16.mxu1 %v38399_v0  ;;  %v38401_v12 = vld [vmem:[#allocation79_spill] sm:$0xff]  ;;  %38404 = vst [vmem:[#allocation15_spill] sm:$0xff] %v31902_v8 }
 0x168   : > { %22033 = vmatmul.mubr.f32.gmra.mrb[12].mxu1 %v38397_v36  ;;  %24192 = vmatprep.mubr.f32.mxu0 %v31313_v4  ;;  %v38402_v4 = vld [vmem:[#allocation86_spill] sm:$0xff] }
 0x169   : > { %22035 = vmatprep.mubr.f32.mxu1 %v38398_v21  ;;  %27029 = vmatpush3.bf16.msra.mxu0 %v38396_v52  ;;  %v38403_v52 = vld [vmem:[#allocation27_spill] sm:$0xff] }
 0x16a   : > { %27031 = vmatprep.subr.bf16.mxu0 %v38400_v17  ;;  %26169 = vmatpush3.bf16.msra.mxu1 %v38399_v0  ;;  %v38405_v0 = vld [vmem:[#allocation91_spill] sm:$0xff] }
 0x16b   : > { %24193 = vmatmul.mubr.f32.gmra.mrb[12].mxu0 %v31349_v6  ;;  %26171 = vmatprep.subr.bf16.mxu1 %v38403_v52  ;;  %v38406_v6 = vld [vmem:[#allocation92_spill] sm:$0xff] }
 0x16c   : > { %22036 = vmatmul.mubr.f32.gmra.mrb[14].mxu1 %v38401_v12  ;;  %24195 = vmatprep.mubr.f32.mxu0 %v31430_v51  ;;  %v38408_v51 = vld [vmem:[#allocation99_spill] sm:$0xff] }
 0x16d   : > { %22038 = vmatprep.mubr.f32.mxu1 %v38402_v4  ;;  %27033 = vmatpush3.bf16.msra.mxu0 %v38400_v17  ;;  %v38407_v17 = vld [vmem:[#allocation173_spill] sm:$0xff] }
 0x16e   : > { %27035 = vmatprep.subr.bf16.mxu0 %v31362_v43  ;;  %26173 = vmatpush3.bf16.msra.mxu1 %v38403_v52  ;;  %v38409_v52 = vld [vmem:[#allocation106_spill] sm:$0xff] }
 0x16f   : > { %24196 = vmatmul.mubr.f32.gmra.mrb[14].mxu0 %v31474_v14  ;;  %26175 = vmatprep.subr.bf16.mxu1 %v31902_v8  ;;  %v38410_v14 = vld [vmem:[#allocation111_spill] sm:$0xff] }
 0x170   : > { %22039 = vmatmul.mubr.f32.gmra.mrb[16].mxu1 %v38405_v0  ;;  %24198 = vmatprep.mubr.f32.mxu0 %v31508_v44  ;;  %v38411_v44 = vld [vmem:[#allocation112_spill] sm:$0xff] }
 0x171   : > { %22041 = vmatprep.mubr.f32.mxu1 %v38406_v6  ;;  %27037 = vmatpush3.bf16.msra.mxu0 %v31362_v43  ;;  %v38412_v43 = vld [vmem:[#allocation119_spill] sm:$0xff] }
 0x172   : > { %27039 = vmatprep.subr.bf16.mxu0 %v38407_v17 }
 0x173   : > { %24199 = vmatmul.mubr.f32.gmra.mrb[16].mxu0 %v31534_v7  ;;  %v38413_v7 = vld [vmem:[#allocation126_spill] sm:$0xff] }
 0x174   : > { %22042 = vmatmul.mubr.f32.gmra.mrb[18].mxu1 %v38408_v51  ;;  %24201 = vmatprep.mubr.f32.mxu0 %v31546_v11  ;;  %v38414_v11 = vld [vmem:[#allocation131_spill] sm:$0xff] }
 0x175   : > { %22044 = vmatprep.mubr.f32.mxu1 %v38409_v52 }
 0x177   : > { %24202 = vmatmul.mubr.f32.gmra.mrb[18].mxu0 %v31550_v39  ;;  %v38415_v39 = vld [vmem:[#allocation132_spill] sm:$0xff] }
 0x178   : > { %22045 = vmatmul.mubr.f32.gmra.mrb[20].mxu1 %v38410_v14  ;;  %24204 = vmatprep.mubr.f32.mxu0 %v31568_v18  ;;  %v38416_v18 = vld [vmem:[#allocation139_spill] sm:$0xff] }
 0x179   : > { %22047 = vmatprep.mubr.f32.mxu1 %v38411_v44 }
 0x17b   : > { %24205 = vmatmul.mubr.f32.gmra.mrb[20].mxu0 %v31587_v46  ;;  %v38417_v46 = vld [vmem:[#allocation146_spill] sm:$0xff] }
 0x17c   : > { %22048 = vmatmul.mubr.f32.gmra.mrb[22].mxu1 %v38412_v43  ;;  %24207 = vmatprep.mubr.f32.mxu0 %v31593_v33  ;;  %v255_v33 = vld [vmem:[%s36498_s1 + $0x10] sm:$0xff] }
 0x17d   : > { %22050 = vmatprep.mubr.f32.mxu1 %v38413_v7  ;;  %v2428_v23 = vand.u32 4294901760, %v255_v33 }
 0x17f   : > { %24208 = vmatmul.mubr.f32.gmra.mrb[22].mxu0 %v31630_v32  ;;  %v256_v32 = vld [vmem:[%s36498_s1 + $0x18] sm:$0xff] }
 0x180   : > { %22051 = vmatmul.mubr.f32.gmra.mrb[24].mxu1 %v38414_v11  ;;  %24210 = vmatprep.mubr.f32.mxu0 %v31641_v25  ;;  %v38418_v25 = vld [vmem:[#allocation151_spill] sm:$0xff] }
 0x181   : > { %22053 = vmatprep.mubr.f32.mxu1 %v38415_v39 }
 0x183   : > { %24211 = vmatmul.mubr.f32.gmra.mrb[24].mxu0 %v31678_v60  ;;  %v38419_v60 = vld [vmem:[#allocation152_spill] sm:$0xff] }
 0x184   : > { %22054 = vmatmul.mubr.f32.gmra.mrb[26].mxu1 %v38416_v18  ;;  %24213 = vmatprep.mubr.f32.mxu0 %v31684_v62  ;;  %v2431_v62 = vand.u32 4294901760, %v256_v32 }
 0x185   : > { %22056 = vmatprep.mubr.f32.mxu1 %v38417_v46 }
 0x186   : > { %v31947_v58 = vpack.c.bf16 %v2431_v62, %v2428_v23 }
 0x187   : > { %24214 = vmatmul.mubr.f32.gmra.mrb[26].mxu0 %v31712_v40  ;;  %v257_v40 = vld [vmem:[%s36498_s1 + $0x20] sm:$0xff] }
 0x188   : > { %22057 = vmatmul.mubr.f32.gmra.mrb[28].mxu1 %v38418_v25  ;;  %24216 = vmatprep.mubr.f32.mxu0 %v31719_v37  ;;  %38421 = vst [vmem:[#allocation18_spill] sm:$0xff] %v31947_v58  ;;  %v258_v37 = vld [vmem:[%s36498_s1 + $0x28] sm:$0xff] }
 0x189   : > { %22059 = vmatprep.mubr.f32.mxu1 %v38419_v60  ;;  %v31956_v60 = vsub.f32 %v31879_v29, %v2422_v19  ;;  %v2434_v19 = vand.u32 4294901760, %v257_v40  ;;  %v2437_v29 = vand.u32 4294901760, %v258_v37 }
 0x18b   : > { %24217 = vmatmul.mubr.f32.gmra.mrb[28].mxu0 %v31740_v41  ;;  %38422 = vst [vmem:[#allocation4_spill] sm:$0xff] %v31956_v60  ;;  %v31959_v41 = vsub.f32 %v31884_v15, %v2425_v1  ;;  %v31974_v1 = vld [vmem:[%s36498_s1 + $0x30] sm:$0xff] }
 0x18c   : > { %22060 = vmatmul.mubr.f32.gmra.mrb[30].mxu1 %v38420_v61  ;;  %24219 = vmatprep.mubr.f32.mxu0 %v31750_v53  ;;  %v38426_v15 = vld [vmem:[#allocation192_spill] sm:$0xff] }
 0x18d   : > { %22094 = vmatprep.mubr.f32.mxu1 %v38370_v34  ;;  %38423 = vst [vmem:[#allocation6_spill] sm:$0xff] %v31959_v41  ;;  %v38424_v34 = vld [vmem:[#allocation189_spill] sm:$0xff]  ;;  %v31967_v53 = vpack.c.bf16 %v31959_v41, %v31956_v60 }
 0x18f   : > { %24220 = vmatmul.mubr.f32.gmra.mrb[30].mxu0 %v31765_v59  ;;  %38425 = vst [vmem:[#allocation180_spill] sm:$0xff] %v31967_v53  ;;  %v31987_v59 = vpack.c.bf16 %v2437_v29, %v2434_v19  ;;  %v38433_v53 = vld [vmem:[#allocation201_spill] sm:$0xff] }
 0x190   : > { %22095 = vmatmul.mubr.f32.vlgmr.msra.gmra.mrb[0].mxu1 %v38371_v24  ;;  %24254 = vmatprep.mubr.f32.mxu0 %v38424_v34  ;;  %v31979_v24 = vld [vmem:[%s36498_s1 + $0x38] sm:$0xff] }
 0x191   : > { %26177 = vmatpush3.bf16.msra.mxu1 %v31902_v8  ;;  %22097 = vmatprep.mubr.f32.mxu1 %v38372_v5  ;;  %v38427_v5 = vld [vmem:[#allocation194_spill] sm:$0xff]  ;;  %v38428_v34 = vld [vmem:[#allocation17_spill] sm:$0xff]  ;;  %38429 = vst [vmem:[#allocation8_spill] sm:$0xff] %v31987_v59 }
 0x192   : > { %26179 = vmatprep.subr.bf16.mxu1 %v31947_v58 }
 0x193   : > { %24255 = vmatmul.mubr.f32.vlgmr.msra.gmra.mrb[0].mxu0 %v38426_v15  ;;  %v32004_v15 = vsub.f32 %v256_v32, %v2431_v62  ;;  %v38435_v32 = vand.u32 4294901760, %v31979_v24 }
 0x194   : > { %22098 = vmatmul.mubr.f32.gmra.mrb[2].mxu1 %v38374_v27  ;;  %27041 = vmatpush3.bf16.msra.mxu0 %v38407_v17  ;;  %v31995_v27 = vld [vmem:[%s36498_s1 + $0x40] sm:$0xff]  ;;  %v38432_v17 = vld [vmem:[#allocation199_spill] sm:$0xff] }
 0x195   : > { %24257 = vmatprep.mubr.f32.mxu0 %v38427_v5  ;;  %22100 = vmatprep.mubr.f32.mxu1 %v38375_v45  ;;  %v32000_v5 = vld [vmem:[%s36498_s1 + $0x48] sm:$0xff]  ;;  %v32002_v45 = vsub.f32 %v255_v33, %v2428_v23  ;;  %38431 = vst [vmem:[#allocation10_spill] sm:$0xff] %v32004_v15  ;;  %v38434_v33 = vand.u32 4294901760, %v31974_v1  ;;  %v37165_v23 = vand.u32 4294901760, %v31995_v27 }
 0x196   : > { %27043 = vmatprep.subr.bf16.mxu0 %v38428_v34  ;;  %26181 = vmatpush3.bf16.msra.mxu1 %v31947_v58 }
 0x197   : > { %38430 = vst [vmem:[#allocation185_spill] sm:$0xff] %v32002_v45  ;;  %24258 = vmatmul.mubr.f32.gmra.mrb[2].mxu0 %v38432_v17  ;;  %v32012_v8 = vpack.c.bf16 %v32004_v15, %v32002_v45  ;;  %26183 = vmatprep.subr.bf16.mxu1 %v31987_v59  ;;  %v32020_v62 = vpack.c.bf16 %v38435_v32, %v38434_v33  ;;  %v32034_v17 = vld [vmem:[%s36498_s1 + $0x58] sm:$0xff]  ;;  %v38438_v33 = vld [vmem:[#allocation211_spill] sm:$0xff] }
 0x198   : > { %22101 = vmatmul.mubr.f32.gmra.mrb[4].mxu1 %v38377_v42  ;;  %24260 = vmatprep.mubr.f32.mxu0 %v38433_v53  ;;  %v37164_v42 = vand.u32 4294901760, %v32000_v5  ;;  %v38437_v53 = vld [vmem:[#allocation21_spill] sm:$0xff] }
 0x199   : > { %27045 = vmatpush3.bf16.msra.mxu0 %v38428_v34  ;;  %22103 = vmatprep.mubr.f32.mxu1 %v38379_v16  ;;  %38436 = vst [vmem:[#allocation196_spill] sm:$0xff] %v32020_v62  ;;  %v32029_v16 = vld [vmem:[%s36498_s1 + $0x50] sm:$0xff] }
 0x19a   : > { %27047 = vmatprep.subr.bf16.mxu0 %v38437_v53  ;;  %26185 = vmatpush3.bf16.msra.mxu1 %v31987_v59  ;;  %v32046_v32 = vpack.c.bf16 %v37164_v42, %v37165_v23  ;;  %v32062_v42 = vsub.f32 %v257_v40, %v2434_v19  ;;  %v32064_v23 = vsub.f32 %v258_v37, %v2437_v29  ;;  %v38443_v37 = vand.u32 4294901760, %v32029_v16  ;;  %v32091_v59 = vld [vmem:[%s36498_s1 + $0x70] sm:$0xff] }
 0x19b   : > { %24261 = vmatmul.mubr.f32.gmra.mrb[4].mxu0 %v38438_v33  ;;  %26187 = vmatprep.subr.bf16.mxu1 %v32020_v62  ;;  %v38444_v40 = vand.u32 4294901760, %v32034_v17  ;;  %v38455_v29 = vand.u32 4294901760, %v31979_v24 }
 0x19c   : > { %22104 = vmatmul.mubr.f32.gmra.mrb[6].mxu1 %v38383_v20  ;;  %24263 = vmatprep.mubr.f32.mxu0 %v31270_v35  ;;  %38439 = vst [vmem:[#allocation12_spill] sm:$0xff] %v32046_v32  ;;  %v32053_v20 = vld [vmem:[%s36498_s1 + $0x60] sm:$0xff]  ;;  %38441 = vst [vmem:[#allocation208_spill] sm:$0xff] %v32062_v42  ;;  %v32074_v58 = vpack.c.bf16 %v32064_v23, %v32062_v42 }
 0x19d   : > { %22106 = vmatprep.mubr.f32.mxu1 %v38384_v54  ;;  %27049 = vmatpush3.bf16.msra.mxu0 %v38437_v53  ;;  %v32058_v54 = vld [vmem:[%s36498_s1 + $0x68] sm:$0xff]  ;;  %v38440_v35 = vld [vmem:[#allocation174_spill] sm:$0xff]  ;;  %38442 = vst [vmem:[#allocation14_spill] sm:$0xff] %v32064_v23  ;;  %v32082_v19 = vpack.c.bf16 %v38444_v40, %v38443_v37  ;;  %v38447_v37 = vand.u32 4294901760, %v32053_v20 }
 0x19e   : > { %27051 = vmatprep.subr.bf16.mxu0 %v38440_v35  ;;  %26189 = vmatpush3.bf16.msra.mxu1 %v32020_v62  ;;  %v38448_v40 = vand.u32 4294901760, %v32058_v54  ;;  %v32298_v62 = vld [vmem:[%s29796_s27 + $0x80] sm:$0xff] }
 0x19f   : > { %24264 = vmatmul.mubr.f32.gmra.mrb[6].mxu0 %v31276_v31  ;;  %26191 = vmatprep.subr.bf16.mxu1 %v32046_v32  ;;  %38445 = vst [vmem:[#allocation221_spill] sm:$0xff] %v32082_v19  ;;  %v38452_v31 = vld [vmem:[#allocation179_spill] sm:$0xff] }
 0x1a0   : > { %22107 = vmatmul.mubr.f32.gmra.mrb[8].mxu1 %v38387_v38  ;;  %24266 = vmatprep.mubr.f32.mxu0 %v31287_v63  ;;  %v32096_v38 = vld [vmem:[%s36498_s1 + $0x78] sm:$0xff]  ;;  %v32106_v33 = vpack.c.bf16 %v38448_v40, %v38447_v37  ;;  %v38453_v37 = vand.u32 4294901760, %v31974_v1 }
 0x1a1   : > { %22109 = vmatprep.mubr.f32.mxu1 %v38389_v48  ;;  %27053 = vmatpush3.bf16.msra.mxu0 %v38440_v35  ;;  %v38446_v48 = vld [vmem:[#allocation175_spill] sm:$0xff]  ;;  %v32368_v35 = vld [vmem:[%s29796_s27 + $0xc0] sm:$0xff] }
 0x1a2   : > { %27055 = vmatprep.subr.bf16.mxu0 %v38446_v48  ;;  %26193 = vmatpush3.bf16.msra.mxu1 %v32046_v32  ;;  %38449 = vst [vmem:[#allocation27_spill] sm:$0xff] %v32106_v33  ;;  %v32123_v40 = vsub.f32 %v31974_v1, %v38453_v37  ;;  %v38457_v32 = vld [vmem:[#allocation237_spill] sm:$0xff]  ;;  %v38460_v1 = vand.u32 4294901760, %v32091_v59 }
 0x1a3   : > { %24267 = vmatmul.mubr.f32.gmra.mrb[8].mxu0 %v31325_v28  ;;  %26195 = vmatprep.subr.bf16.mxu1 %v32082_v19  ;;  %v32128_v28 = vsub.f32 %v31979_v24, %v38455_v29  ;;  %v38461_v24 = vand.u32 4294901760, %v32096_v38 }
 0x1a4   : > { %22110 = vmatmul.mubr.f32.gmra.mrb[10].mxu1 %v38393_v55  ;;  %24269 = vmatprep.mubr.f32.mxu0 %v31334_v2  ;;  %v38450_v55 = vand.u32 4294901760, %v31956_v60  ;;  %38454 = vst [vmem:[#allocation17_spill] sm:$0xff] %v32123_v40 }
 0x1a5   : > { %22112 = vmatprep.mubr.f32.mxu1 %v38394_v26  ;;  %27057 = vmatpush3.bf16.msra.mxu0 %v38446_v48  ;;  %v38451_v26 = vand.u32 4294901760, %v31959_v41  ;;  %38456 = vst [vmem:[#allocation21_spill] sm:$0xff] %v32128_v28  ;;  %v32144_v29 = vpack.c.bf16 %v38461_v24, %v38460_v1  ;;  %v38466_v24 = vand.u32 4294901760, %v38314_v57  ;;  %v38476_v57 = vand.u32 4294901760, %v32029_v16 }
 0x1a6   : > { %v2826_v2 = vsub.f32 %v31956_v60, %v38450_v55  ;;  %27059 = vmatprep.subr.bf16.mxu0 %v38452_v31  ;;  %26197 = vmatpush3.bf16.msra.mxu1 %v32082_v19  ;;  %v38458_v55 = vld [vmem:[#allocation239_spill] sm:$0xff]  ;;  %v38508_v19 = vand.u32 4294901760, %v32004_v15 }
 0x1a7   : > { %v2833_v63 = vsub.f32 %v31959_v41, %v38451_v26  ;;  %24270 = vmatmul.mubr.f32.gmra.mrb[10].mxu0 %v38457_v32  ;;  %v32136_v26 = vpack.c.bf16 %v32128_v28, %v32123_v40  ;;  %26199 = vmatprep.subr.bf16.mxu1 %v32106_v33  ;;  %38462 = vst [vmem:[#allocation315_spill] sm:$0xff] %v32144_v29  ;;  %v38463_v32 = vld [vmem:[#allocation181_spill] sm:$0xff] }
 0x1a8   : > { %22113 = vmatmul.mubr.f32.gmra.mrb[12].mxu1 %v38397_v36  ;;  %24272 = vmatprep.mubr.f32.mxu0 %v38458_v55  ;;  %v2827_v37 = vand.u32 4294901760, %v2826_v2  ;;  %v38464_v2 = vld [vmem:[#allocation184_spill] sm:$0xff]  ;;  %v29489_v41 = vld [vmem:[%s29796_s27 + $0x78] sm:$0xff] }
 0x1a9   : > { %22115 = vmatprep.mubr.f32.mxu1 %v38398_v21  ;;  %38459 = vst [vmem:[#allocation314_spill] sm:$0xff] %v32136_v26  ;;  %27061 = vmatpush3.bf16.msra.mxu0 %v38452_v31  ;;  %v2834_v36 = vand.u32 4294901760, %v2833_v63  ;;  %v38465_v63 = vand.u32 4294901760, %v30968_v56  ;;  %v32289_v60 = vand.u32 4294901760, %v29489_v41  ;;  %v38531_v26 = vand.u32 4294901760, %v32064_v23 }
 0x1aa   : > { %27063 = vmatprep.subr.bf16.mxu0 %v38463_v32  ;;  %26201 = vmatpush3.bf16.msra.mxu1 %v32106_v33 }
 0x1ab   : > { %24273 = vmatmul.mubr.f32.gmra.mrb[12].mxu0 %v31391_v10  ;;  %26203 = vmatprep.subr.bf16.mxu1 %v32144_v29  ;;  %v32154_v1 = vpack.c.bf16 %v2834_v36, %v2827_v37  ;;  %v32162_v21 = vpack.c.bf16 %v38466_v24, %v38465_v63  ;;  %v38471_v37 = vld [vmem:[#allocation88_spill] sm:$0xff]  ;;  %v38472_v10 = vld [vmem:[#allocation258_spill] sm:$0xff]  ;;  %38506 = vst [vmem:[#allocation341_spill] sm:$0xff] %v32289_v60 }
 0x1ac   : > { %22116 = vmatmul.mubr.f32.gmra.mrb[14].mxu1 %v38401_v12  ;;  %24275 = vmatprep.mubr.f32.mxu0 %v31466_v3  ;;  %v38467_v12 = vand.u32 4294901760, %v31995_v27  ;;  %v38469_v3 = vand.u32 4294901760, %v32000_v5  ;;  %v38480_v24 = vld [vmem:[#allocation264_spill] sm:$0xff] }
 0x1ad   : > { %22118 = vmatprep.mubr.f32.mxu1 %v38402_v4  ;;  %27065 = vmatpush3.bf16.msra.mxu0 %v38463_v32 }
 0x1ae   : > { %27067 = vmatprep.subr.bf16.mxu0 %v38464_v2  ;;  %26205 = vmatpush3.bf16.msra.mxu1 %v32144_v29  ;;  %v32167_v4 = vsub.f32 %v31995_v27, %v38467_v12  ;;  %v32172_v36 = vsub.f32 %v32000_v5, %v38469_v3  ;;  %v38474_v12 = vld [vmem:[#allocation107_spill] sm:$0xff]  ;;  %v38475_v3 = vld [vmem:[#allocation262_spill] sm:$0xff]  ;;  %v32192_v27 = vsub.f32 %v32029_v16, %v38476_v57  ;;  %v38478_v5 = vand.u32 4294901760, %v32034_v17 }
 0x1af   : > { %24276 = vmatmul.mubr.f32.gmra.mrb[14].mxu0 %v38471_v37  ;;  %26207 = vmatprep.subr.bf16.mxu1 %v32154_v1  ;;  %v29480_v57 = vld [vmem:[%s29796_s27 + $0x8] sm:$0xff]  ;;  %v38507_v29 = vand.u32 4294901760, %v32002_v45 }
 0x1b0   : > { %38468 = vst [vmem:[#allocation316_spill] sm:$0xff] %v32167_v4  ;;  %38470 = vst [vmem:[#allocation317_spill] sm:$0xff] %v32172_v36  ;;  %22119 = vmatmul.mubr.f32.gmra.mrb[16].mxu1 %v38405_v0  ;;  %24278 = vmatprep.mubr.f32.mxu0 %v38472_v10  ;;  %v32180_v56 = vpack.c.bf16 %v32172_v36, %v32167_v4  ;;  %v32197_v63 = vsub.f32 %v32034_v17, %v38478_v5  ;;  %v32211_v17 = vand.u32 4294901760, %v29480_v57  ;;  %v29481_v5 = vld [vmem:[%s29796_s27 + $0x18] sm:$0xff]  ;;  %v29487_v10 = vld [vmem:[%s29796_s27 + $0x60] sm:$0xff] }
 0x1b1   : > { %22121 = vmatprep.mubr.f32.mxu1 %v38406_v6  ;;  %27069 = vmatpush3.bf16.msra.mxu0 %v38464_v2  ;;  %38477 = vst [vmem:[#allocation319_spill] sm:$0xff] %v32192_v27  ;;  %v32214_v0 = vand.u32 4294901760, %v29481_v5  ;;  %v32278_v37 = vand.u32 4294901760, %v29487_v10  ;;  %v2840_v33 = vsub.f32 %v32002_v45, %v38507_v29  ;;  %v32316_v45 = vld [vmem:[%s29796_s27 + $0x98] sm:$0xff] }
 0x1b2   : > { %38473 = vst [vmem:[#allocation318_spill] sm:$0xff] %v32180_v56  ;;  %27071 = vmatprep.subr.bf16.mxu0 %v32162_v21  ;;  %38479 = vst [vmem:[#allocation320_spill] sm:$0xff] %v32197_v63  ;;  %v32208_v16 = vpack.c.bf16 %v32197_v63, %v32192_v27  ;;  %v38530_v56 = vand.u32 4294901760, %v32062_v42 }
 0x1b3   : > { %24279 = vmatmul.mubr.f32.gmra.mrb[16].mxu0 %v38474_v12  ;;  %38484 = vst [vmem:[#allocation323_spill] sm:$0xff] %v32211_v17  ;;  %38485 = vst [vmem:[#allocation324_spill] sm:$0xff] %v32214_v0  ;;  %v38490_v12 = vand.u32 4294901760, %v32053_v20 }
 0x1b4   : > { %22122 = vmatmul.mubr.f32.gmra.mrb[18].mxu1 %v38408_v51  ;;  %24281 = vmatprep.mubr.f32.mxu0 %v38475_v3  ;;  %v38481_v51 = vld [vmem:[#allocation266_spill] sm:$0xff]  ;;  %38483 = vst [vmem:[#allocation322_spill] sm:$0xff] %v32208_v16  ;;  %v32227_v3 = vsub.f32 %v29480_v57, %v32211_v17  ;;  %v32245_v57 = vsub.f32 %v29481_v5, %v32214_v0  ;;  %38503 = vst [vmem:[#allocation339_spill] sm:$0xff] %v32278_v37 }
 0x1b5   : > { %22124 = vmatprep.mubr.f32.mxu1 %v38409_v52  ;;  %v29479_v52 = vld [vmem:[%s29796_s27] sm:$0xff] }
 0x1b6   : > { %v32204_v6 = vand.u32 4294901760, %v29479_v52  ;;  %38489 = vst [vmem:[#allocation327_spill] sm:$0xff] %v32227_v3  ;;  %38495 = vst [vmem:[#allocation331_spill] sm:$0xff] %v32245_v57  ;;  %v38511_v2 = vand.u32 4294901760, %v32227_v3 }
 0x1b7   : > { %24282 = vmatmul.mubr.f32.gmra.mrb[18].mxu0 %v38480_v24 }
 0x1b8   : > { %22125 = vmatmul.mubr.f32.gmra.mrb[20].mxu1 %v38410_v14  ;;  %24284 = vmatprep.mubr.f32.mxu0 %v38481_v51  ;;  %38482 = vst [vmem:[#allocation321_spill] sm:$0xff] %v32204_v6  ;;  %v38486_v14 = vld [vmem:[#allocation148_spill] sm:$0xff]  ;;  %v29482_v51 = vld [vmem:[%s29796_s27 + $0x20] sm:$0xff]  ;;  %v2515_v32 = vsub.f32 %v32227_v3, %v38511_v2 }
 0x1b9   : > { %22127 = vmatprep.mubr.f32.mxu1 %v38411_v44  ;;  %v32221_v44 = vsub.f32 %v29479_v52, %v32204_v6  ;;  %v32224_v24 = vand.u32 4294901760, %v29482_v51  ;;  %v38516_v3 = vld [vmem:[#allocation152_spill] sm:$0xff] }
 0x1bb   : > { %24285 = vmatmul.mubr.f32.gmra.mrb[20].mxu0 %v31625_v50  ;;  %38487 = vst [vmem:[#allocation325_spill] sm:$0xff] %v32221_v44  ;;  %38488 = vst [vmem:[#allocation326_spill] sm:$0xff] %v32224_v24  ;;  %v32232_v50 = vsub.f32 %v32053_v20, %v38490_v12  ;;  %v32258_v5 = vsub.f32 %v29482_v51, %v32224_v24  ;;  %v32266_v20 = vand.u32 4294901760, %v32245_v57  ;;  %v29486_v51 = vld [vmem:[%s29796_s27 + $0x50] sm:$0xff] }
 0x1bc   : > { %22128 = vmatmul.mubr.f32.gmra.mrb[22].mxu1 %v38412_v43  ;;  %24287 = vmatprep.mubr.f32.mxu0 %v38486_v14  ;;  %v38492_v43 = vand.u32 4294901760, %v32058_v54 }
 0x1bd   : > { %22130 = vmatprep.mubr.f32.mxu1 %v38413_v7  ;;  %38491 = vst [vmem:[#allocation328_spill] sm:$0xff] %v32232_v50  ;;  %v29483_v7 = vld [vmem:[%s29796_s27 + $0x30] sm:$0xff]  ;;  %38497 = vst [vmem:[#allocation333_spill] sm:$0xff] %v32258_v5  ;;  %v32313_v29 = vand.u32 4294901760, %v32258_v5 }
 0x1be   : > { %v32237_v14 = vsub.f32 %v32058_v54, %v38492_v43  ;;  %v32240_v52 = vand.u32 4294901760, %v29483_v7  ;;  %38499 = vst [vmem:[#allocation335_spill] sm:$0xff] %v32266_v20 }
 0x1bf   : > { %24288 = vmatmul.mubr.f32.gmra.mrb[22].mxu0 %v31663_v49  ;;  %38512 = vst [vmem:[#allocation344_spill] sm:$0xff] %v32313_v29 }
 0x1c0   : > { %38493 = vst [vmem:[#allocation329_spill] sm:$0xff] %v32237_v14  ;;  %38494 = vst [vmem:[#allocation330_spill] sm:$0xff] %v32240_v52  ;;  %22131 = vmatmul.mubr.f32.gmra.mrb[24].mxu1 %v38414_v11  ;;  %24290 = vmatprep.mubr.f32.mxu0 %v31676_v22  ;;  %v32252_v54 = vpack.c.bf16 %v32237_v14, %v32232_v50  ;;  %v29484_v22 = vld [vmem:[%s29796_s27 + $0x38] sm:$0xff]  ;;  %v32269_v43 = vsub.f32 %v29483_v7, %v32240_v52  ;;  %v29485_v11 = vld [vmem:[%s29796_s27 + $0x48] sm:$0xff] }
 0x1c1   : > { %22133 = vmatprep.mubr.f32.mxu1 %v38415_v39  ;;  %v32261_v49 = vand.u32 4294901760, %v29484_v22  ;;  %v32272_v12 = vand.u32 4294901760, %v29485_v11  ;;  %v32275_v39 = vand.u32 4294901760, %v29486_v51 }
 0x1c2   : > { %38496 = vst [vmem:[#allocation332_spill] sm:$0xff] %v32252_v54  ;;  %38500 = vst [vmem:[#allocation336_spill] sm:$0xff] %v32269_v43  ;;  %v32326_v54 = vand.u32 4294901760, %v32269_v43 }
 0x1c3   : > { %38498 = vst [vmem:[#allocation334_spill] sm:$0xff] %v32261_v49  ;;  %24291 = vmatmul.mubr.f32.gmra.mrb[24].mxu0 %v31710_v30  ;;  %38501 = vst [vmem:[#allocation337_spill] sm:$0xff] %v32272_v12  ;;  %v29488_v30 = vld [vmem:[%s29796_s27 + $0x68] sm:$0xff]  ;;  %v32329_v2 = vsub.f32 %v29484_v22, %v32261_v49  ;;  %v32334_v16 = vsub.f32 %v29485_v11, %v32272_v12  ;;  %v32351_v11 = vld [vmem:[%s29796_s27 + $0xb0] sm:$0xff] }
 0x1c4   : > { %22134 = vmatmul.mubr.f32.gmra.mrb[26].mxu1 %v38416_v18  ;;  %38502 = vst [vmem:[#allocation338_spill] sm:$0xff] %v32275_v39  ;;  %24293 = vmatprep.mubr.f32.mxu0 %v31717_v9  ;;  %v38504_v18 = vand.u32 4294901760, %v32221_v44  ;;  %v32286_v55 = vand.u32 4294901760, %v29488_v30  ;;  %v2847_v9 = vsub.f32 %v32004_v15, %v38508_v19  ;;  %v32319_v19 = vand.u32 4294901760, %v32316_v45  ;;  %38514 = vst [vmem:[#allocation346_spill] sm:$0xff] %v32326_v54 }
 0x1c5   : > { %22136 = vmatprep.mubr.f32.mxu1 %v38417_v46  ;;  %v32301_v46 = vand.u32 4294901760, %v32298_v62  ;;  %v2525_v15 = vsub.f32 %v32245_v57, %v32266_v20  ;;  %38515 = vst [vmem:[#allocation347_spill] sm:$0xff] %v32329_v2  ;;  %38517 = vst [vmem:[#allocation348_spill] sm:$0xff] %v32334_v16  ;;  %v2841_v20 = vand.u32 4294901760, %v2840_v33  ;;  %v38522_v33 = vld [vmem:[#allocation298_spill] sm:$0xff]  ;;  %v32363_v48 = vand.u32 4294901760, %v32329_v2 }
 0x1c6   : > { %v2505_v7 = vsub.f32 %v32221_v44, %v38504_v18  ;;  %38505 = vst [vmem:[#allocation340_spill] sm:$0xff] %v32286_v55  ;;  %v32304_v18 = vld [vmem:[%s29796_s27 + $0x90] sm:$0xff]  ;;  %38513 = vst [vmem:[#allocation345_spill] sm:$0xff] %v32319_v19  ;;  %v2848_v57 = vand.u32 4294901760, %v2847_v9  ;;  %v2545_v9 = vsub.f32 %v32269_v43, %v32326_v54 }
 0x1c7   : > { %38509 = vst [vmem:[#allocation342_spill] sm:$0xff] %v32301_v46  ;;  %v32307_v44 = vand.u32 4294901760, %v32304_v18  ;;  %24294 = vmatmul.mubr.f32.gmra.mrb[26].mxu0 %v31738_v13  ;;  %v32340_v13 = vsub.f32 %v29487_v10, %v32278_v37  ;;  %v2535_v10 = vsub.f32 %v32258_v5, %v32313_v29  ;;  %38523 = vst [vmem:[#allocation353_spill] sm:$0xff] %v32363_v48  ;;  %v38525_v29 = vld [vmem:[#allocation302_spill] sm:$0xff] }
 0x1c8   : > { %22137 = vmatmul.mubr.f32.gmra.mrb[28].mxu1 %v38418_v25  ;;  %24296 = vmatprep.mubr.f32.mxu0 %v31748_v47  ;;  %v2506_v31 = vand.u32 4294901760, %v2505_v7  ;;  %v32337_v25 = vsub.f32 %v29486_v51, %v32275_v39  ;;  %v32345_v47 = vld [vmem:[%s29796_s27 + $0xa8] sm:$0xff]  ;;  %v32354_v51 = vand.u32 4294901760, %v32351_v11  ;;  %v26210_v43 = vpack.c.bf16 %v2848_v57, %v2841_v20  ;;  %v38536_v39 = vld [vmem:[#allocation305_spill] sm:$0xff] }
 0x1c9   : > { %38510 = vst [vmem:[#allocation343_spill] sm:$0xff] %v32307_v44  ;;  %22139 = vmatprep.mubr.f32.mxu1 %v38516_v3  ;;  %38519 = vst [vmem:[#allocation350_spill] sm:$0xff] %v32340_v13  ;;  %v32348_v7 = vand.u32 4294901760, %v32345_v47  ;;  %v2516_v3 = vand.u32 4294901760, %v2515_v32  ;;  %v32371_v32 = vand.u32 4294901760, %v32368_v35  ;;  %v32383_v22 = vand.u32 4294901760, %v32340_v13 }
 0x1ca   : > { %38518 = vst [vmem:[#allocation349_spill] sm:$0xff] %v32337_v25  ;;  %38521 = vst [vmem:[#allocation352_spill] sm:$0xff] %v32354_v51  ;;  %v32380_v54 = vand.u32 4294901760, %v32337_v25  ;;  %v2854_v5 = vsub.f32 %v32062_v42, %v38530_v56  ;;  %v32397_v37 = vand.u32 4294901760, %v2535_v10  ;;  %v32400_v57 = vsub.f32 %v29488_v30, %v32286_v55  ;;  %v38540_v55 = vld [vmem:[#allocation197_spill] sm:$0xff] }
 0x1cb   : > { %38520 = vst [vmem:[#allocation351_spill] sm:$0xff] %v32348_v7  ;;  %24297 = vmatmul.mubr.f32.gmra.mrb[28].mxu0 %v38522_v33  ;;  %38524 = vst [vmem:[#allocation354_spill] sm:$0xff] %v32371_v32  ;;  %v32377_v33 = vand.u32 4294901760, %v32334_v16  ;;  %v32403_v20 = vsub.f32 %v29489_v41, %v32289_v60  ;;  %v32406_v56 = vand.u32 4294901760, %v2545_v9  ;;  %v38539_v42 = vand.u32 4294901760, %v32128_v28  ;;  %v38541_v41 = vld [vmem:[#allocation203_spill] sm:$0xff] }
 0x1cc   : > { %22140 = vmatmul.mubr.f32.gmra.mrb[30].mxu1 %v38420_v61  ;;  %24299 = vmatprep.mubr.f32.mxu0 %v38525_v29  ;;  %v32374_v61 = vand.u32 4294901760, %v2525_v15  ;;  %38528 = vst [vmem:[#allocation357_spill] sm:$0xff] %v32380_v54  ;;  %38529 = vst [vmem:[#allocation358_spill] sm:$0xff] %v32383_v22  ;;  %v32392_v15 = vld [vmem:[%s29796_s27 + $0xc8] sm:$0xff]  ;;  %v38543_v9 = vld [vmem:[#allocation206_spill] sm:$0xff] }
 0x1cd   : > { %22174 = vmatprep.mubr.f32.mxu1 %v2506_v31  ;;  %38527 = vst [vmem:[#allocation356_spill] sm:$0xff] %v32377_v33  ;;  %v2861_v31 = vsub.f32 %v32064_v23, %v38531_v26  ;;  %v32395_v29 = vand.u32 4294901760, %v32392_v15  ;;  %38533 = vst [vmem:[#allocation360_spill] sm:$0xff] %v32397_v37  ;;  %v2555_v26 = vsub.f32 %v32329_v2, %v32363_v48  ;;  %v38538_v23 = vand.u32 4294901760, %v32123_v40 }
 0x1ce   : > { %38526 = vst [vmem:[#allocation355_spill] sm:$0xff] %v32374_v61  ;;  %38534 = vst [vmem:[#allocation361_spill] sm:$0xff] %v32400_v57  ;;  %v2875_v30 = vsub.f32 %v32128_v28, %v38539_v42  ;;  %v2565_v48 = vsub.f32 %v32334_v16, %v32377_v33  ;;  %v2575_v42 = vsub.f32 %v32337_v25, %v32380_v54  ;;  %v38552_v33 = vld [vmem:[#allocation200_spill] sm:$0xff]  ;;  %v38553_v28 = vand.u32 4294901760, %v32167_v4 }
 0x1cf   : > { %38532 = vst [vmem:[#allocation359_spill] sm:$0xff] %v32395_v29  ;;  %38535 = vst [vmem:[#allocation362_spill] sm:$0xff] %v32403_v20  ;;  %24300 = vmatmul.mubr.f32.gmra.mrb[30].mxu0 %v38536_v39  ;;  %v2868_v10 = vsub.f32 %v32123_v40, %v38538_v23  ;;  %v38544_v39 = vand.u32 4294901760, %v38543_v9  ;;  %v32432_v9 = vld [vmem:[%s29796_s27 + $0xd8] sm:$0xff]  ;;  %v32441_v23 = vand.u32 4294901760, %v32403_v20  ;;  %v32445_v2 = vsub.f32 %v32298_v62, %v32301_v46 }
 0x1d0   : > { %22175 = vmatmul.mubr.f32.vlgmr.msra.gmra.mrb[0].mxu1 %v2516_v3  ;;  %38537 = vst [vmem:[#allocation363_spill] sm:$0xff] %v32406_v56  ;;  %24334 = vmatprep.mubr.f32.mxu0 %v38540_v55  ;;  %v38542_v3 = vand.u32 4294901760, %v38541_v41  ;;  %v2855_v41 = vand.u32 4294901760, %v2854_v5  ;;  %v2862_v55 = vand.u32 4294901760, %v2861_v31  ;;  %v32449_v5 = vand.u32 4294901760, %v2555_v26 }
 0x1d1   : > { %26209 = vmatpush3.bf16.msra.mxu1 %v32154_v1  ;;  %22177 = vmatprep.mubr.f32.mxu1 %v32374_v61  ;;  %v2585_v1 = vsub.f32 %v32340_v13, %v32383_v22  ;;  %38547 = vst [vmem:[#allocation364_spill] sm:$0xff] %v32441_v23  ;;  %38548 = vst [vmem:[#allocation365_spill] sm:$0xff] %v32445_v2  ;;  %v38549_v61 = vld [vmem:[#allocation198_spill] sm:$0xff]  ;;  %v32453_v31 = vsub.f32 %v32304_v18, %v32307_v44  ;;  %v2869_v22 = vand.u32 4294901760, %v2868_v10 }
 0x1d2   : > { %v27074_v60 = vpack.c.bf16 %v38544_v39, %v38542_v3  ;;  %26211 = vmatprep.subr.bf16.mxu1 %v26210_v43  ;;  %v32435_v39 = vand.u32 4294901760, %v32432_v9  ;;  %v32438_v3 = vand.u32 4294901760, %v32400_v57  ;;  %38550 = vst [vmem:[#allocation366_spill] sm:$0xff] %v32449_v5  ;;  %v2876_v54 = vand.u32 4294901760, %v2875_v30 }
 0x1d3   : > { %24335 = vmatmul.mubr.f32.vlgmr.msra.gmra.mrb[0].mxu0 %v38549_v61  ;;  %38551 = vst [vmem:[#allocation367_spill] sm:$0xff] %v32453_v31  ;;  %v2882_v62 = vsub.f32 %v32167_v4, %v38553_v28  ;;  %v38554_v61 = vand.u32 4294901760, %v32172_v36  ;;  %v32466_v18 = vand.u32 4294901760, %v2565_v48  ;;  %v32470_v10 = vand.u32 4294901760, %v2585_v1  ;;  %v38567_v1 = vld [vmem:[#allocation210_spill] sm:$0xff] }
 0x1d4   : > { %38545 = vst [vmem:[#allocation203_spill] sm:$0xff] %v32435_v39  ;;  %38546 = vst [vmem:[#allocation206_spill] sm:$0xff] %v32438_v3  ;;  %22178 = vmatmul.mubr.f32.gmra.mrb[2].mxu1 %v32397_v37  ;;  %27073 = vmatpush3.bf16.msra.mxu0 %v32162_v21  ;;  %v32468_v21 = vand.u32 4294901760, %v2575_v42  ;;  %v26214_v30 = vpack.c.bf16 %v2862_v55, %v2855_v41  ;;  %v2595_v28 = vsub.f32 %v32400_v57, %v32438_v3  ;;  %v38563_v42 = vld [vmem:[#allocation207_spill] sm:$0xff] }
 0x1d5   : > { %24337 = vmatprep.mubr.f32.mxu0 %v38552_v33  ;;  %v2889_v37 = vsub.f32 %v32172_v36, %v38554_v61  ;;  %22180 = vmatprep.mubr.f32.mxu1 %v32406_v56  ;;  %38555 = vst [vmem:[#allocation368_spill] sm:$0xff] %v32466_v18  ;;  %38557 = vst [vmem:[#allocation370_spill] sm:$0xff] %v32470_v10  ;;  %v38558_v33 = vld [vmem:[#allocation177_spill] sm:$0xff]  ;;  %v38560_v36 = vld [vmem:[#allocation178_spill] sm:$0xff]  ;;  %v2605_v40 = vsub.f32 %v32403_v20, %v32441_v23  ;;  %v32481_v48 = vand.u32 4294901760, %v32445_v2 }
 0x1d6   : > { %27075 = vmatprep.subr.bf16.mxu0 %v27074_v60  ;;  %38556 = vst [vmem:[#allocation369_spill] sm:$0xff] %v32468_v21  ;;  %26213 = vmatpush3.bf16.msra.mxu1 %v26210_v43  ;;  %v38559_v61 = vand.u32 4294901760, %v38558_v33  ;;  %v38561_v26 = vand.u32 4294901760, %v38560_v36  ;;  %v32486_v55 = vand.u32 4294901760, %v32453_v31  ;;  %v32490_v43 = vsub.f32 %v32316_v45, %v32319_v19 }
 0x1d7   : > { %38562 = vst [vmem:[#allocation177_spill] sm:$0xff] %v32481_v48  ;;  %24338 = vmatmul.mubr.f32.gmra.mrb[2].mxu0 %v38563_v42  ;;  %v26218_v33 = vpack.c.bf16 %v2876_v54, %v2869_v22  ;;  %v32494_v36 = vsub.f32 %v32345_v47, %v32348_v7  ;;  %v2883_v41 = vand.u32 4294901760, %v2882_v62  ;;  %v38569_v23 = vand.u32 4294901760, %v32197_v63  ;;  %26215 = vmatprep.subr.bf16.mxu1 %v26214_v30  ;;  %v38576_v47 = vld [vmem:[#allocation182_spill] sm:$0xff] }
 0x1d8   : > { %v27078_v4 = vpack.c.bf16 %v38561_v26, %v38559_v61  ;;  %22181 = vmatmul.mubr.f32.gmra.mrb[4].mxu1 %v32449_v5  ;;  %38564 = vst [vmem:[#allocation178_spill] sm:$0xff] %v32486_v55  ;;  %38565 = vst [vmem:[#allocation371_spill] sm:$0xff] %v32490_v43  ;;  %24340 = vmatprep.mubr.f32.mxu0 %v38567_v1  ;;  %v2890_v26 = vand.u32 4294901760, %v2889_v37  ;;  %v38568_v61 = vand.u32 4294901760, %v32192_v27  ;;  %v38570_v54 = vand.u32 4294901760, %v32091_v59  ;;  %v38578_v1 = vld [vmem:[#allocation183_spill] sm:$0xff] }
 0x1d9   : > { %38566 = vst [vmem:[#allocation372_spill] sm:$0xff] %v32494_v36  ;;  %27077 = vmatpush3.bf16.msra.mxu0 %v27074_v60  ;;  %v2903_v3 = vsub.f32 %v32197_v63, %v38569_v23  ;;  %22183 = vmatprep.mubr.f32.mxu1 %v32466_v18  ;;  %v38572_v37 = vand.u32 4294901760, %v32096_v38  ;;  %v32516_v62 = vand.u32 4294901760, %v2595_v28  ;;  %v32518_v23 = vand.u32 4294901760, %v2605_v40  ;;  %v29501_v18 = vld [vmem:[%s29796_s27 + $0x108] sm:$0xff] }
 0x1da   : > { %v2896_v42 = vsub.f32 %v32192_v27, %v38568_v61  ;;  %v32509_v60 = vsub.f32 %v32091_v59, %v38570_v54  ;;  %27079 = vmatprep.subr.bf16.mxu0 %v27078_v4  ;;  %26217 = vmatpush3.bf16.msra.mxu1 %v26214_v30  ;;  %v2615_v61 = vsub.f32 %v32445_v2, %v32481_v48  ;;  %v38577_v45 = vand.u32 4294901760, %v38576_v47  ;;  %v38580_v54 = vld [vmem:[#allocation218_spill] sm:$0xff] }
 0x1db   : > { %v32514_v22 = vsub.f32 %v32096_v38, %v38572_v37  ;;  %38574 = vst [vmem:[#allocation375_spill] sm:$0xff] %v32516_v62  ;;  %38575 = vst [vmem:[#allocation376_spill] sm:$0xff] %v32518_v23  ;;  %v38579_v63 = vand.u32 4294901760, %v38578_v1  ;;  %24341 = vmatmul.mubr.f32.gmra.mrb[4].mxu0 %v38580_v54  ;;  %v2625_v38 = vsub.f32 %v32453_v31, %v32486_v55  ;;  %v32531_v30 = vand.u32 4294901760, %v32490_v43 }
 0x1dc   : > { %38571 = vst [vmem:[#allocation373_spill] sm:$0xff] %v32509_v60  ;;  %22184 = vmatmul.mubr.f32.gmra.mrb[6].mxu1 %v32468_v21  ;;  %v32534_v40 = vand.u32 4294901760, %v32494_v36  ;;  %v32538_v28 = vsub.f32 %v32351_v11, %v32354_v51  ;;  %v32544_v1 = vsub.f32 %v32368_v35, %v32371_v32  ;;  %v2897_v47 = vand.u32 4294901760, %v2896_v42  ;;  %26219 = vmatprep.subr.bf16.mxu1 %v26218_v33 }
 0x1dd   : > { %38573 = vst [vmem:[#allocation374_spill] sm:$0xff] %v32514_v22  ;;  %v27082_v59 = vpack.c.bf16 %v38579_v63, %v38577_v45  ;;  %38581 = vst [vmem:[#allocation182_spill] sm:$0xff] %v32531_v30  ;;  %v38584_v63 = vld [vmem:[#allocation229_spill] sm:$0xff]  ;;  %22186 = vmatprep.mubr.f32.mxu1 %v32470_v10  ;;  %v26222_v45 = vpack.c.bf16 %v2890_v26, %v2883_v41  ;;  %v2904_v37 = vand.u32 4294901760, %v2903_v3  ;;  %27081 = vmatpush3.bf16.msra.mxu0 %v27078_v4  ;;  %v29498_v10 = vld [vmem:[%s29796_s27 + $0xe0] sm:$0xff] }
 0x1de   : > { %38582 = vst [vmem:[#allocation183_spill] sm:$0xff] %v32534_v40  ;;  %38583 = vst [vmem:[#allocation377_spill] sm:$0xff] %v32538_v28  ;;  %24343 = vmatprep.mubr.f32.mxu0 %v38584_v63  ;;  %v38586_v54 = vand.u32 4294901760, %v32232_v50  ;;  %v38587_v11 = vand.u32 4294901760, %v32237_v14  ;;  %v32555_v35 = vand.u32 4294901760, %v29498_v10  ;;  %v29499_v41 = vld [vmem:[%s29796_s27 + $0xf0] sm:$0xff]  ;;  %26221 = vmatpush3.bf16.msra.mxu1 %v26218_v33  ;;  %v2635_v63 = vsub.f32 %v32490_v43, %v32531_v30 }
 0x1df   : > { %38585 = vst [vmem:[#allocation378_spill] sm:$0xff] %v32544_v1  ;;  %v32558_v42 = vand.u32 4294901760, %v29499_v41  ;;  %v32560_v4 = vand.u32 4294901760, %v2615_v61  ;;  %27083 = vmatprep.subr.bf16.mxu0 %v27082_v59  ;;  %v38591_v3 = vld [vmem:[#allocation190_spill] sm:$0xff]  ;;  %v32568_v27 = vand.u32 4294901760, %v2625_v38  ;;  %v32573_v61 = vand.u32 4294901760, %v32538_v28  ;;  %26223 = vmatprep.subr.bf16.mxu1 %v26222_v45 }
 0x1e0   : > { %v2910_v55 = vsub.f32 %v32232_v50, %v38586_v54  ;;  %v2917_v48 = vsub.f32 %v32237_v14, %v38587_v11  ;;  %38588 = vst [vmem:[#allocation379_spill] sm:$0xff] %v32555_v35  ;;  %v38592_v26 = vand.u32 4294901760, %v38591_v3  ;;  %v38593_v54 = vld [vmem:[#allocation191_spill] sm:$0xff]  ;;  %22187 = vmatmul.mubr.f32.gmra.mrb[8].mxu1 %v32516_v62  ;;  %v32577_v33 = vsub.f32 %v32392_v15, %v32395_v29  ;;  %v38599_v3 = vld [vmem:[#allocation232_spill] sm:$0xff] }
 0x1e1   : > { %38589 = vst [vmem:[#allocation380_spill] sm:$0xff] %v32558_v42  ;;  %38590 = vst [vmem:[#allocation381_spill] sm:$0xff] %v32560_v4  ;;  %v38594_v50 = vand.u32 4294901760, %v38593_v54  ;;  %v38595_v11 = vld [vmem:[#allocation231_spill] sm:$0xff]  ;;  %22189 = vmatprep.mubr.f32.mxu1 %v32518_v23  ;;  %v32584_v38 = vand.u32 4294901760, %v32544_v1  ;;  %v26226_v54 = vpack.c.bf16 %v2904_v37, %v2897_v47  ;;  %27085 = vmatpush3.bf16.msra.mxu0 %v27082_v59  ;;  %v38602_v30 = vand.u32 4294901760, %v32509_v60 }
 0x1e2   : > { %24344 = vmatmul.mubr.f32.gmra.mrb[6].mxu0 %v38595_v11  ;;  %38596 = vst [vmem:[#allocation190_spill] sm:$0xff] %v32568_v27  ;;  %38597 = vst [vmem:[#allocation191_spill] sm:$0xff] %v32573_v61  ;;  %v2911_v11 = vand.u32 4294901760, %v2910_v55  ;;  %v2918_v15 = vand.u32 4294901760, %v2917_v48  ;;  %v38603_v14 = vand.u32 4294901760, %v32514_v22  ;;  %v29500_v23 = vld [vmem:[%s29796_s27 + $0xf8] sm:$0xff]  ;;  %26225 = vmatpush3.bf16.msra.mxu1 %v26222_v45  ;;  %v32616_v45 = vsub.f32 %v29498_v10, %v32555_v35 }
 0x1e3   : > { %v27086_v21 = vpack.c.bf16 %v38594_v50, %v38592_v26  ;;  %38598 = vst [vmem:[#allocation382_spill] sm:$0xff] %v32577_v33  ;;  %24346 = vmatprep.mubr.f32.mxu0 %v38599_v3  ;;  %v2645_v50 = vsub.f32 %v32494_v36, %v32534_v40  ;;  %38600 = vst [vmem:[#allocation383_spill] sm:$0xff] %v32584_v38  ;;  %v32588_v26 = vsub.f32 %v32432_v9, %v32435_v39  ;;  %v38606_v9 = vld [vmem:[#allocation204_spill] sm:$0xff]  ;;  %v38608_v55 = vld [vmem:[#allocation205_spill] sm:$0xff] }
 0x1e4   : > { %v2924_v3 = vsub.f32 %v32509_v60, %v38602_v30  ;;  %v2931_v40 = vsub.f32 %v32514_v22, %v38603_v14  ;;  %v32597_v62 = vand.u32 4294901760, %v29500_v23  ;;  %v32600_v5 = vand.u32 4294901760, %v29501_v18  ;;  %v38610_v37 = vld [vmem:[#allocation240_spill] sm:$0xff]  ;;  %22190 = vmatmul.mubr.f32.gmra.mrb[10].mxu1 %v32560_v4  ;;  %38613 = vst [vmem:[#allocation387_spill] sm:$0xff] %v32616_v45  ;;  %26227 = vmatprep.subr.bf16.mxu1 %v26226_v54 }
 0x1e5   : > { %38601 = vst [vmem:[#allocation384_spill] sm:$0xff] %v32588_v26  ;;  %27087 = vmatprep.subr.bf16.mxu0 %v27086_v21  ;;  %v38607_v59 = vand.u32 4294901760, %v38606_v9  ;;  %v38609_v48 = vand.u32 4294901760, %v38608_v55  ;;  %v32608_v30 = vand.u32 4294901760, %v2635_v63  ;;  %v2655_v14 = vsub.f32 %v32538_v28, %v32573_v61  ;;  %v38614_v9 = vld [vmem:[#allocation242_spill] sm:$0xff]  ;;  %22192 = vmatprep.mubr.f32.mxu1 %v32568_v27  ;;  %v29502_v4 = vld [vmem:[%s29796_s27 + $0x110] sm:$0xff] }
 0x1e6   : > { %38604 = vst [vmem:[#allocation385_spill] sm:$0xff] %v32597_v62  ;;  %38605 = vst [vmem:[#allocation386_spill] sm:$0xff] %v32600_v5  ;;  %24347 = vmatmul.mubr.f32.gmra.mrb[8].mxu0 %v38610_v37  ;;  %v32613_v56 = vand.u32 4294901760, %v32577_v33  ;;  %v2665_v63 = vsub.f32 %v32544_v1, %v32584_v38  ;;  %v32625_v55 = vand.u32 4294901760, %v32588_v26  ;;  %v26230_v37 = vpack.c.bf16 %v2918_v15, %v2911_v11  ;;  %v29503_v27 = vld [vmem:[%s29796_s27 + $0x120] sm:$0xff]  ;;  %v38620_v38 = vld [vmem:[#allocation216_spill] sm:$0xff] }
 0x1e7   : > { %v27090_v47 = vpack.c.bf16 %v38609_v48, %v38607_v59  ;;  %38611 = vst [vmem:[#allocation204_spill] sm:$0xff] %v32608_v30  ;;  %24349 = vmatprep.mubr.f32.mxu0 %v38614_v9  ;;  %v32620_v59 = vand.u32 4294901760, %v2645_v50  ;;  %v32628_v48 = vsub.f32 %v29499_v41, %v32558_v42  ;;  %27089 = vmatpush3.bf16.msra.mxu0 %v27086_v21  ;;  %v2925_v10 = vand.u32 4294901760, %v2924_v3  ;;  %v38622_v28 = vld [vmem:[#allocation217_spill] sm:$0xff]  ;;  %v38624_v41 = vld [vmem:[#allocation243_spill] sm:$0xff] }
 0x1e8   : > { %38612 = vst [vmem:[#allocation205_spill] sm:$0xff] %v32613_v56  ;;  %38616 = vst [vmem:[#allocation389_spill] sm:$0xff] %v32625_v55  ;;  %v2932_v61 = vand.u32 4294901760, %v2931_v40  ;;  %v32631_v9 = vand.u32 4294901760, %v29502_v4  ;;  %v32634_v50 = vand.u32 4294901760, %v29503_v27  ;;  %26229 = vmatpush3.bf16.msra.mxu1 %v26226_v54  ;;  %v38621_v1 = vand.u32 4294901760, %v38620_v38 }
 0x1e9   : > { %38615 = vst [vmem:[#allocation388_spill] sm:$0xff] %v32620_v59  ;;  %38617 = vst [vmem:[#allocation390_spill] sm:$0xff] %v32628_v48  ;;  %27091 = vmatprep.subr.bf16.mxu0 %v27090_v47  ;;  %v38623_v36 = vand.u32 4294901760, %v38622_v28  ;;  %22193 = vmatmul.mubr.f32.gmra.mrb[12].mxu1 %v32608_v30  ;;  %v32642_v21 = vand.u32 4294901760, %v2655_v14  ;;  %v2675_v40 = vsub.f32 %v32577_v33, %v32613_v56  ;;  %v32647_v11 = vand.u32 4294901760, %v32616_v45  ;;  %v38628_v38 = vld [vmem:[#allocation245_spill] sm:$0xff] }
 0x1ea   : > { %38618 = vst [vmem:[#allocation391_spill] sm:$0xff] %v32631_v9  ;;  %38619 = vst [vmem:[#allocation392_spill] sm:$0xff] %v32634_v50  ;;  %24350 = vmatmul.mubr.f32.gmra.mrb[10].mxu0 %v38624_v41  ;;  %v32650_v3 = vsub.f32 %v29500_v23, %v32597_v62  ;;  %22195 = vmatprep.mubr.f32.mxu1 %v32620_v59  ;;  %v2685_v28 = vsub.f32 %v32588_v26, %v32625_v55  ;;  %v29504_v23 = vld [vmem:[%s29796_s27 + $0x128] sm:$0xff]  ;;  %v38636_v55 = vld [vmem:[#allocation236_spill] sm:$0xff] }
 0x1eb   : > { %v27094_v43 = vpack.c.bf16 %v38623_v36, %v38621_v1  ;;  %38625 = vst [vmem:[#allocation216_spill] sm:$0xff] %v32642_v21  ;;  %38626 = vst [vmem:[#allocation217_spill] sm:$0xff] %v32647_v11  ;;  %24352 = vmatprep.mubr.f32.mxu0 %v38628_v38  ;;  %v32654_v36 = vand.u32 4294901760, %v2665_v63  ;;  %v32659_v1 = vand.u32 4294901760, %v32628_v48  ;;  %v32662_v54 = vsub.f32 %v29501_v18, %v32600_v5  ;;  %v29505_v38 = vld [vmem:[%s29796_s27 + $0x138] sm:$0xff]  ;;  %v38634_v63 = vld [vmem:[#allocation235_spill] sm:$0xff] }
 0x1ec   : > { %38627 = vst [vmem:[#allocation393_spill] sm:$0xff] %v32650_v3  ;;  %27093 = vmatpush3.bf16.msra.mxu0 %v27090_v47  ;;  %26231 = vmatprep.subr.bf16.mxu1 %v26230_v37  ;;  %v26234_v15 = vpack.c.bf16 %v2932_v61, %v2925_v10  ;;  %v32665_v14 = vand.u32 4294901760, %v29504_v23  ;;  %v32668_v41 = vand.u32 4294901760, %v29505_v38  ;;  %v38635_v56 = vand.u32 4294901760, %v38634_v63  ;;  %v38638_v26 = vld [vmem:[#allocation248_spill] sm:$0xff]  ;;  %v38642_v10 = vld [vmem:[#allocation87_spill] sm:$0xff] }
 0x1ed   : > { %38629 = vst [vmem:[#allocation394_spill] sm:$0xff] %v32654_v36  ;;  %38630 = vst [vmem:[#allocation395_spill] sm:$0xff] %v32659_v1  ;;  %27095 = vmatprep.subr.bf16.mxu0 %v27094_v43  ;;  %26233 = vmatpush3.bf16.msra.mxu1 %v26230_v37  ;;  %v38637_v59 = vand.u32 4294901760, %v38636_v55  ;;  %v32676_v18 = vand.u32 4294901760, %v2675_v40  ;;  %v2695_v61 = vsub.f32 %v32616_v45, %v32647_v11  ;;  %v32681_v47 = vand.u32 4294901760, %v32650_v3  ;;  %v29506_v63 = vld [vmem:[%s29796_s27 + $0x140] sm:$0xff] }
 0x1ee   : > { %38631 = vst [vmem:[#allocation396_spill] sm:$0xff] %v32662_v54  ;;  %38632 = vst [vmem:[#allocation397_spill] sm:$0xff] %v32665_v14  ;;  %24353 = vmatmul.mubr.f32.gmra.mrb[12].mxu0 %v38638_v26  ;;  %22196 = vmatmul.mubr.f32.gmra.mrb[14].mxu1 %v32642_v21  ;;  %v32684_v37 = vsub.f32 %v29502_v4, %v32631_v9  ;;  %v32693_v55 = vand.u32 4294901760, %v32662_v54  ;;  %v32696_v40 = vsub.f32 %v29503_v27, %v32634_v50  ;;  %v29507_v26 = vld [vmem:[%s29796_s27 + $0x150] sm:$0xff] }
 0x1ef   : > { %38633 = vst [vmem:[#allocation398_spill] sm:$0xff] %v32668_v41  ;;  %v27098_v30 = vpack.c.bf16 %v38637_v59, %v38635_v56  ;;  %38639 = vst [vmem:[#allocation235_spill] sm:$0xff] %v32676_v18  ;;  %24355 = vmatprep.mubr.f32.mxu0 %v38642_v10  ;;  %22198 = vmatprep.mubr.f32.mxu1 %v32654_v36  ;;  %v32688_v56 = vand.u32 4294901760, %v2685_v28  ;;  %v2705_v59 = vsub.f32 %v32628_v48, %v32659_v1  ;;  %v38648_v28 = vld [vmem:[#allocation257_spill] sm:$0xff]  ;;  %v38664_v48 = vld [vmem:[#allocation267_spill] sm:$0xff] }
 0x1f0   : > { %38640 = vst [vmem:[#allocation236_spill] sm:$0xff] %v32681_v47  ;;  %38641 = vst [vmem:[#allocation399_spill] sm:$0xff] %v32684_v37  ;;  %27097 = vmatpush3.bf16.msra.mxu0 %v27094_v43  ;;  %26235 = vmatprep.subr.bf16.mxu1 %v26234_v15  ;;  %v32699_v4 = vand.u32 4294901760, %v29506_v63  ;;  %v32702_v10 = vand.u32 4294901760, %v29507_v26  ;;  %v32706_v1 = vand.u32 4294901760, %v2695_v61  ;;  %v2715_v27 = vsub.f32 %v32650_v3, %v32681_v47  ;;  %v38652_v36 = vld [vmem:[#allocation261_spill] sm:$0xff] }
 0x1f1   : > { %38643 = vst [vmem:[#allocation400_spill] sm:$0xff] %v32688_v56  ;;  %38644 = vst [vmem:[#allocation401_spill] sm:$0xff] %v32693_v55  ;;  %27099 = vmatprep.subr.bf16.mxu0 %v27098_v30  ;;  %26237 = vmatpush3.bf16.msra.mxu1 %v26234_v15  ;;  %v32711_v43 = vand.u32 4294901760, %v32684_v37  ;;  %v32714_v11 = vsub.f32 %v29504_v23, %v32665_v14  ;;  %v32718_v15 = vand.u32 4294901760, %v2705_v59  ;;  %v32723_v61 = vand.u32 4294901760, %v32696_v40  ;;  %v29508_v23 = vld [vmem:[%s29796_s27 + $0x158] sm:$0xff] }
 0x1f2   : > { %38645 = vst [vmem:[#allocation402_spill] sm:$0xff] %v32696_v40  ;;  %38646 = vst [vmem:[#allocation403_spill] sm:$0xff] %v32699_v4  ;;  %24356 = vmatmul.mubr.f32.gmra.mrb[14].mxu0 %v38648_v28  ;;  %22199 = vmatmul.mubr.f32.gmra.mrb[16].mxu1 %v32676_v18  ;;  %v2725_v28 = vsub.f32 %v32662_v54, %v32693_v55  ;;  %v32726_v47 = vsub.f32 %v29505_v38, %v32668_v41  ;;  %v38656_v18 = vld [vmem:[#allocation180_spill] sm:$0xff]  ;;  %v32730_v21 = vand.u32 4294901760, %v29508_v23  ;;  %v38659_v59 = vld [vmem:[#allocation173_spill] sm:$0xff] }
 0x1f3   : > { %38647 = vst [vmem:[#allocation404_spill] sm:$0xff] %v32702_v10  ;;  %38649 = vst [vmem:[#allocation405_spill] sm:$0xff] %v32706_v1  ;;  %24358 = vmatprep.mubr.f32.mxu0 %v38652_v36  ;;  %22201 = vmatprep.mubr.f32.mxu1 %v32688_v56  ;;  %v29509_v36 = vld [vmem:[%s29796_s27 + $0x168] sm:$0xff]  ;;  %v38660_v3 = vld [vmem:[#allocation128_spill] sm:$0xff]  ;;  %v32738_v55 = vand.u32 4294901760, %v2715_v27  ;;  %v32743_v38 = vand.u32 4294901760, %v32714_v11  ;;  %v32746_v54 = vsub.f32 %v29506_v63, %v32699_v4 }
 0x1f4   : > { %38650 = vst [vmem:[#allocation406_spill] sm:$0xff] %v32711_v43  ;;  %38651 = vst [vmem:[#allocation407_spill] sm:$0xff] %v32714_v11  ;;  %27101 = vmatpush3.bf16.msra.mxu0 %v27098_v30  ;;  %26239 = vmatprep.subr.bf16.mxu1 %v38656_v18  ;;  %v32733_v56 = vand.u32 4294901760, %v29509_v36  ;;  %v2735_v30 = vsub.f32 %v32684_v37, %v32711_v43  ;;  %v32750_v45 = vand.u32 4294901760, %v2725_v28  ;;  %v32755_v27 = vand.u32 4294901760, %v32726_v47  ;;  %v38669_v63 = vld [vmem:[#allocation268_spill] sm:$0xff] }
 0x1f5   : > { %38653 = vst [vmem:[#allocation408_spill] sm:$0xff] %v32718_v15  ;;  %38654 = vst [vmem:[#allocation409_spill] sm:$0xff] %v32723_v61  ;;  %27103 = vmatprep.subr.bf16.mxu0 %v38659_v59  ;;  %v32758_v43 = vsub.f32 %v29507_v26, %v32702_v10  ;;  %v2755_v28 = vsub.f32 %v32714_v11, %v32743_v38  ;;  %v38673_v26 = vld [vmem:[#allocation271_spill] sm:$0xff] }
 0x1f6   : > { %38655 = vst [vmem:[#allocation410_spill] sm:$0xff] %v32726_v47  ;;  %38657 = vst [vmem:[#allocation180_spill] sm:$0xff] %v32730_v21  ;;  %24359 = vmatmul.mubr.f32.gmra.mrb[16].mxu0 %v38660_v3  ;;  %22202 = vmatmul.mubr.f32.gmra.mrb[18].mxu1 %v32706_v1  ;;  %v2745_v3 = vsub.f32 %v32696_v40, %v32723_v61  ;;  %v29510_v1 = vld [vmem:[%s29796_s27 + $0x170] sm:$0xff]  ;;  %v32770_v61 = vand.u32 4294901760, %v32746_v54 }
 0x1f7   : > { %38658 = vst [vmem:[#allocation411_spill] sm:$0xff] %v32733_v56  ;;  %38661 = vst [vmem:[#allocation173_spill] sm:$0xff] %v32738_v55  ;;  %24361 = vmatprep.mubr.f32.mxu0 %v38664_v48  ;;  %22204 = vmatprep.mubr.f32.mxu1 %v32718_v15  ;;  %v32761_v37 = vand.u32 4294901760, %v29510_v1  ;;  %v32765_v48 = vand.u32 4294901760, %v2735_v30  ;;  %v32773_v15 = vsub.f32 %v29508_v23, %v32730_v21  ;;  %v32782_v30 = vand.u32 4294901760, %v32758_v43 }
 0x1f8   : > { %38662 = vst [vmem:[#allocation412_spill] sm:$0xff] %v32743_v38  ;;  %38663 = vst [vmem:[#allocation413_spill] sm:$0xff] %v32746_v54  ;;  %v32777_v40 = vand.u32 4294901760, %v2745_v3  ;;  %v32785_v38 = vsub.f32 %v29509_v36, %v32733_v56  ;;  %v32789_v23 = vand.u32 4294901760, %v2755_v28 }
 0x1f9   : > { %38665 = vst [vmem:[#allocation414_spill] sm:$0xff] %v32750_v45  ;;  %38666 = vst [vmem:[#allocation415_spill] sm:$0xff] %v32755_v27  ;;  %v32794_v3 = vand.u32 4294901760, %v32773_v15 }
 0x1fa   : > { %38667 = vst [vmem:[#allocation416_spill] sm:$0xff] %v32758_v43  ;;  %38668 = vst [vmem:[#allocation417_spill] sm:$0xff] %v32761_v37  ;;  %24362 = vmatmul.mubr.f32.gmra.mrb[18].mxu0 %v38669_v63  ;;  %22205 = vmatmul.mubr.f32.gmra.mrb[20].mxu1 %v32738_v55  ;;  %v2765_v63 = vsub.f32 %v32726_v47, %v32755_v27  ;;  %v38677_v55 = vld [vmem:[#allocation274_spill] sm:$0xff]  ;;  %v32797_v27 = vsub.f32 %v29510_v1, %v32761_v37  ;;  %v32806_v28 = vand.u32 4294901760, %v32785_v38 }
 0x1fb   : > { %38670 = vst [vmem:[#allocation418_spill] sm:$0xff] %v32765_v48  ;;  %38671 = vst [vmem:[#allocation419_spill] sm:$0xff] %v32770_v61  ;;  %24364 = vmatprep.mubr.f32.mxu0 %v38673_v26  ;;  %22207 = vmatprep.mubr.f32.mxu1 %v32750_v45  ;;  %v2775_v26 = vsub.f32 %v32746_v54, %v32770_v61  ;;  %v38681_v45 = vld [vmem:[#allocation275_spill] sm:$0xff]  ;;  %v2795_v1 = vsub.f32 %v32773_v15, %v32794_v3 }
 0x1fc   : > { %38672 = vst [vmem:[#allocation420_spill] sm:$0xff] %v32773_v15  ;;  %38674 = vst [vmem:[#allocation421_spill] sm:$0xff] %v32777_v40  ;;  %v32801_v36 = vand.u32 4294901760, %v2765_v63  ;;  %v38687_v63 = vld [vmem:[#allocation283_spill] sm:$0xff] }
 0x1fd   : > { %38675 = vst [vmem:[#allocation422_spill] sm:$0xff] %v32782_v30  ;;  %38676 = vst [vmem:[#allocation423_spill] sm:$0xff] %v32785_v38  ;;  %v32810_v61 = vand.u32 4294901760, %v2775_v26  ;;  %v32825_v26 = vand.u32 4294901760, %v2795_v1  ;;  %v38696_v1 = vld [vmem:[#allocation304_spill] sm:$0xff] }
 0x1fe   : > { %24365 = vmatmul.mubr.f32.gmra.mrb[20].mxu0 %v38677_v55  ;;  %22208 = vmatmul.mubr.f32.gmra.mrb[22].mxu1 %v32765_v48  ;;  %38678 = vst [vmem:[#allocation424_spill] sm:$0xff] %v32789_v23  ;;  %38679 = vst [vmem:[#allocation425_spill] sm:$0xff] %v32794_v3  ;;  %v2785_v55 = vsub.f32 %v32758_v43, %v32782_v30  ;;  %v38684_v48 = vld [vmem:[#allocation281_spill] sm:$0xff] }
 0x1ff   : > { %38680 = vst [vmem:[#allocation426_spill] sm:$0xff] %v32797_v27  ;;  %24367 = vmatprep.mubr.f32.mxu0 %v38681_v45  ;;  %22210 = vmatprep.mubr.f32.mxu1 %v32777_v40  ;;  %38682 = vst [vmem:[#allocation427_spill] sm:$0xff] %v32801_v36  ;;  %v32815_v45 = vand.u32 4294901760, %v32797_v27  ;;  %v2805_v40 = vsub.f32 %v32785_v38, %v32806_v28 }
 0x200   : > { %38683 = vst [vmem:[#allocation428_spill] sm:$0xff] %v32806_v28  ;;  %38685 = vst [vmem:[#allocation429_spill] sm:$0xff] %v32810_v61  ;;  %v32819_v30 = vand.u32 4294901760, %v2785_v55  ;;  %v38693_v55 = vld [vmem:[#allocation297_spill] sm:$0xff] }
 0x201   : > { %38686 = vst [vmem:[#allocation430_spill] sm:$0xff] %v32815_v45  ;;  %38690 = vst [vmem:[#allocation432_spill] sm:$0xff] %v32825_v26  ;;  %v2815_v3 = vsub.f32 %v32797_v27, %v32815_v45  ;;  %v38697_v45 = vld [vmem:[#allocation307_spill] sm:$0xff] }
 0x202   : > { %24368 = vmatmul.mubr.f32.gmra.mrb[22].mxu0 %v38684_v48  ;;  %22211 = vmatmul.mubr.f32.gmra.mrb[24].mxu1 %v32789_v23  ;;  %38688 = vst [vmem:[#allocation431_spill] sm:$0xff] %v32819_v30  ;;  %v38689_v48 = vld [vmem:[#allocation290_spill] sm:$0xff]  ;;  %v38691_v23 = vld [vmem:[#allocation293_spill] sm:$0xff] }
 0x203   : > { %24370 = vmatprep.mubr.f32.mxu0 %v38687_v63  ;;  %22213 = vmatprep.mubr.f32.mxu1 %v32801_v36  ;;  %v32831_v63 = vand.u32 4294901760, %v2805_v40  ;;  %v32835_v28 = vand.u32 4294901760, %v2815_v3  ;;  %v38698_v40 = vld [vmem:[#allocation309_spill] sm:$0xff]  ;;  %v38700_v3 = vld [vmem:[#allocation187_spill] sm:$0xff] }
 0x204   : > { %v32969_v36 = vld [vmem:[%s36498_s1 + $0x328] sm:$0xff] }
 0x205   : > { %38692 = vst [vmem:[#allocation433_spill] sm:$0xff] %v32831_v63  ;;  %38694 = vst [vmem:[#allocation434_spill] sm:$0xff] %v32835_v28 }
 0x206   : > { %24371 = vmatmul.mubr.f32.gmra.mrb[24].mxu0 %v38689_v48  ;;  %22214 = vmatmul.mubr.f32.gmra.mrb[26].mxu1 %v32810_v61  ;;  %v38695_v48 = vld [vmem:[#allocation301_spill] sm:$0xff]  ;;  %v32964_v61 = vld [vmem:[%s36498_s1 + $0x320] sm:$0xff] }
 0x207   : > { %24373 = vmatprep.mubr.f32.mxu0 %v38691_v23  ;;  %22216 = vmatprep.mubr.f32.mxu1 %v32819_v30  ;;  %v38708_v23 = vld [vmem:[#allocation314_spill] sm:$0xff]  ;;  %v38746_v30 = vld [vmem:[#allocation299_spill] sm:$0xff] }
 0x20a   : > { %24374 = vmatmul.mubr.f32.gmra.mrb[26].mxu0 %v38693_v55  ;;  %22217 = vmatmul.mubr.f32.gmra.mrb[28].mxu1 %v32825_v26  ;;  %v38699_v55 = vld [vmem:[#allocation186_spill] sm:$0xff] }
 0x20b   : > { %24376 = vmatprep.mubr.f32.mxu0 %v38695_v48  ;;  %22219 = vmatprep.mubr.f32.mxu1 %v32831_v63  ;;  %v38707_v48 = vld [vmem:[#allocation339_spill] sm:$0xff]  ;;  %v38745_v63 = vld [vmem:[#allocation325_spill] sm:$0xff] }
 0x20e   : > { %24377 = vmatmul.mubr.f32.gmra.mrb[28].mxu0 %v38696_v1  ;;  %22220 = vmatmul.mubr.f32.gmra.mrb[30].mxu1 %v32835_v28  ;;  %v38705_v1 = vld [vmem:[#allocation338_spill] sm:$0xff]  ;;  %v38729_v28 = vld [vmem:[#allocation255_spill] sm:$0xff] }
 0x20f   : > { %24379 = vmatprep.mubr.f32.mxu0 %v38697_v45  ;;  %22254 = vmatprep.mubr.f32.mxu1 %v32204_v6  ;;  %v38701_v45 = vld [vmem:[#allocation188_spill] sm:$0xff] }
 0x212   : > { %24380 = vmatmul.mubr.f32.gmra.mrb[30].mxu0 %v38698_v40  ;;  %22255 = vmatmul.mubr.f32.vlgmr.msra.gmra.mrb[0].mxu1 %v32211_v17  ;;  %v38702_v40 = vld [vmem:[#allocation193_spill] sm:$0xff]  ;;  %v38724_v17 = vld [vmem:[#allocation238_spill] sm:$0xff] }
 0x213   : > { %24414 = vmatprep.mubr.f32.mxu0 %v38699_v55  ;;  %26241 = vmatpush3.bf16.msra.mxu1 %v38656_v18  ;;  %v38703_v18 = vld [vmem:[#allocation195_spill] sm:$0xff] }
 0x214   : > { %22257 = vmatprep.mubr.f32.mxu1 %v32214_v0  ;;  %26243 = vmatprep.subr.bf16.mxu1 %v32012_v8 }
 0x216   : > { %24415 = vmatmul.mubr.f32.vlgmr.msra.gmra.mrb[0].mxu0 %v38700_v3  ;;  %22258 = vmatmul.mubr.f32.gmra.mrb[2].mxu1 %v32224_v24  ;;  %v38711_v24 = vld [vmem:[#allocation340_spill] sm:$0xff] }
 0x217   : > { %27105 = vmatpush3.bf16.msra.mxu0 %v38659_v59  ;;  %24417 = vmatprep.mubr.f32.mxu0 %v38701_v45  ;;  %v38704_v59 = vld [vmem:[#allocation202_spill] sm:$0xff] }
 0x218   : > { %22260 = vmatprep.mubr.f32.mxu1 %v32240_v52  ;;  %27107 = vmatprep.subr.bf16.mxu0 %v38428_v34 }
 0x219   : > { %26245 = vmatpush3.bf16.msra.mxu1 %v32012_v8  ;;  %v38706_v8 = vld [vmem:[#allocation212_spill] sm:$0xff] }
 0x21a   : > { %24418 = vmatmul.mubr.f32.gmra.mrb[2].mxu0 %v38702_v40  ;;  %22261 = vmatmul.mubr.f32.gmra.mrb[4].mxu1 %v32261_v49  ;;  %v38713_v49 = vld [vmem:[#allocation341_spill] sm:$0xff] }
 0x21b   : > { %24420 = vmatprep.mubr.f32.mxu0 %v38703_v18  ;;  %27109 = vmatpush3.bf16.msra.mxu0 %v38428_v34  ;;  %v38709_v34 = vld [vmem:[#allocation174_spill] sm:$0xff] }
 0x21c   : > { %22263 = vmatprep.mubr.f32.mxu1 %v32272_v12  ;;  %26247 = vmatprep.subr.bf16.mxu1 %v32074_v58  ;;  %v38710_v12 = vld [vmem:[#allocation214_spill] sm:$0xff] }
 0x21d   : > { %27111 = vmatprep.subr.bf16.mxu0 %v38437_v53  ;;  %26249 = vmatpush3.bf16.msra.mxu1 %v32074_v58  ;;  %v38712_v58 = vld [vmem:[#allocation215_spill] sm:$0xff] }
 0x21e   : > { %24421 = vmatmul.mubr.f32.gmra.mrb[4].mxu0 %v38704_v59  ;;  %22264 = vmatmul.mubr.f32.gmra.mrb[6].mxu1 %v38705_v1  ;;  %v38714_v1 = vld [vmem:[#allocation318_spill] sm:$0xff] }
 0x21f   : > { %24423 = vmatprep.mubr.f32.mxu0 %v38706_v8  ;;  %22266 = vmatprep.mubr.f32.mxu1 %v38707_v48  ;;  %v38715_v48 = vld [vmem:[#allocation175_spill] sm:$0xff] }
 0x220   : > { %27113 = vmatpush3.bf16.msra.mxu0 %v38437_v53  ;;  %26251 = vmatprep.subr.bf16.mxu1 %v38708_v23  ;;  %v38716_v53 = vld [vmem:[#allocation223_spill] sm:$0xff] }
 0x221   : > { %27115 = vmatprep.subr.bf16.mxu0 %v38709_v34  ;;  %26253 = vmatpush3.bf16.msra.mxu1 %v38708_v23  ;;  %v38717_v23 = vld [vmem:[#allocation226_spill] sm:$0xff] }
 0x222   : > { %24424 = vmatmul.mubr.f32.gmra.mrb[6].mxu0 %v38710_v12  ;;  %22267 = vmatmul.mubr.f32.gmra.mrb[8].mxu1 %v38711_v24  ;;  %v38718_v24 = vld [vmem:[#allocation322_spill] sm:$0xff] }
 0x223   : > { %24426 = vmatprep.mubr.f32.mxu0 %v38712_v58  ;;  %22269 = vmatprep.mubr.f32.mxu1 %v38713_v49  ;;  %v38719_v49 = vld [vmem:[#allocation179_spill] sm:$0xff] }
 0x224   : > { %27117 = vmatpush3.bf16.msra.mxu0 %v38709_v34  ;;  %26255 = vmatprep.subr.bf16.mxu1 %v38714_v1  ;;  %v38720_v34 = vld [vmem:[#allocation228_spill] sm:$0xff] }
 0x225   : > { %27119 = vmatprep.subr.bf16.mxu0 %v38715_v48  ;;  %26257 = vmatpush3.bf16.msra.mxu1 %v38714_v1  ;;  %v32893_v1 = vld [vmem:[%s36498_s1 + $0x300] sm:$0xff] }
 0x226   : > { %24427 = vmatmul.mubr.f32.gmra.mrb[8].mxu0 %v38716_v53  ;;  %22270 = vmatmul.mubr.f32.gmra.mrb[10].mxu1 %v32301_v46  ;;  %v38723_v46 = vld [vmem:[#allocation181_spill] sm:$0xff]  ;;  %v12635_v0 = vand.u32 4294901760, %v32893_v1 }
 0x227   : > { %24429 = vmatprep.mubr.f32.mxu0 %v38717_v23  ;;  %22272 = vmatprep.mubr.f32.mxu1 %v32307_v44  ;;  %v32898_v44 = vld [vmem:[%s36498_s1 + $0x308] sm:$0xff] }
 0x228   : > { %27121 = vmatpush3.bf16.msra.mxu0 %v38715_v48  ;;  %26259 = vmatprep.subr.bf16.mxu1 %v38718_v24  ;;  %v38721_v48 = vld [vmem:[#allocation230_spill] sm:$0xff]  ;;  %v12638_v52 = vand.u32 4294901760, %v32898_v44 }
 0x229   : > { %27123 = vmatprep.subr.bf16.mxu0 %v38719_v49  ;;  %26261 = vmatpush3.bf16.msra.mxu1 %v38718_v24  ;;  %v38722_v24 = vld [vmem:[#allocation332_spill] sm:$0xff] }
 0x22a   : > { %24430 = vmatmul.mubr.f32.gmra.mrb[10].mxu0 %v38720_v34  ;;  %22273 = vmatmul.mubr.f32.gmra.mrb[12].mxu1 %v32319_v19  ;;  %v26266_v19 = vpack.c.bf16 %v32514_v22, %v32509_v60  ;;  %v32916_v6 = vpack.c.bf16 %v12638_v52, %v12635_v0  ;;  %v38749_v22 = vld [vmem:[#allocation18_spill] sm:$0xff] }
 0x22b   : > { %24432 = vmatprep.mubr.f32.mxu0 %v38721_v48  ;;  %22275 = vmatprep.mubr.f32.mxu1 %v32348_v7  ;;  %v38725_v7 = vld [vmem:[#allocation249_spill] sm:$0xff] }
 0x22c   : > { %27125 = vmatpush3.bf16.msra.mxu0 %v38719_v49  ;;  %26263 = vmatprep.subr.bf16.mxu1 %v38722_v24  ;;  %v38726_v49 = vld [vmem:[#allocation184_spill] sm:$0xff]  ;;  %38727 = vst [vmem:[#allocation314_spill] sm:$0xff] %v32916_v6 }
 0x22d   : > { %27127 = vmatprep.subr.bf16.mxu0 %v38723_v46  ;;  %26265 = vmatpush3.bf16.msra.mxu1 %v38722_v24  ;;  %v38728_v24 = vld [vmem:[#allocation253_spill] sm:$0xff] }
 0x22e   : > { %24433 = vmatmul.mubr.f32.gmra.mrb[12].mxu0 %v38724_v17  ;;  %22276 = vmatmul.mubr.f32.gmra.mrb[14].mxu1 %v32354_v51  ;;  %v38730_v51 = vld [vmem:[#allocation15_spill] sm:$0xff] }
 0x22f   : > { %24435 = vmatprep.mubr.f32.mxu0 %v38725_v7  ;;  %22278 = vmatprep.mubr.f32.mxu1 %v32371_v32  ;;  %v38733_v32 = vld [vmem:[#allocation260_spill] sm:$0xff] }
 0x230   : > { %27129 = vmatpush3.bf16.msra.mxu0 %v38723_v46  ;;  %26267 = vmatprep.subr.bf16.mxu1 %v26266_v19  ;;  %v38731_v46 = vld [vmem:[#allocation256_spill] sm:$0xff] }
 0x231   : > { %27131 = vmatprep.subr.bf16.mxu0 %v38726_v49  ;;  %26269 = vmatpush3.bf16.msra.mxu1 %v26266_v19  ;;  %v38732_v19 = vld [vmem:[#allocation259_spill] sm:$0xff] }
 0x232   : > { %24436 = vmatmul.mubr.f32.gmra.mrb[14].mxu0 %v38728_v24  ;;  %22279 = vmatmul.mubr.f32.gmra.mrb[16].mxu1 %v32395_v29  ;;  %v38734_v29 = vld [vmem:[#allocation108_spill] sm:$0xff] }
 0x233   : > { %24438 = vmatprep.mubr.f32.mxu0 %v38729_v28  ;;  %22281 = vmatprep.mubr.f32.mxu1 %v32435_v39  ;;  %v38736_v39 = vld [vmem:[#allocation127_spill] sm:$0xff] }
 0x234   : > { %27133 = vmatpush3.bf16.msra.mxu0 %v38726_v49  ;;  %26271 = vmatprep.subr.bf16.mxu1 %v38730_v51  ;;  %v38735_v49 = vld [vmem:[#allocation265_spill] sm:$0xff] }
 0x235   : > { %27135 = vmatprep.subr.bf16.mxu0 %v32916_v6 }
 0x236   : > { %24439 = vmatmul.mubr.f32.gmra.mrb[16].mxu0 %v38731_v46  ;;  %22282 = vmatmul.mubr.f32.gmra.mrb[18].mxu1 %v32555_v35  ;;  %v38737_v35 = vld [vmem:[#allocation269_spill] sm:$0xff] }
 0x237   : > { %24441 = vmatprep.mubr.f32.mxu0 %v38732_v19  ;;  %22284 = vmatprep.mubr.f32.mxu1 %v32558_v42  ;;  %v38738_v42 = vld [vmem:[#allocation272_spill] sm:$0xff] }
 0x23a   : > { %24442 = vmatmul.mubr.f32.gmra.mrb[18].mxu0 %v38733_v32  ;;  %22285 = vmatmul.mubr.f32.gmra.mrb[20].mxu1 %v32597_v62  ;;  %v38739_v62 = vld [vmem:[#allocation278_spill] sm:$0xff] }
 0x23b   : > { %24444 = vmatprep.mubr.f32.mxu0 %v38734_v29  ;;  %22287 = vmatprep.mubr.f32.mxu1 %v32600_v5  ;;  %v38740_v5 = vld [vmem:[#allocation280_spill] sm:$0xff] }
 0x23e   : > { %24445 = vmatmul.mubr.f32.gmra.mrb[20].mxu0 %v38735_v49  ;;  %22288 = vmatmul.mubr.f32.gmra.mrb[22].mxu1 %v32631_v9  ;;  %v38741_v9 = vld [vmem:[#allocation285_spill] sm:$0xff] }
 0x23f   : > { %24447 = vmatprep.mubr.f32.mxu0 %v38736_v39  ;;  %22290 = vmatprep.mubr.f32.mxu1 %v32634_v50  ;;  %v38742_v50 = vld [vmem:[#allocation287_spill] sm:$0xff] }
 0x242   : > { %24448 = vmatmul.mubr.f32.gmra.mrb[22].mxu0 %v38737_v35  ;;  %22291 = vmatmul.mubr.f32.gmra.mrb[24].mxu1 %v32665_v14  ;;  %v38743_v14 = vld [vmem:[#allocation292_spill] sm:$0xff] }
 0x243   : > { %24450 = vmatprep.mubr.f32.mxu0 %v38738_v42  ;;  %22293 = vmatprep.mubr.f32.mxu1 %v32668_v41  ;;  %v19020_v41 = vld [vmem:[%s36498_s1 + $0x310] sm:$0xff] }
 0x246   : > { %24451 = vmatmul.mubr.f32.gmra.mrb[24].mxu0 %v38739_v62  ;;  %22294 = vmatmul.mubr.f32.gmra.mrb[26].mxu1 %v32699_v4  ;;  %v19021_v4 = vld [vmem:[%s36498_s1 + $0x318] sm:$0xff] }
 0x247   : > { %24453 = vmatprep.mubr.f32.mxu0 %v38740_v5  ;;  %22296 = vmatprep.mubr.f32.mxu1 %v32702_v10  ;;  %v38744_v10 = vld [vmem:[#allocation295_spill] sm:$0xff]  ;;  %v12644_v26 = vand.u32 4294901760, %v19021_v4 }
 0x24a   : > { %24454 = vmatmul.mubr.f32.gmra.mrb[26].mxu0 %v38741_v9  ;;  %22297 = vmatmul.mubr.f32.gmra.mrb[28].mxu1 %v32730_v21  ;;  %v12641_v21 = vand.u32 4294901760, %v19020_v41 }
 0x24b   : > { %24456 = vmatprep.mubr.f32.mxu0 %v38742_v50  ;;  %22299 = vmatprep.mubr.f32.mxu1 %v32733_v56  ;;  %v38747_v56 = vld [vmem:[#allocation327_spill] sm:$0xff] }
 0x24c   : > { %v32975_v60 = vpack.c.bf16 %v12644_v26, %v12641_v21 }
 0x24e   : > { %24457 = vmatmul.mubr.f32.gmra.mrb[28].mxu0 %v38743_v14  ;;  %22300 = vmatmul.mubr.f32.gmra.mrb[30].mxu1 %v32761_v37  ;;  %v38748_v37 = vld [vmem:[#allocation331_spill] sm:$0xff]  ;;  %38750 = vst [vmem:[#allocation174_spill] sm:$0xff] %v32975_v60 }
 0x24f   : > { %24459 = vmatprep.mubr.f32.mxu0 %v38744_v10  ;;  %22334 = vmatprep.mubr.f32.mxu1 %v38745_v63  ;;  %v12647_v63 = vand.u32 4294901760, %v32964_v61  ;;  %v12650_v10 = vand.u32 4294901760, %v32969_v36 }
 0x252   : > { %24460 = vmatmul.mubr.f32.gmra.mrb[30].mxu0 %v38746_v30  ;;  %22335 = vmatmul.mubr.f32.vlgmr.msra.gmra.mrb[0].mxu1 %v38747_v56  ;;  %v32978_v56 = vsub.f32 %v32893_v1, %v12635_v0  ;;  %v32981_v30 = vsub.f32 %v32898_v44, %v12638_v52  ;;  %v32995_v0 = vld [vmem:[%s36498_s1 + $0x338] sm:$0xff]  ;;  %v38754_v52 = vld [vmem:[#allocation336_spill] sm:$0xff]  ;;  %v33006_v1 = vpack.c.bf16 %v12650_v10, %v12647_v63 }
 0x253   : > { %24494 = vmatprep.mubr.f32.mxu0 %v38699_v55  ;;  %26273 = vmatpush3.bf16.msra.mxu1 %v38730_v51  ;;  %v38753_v55 = vld [vmem:[#allocation333_spill] sm:$0xff]  ;;  %v38756_v51 = vld [vmem:[#allocation347_spill] sm:$0xff] }
 0x254   : > { %22337 = vmatprep.mubr.f32.mxu1 %v38748_v37  ;;  %26275 = vmatprep.subr.bf16.mxu1 %v38749_v22  ;;  %38751 = vst [vmem:[#allocation318_spill] sm:$0xff] %v32978_v56  ;;  %38752 = vst [vmem:[#allocation175_spill] sm:$0xff] %v32981_v30  ;;  %v32990_v37 = vld [vmem:[%s36498_s1 + $0x330] sm:$0xff]  ;;  %v32999_v44 = vpack.c.bf16 %v32981_v30, %v32978_v56 }
 0x255   : > { %38755 = vst [vmem:[#allocation322_spill] sm:$0xff] %v33006_v1 }
 0x256   : > { %24495 = vmatmul.mubr.f32.vlgmr.msra.gmra.mrb[0].mxu0 %v38700_v3  ;;  %22338 = vmatmul.mubr.f32.gmra.mrb[2].mxu1 %v38753_v55  ;;  %v38757_v3 = vld [vmem:[#allocation8_spill] sm:$0xff]  ;;  %v33026_v55 = vsub.f32 %v19020_v41, %v12641_v21  ;;  %v33050_v21 = vld [vmem:[%s36498_s1 + $0x358] sm:$0xff] }
 0x257   : > { %27137 = vmatpush3.bf16.msra.mxu0 %v32916_v6  ;;  %24497 = vmatprep.mubr.f32.mxu0 %v38701_v45  ;;  %v33015_v45 = vld [vmem:[%s36498_s1 + $0x340] sm:$0xff]  ;;  %v38761_v6 = vand.u32 4294901760, %v32995_v0  ;;  %v33045_v41 = vld [vmem:[%s36498_s1 + $0x350] sm:$0xff] }
 0x258   : > { %22340 = vmatprep.mubr.f32.mxu1 %v38754_v52  ;;  %27139 = vmatprep.subr.bf16.mxu0 %v32975_v60  ;;  %v33020_v52 = vld [vmem:[%s36498_s1 + $0x348] sm:$0xff]  ;;  %38758 = vst [vmem:[#allocation179_spill] sm:$0xff] %v33026_v55 }
 0x259   : > { %26277 = vmatpush3.bf16.msra.mxu1 %v38749_v22 }
 0x25a   : > { %24498 = vmatmul.mubr.f32.gmra.mrb[2].mxu0 %v38702_v40  ;;  %22341 = vmatmul.mubr.f32.gmra.mrb[4].mxu1 %v38756_v51  ;;  %v33028_v40 = vsub.f32 %v19021_v4, %v12644_v26  ;;  %v38760_v51 = vand.u32 4294901760, %v32990_v37  ;;  %v33089_v26 = vsub.f32 %v32964_v61, %v12647_v63  ;;  %v33114_v61 = vld [vmem:[%s36498_s1 + $0x378] sm:$0xff] }
 0x25b   : > { %24500 = vmatprep.mubr.f32.mxu0 %v38703_v18  ;;  %27141 = vmatpush3.bf16.msra.mxu0 %v32975_v60  ;;  %v37483_v18 = vand.u32 4294901760, %v33015_v45  ;;  %v37482_v60 = vand.u32 4294901760, %v33020_v52 }
 0x25c   : > { %22343 = vmatprep.mubr.f32.mxu1 %v32334_v16  ;;  %26279 = vmatprep.subr.bf16.mxu1 %v38757_v3  ;;  %38759 = vst [vmem:[#allocation332_spill] sm:$0xff] %v33028_v40  ;;  %v33036_v22 = vpack.c.bf16 %v38761_v6, %v38760_v51  ;;  %v33054_v6 = vpack.c.bf16 %v33028_v40, %v33026_v55  ;;  %v38763_v51 = vld [vmem:[#allocation196_spill] sm:$0xff]  ;;  %38766 = vst [vmem:[#allocation8_spill] sm:$0xff] %v33089_v26 }
 0x25d   : > { %27143 = vmatprep.subr.bf16.mxu0 %v33006_v1  ;;  %26281 = vmatpush3.bf16.msra.mxu1 %v38757_v3  ;;  %v33066_v4 = vpack.c.bf16 %v37482_v60, %v37483_v18  ;;  %v38765_v60 = vld [vmem:[#allocation12_spill] sm:$0xff]  ;;  %v38778_v18 = vld [vmem:[#allocation27_spill] sm:$0xff] }
 0x25e   : > { %38762 = vst [vmem:[#allocation181_spill] sm:$0xff] %v33036_v22  ;;  %24501 = vmatmul.mubr.f32.gmra.mrb[4].mxu0 %v38704_v59  ;;  %22344 = vmatmul.mubr.f32.gmra.mrb[6].mxu1 %v32337_v25  ;;  %v33073_v59 = vld [vmem:[%s36498_s1 + $0x360] sm:$0xff] }
 0x25f   : > { %24503 = vmatprep.mubr.f32.mxu0 %v38706_v8  ;;  %22346 = vmatprep.mubr.f32.mxu1 %v32340_v13  ;;  %38764 = vst [vmem:[#allocation184_spill] sm:$0xff] %v33066_v4  ;;  %v33092_v13 = vsub.f32 %v32969_v36, %v12650_v10  ;;  %v33109_v10 = vld [vmem:[%s36498_s1 + $0x370] sm:$0xff]  ;;  %v38771_v36 = vld [vmem:[#allocation221_spill] sm:$0xff]  ;;  %v38772_v63 = vand.u32 4294901760, %v33073_v59 }
 0x260   : > { %27145 = vmatpush3.bf16.msra.mxu0 %v33006_v1  ;;  %26283 = vmatprep.subr.bf16.mxu1 %v38763_v51  ;;  %v33078_v1 = vld [vmem:[%s36498_s1 + $0x368] sm:$0xff] }
 0x261   : > { %27147 = vmatprep.subr.bf16.mxu0 %v33036_v22  ;;  %26285 = vmatpush3.bf16.msra.mxu1 %v38763_v51  ;;  %38767 = vst [vmem:[#allocation196_spill] sm:$0xff] %v33092_v13 }
 0x262   : > { %24504 = vmatmul.mubr.f32.gmra.mrb[6].mxu0 %v38710_v12  ;;  %22347 = vmatmul.mubr.f32.gmra.mrb[8].mxu1 %v32400_v57  ;;  %v38769_v12 = vand.u32 4294901760, %v33050_v21 }
 0x263   : > { %24506 = vmatprep.mubr.f32.mxu0 %v38712_v58  ;;  %22349 = vmatprep.mubr.f32.mxu1 %v32403_v20  ;;  %v38768_v58 = vand.u32 4294901760, %v33045_v41 }
 0x264   : > { %27149 = vmatpush3.bf16.msra.mxu0 %v33036_v22  ;;  %26287 = vmatprep.subr.bf16.mxu1 %v38765_v60 }
 0x265   : > { %27151 = vmatprep.subr.bf16.mxu0 %v33066_v4  ;;  %26289 = vmatpush3.bf16.msra.mxu1 %v38765_v60  ;;  %v33100_v22 = vpack.c.bf16 %v38769_v12, %v38768_v58  ;;  %v33118_v12 = vpack.c.bf16 %v33092_v13, %v33089_v26  ;;  %v38773_v58 = vand.u32 4294901760, %v33078_v1 }
 0x266   : > { %24507 = vmatmul.mubr.f32.gmra.mrb[8].mxu0 %v38716_v53  ;;  %22350 = vmatmul.mubr.f32.gmra.mrb[10].mxu1 %v32445_v2  ;;  %v38774_v53 = vand.u32 4294901760, %v32978_v56 }
 0x267   : > { %38770 = vst [vmem:[#allocation12_spill] sm:$0xff] %v33100_v22  ;;  %24509 = vmatprep.mubr.f32.mxu0 %v38717_v23  ;;  %22352 = vmatprep.mubr.f32.mxu1 %v32453_v31  ;;  %v33128_v8 = vpack.c.bf16 %v38773_v58, %v38772_v63  ;;  %v38775_v31 = vand.u32 4294901760, %v32981_v30  ;;  %v38776_v63 = vld [vmem:[#allocation371_spill] sm:$0xff]  ;;  %v38777_v58 = vld [vmem:[#allocation372_spill] sm:$0xff]  ;;  %v38779_v23 = vand.u32 4294901760, %v32990_v37 }
 0x268   : > { %27153 = vmatpush3.bf16.msra.mxu0 %v33066_v4  ;;  %26291 = vmatprep.subr.bf16.mxu1 %v38771_v36  ;;  %v13039_v4 = vsub.f32 %v32978_v56, %v38774_v53  ;;  %v38781_v56 = vand.u32 4294901760, %v32995_v0 }
 0x269   : > { %27155 = vmatprep.subr.bf16.mxu0 %v33100_v22  ;;  %26293 = vmatpush3.bf16.msra.mxu1 %v38771_v36  ;;  %v13046_v2 = vsub.f32 %v32981_v30, %v38775_v31  ;;  %v33149_v53 = vsub.f32 %v32990_v37, %v38779_v23  ;;  %v38785_v37 = vld [vmem:[#allocation377_spill] sm:$0xff]  ;;  %v38786_v23 = vld [vmem:[#allocation378_spill] sm:$0xff] }
 0x26a   : > { %24510 = vmatmul.mubr.f32.gmra.mrb[10].mxu0 %v38720_v34  ;;  %22353 = vmatmul.mubr.f32.gmra.mrb[12].mxu1 %v38776_v63  ;;  %v33154_v31 = vsub.f32 %v32995_v0, %v38781_v56  ;;  %v38784_v34 = vand.u32 4294901760, %v33114_v61  ;;  %v38787_v0 = vld [vmem:[#allocation315_spill] sm:$0xff] }
 0x26b   : > { %24512 = vmatprep.mubr.f32.mxu0 %v38721_v48  ;;  %22355 = vmatprep.mubr.f32.mxu1 %v38777_v58  ;;  %38780 = vst [vmem:[#allocation221_spill] sm:$0xff] %v33149_v53  ;;  %v38783_v48 = vand.u32 4294901760, %v33109_v10  ;;  %v13047_v58 = vand.u32 4294901760, %v13046_v2 }
 0x26c   : > { %27157 = vmatpush3.bf16.msra.mxu0 %v33100_v22  ;;  %26295 = vmatprep.subr.bf16.mxu1 %v38778_v18  ;;  %38782 = vst [vmem:[#allocation27_spill] sm:$0xff] %v33154_v31  ;;  %v13040_v22 = vand.u32 4294901760, %v13039_v4  ;;  %v33168_v56 = vpack.c.bf16 %v33154_v31, %v33149_v53  ;;  %v38790_v4 = vld [vmem:[#allocation6_spill] sm:$0xff] }
 0x26d   : > { %27159 = vmatprep.subr.bf16.mxu0 %v33128_v8  ;;  %26297 = vmatpush3.bf16.msra.mxu1 %v38778_v18  ;;  %v33162_v30 = vpack.c.bf16 %v38784_v34, %v38783_v48  ;;  %v38788_v34 = vld [vmem:[#allocation4_spill] sm:$0xff]  ;;  %v38791_v2 = vand.u32 4294901760, %v38790_v4  ;;  %v38797_v4 = vld [vmem:[#allocation387_spill] sm:$0xff] }
 0x26e   : > { %24513 = vmatmul.mubr.f32.gmra.mrb[12].mxu0 %v38724_v17  ;;  %22356 = vmatmul.mubr.f32.gmra.mrb[14].mxu1 %v38785_v37  ;;  %v38789_v48 = vand.u32 4294901760, %v38788_v34  ;;  %v33182_v17 = vpack.c.bf16 %v13047_v58, %v13040_v22  ;;  %v38793_v34 = vand.u32 4294901760, %v33015_v45  ;;  %v38795_v22 = vand.u32 4294901760, %v33020_v52 }
 0x26f   : > { %24515 = vmatprep.mubr.f32.mxu0 %v38725_v7  ;;  %22358 = vmatprep.mubr.f32.mxu1 %v38786_v23  ;;  %v38792_v7 = vld [vmem:[#allocation384_spill] sm:$0xff] }
 0x270   : > { %27161 = vmatpush3.bf16.msra.mxu0 %v33128_v8  ;;  %26299 = vmatprep.subr.bf16.mxu1 %v38787_v0  ;;  %v33178_v63 = vpack.c.bf16 %v38791_v2, %v38789_v48  ;;  %v33193_v48 = vsub.f32 %v33015_v45, %v38793_v34  ;;  %v33198_v58 = vsub.f32 %v33020_v52, %v38795_v22  ;;  %v38799_v45 = vld [vmem:[#allocation393_spill] sm:$0xff]  ;;  %v38800_v52 = vld [vmem:[#allocation396_spill] sm:$0xff]  ;;  %v38801_v34 = vand.u32 4294901760, %v33045_v41 }
 0x271   : > { %27163 = vmatprep.subr.bf16.mxu0 %v33162_v30  ;;  %26301 = vmatpush3.bf16.msra.mxu1 %v38787_v0 }
 0x272   : > { %24516 = vmatmul.mubr.f32.gmra.mrb[14].mxu0 %v38728_v24  ;;  %22359 = vmatmul.mubr.f32.gmra.mrb[16].mxu1 %v32577_v33  ;;  %38794 = vst [vmem:[#allocation315_spill] sm:$0xff] %v33193_v48  ;;  %38796 = vst [vmem:[#allocation4_spill] sm:$0xff] %v33198_v58  ;;  %v33205_v2 = vpack.c.bf16 %v33198_v58, %v33193_v48  ;;  %v33216_v22 = vsub.f32 %v33045_v41, %v38801_v34 }
 0x273   : > { %24518 = vmatprep.mubr.f32.mxu0 %v38729_v28  ;;  %22361 = vmatprep.mubr.f32.mxu1 %v38792_v7  ;;  %v38798_v28 = vld [vmem:[#allocation390_spill] sm:$0xff] }
 0x274   : > { %27165 = vmatpush3.bf16.msra.mxu0 %v33162_v30  ;;  %26303 = vmatprep.subr.bf16.mxu1 %v33178_v63  ;;  %38802 = vst [vmem:[#allocation6_spill] sm:$0xff] %v33216_v22 }
 0x275   : > { %27167 = vmatprep.subr.bf16.mxu0 %v33182_v17 }
 0x276   : > { %24519 = vmatmul.mubr.f32.gmra.mrb[16].mxu0 %v38731_v46  ;;  %22362 = vmatmul.mubr.f32.gmra.mrb[18].mxu1 %v38797_v4  ;;  %v38803_v46 = vand.u32 4294901760, %v33050_v21 }
 0x277   : > { %24521 = vmatprep.mubr.f32.mxu0 %v38732_v19  ;;  %22364 = vmatprep.mubr.f32.mxu1 %v38798_v28  ;;  %v38805_v19 = vld [vmem:[#allocation399_spill] sm:$0xff] }
 0x278   : > { %v33221_v24 = vsub.f32 %v33050_v21, %v38803_v46  ;;  %v38807_v46 = vand.u32 4294901760, %v33073_v59  ;;  %v38809_v21 = vand.u32 4294901760, %v33078_v1 }
 0x27a   : > { %24522 = vmatmul.mubr.f32.gmra.mrb[18].mxu0 %v38733_v32  ;;  %22365 = vmatmul.mubr.f32.gmra.mrb[20].mxu1 %v38799_v45  ;;  %38804 = vst [vmem:[#allocation435_spill] sm:$0xff] %v33221_v24  ;;  %v33227_v32 = vpack.c.bf16 %v33221_v24, %v33216_v22  ;;  %v33238_v41 = vsub.f32 %v33073_v59, %v38807_v46  ;;  %v37519_v59 = vand.u32 4294901760, %v33026_v55  ;;  %v37522_v46 = vand.u32 4294901760, %v33028_v40 }
 0x27b   : > { %24524 = vmatprep.mubr.f32.mxu0 %v38734_v29  ;;  %22367 = vmatprep.mubr.f32.mxu1 %v38800_v52  ;;  %v38806_v29 = vld [vmem:[#allocation402_spill] sm:$0xff]  ;;  %v33243_v34 = vsub.f32 %v33078_v1, %v38809_v21 }
 0x27c   : > { %38808 = vst [vmem:[#allocation436_spill] sm:$0xff] %v33238_v41  ;;  %v13053_v1 = vsub.f32 %v33026_v55, %v37519_v59  ;;  %v13060_v21 = vsub.f32 %v33028_v40, %v37522_v46  ;;  %v38816_v46 = vld [vmem:[#allocation10_spill] sm:$0xff]  ;;  %v38823_v59 = vld [vmem:[#allocation363_spill] sm:$0xff] }
 0x27d   : > { %38810 = vst [vmem:[#allocation437_spill] sm:$0xff] %v33243_v34  ;;  %v38817_v40 = vand.u32 4294901760, %v38816_v46  ;;  %v38826_v46 = vld [vmem:[#allocation335_spill] sm:$0xff] }
 0x27e   : > { %24525 = vmatmul.mubr.f32.gmra.mrb[20].mxu0 %v38735_v49  ;;  %22368 = vmatmul.mubr.f32.gmra.mrb[22].mxu1 %v38805_v19  ;;  %v38814_v49 = vld [vmem:[#allocation185_spill] sm:$0xff] }
 0x27f   : > { %24527 = vmatprep.mubr.f32.mxu0 %v38736_v39  ;;  %22370 = vmatprep.mubr.f32.mxu1 %v38806_v29  ;;  %v38815_v55 = vand.u32 4294901760, %v38814_v49  ;;  %v38821_v39 = vld [vmem:[#allocation327_spill] sm:$0xff]  ;;  %v38825_v49 = vand.u32 4294901760, %v33154_v31 }
 0x282   : > { %24528 = vmatmul.mubr.f32.gmra.mrb[22].mxu0 %v38737_v35  ;;  %22371 = vmatmul.mubr.f32.gmra.mrb[24].mxu1 %v32714_v11  ;;  %v33249_v35 = vpack.c.bf16 %v33243_v34, %v33238_v41 }
 0x283   : > { %24530 = vmatprep.mubr.f32.mxu0 %v38738_v42  ;;  %22373 = vmatprep.mubr.f32.mxu1 %v32726_v47 }
 0x286   : > { %24531 = vmatmul.mubr.f32.gmra.mrb[24].mxu0 %v38739_v62  ;;  %22374 = vmatmul.mubr.f32.gmra.mrb[26].mxu1 %v32746_v54  ;;  %v13061_v62 = vand.u32 4294901760, %v13060_v21 }
 0x287   : > { %24533 = vmatprep.mubr.f32.mxu0 %v38740_v5  ;;  %22376 = vmatprep.mubr.f32.mxu1 %v32758_v43  ;;  %v26306_v5 = vpack.c.bf16 %v38817_v40, %v38815_v55  ;;  %v38824_v55 = vand.u32 4294901760, %v33149_v53 }
 0x289   : > { %v13081_v40 = vsub.f32 %v33149_v53, %v38824_v55  ;;  %v38829_v55 = vld [vmem:[#allocation368_spill] sm:$0xff] }
 0x28a   : > { %24534 = vmatmul.mubr.f32.gmra.mrb[26].mxu0 %v38741_v9  ;;  %22377 = vmatmul.mubr.f32.gmra.mrb[28].mxu1 %v32773_v15  ;;  %v38811_v9 = vld [vmem:[#allocation295_spill] sm:$0xff]  ;;  %v38822_v15 = vand.u32 4294901760, %v38821_v39  ;;  %v37535_v39 = vand.u32 4294901760, %v33198_v58 }
 0x28b   : > { %24536 = vmatprep.mubr.f32.mxu0 %v38742_v50  ;;  %22379 = vmatprep.mubr.f32.mxu1 %v32785_v38  ;;  %v38812_v50 = vld [vmem:[#allocation325_spill] sm:$0xff]  ;;  %v13054_v38 = vand.u32 4294901760, %v13053_v1  ;;  %v38834_v1 = vld [vmem:[#allocation346_spill] sm:$0xff] }
 0x28c   : > { %v38813_v42 = vand.u32 4294901760, %v38812_v50 }
 0x28e   : > { %24537 = vmatmul.mubr.f32.gmra.mrb[28].mxu0 %v38743_v14  ;;  %22380 = vmatmul.mubr.f32.gmra.mrb[30].mxu1 %v32797_v27  ;;  %v38818_v14 = vand.u32 4294901760, %v33089_v26 }
 0x28f   : > { %24539 = vmatprep.mubr.f32.mxu0 %v38811_v9  ;;  %22414 = vmatprep.mubr.f32.mxu1 %v38813_v42  ;;  %v38819_v9 = vand.u32 4294901760, %v33092_v13  ;;  %v38820_v42 = vld [vmem:[#allocation299_spill] sm:$0xff] }
 0x290   : > { %v13067_v27 = vsub.f32 %v33089_v26, %v38818_v14  ;;  %v13088_v14 = vsub.f32 %v33154_v31, %v38825_v49  ;;  %v38832_v31 = vld [vmem:[#allocation14_spill] sm:$0xff] }
 0x291   : > { %v13074_v50 = vsub.f32 %v33092_v13, %v38819_v9  ;;  %v27170_v9 = vpack.c.bf16 %v13061_v62, %v13054_v38  ;;  %v13082_v62 = vand.u32 4294901760, %v13081_v40  ;;  %v38837_v40 = vld [vmem:[#allocation353_spill] sm:$0xff]  ;;  %v38959_v26 = vld [vmem:[#allocation398_spill] sm:$0xff] }
 0x292   : > { %24540 = vmatmul.mubr.f32.gmra.mrb[30].mxu0 %v38820_v42  ;;  %22415 = vmatmul.mubr.f32.vlgmr.msra.gmra.mrb[0].mxu1 %v38822_v15  ;;  %v13068_v15 = vand.u32 4294901760, %v13067_v27  ;;  %v38827_v42 = vld [vmem:[#allocation366_spill] sm:$0xff]  ;;  %v13089_v38 = vand.u32 4294901760, %v13088_v14  ;;  %v38835_v27 = vand.u32 4294901760, %v33193_v48 }
 0x293   : > { %24574 = vmatprep.mubr.f32.mxu0 %v38823_v59  ;;  %26305 = vmatpush3.bf16.msra.mxu1 %v33178_v63  ;;  %v13075_v21 = vand.u32 4294901760, %v13074_v50  ;;  %v38828_v63 = vld [vmem:[#allocation344_spill] sm:$0xff]  ;;  %v38838_v14 = vld [vmem:[#allocation370_spill] sm:$0xff] }
 0x294   : > { %22417 = vmatprep.mubr.f32.mxu1 %v38826_v46  ;;  %26307 = vmatprep.subr.bf16.mxu1 %v26306_v5  ;;  %v38830_v59 = vld [vmem:[#allocation208_spill] sm:$0xff]  ;;  %v38833_v46 = vand.u32 4294901760, %v38832_v31  ;;  %v13095_v50 = vsub.f32 %v33193_v48, %v38835_v27  ;;  %v38841_v27 = vld [vmem:[#allocation21_spill] sm:$0xff]  ;;  %v27178_v13 = vpack.c.bf16 %v13089_v38, %v13082_v62  ;;  %v38848_v38 = vand.u32 4294901760, %v33114_v61 }
 0x295   : > { %v38831_v49 = vand.u32 4294901760, %v38830_v59  ;;  %v27174_v31 = vpack.c.bf16 %v13075_v21, %v13068_v15  ;;  %v38845_v21 = vand.u32 4294901760, %v33221_v24 }
 0x296   : > { %24575 = vmatmul.mubr.f32.vlgmr.msra.gmra.mrb[0].mxu0 %v38827_v42  ;;  %22418 = vmatmul.mubr.f32.gmra.mrb[2].mxu1 %v38828_v63  ;;  %v38842_v42 = vand.u32 4294901760, %v38841_v27  ;;  %v13096_v63 = vand.u32 4294901760, %v13095_v50  ;;  %v33339_v50 = vsub.f32 %v33114_v61, %v38848_v38  ;;  %v38852_v27 = vld [vmem:[#allocation376_spill] sm:$0xff]  ;;  %v38858_v61 = vand.u32 4294901760, %v33238_v41 }
 0x297   : > { %27169 = vmatpush3.bf16.msra.mxu0 %v33182_v17  ;;  %24577 = vmatprep.mubr.f32.mxu0 %v38829_v55  ;;  %v26310_v53 = vpack.c.bf16 %v38833_v46, %v38831_v49  ;;  %v13102_v17 = vsub.f32 %v33198_v58, %v37535_v39  ;;  %v38836_v46 = vld [vmem:[#allocation369_spill] sm:$0xff]  ;;  %v38843_v39 = vld [vmem:[#allocation356_spill] sm:$0xff]  ;;  %v38923_v58 = vld [vmem:[#allocation422_spill] sm:$0xff] }
 0x298   : > { %22420 = vmatprep.mubr.f32.mxu1 %v38834_v1  ;;  %27171 = vmatprep.subr.bf16.mxu0 %v27170_v9  ;;  %v38839_v49 = vld [vmem:[#allocation17_spill] sm:$0xff]  ;;  %38849 = vst [vmem:[#allocation185_spill] sm:$0xff] %v33339_v50  ;;  %v13123_v38 = vsub.f32 %v33238_v41, %v38858_v61  ;;  %v38962_v1 = vld [vmem:[#allocation180_spill] sm:$0xff] }
 0x299   : > { %26309 = vmatpush3.bf16.msra.mxu1 %v26306_v5  ;;  %v38840_v55 = vand.u32 4294901760, %v38839_v49  ;;  %v13103_v59 = vand.u32 4294901760, %v13102_v17  ;;  %v38844_v5 = vand.u32 4294901760, %v33216_v22  ;;  %v38850_v17 = vld [vmem:[#allocation375_spill] sm:$0xff]  ;;  %v38851_v49 = vld [vmem:[#allocation357_spill] sm:$0xff] }
 0x29a   : > { %24578 = vmatmul.mubr.f32.gmra.mrb[2].mxu0 %v38836_v46  ;;  %22421 = vmatmul.mubr.f32.gmra.mrb[4].mxu1 %v38837_v40  ;;  %v13124_v61 = vand.u32 4294901760, %v13123_v38  ;;  %v38870_v41 = vld [vmem:[#allocation177_spill] sm:$0xff]  ;;  %v38961_v40 = vld [vmem:[#allocation404_spill] sm:$0xff] }
 0x29b   : > { %24580 = vmatprep.mubr.f32.mxu0 %v38838_v14  ;;  %27173 = vmatpush3.bf16.msra.mxu0 %v27170_v9  ;;  %v26314_v48 = vpack.c.bf16 %v38842_v42, %v38840_v55  ;;  %v13109_v15 = vsub.f32 %v33216_v22, %v38844_v5  ;;  %v13116_v14 = vsub.f32 %v33221_v24, %v38845_v21  ;;  %v38846_v55 = vand.u32 4294901760, %v33109_v10  ;;  %v38854_v5 = vld [vmem:[#allocation316_spill] sm:$0xff]  ;;  %v38856_v42 = vld [vmem:[#allocation317_spill] sm:$0xff] }
 0x29c   : > { %22423 = vmatprep.mubr.f32.mxu1 %v38843_v39  ;;  %26311 = vmatprep.subr.bf16.mxu1 %v26310_v53  ;;  %v38855_v21 = vand.u32 4294901760, %v38854_v5  ;;  %v27182_v9 = vpack.c.bf16 %v13103_v59, %v13096_v63  ;;  %v38860_v22 = vld [vmem:[#allocation381_spill] sm:$0xff]  ;;  %v38862_v63 = vld [vmem:[#allocation190_spill] sm:$0xff]  ;;  %v38863_v59 = vld [vmem:[#allocation364_spill] sm:$0xff] }
 0x29d   : > { %27175 = vmatprep.subr.bf16.mxu0 %v27174_v31  ;;  %26313 = vmatpush3.bf16.msra.mxu1 %v26310_v53  ;;  %v33334_v62 = vsub.f32 %v33109_v10, %v38846_v55  ;;  %v38853_v53 = vld [vmem:[#allocation358_spill] sm:$0xff]  ;;  %v38857_v10 = vand.u32 4294901760, %v38856_v42  ;;  %v13110_v46 = vand.u32 4294901760, %v13109_v15  ;;  %v13117_v24 = vand.u32 4294901760, %v13116_v14  ;;  %v38866_v15 = vld [vmem:[#allocation320_spill] sm:$0xff]  ;;  %v38960_v39 = vld [vmem:[#allocation403_spill] sm:$0xff] }
 0x29e   : > { %24581 = vmatmul.mubr.f32.gmra.mrb[4].mxu0 %v38850_v17  ;;  %22424 = vmatmul.mubr.f32.gmra.mrb[6].mxu1 %v38851_v49  ;;  %v38861_v42 = vld [vmem:[#allocation206_spill] sm:$0xff]  ;;  %v38957_v49 = vld [vmem:[#allocation392_spill] sm:$0xff] }
 0x29f   : > { %38847 = vst [vmem:[#allocation325_spill] sm:$0xff] %v33334_v62  ;;  %24583 = vmatprep.mubr.f32.mxu0 %v38852_v27  ;;  %22426 = vmatprep.mubr.f32.mxu1 %v38853_v53  ;;  %v26318_v55 = vpack.c.bf16 %v38857_v10, %v38855_v21  ;;  %v38859_v27 = vand.u32 4294901760, %v33243_v34  ;;  %v38867_v21 = vand.u32 4294901760, %v38866_v15  ;;  %v38955_v53 = vld [vmem:[#allocation386_spill] sm:$0xff] }
 0x2a0   : > { %27177 = vmatpush3.bf16.msra.mxu0 %v27174_v31  ;;  %26315 = vmatprep.subr.bf16.mxu1 %v26314_v48  ;;  %v37540_v31 = vand.u32 4294901760, %v33334_v62 }
 0x2a1   : > { %27179 = vmatprep.subr.bf16.mxu0 %v27178_v13  ;;  %26317 = vmatpush3.bf16.msra.mxu1 %v26314_v48  ;;  %v13130_v17 = vsub.f32 %v33243_v34, %v38859_v27  ;;  %v38864_v48 = vld [vmem:[#allocation319_spill] sm:$0xff]  ;;  %v27186_v27 = vpack.c.bf16 %v13117_v24, %v13110_v46  ;;  %v38873_v24 = vld [vmem:[#allocation328_spill] sm:$0xff] }
 0x2a2   : > { %24584 = vmatmul.mubr.f32.gmra.mrb[6].mxu0 %v38860_v22  ;;  %22427 = vmatmul.mubr.f32.gmra.mrb[8].mxu1 %v38861_v42  ;;  %v38865_v14 = vand.u32 4294901760, %v38864_v48  ;;  %v13137_v22 = vsub.f32 %v33334_v62, %v37540_v31  ;;  %v38871_v48 = vld [vmem:[#allocation388_spill] sm:$0xff]  ;;  %v38874_v46 = vand.u32 4294901760, %v38873_v24  ;;  %v38949_v42 = vld [vmem:[#allocation203_spill] sm:$0xff] }
 0x2a3   : > { %24586 = vmatprep.mubr.f32.mxu0 %v38862_v63  ;;  %22429 = vmatprep.mubr.f32.mxu1 %v38863_v59  ;;  %v13131_v5 = vand.u32 4294901760, %v13130_v17  ;;  %v38868_v63 = vand.u32 4294901760, %v33339_v50  ;;  %v38875_v17 = vld [vmem:[#allocation329_spill] sm:$0xff]  ;;  %v38877_v31 = vld [vmem:[#allocation216_spill] sm:$0xff]  ;;  %v38948_v59 = vld [vmem:[#allocation359_spill] sm:$0xff] }
 0x2a4   : > { %27181 = vmatpush3.bf16.msra.mxu0 %v27178_v13  ;;  %26319 = vmatprep.subr.bf16.mxu1 %v26318_v55  ;;  %v26322_v10 = vpack.c.bf16 %v38867_v21, %v38865_v14  ;;  %v38869_v13 = vld [vmem:[#allocation204_spill] sm:$0xff]  ;;  %v38872_v14 = vld [vmem:[#allocation178_spill] sm:$0xff]  ;;  %v13138_v21 = vand.u32 4294901760, %v13137_v22  ;;  %v38885_v22 = vld [vmem:[#allocation235_spill] sm:$0xff] }
 0x2a5   : > { %27183 = vmatprep.subr.bf16.mxu0 %v27182_v9  ;;  %26321 = vmatpush3.bf16.msra.mxu1 %v26318_v55  ;;  %v13144_v34 = vsub.f32 %v33339_v50, %v38868_v63  ;;  %v38876_v55 = vand.u32 4294901760, %v38875_v17  ;;  %v27190_v15 = vpack.c.bf16 %v13131_v5, %v13124_v61  ;;  %v38888_v61 = vld [vmem:[#allocation383_spill] sm:$0xff] }
 0x2a6   : > { %24587 = vmatmul.mubr.f32.gmra.mrb[8].mxu0 %v38869_v13  ;;  %22430 = vmatmul.mubr.f32.gmra.mrb[10].mxu1 %v38870_v41  ;;  %v38878_v13 = vld [vmem:[#allocation182_spill] sm:$0xff] }
 0x2a7   : > { %24589 = vmatprep.mubr.f32.mxu0 %v38871_v48  ;;  %22432 = vmatprep.mubr.f32.mxu1 %v38872_v14  ;;  %v26326_v38 = vpack.c.bf16 %v38876_v55, %v38874_v46  ;;  %v13145_v63 = vand.u32 4294901760, %v13144_v34  ;;  %v38879_v41 = vld [vmem:[#allocation394_spill] sm:$0xff]  ;;  %v38880_v48 = vld [vmem:[#allocation183_spill] sm:$0xff]  ;;  %v38891_v55 = vld [vmem:[#allocation408_spill] sm:$0xff] }
 0x2a8   : > { %27185 = vmatpush3.bf16.msra.mxu0 %v27182_v9  ;;  %26323 = vmatprep.subr.bf16.mxu1 %v26322_v10  ;;  %v38881_v9 = vld [vmem:[#allocation373_spill] sm:$0xff]  ;;  %v38883_v14 = vld [vmem:[#allocation374_spill] sm:$0xff]  ;;  %v38886_v34 = vld [vmem:[#allocation191_spill] sm:$0xff] }
 0x2a9   : > { %27187 = vmatprep.subr.bf16.mxu0 %v27186_v27  ;;  %26325 = vmatpush3.bf16.msra.mxu1 %v26322_v10  ;;  %v38882_v24 = vand.u32 4294901760, %v38881_v9  ;;  %v38884_v17 = vand.u32 4294901760, %v38883_v14  ;;  %v27194_v5 = vpack.c.bf16 %v13145_v63, %v13138_v21  ;;  %v38887_v10 = vld [vmem:[#allocation400_spill] sm:$0xff]  ;;  %v38890_v14 = vld [vmem:[#allocation205_spill] sm:$0xff]  ;;  %v38893_v21 = vld [vmem:[#allocation15_spill] sm:$0xff] }
 0x2aa   : > { %24590 = vmatmul.mubr.f32.gmra.mrb[10].mxu0 %v38877_v31  ;;  %22433 = vmatmul.mubr.f32.gmra.mrb[12].mxu1 %v38878_v13  ;;  %v38894_v63 = vld [vmem:[#allocation173_spill] sm:$0xff]  ;;  %v29511_v9 = vld [vmem:[%s29796_s27 + $0x180] sm:$0xff] }
 0x2ab   : > { %24592 = vmatprep.mubr.f32.mxu0 %v38879_v41  ;;  %22435 = vmatprep.mubr.f32.mxu1 %v38880_v48  ;;  %v26330_v46 = vpack.c.bf16 %v38884_v17, %v38882_v24  ;;  %v33400_v24 = vand.u32 4294901760, %v29511_v9  ;;  %v38897_v17 = vld [vmem:[#allocation414_spill] sm:$0xff]  ;;  %v38902_v41 = vld [vmem:[#allocation421_spill] sm:$0xff]  ;;  %v38920_v48 = vld [vmem:[#allocation432_spill] sm:$0xff] }
 0x2ac   : > { %27189 = vmatpush3.bf16.msra.mxu0 %v27186_v27  ;;  %26327 = vmatprep.subr.bf16.mxu1 %v26326_v38  ;;  %v38889_v27 = vld [vmem:[#allocation405_spill] sm:$0xff] }
 0x2ad   : > { %27191 = vmatprep.subr.bf16.mxu0 %v27190_v15  ;;  %26329 = vmatpush3.bf16.msra.mxu1 %v26326_v38  ;;  %v38892_v38 = vld [vmem:[#allocation389_spill] sm:$0xff]  ;;  %38896 = vst [vmem:[#allocation10_spill] sm:$0xff] %v33400_v24  ;;  %v33413_v31 = vsub.f32 %v29511_v9, %v33400_v24 }
 0x2ae   : > { %24593 = vmatmul.mubr.f32.gmra.mrb[12].mxu0 %v38885_v22  ;;  %22436 = vmatmul.mubr.f32.gmra.mrb[14].mxu1 %v38886_v34  ;;  %v38901_v22 = vld [vmem:[#allocation236_spill] sm:$0xff]  ;;  %v38918_v34 = vld [vmem:[#allocation431_spill] sm:$0xff] }
 0x2af   : > { %24595 = vmatprep.mubr.f32.mxu0 %v38887_v10  ;;  %22438 = vmatprep.mubr.f32.mxu1 %v38888_v61  ;;  %38904 = vst [vmem:[#allocation208_spill] sm:$0xff] %v33413_v31  ;;  %v38914_v61 = vld [vmem:[#allocation429_spill] sm:$0xff] }
 0x2b0   : > { %27193 = vmatpush3.bf16.msra.mxu0 %v27190_v15  ;;  %26331 = vmatprep.subr.bf16.mxu1 %v26330_v46  ;;  %v38895_v15 = vld [vmem:[#allocation217_spill] sm:$0xff] }
 0x2b1   : > { %27195 = vmatprep.subr.bf16.mxu0 %v27194_v5  ;;  %26333 = vmatpush3.bf16.msra.mxu1 %v26330_v46  ;;  %v38898_v46 = vld [vmem:[#allocation395_spill] sm:$0xff] }
 0x2b2   : > { %24596 = vmatmul.mubr.f32.gmra.mrb[14].mxu0 %v38889_v27  ;;  %22439 = vmatmul.mubr.f32.gmra.mrb[16].mxu1 %v38890_v14  ;;  %v29512_v27 = vld [vmem:[%s29796_s27 + $0x188] sm:$0xff] }
 0x2b3   : > { %24598 = vmatprep.mubr.f32.mxu0 %v38891_v55  ;;  %22441 = vmatprep.mubr.f32.mxu1 %v38892_v38  ;;  %v250_v55 = vld [vmem:[%s29796_s27 + $0x198] sm:$0xff]  ;;  %v33406_v10 = vand.u32 4294901760, %v29512_v27  ;;  %v38906_v38 = vld [vmem:[#allocation424_spill] sm:$0xff] }
 0x2b4   : > { %27197 = vmatpush3.bf16.msra.mxu0 %v27194_v5  ;;  %26335 = vmatprep.subr.bf16.mxu1 %v38893_v21  ;;  %v38900_v5 = vld [vmem:[#allocation418_spill] sm:$0xff] }
 0x2b5   : > { %27199 = vmatprep.subr.bf16.mxu0 %v32999_v44  ;;  %38899 = vst [vmem:[#allocation327_spill] sm:$0xff] %v33406_v10  ;;  %v33421_v14 = vsub.f32 %v29512_v27, %v33406_v10 }
 0x2b6   : > { %24599 = vmatmul.mubr.f32.gmra.mrb[16].mxu0 %v38894_v63  ;;  %22442 = vmatmul.mubr.f32.gmra.mrb[18].mxu1 %v38895_v15  ;;  %v38903_v63 = vld [vmem:[#allocation401_spill] sm:$0xff]  ;;  %v33415_v15 = vand.u32 4294901760, %v250_v55 }
 0x2b7   : > { %24601 = vmatprep.mubr.f32.mxu0 %v38897_v17  ;;  %22444 = vmatprep.mubr.f32.mxu1 %v38898_v46  ;;  %v251_v17 = vld [vmem:[%s29796_s27 + $0x1a0] sm:$0xff]  ;;  %38908 = vst [vmem:[#allocation17_spill] sm:$0xff] %v33421_v14 }
 0x2b8   : > { %38905 = vst [vmem:[#allocation14_spill] sm:$0xff] %v33415_v15  ;;  %v38907_v46 = vld [vmem:[#allocation406_spill] sm:$0xff]  ;;  %v33431_v9 = vsub.f32 %v250_v55, %v33415_v15 }
 0x2ba   : > { %24602 = vmatmul.mubr.f32.gmra.mrb[18].mxu0 %v38900_v5  ;;  %22445 = vmatmul.mubr.f32.gmra.mrb[20].mxu1 %v38901_v22  ;;  %v33423_v5 = vand.u32 4294901760, %v251_v17  ;;  %v38910_v22 = vld [vmem:[#allocation427_spill] sm:$0xff]  ;;  %38913 = vst [vmem:[#allocation317_spill] sm:$0xff] %v33431_v9  ;;  %v37546_v55 = vand.u32 4294901760, %v33431_v9 }
 0x2bb   : > { %24604 = vmatprep.mubr.f32.mxu0 %v38902_v41  ;;  %22447 = vmatprep.mubr.f32.mxu1 %v38903_v63  ;;  %v38911_v41 = vld [vmem:[#allocation409_spill] sm:$0xff]  ;;  %v33428_v63 = vand.u32 4294901760, %v33413_v31 }
 0x2bc   : > { %38909 = vst [vmem:[#allocation21_spill] sm:$0xff] %v33423_v5  ;;  %v33439_v27 = vsub.f32 %v251_v17, %v33423_v5  ;;  %v38922_v17 = vld [vmem:[#allocation433_spill] sm:$0xff] }
 0x2bd   : > { %38912 = vst [vmem:[#allocation316_spill] sm:$0xff] %v33428_v63 }
 0x2be   : > { %24605 = vmatmul.mubr.f32.gmra.mrb[20].mxu0 %v38906_v38  ;;  %22448 = vmatmul.mubr.f32.gmra.mrb[22].mxu1 %v38907_v46  ;;  %v38915_v38 = vld [vmem:[#allocation412_spill] sm:$0xff]  ;;  %v33436_v46 = vand.u32 4294901760, %v33421_v14  ;;  %38917 = vst [vmem:[#allocation320_spill] sm:$0xff] %v33439_v27  ;;  %v37547_v13 = vand.u32 4294901760, %v33439_v27 }
 0x2bf   : > { %24607 = vmatprep.mubr.f32.mxu0 %v38910_v22  ;;  %22450 = vmatprep.mubr.f32.mxu1 %v38911_v41  ;;  %v38919_v22 = vld [vmem:[#allocation415_spill] sm:$0xff]  ;;  %v6932_v41 = vsub.f32 %v33413_v31, %v33428_v63  ;;  %v13018_v63 = vsub.f32 %v33431_v9, %v37546_v55  ;;  %v18956_v9 = vld [vmem:[%s36498_s1 + $0x110] sm:$0xff]  ;;  %v38964_v31 = vld [vmem:[#allocation417_spill] sm:$0xff] }
 0x2c0   : > { %38916 = vst [vmem:[#allocation319_spill] sm:$0xff] %v33436_v46 }
 0x2c2   : > { %24608 = vmatmul.mubr.f32.gmra.mrb[22].mxu0 %v38914_v61  ;;  %22451 = vmatmul.mubr.f32.gmra.mrb[24].mxu1 %v38915_v38  ;;  %v38921_v61 = vld [vmem:[#allocation419_spill] sm:$0xff]  ;;  %v6942_v38 = vsub.f32 %v33421_v14, %v33436_v46  ;;  %v13028_v46 = vsub.f32 %v33439_v27, %v37547_v13  ;;  %v38933_v13 = vld [vmem:[#allocation324_spill] sm:$0xff]  ;;  %v18957_v14 = vld [vmem:[%s36498_s1 + $0x118] sm:$0xff] }
 0x2c3   : > { %24610 = vmatprep.mubr.f32.mxu0 %v38918_v34  ;;  %22453 = vmatprep.mubr.f32.mxu1 %v38919_v22  ;;  %v33453_v34 = vand.u32 4294901760, %v6932_v41  ;;  %v38925_v22 = vld [vmem:[#allocation434_spill] sm:$0xff]  ;;  %v13019_v41 = vand.u32 4294901760, %v13018_v63  ;;  %v38963_v27 = vld [vmem:[#allocation411_spill] sm:$0xff] }
 0x2c4   : > { %v13029_v55 = vand.u32 4294901760, %v13028_v46  ;;  %v38935_v63 = vld [vmem:[#allocation334_spill] sm:$0xff]  ;;  %v38937_v46 = vld [vmem:[#allocation337_spill] sm:$0xff] }
 0x2c5   : > { %38924 = vst [vmem:[#allocation328_spill] sm:$0xff] %v33453_v34 }
 0x2c6   : > { %24611 = vmatmul.mubr.f32.gmra.mrb[24].mxu0 %v38920_v48  ;;  %22454 = vmatmul.mubr.f32.gmra.mrb[26].mxu1 %v38921_v61  ;;  %v38926_v48 = vld [vmem:[#allocation425_spill] sm:$0xff]  ;;  %v33460_v61 = vand.u32 4294901760, %v6942_v38  ;;  %v38931_v38 = vld [vmem:[#allocation323_spill] sm:$0xff] }
 0x2c7   : > { %24613 = vmatprep.mubr.f32.mxu0 %v38922_v17  ;;  %22456 = vmatprep.mubr.f32.mxu1 %v38923_v58  ;;  %v38928_v17 = vld [vmem:[#allocation428_spill] sm:$0xff]  ;;  %v38929_v58 = vld [vmem:[#allocation430_spill] sm:$0xff] }
 0x2c8   : > { %38927 = vst [vmem:[#allocation329_spill] sm:$0xff] %v33460_v61 }
 0x2ca   : > { %24614 = vmatmul.mubr.f32.gmra.mrb[26].mxu0 %v38925_v22  ;;  %22457 = vmatmul.mubr.f32.gmra.mrb[28].mxu1 %v38926_v48  ;;  %v38930_v22 = vld [vmem:[#allocation321_spill] sm:$0xff]  ;;  %v38932_v48 = vld [vmem:[#allocation330_spill] sm:$0xff] }
 0x2cb   : > { %24616 = vmatprep.mubr.f32.mxu0 %v33453_v34  ;;  %22459 = vmatprep.mubr.f32.mxu1 %v38928_v17  ;;  %v38934_v34 = vld [vmem:[#allocation18_spill] sm:$0xff]  ;;  %v27226_v17 = vpack.c.bf16 %v33339_v50, %v33334_v62  ;;  %v38952_v50 = vld [vmem:[#allocation380_spill] sm:$0xff] }
 0x2cc   : > { %v38953_v62 = vld [vmem:[#allocation314_spill] sm:$0xff] }
 0x2ce   : > { %24617 = vmatmul.mubr.f32.gmra.mrb[28].mxu0 %v33460_v61  ;;  %22460 = vmatmul.mubr.f32.gmra.mrb[30].mxu1 %v38929_v58  ;;  %v38936_v61 = vld [vmem:[#allocation326_spill] sm:$0xff] }
 0x2cf   : > { %24619 = vmatprep.mubr.f32.mxu0 %v13019_v41  ;;  %22494 = vmatprep.mubr.f32.mxu1 %v38930_v22  ;;  %v38946_v41 = vld [vmem:[#allocation352_spill] sm:$0xff] }
 0x2d2   : > { %24620 = vmatmul.mubr.f32.gmra.mrb[30].mxu0 %v13029_v55  ;;  %22495 = vmatmul.mubr.f32.vlgmr.msra.gmra.mrb[0].mxu1 %v38931_v38  ;;  %v38938_v55 = vld [vmem:[#allocation338_spill] sm:$0xff] }
 0x2d3   : > { %24654 = vmatprep.mubr.f32.mxu0 %v38932_v48  ;;  %26337 = vmatpush3.bf16.msra.mxu1 %v38893_v21  ;;  %v38939_v21 = vld [vmem:[#allocation339_spill] sm:$0xff] }
 0x2d4   : > { %22497 = vmatprep.mubr.f32.mxu1 %v38933_v13  ;;  %26339 = vmatprep.subr.bf16.mxu1 %v38934_v34 }
 0x2d6   : > { %24655 = vmatmul.mubr.f32.vlgmr.msra.gmra.mrb[0].mxu0 %v38935_v63  ;;  %22498 = vmatmul.mubr.f32.gmra.mrb[2].mxu1 %v38936_v61 }
 0x2d7   : > { %27201 = vmatpush3.bf16.msra.mxu0 %v32999_v44  ;;  %24657 = vmatprep.mubr.f32.mxu0 %v38937_v46  ;;  %v38940_v44 = vld [vmem:[#allocation340_spill] sm:$0xff] }
 0x2d8   : > { %22500 = vmatprep.mubr.f32.mxu1 %v38932_v48  ;;  %27203 = vmatprep.subr.bf16.mxu0 %v33054_v6 }
 0x2d9   : > { %26341 = vmatpush3.bf16.msra.mxu1 %v38934_v34  ;;  %v38941_v34 = vld [vmem:[#allocation341_spill] sm:$0xff] }
 0x2da   : > { %24658 = vmatmul.mubr.f32.gmra.mrb[2].mxu0 %v38938_v55  ;;  %22501 = vmatmul.mubr.f32.gmra.mrb[4].mxu1 %v38935_v63 }
 0x2db   : > { %24660 = vmatprep.mubr.f32.mxu0 %v38939_v21  ;;  %27205 = vmatpush3.bf16.msra.mxu0 %v33054_v6  ;;  %v38942_v6 = vld [vmem:[#allocation342_spill] sm:$0xff] }
 0x2dc   : > { %22503 = vmatprep.mubr.f32.mxu1 %v38937_v46  ;;  %26343 = vmatprep.subr.bf16.mxu1 %v38757_v3 }
 0x2dd   : > { %27207 = vmatprep.subr.bf16.mxu0 %v33118_v12  ;;  %26345 = vmatpush3.bf16.msra.mxu1 %v38757_v3  ;;  %v38943_v3 = vld [vmem:[#allocation343_spill] sm:$0xff] }
 0x2de   : > { %24661 = vmatmul.mubr.f32.gmra.mrb[4].mxu0 %v38940_v44  ;;  %22504 = vmatmul.mubr.f32.gmra.mrb[6].mxu1 %v38938_v55 }
 0x2df   : > { %24663 = vmatprep.mubr.f32.mxu0 %v38941_v34  ;;  %22506 = vmatprep.mubr.f32.mxu1 %v38939_v21 }
 0x2e0   : > { %27209 = vmatpush3.bf16.msra.mxu0 %v33118_v12  ;;  %26347 = vmatprep.subr.bf16.mxu1 %v38763_v51  ;;  %v38944_v12 = vld [vmem:[#allocation345_spill] sm:$0xff] }
 0x2e1   : > { %27211 = vmatprep.subr.bf16.mxu0 %v33168_v56  ;;  %26349 = vmatpush3.bf16.msra.mxu1 %v38763_v51  ;;  %v38945_v51 = vld [vmem:[#allocation351_spill] sm:$0xff] }
 0x2e2   : > { %24664 = vmatmul.mubr.f32.gmra.mrb[6].mxu0 %v38942_v6  ;;  %22507 = vmatmul.mubr.f32.gmra.mrb[8].mxu1 %v38940_v44 }
 0x2e3   : > { %24666 = vmatprep.mubr.f32.mxu0 %v38943_v3  ;;  %22509 = vmatprep.mubr.f32.mxu1 %v38941_v34 }
 0x2e4   : > { %27213 = vmatpush3.bf16.msra.mxu0 %v33168_v56  ;;  %26351 = vmatprep.subr.bf16.mxu1 %v38765_v60  ;;  %v33522_v56 = vld [vmem:[%s36498_s1 + $0x108] sm:$0xff] }
 0x2e5   : > { %27215 = vmatprep.subr.bf16.mxu0 %v33205_v2  ;;  %26353 = vmatpush3.bf16.msra.mxu1 %v38765_v60  ;;  %v33517_v60 = vld [vmem:[%s36498_s1 + $0x100] sm:$0xff]  ;;  %v4529_v58 = vand.u32 4294901760, %v33522_v56 }
 0x2e6   : > { %24667 = vmatmul.mubr.f32.gmra.mrb[8].mxu0 %v38944_v12  ;;  %22510 = vmatmul.mubr.f32.gmra.mrb[10].mxu1 %v38942_v6 }
 0x2e7   : > { %24669 = vmatprep.mubr.f32.mxu0 %v38945_v51  ;;  %22512 = vmatprep.mubr.f32.mxu1 %v38943_v3 }
 0x2e8   : > { %27217 = vmatpush3.bf16.msra.mxu0 %v33205_v2  ;;  %26355 = vmatprep.subr.bf16.mxu1 %v38771_v36  ;;  %v38947_v2 = vld [vmem:[#allocation354_spill] sm:$0xff] }
 0x2e9   : > { %27219 = vmatprep.subr.bf16.mxu0 %v33227_v32  ;;  %26357 = vmatpush3.bf16.msra.mxu1 %v38771_v36  ;;  %v4526_v36 = vand.u32 4294901760, %v33517_v60 }
 0x2ea   : > { %24670 = vmatmul.mubr.f32.gmra.mrb[10].mxu0 %v38946_v41  ;;  %22513 = vmatmul.mubr.f32.gmra.mrb[12].mxu1 %v38944_v12 }
 0x2eb   : > { %24672 = vmatprep.mubr.f32.mxu0 %v38947_v2  ;;  %22515 = vmatprep.mubr.f32.mxu1 %v38945_v51 }
 0x2ec   : > { %27221 = vmatpush3.bf16.msra.mxu0 %v33227_v32  ;;  %26359 = vmatprep.subr.bf16.mxu1 %v38778_v18  ;;  %v33542_v32 = vpack.c.bf16 %v4529_v58, %v4526_v36 }
 0x2ed   : > { %27223 = vmatprep.subr.bf16.mxu0 %v33249_v35  ;;  %26361 = vmatpush3.bf16.msra.mxu1 %v38778_v18  ;;  %v38951_v18 = vld [vmem:[#allocation379_spill] sm:$0xff] }
 0x2ee   : > { %24673 = vmatmul.mubr.f32.gmra.mrb[12].mxu0 %v38948_v59  ;;  %22516 = vmatmul.mubr.f32.gmra.mrb[14].mxu1 %v38946_v41  ;;  %38950 = vst [vmem:[#allocation373_spill] sm:$0xff] %v33542_v32 }
 0x2ef   : > { %24675 = vmatprep.mubr.f32.mxu0 %v38949_v42  ;;  %22518 = vmatprep.mubr.f32.mxu1 %v38947_v2 }
 0x2f0   : > { %27225 = vmatpush3.bf16.msra.mxu0 %v33249_v35  ;;  %26363 = vmatprep.subr.bf16.mxu1 %v38787_v0  ;;  %v38954_v35 = vld [vmem:[#allocation385_spill] sm:$0xff] }
 0x2f1   : > { %27227 = vmatprep.subr.bf16.mxu0 %v27226_v17  ;;  %26365 = vmatpush3.bf16.msra.mxu1 %v38787_v0  ;;  %v38956_v0 = vld [vmem:[#allocation391_spill] sm:$0xff] }
 0x2f2   : > { %24676 = vmatmul.mubr.f32.gmra.mrb[14].mxu0 %v38951_v18  ;;  %22519 = vmatmul.mubr.f32.gmra.mrb[16].mxu1 %v38948_v59 }
 0x2f3   : > { %24678 = vmatprep.mubr.f32.mxu0 %v38952_v50  ;;  %22521 = vmatprep.mubr.f32.mxu1 %v38949_v42 }
 0x2f4   : > { %27229 = vmatpush3.bf16.msra.mxu0 %v27226_v17  ;;  %26367 = vmatprep.subr.bf16.mxu1 %v33542_v32  ;;  %v38958_v17 = vld [vmem:[#allocation397_spill] sm:$0xff] }
 0x2f5   : > { %27231 = vmatprep.subr.bf16.mxu0 %v38953_v62 }
 0x2f6   : > { %24679 = vmatmul.mubr.f32.gmra.mrb[16].mxu0 %v38954_v35  ;;  %22522 = vmatmul.mubr.f32.gmra.mrb[18].mxu1 %v38951_v18 }
 0x2f7   : > { %24681 = vmatprep.mubr.f32.mxu0 %v38955_v53  ;;  %22524 = vmatprep.mubr.f32.mxu1 %v38952_v50 }
 0x2fa   : > { %24682 = vmatmul.mubr.f32.gmra.mrb[18].mxu0 %v38956_v0  ;;  %22525 = vmatmul.mubr.f32.gmra.mrb[20].mxu1 %v38954_v35 }
 0x2fb   : > { %24684 = vmatprep.mubr.f32.mxu0 %v38957_v49  ;;  %22527 = vmatprep.mubr.f32.mxu1 %v38955_v53 }
 0x2fe   : > { %24685 = vmatmul.mubr.f32.gmra.mrb[20].mxu0 %v38958_v17  ;;  %22528 = vmatmul.mubr.f32.gmra.mrb[22].mxu1 %v38956_v0 }
 0x2ff   : > { %24687 = vmatprep.mubr.f32.mxu0 %v38959_v26  ;;  %22530 = vmatprep.mubr.f32.mxu1 %v38957_v49 }
 0x302   : > { %24688 = vmatmul.mubr.f32.gmra.mrb[22].mxu0 %v38960_v39  ;;  %22531 = vmatmul.mubr.f32.gmra.mrb[24].mxu1 %v38958_v17 }
 0x303   : > { %24690 = vmatprep.mubr.f32.mxu0 %v38961_v40  ;;  %22533 = vmatprep.mubr.f32.mxu1 %v38959_v26  ;;  %v4535_v26 = vand.u32 4294901760, %v18957_v14 }
 0x306   : > { %24691 = vmatmul.mubr.f32.gmra.mrb[24].mxu0 %v38962_v1  ;;  %22534 = vmatmul.mubr.f32.gmra.mrb[26].mxu1 %v38960_v39  ;;  %v4532_v39 = vand.u32 4294901760, %v18956_v9 }
 0x307   : > { %24693 = vmatprep.mubr.f32.mxu0 %v38963_v27  ;;  %22536 = vmatprep.mubr.f32.mxu1 %v38961_v40 }
 0x308   : > { %v33585_v40 = vpack.c.bf16 %v4535_v26, %v4532_v39 }
 0x30a   : > { %24694 = vmatmul.mubr.f32.gmra.mrb[26].mxu0 %v38964_v31  ;;  %22537 = vmatmul.mubr.f32.gmra.mrb[28].mxu1 %v38962_v1  ;;  %38965 = vst [vmem:[#allocation374_spill] sm:$0xff] %v33585_v40  ;;  %v18958_v1 = vld [vmem:[%s36498_s1 + $0x120] sm:$0xff] }
 0x30b   : > { %24696 = vmatprep.mubr.f32.mxu0 %v33400_v24  ;;  %22539 = vmatprep.mubr.f32.mxu1 %v38963_v27  ;;  %v18959_v24 = vld [vmem:[%s36498_s1 + $0x128] sm:$0xff]  ;;  %v33594_v27 = vsub.f32 %v33517_v60, %v4526_v36  ;;  %v4538_v60 = vand.u32 4294901760, %v18958_v1 }
 0x30c   : > { %v4541_v36 = vand.u32 4294901760, %v18959_v24 }
 0x30d   : > { %38966 = vst [vmem:[#allocation15_spill] sm:$0xff] %v33594_v27 }
 0x30e   : > { %24697 = vmatmul.mubr.f32.gmra.mrb[28].mxu0 %v33406_v10  ;;  %22540 = vmatmul.mubr.f32.gmra.mrb[30].mxu1 %v38964_v31  ;;  %v33597_v10 = vsub.f32 %v33522_v56, %v4529_v58  ;;  %v33612_v58 = vld [vmem:[%s36498_s1 + $0x130] sm:$0xff]  ;;  %v38969_v56 = vld [vmem:[#allocation347_spill] sm:$0xff] }
 0x30f   : > { %24699 = vmatprep.mubr.f32.mxu0 %v33415_v15  ;;  %22574 = vmatprep.mubr.f32.mxu1 %v38930_v22  ;;  %v38968_v22 = vld [vmem:[#allocation336_spill] sm:$0xff] }
 0x310   : > { %38967 = vst [vmem:[#allocation321_spill] sm:$0xff] %v33597_v10  ;;  %v33605_v15 = vpack.c.bf16 %v33597_v10, %v33594_v27 }
 0x312   : > { %24700 = vmatmul.mubr.f32.gmra.mrb[30].mxu0 %v33423_v5  ;;  %22575 = vmatmul.mubr.f32.vlgmr.msra.gmra.mrb[0].mxu1 %v38931_v38  ;;  %v33617_v38 = vld [vmem:[%s36498_s1 + $0x138] sm:$0xff] }
 0x313   : > { %24734 = vmatprep.mubr.f32.mxu0 %v38968_v22  ;;  %26369 = vmatpush3.bf16.msra.mxu1 %v33542_v32  ;;  %v38970_v22 = vld [vmem:[#allocation174_spill] sm:$0xff] }
 0x314   : > { %22577 = vmatprep.mubr.f32.mxu1 %v38933_v13  ;;  %26371 = vmatprep.subr.bf16.mxu1 %v33585_v40  ;;  %v33625_v13 = vpack.c.bf16 %v4541_v36, %v4538_v60  ;;  %v38974_v32 = vld [vmem:[#allocation350_spill] sm:$0xff] }
 0x316   : > { %24735 = vmatmul.mubr.f32.vlgmr.msra.gmra.mrb[0].mxu0 %v38969_v56  ;;  %22578 = vmatmul.mubr.f32.gmra.mrb[2].mxu1 %v38936_v61  ;;  %38971 = vst [vmem:[#allocation323_spill] sm:$0xff] %v33625_v13  ;;  %v33633_v56 = vld [vmem:[%s36498_s1 + $0x140] sm:$0xff]  ;;  %v33640_v61 = vsub.f32 %v18956_v9, %v4532_v39  ;;  %v38975_v39 = vand.u32 4294901760, %v33612_v58 }
 0x317   : > { %27233 = vmatpush3.bf16.msra.mxu0 %v38953_v62  ;;  %24737 = vmatprep.mubr.f32.mxu0 %v32334_v16  ;;  %v33638_v16 = vld [vmem:[%s36498_s1 + $0x148] sm:$0xff]  ;;  %v37590_v9 = vand.u32 4294901760, %v33633_v56 }
 0x318   : > { %22580 = vmatprep.mubr.f32.mxu1 %v38932_v48  ;;  %27235 = vmatprep.subr.bf16.mxu0 %v38970_v22  ;;  %38972 = vst [vmem:[#allocation18_spill] sm:$0xff] %v33640_v61  ;;  %v33642_v48 = vsub.f32 %v18957_v14, %v4535_v26  ;;  %v38976_v26 = vand.u32 4294901760, %v33617_v38 }
 0x319   : > { %26373 = vmatpush3.bf16.msra.mxu1 %v33585_v40  ;;  %v33667_v40 = vld [vmem:[%s36498_s1 + $0x150] sm:$0xff] }
 0x31a   : > { %38973 = vst [vmem:[#allocation314_spill] sm:$0xff] %v33642_v48  ;;  %24738 = vmatmul.mubr.f32.gmra.mrb[2].mxu0 %v32337_v25  ;;  %22581 = vmatmul.mubr.f32.gmra.mrb[4].mxu1 %v38935_v63  ;;  %v33650_v5 = vpack.c.bf16 %v33642_v48, %v33640_v61  ;;  %v33658_v14 = vpack.c.bf16 %v38976_v26, %v38975_v39  ;;  %v38978_v25 = vld [vmem:[#allocation322_spill] sm:$0xff]  ;;  %v38983_v26 = vld [vmem:[#allocation365_spill] sm:$0xff] }
 0x31b   : > { %24740 = vmatprep.mubr.f32.mxu0 %v38974_v32  ;;  %27237 = vmatpush3.bf16.msra.mxu0 %v38970_v22  ;;  %v37589_v32 = vand.u32 4294901760, %v33638_v16  ;;  %v33672_v22 = vld [vmem:[%s36498_s1 + $0x158] sm:$0xff] }
 0x31c   : > { %22583 = vmatprep.mubr.f32.mxu1 %v38937_v46  ;;  %26375 = vmatprep.subr.bf16.mxu1 %v33625_v13  ;;  %38977 = vst [vmem:[#allocation438_spill] sm:$0xff] %v33658_v14 }
 0x31d   : > { %27239 = vmatprep.subr.bf16.mxu0 %v38978_v25  ;;  %26377 = vmatpush3.bf16.msra.mxu1 %v33625_v13  ;;  %v33684_v39 = vpack.c.bf16 %v37589_v32, %v37590_v9  ;;  %v33696_v13 = vld [vmem:[%s36498_s1 + $0x168] sm:$0xff]  ;;  %v33700_v32 = vsub.f32 %v18958_v1, %v4538_v60  ;;  %v33702_v9 = vsub.f32 %v18959_v24, %v4541_v36  ;;  %v38985_v1 = vand.u32 4294901760, %v33667_v40 }
 0x31e   : > { %24741 = vmatmul.mubr.f32.gmra.mrb[4].mxu0 %v32400_v57  ;;  %22584 = vmatmul.mubr.f32.gmra.mrb[6].mxu1 %v38938_v55  ;;  %v38984_v57 = vld [vmem:[#allocation367_spill] sm:$0xff]  ;;  %v38986_v24 = vand.u32 4294901760, %v33672_v22  ;;  %v33729_v55 = vld [vmem:[%s36498_s1 + $0x170] sm:$0xff]  ;;  %v38992_v36 = vand.u32 4294901760, %v33696_v13 }
 0x31f   : > { %24743 = vmatprep.mubr.f32.mxu0 %v32403_v20  ;;  %22586 = vmatprep.mubr.f32.mxu1 %v38939_v21  ;;  %38979 = vst [vmem:[#allocation439_spill] sm:$0xff] %v33684_v39  ;;  %v33691_v20 = vld [vmem:[%s36498_s1 + $0x160] sm:$0xff]  ;;  %38981 = vst [vmem:[#allocation440_spill] sm:$0xff] %v33700_v32  ;;  %v33712_v46 = vpack.c.bf16 %v33702_v9, %v33700_v32 }
 0x320   : > { %27241 = vmatpush3.bf16.msra.mxu0 %v38978_v25  ;;  %26379 = vmatprep.subr.bf16.mxu1 %v33658_v14  ;;  %v38980_v25 = vld [vmem:[#allocation181_spill] sm:$0xff]  ;;  %38982 = vst [vmem:[#allocation441_spill] sm:$0xff] %v33702_v9  ;;  %v33720_v60 = vpack.c.bf16 %v38986_v24, %v38985_v1  ;;  %v38989_v1 = vld [vmem:[#allocation371_spill] sm:$0xff]  ;;  %v38990_v24 = vld [vmem:[#allocation372_spill] sm:$0xff]  ;;  %v38991_v21 = vand.u32 4294901760, %v33691_v20 }
 0x321   : > { %27243 = vmatprep.subr.bf16.mxu0 %v38980_v25  ;;  %26381 = vmatpush3.bf16.msra.mxu1 %v33658_v14  ;;  %v38999_v14 = vand.u32 4294901760, %v33617_v38 }
 0x322   : > { %24744 = vmatmul.mubr.f32.gmra.mrb[6].mxu0 %v38983_v26  ;;  %22587 = vmatmul.mubr.f32.gmra.mrb[8].mxu1 %v38940_v44  ;;  %38987 = vst [vmem:[#allocation442_spill] sm:$0xff] %v33720_v60  ;;  %v33734_v26 = vld [vmem:[%s36498_s1 + $0x178] sm:$0xff] }
 0x323   : > { %24746 = vmatprep.mubr.f32.mxu0 %v38984_v57  ;;  %22589 = vmatprep.mubr.f32.mxu1 %v38941_v34  ;;  %v38988_v57 = vld [vmem:[#allocation184_spill] sm:$0xff] }
 0x324   : > { %27245 = vmatpush3.bf16.msra.mxu0 %v38980_v25  ;;  %26383 = vmatprep.subr.bf16.mxu1 %v33684_v39  ;;  %v38996_v34 = vld [vmem:[#allocation12_spill] sm:$0xff] }
 0x325   : > { %27247 = vmatprep.subr.bf16.mxu0 %v38988_v57  ;;  %26385 = vmatpush3.bf16.msra.mxu1 %v33684_v39  ;;  %v33744_v39 = vpack.c.bf16 %v38992_v36, %v38991_v21  ;;  %v38997_v21 = vand.u32 4294901760, %v33612_v58 }
 0x326   : > { %24747 = vmatmul.mubr.f32.gmra.mrb[8].mxu0 %v38989_v1  ;;  %22590 = vmatmul.mubr.f32.gmra.mrb[10].mxu1 %v38942_v6  ;;  %v38994_v6 = vand.u32 4294901760, %v33594_v27  ;;  %v33766_v1 = vsub.f32 %v33617_v38, %v38999_v14 }
 0x327   : > { %24749 = vmatprep.mubr.f32.mxu0 %v38990_v24  ;;  %22592 = vmatprep.mubr.f32.mxu1 %v38943_v3  ;;  %38993 = vst [vmem:[#allocation184_spill] sm:$0xff] %v33744_v39  ;;  %v38995_v3 = vand.u32 4294901760, %v33597_v10  ;;  %v33761_v36 = vsub.f32 %v33612_v58, %v38997_v21  ;;  %v39001_v58 = vand.u32 4294901760, %v33734_v26 }
 0x328   : > { %27249 = vmatpush3.bf16.msra.mxu0 %v38988_v57  ;;  %26387 = vmatprep.subr.bf16.mxu1 %v33720_v60  ;;  %v4930_v24 = vsub.f32 %v33594_v27, %v38994_v6  ;;  %v39023_v27 = vld [vmem:[#allocation180_spill] sm:$0xff] }
 0x329   : > { %v4937_v25 = vsub.f32 %v33597_v10, %v38995_v3  ;;  %27251 = vmatprep.subr.bf16.mxu0 %v38996_v34  ;;  %26389 = vmatpush3.bf16.msra.mxu1 %v33720_v60  ;;  %38998 = vst [vmem:[#allocation12_spill] sm:$0xff] %v33761_v36  ;;  %v33774_v6 = vpack.c.bf16 %v33766_v1, %v33761_v36  ;;  %v39000_v3 = vand.u32 4294901760, %v33729_v55  ;;  %v39009_v10 = vand.u32 4294901760, %v33638_v16 }
 0x32a   : > { %24750 = vmatmul.mubr.f32.gmra.mrb[10].mxu0 %v38785_v37  ;;  %22593 = vmatmul.mubr.f32.gmra.mrb[12].mxu1 %v38944_v12  ;;  %v4931_v14 = vand.u32 4294901760, %v4930_v24 }
 0x32b   : > { %24752 = vmatprep.mubr.f32.mxu0 %v38786_v23  ;;  %22595 = vmatprep.mubr.f32.mxu1 %v38945_v51  ;;  %v33782_v38 = vpack.c.bf16 %v39001_v58, %v39000_v3  ;;  %v4938_v21 = vand.u32 4294901760, %v4937_v25  ;;  %v39003_v25 = vld [vmem:[#allocation318_spill] sm:$0xff]  ;;  %v39005_v58 = vld [vmem:[#allocation175_spill] sm:$0xff] }
 0x32c   : > { %27253 = vmatpush3.bf16.msra.mxu0 %v38996_v34  ;;  %26391 = vmatprep.subr.bf16.mxu1 %v33744_v39  ;;  %v39004_v3 = vand.u32 4294901760, %v39003_v25 }
 0x32d   : > { %39002 = vst [vmem:[#allocation443_spill] sm:$0xff] %v33782_v38  ;;  %27255 = vmatprep.subr.bf16.mxu0 %v33128_v8  ;;  %26393 = vmatpush3.bf16.msra.mxu1 %v33744_v39  ;;  %v33792_v24 = vpack.c.bf16 %v4938_v21, %v4931_v14  ;;  %v33810_v14 = vsub.f32 %v33638_v16, %v39009_v10  ;;  %v29514_v21 = vld [vmem:[%s29796_s27 + $0x8] sm:$0xff]  ;;  %v29515_v16 = vld [vmem:[%s29796_s27 + $0x10] sm:$0x3] }
 0x32e   : > { %24753 = vmatmul.mubr.f32.gmra.mrb[12].mxu0 %v32577_v33  ;;  %22596 = vmatmul.mubr.f32.gmra.mrb[14].mxu1 %v38946_v41  ;;  %v39006_v33 = vand.u32 4294901760, %v39005_v58  ;;  %v4397_v25 = vrot.slane %v29514_v21, 2  ;;  %v4399_v10 = vrot.slane %v29515_v16, 2  ;;  %v39010_v58 = vand.u32 4294901760, %v33667_v40  ;;  %v39025_v39 = vld [vmem:[#allocation411_spill] sm:$0xff] }
 0x32f   : > { %24755 = vmatprep.mubr.f32.mxu0 %v38792_v7  ;;  %22598 = vmatprep.mubr.f32.mxu1 %v38947_v2  ;;  %v39007_v7 = vand.u32 4294901760, %v33633_v56  ;;  %v39011_v21 = vand.u32 4294901760, %v33672_v22 }
 0x330   : > { %27257 = vmatpush3.bf16.msra.mxu0 %v33128_v8  ;;  %26395 = vmatprep.subr.bf16.mxu1 %v33782_v38  ;;  %v33800_v23 = vpack.c.bf16 %v39006_v33, %v39004_v3 }
 0x331   : > { %27259 = vmatprep.subr.bf16.mxu0 %v33162_v30  ;;  %26397 = vmatpush3.bf16.msra.mxu1 %v33782_v38  ;;  %v33805_v37 = vsub.f32 %v33633_v56, %v39007_v7  ;;  %v29513_v7 = vld [vmem:[%s29796_s27] sm:$0xff]  ;;  %v39024_v38 = vld [vmem:[#allocation208_spill] sm:$0xff] }
 0x332   : > { %24756 = vmatmul.mubr.f32.gmra.mrb[14].mxu0 %v38797_v4  ;;  %22599 = vmatmul.mubr.f32.gmra.mrb[16].mxu1 %v38948_v59  ;;  %v4396_v56 = vrot.slane %v29513_v7, 2  ;;  %v33834_v7 = vsub.f32 %v33667_v40, %v39010_v58  ;;  %v39022_v4 = vld [vmem:[#allocation426_spill] sm:$0xff] }
 0x333   : > { %39008 = vst [vmem:[#allocation318_spill] sm:$0xff] %v33805_v37  ;;  %24758 = vmatprep.mubr.f32.mxu0 %v38798_v28  ;;  %22601 = vmatprep.mubr.f32.mxu1 %v38949_v42  ;;  %v33818_v33 = vpack.c.bf16 %v33810_v14, %v33805_v37  ;;  %v33839_v28 = vsub.f32 %v33672_v22, %v39011_v21  ;;  %v39014_v21 = vand.u32 4294901760, %v33691_v20 }
 0x334   : > { %27261 = vmatpush3.bf16.msra.mxu0 %v33162_v30  ;;  %26399 = vmatprep.subr.bf16.mxu1 %v33792_v24  ;;  %v4398_v3 = vsel %vm4395_vm1, %v4396_v56, %v4397_v25  ;;  %v4400_v56 = vsel %vm4395_vm1, %v4397_v25, %v4399_v10  ;;  %v39015_v10 = vand.u32 4294901760, %v33696_v13 }
 0x335   : > { %27263 = vmatprep.subr.bf16.mxu0 %v33800_v23  ;;  %v33845_v16 = vand.u32 4294901760, %v4398_v3  ;;  %v33850_v40 = vpack.c.bf16 %v33839_v28, %v33834_v7  ;;  %v33854_v22 = vand.u32 4294901760, %v4400_v56  ;;  %v33864_v25 = vsub.f32 %v33691_v20, %v39014_v21 }
 0x336   : > { %24759 = vmatmul.mubr.f32.gmra.mrb[16].mxu0 %v38799_v45  ;;  %22602 = vmatmul.mubr.f32.gmra.mrb[18].mxu1 %v38951_v18  ;;  %v37629_v21 = vand.u32 4294901760, %v33642_v48 }
 0x337   : > { %24761 = vmatprep.mubr.f32.mxu0 %v38800_v52  ;;  %22604 = vmatprep.mubr.f32.mxu1 %v38952_v50  ;;  %39012 = vst [vmem:[#allocation175_spill] sm:$0xff] %v33854_v22  ;;  %v33859_v58 = vsub.f32 %v4398_v3, %v33845_v16  ;;  %v39017_v3 = vld [vmem:[#allocation398_spill] sm:$0xff] }
 0x339   : > { %39013 = vst [vmem:[#allocation444_spill] sm:$0xff] %v33859_v58 }
 0x33a   : > { %24762 = vmatmul.mubr.f32.gmra.mrb[18].mxu0 %v38805_v19  ;;  %22605 = vmatmul.mubr.f32.gmra.mrb[20].mxu1 %v38954_v35  ;;  %v39020_v19 = vld [vmem:[#allocation423_spill] sm:$0xff] }
 0x33b   : > { %24764 = vmatprep.mubr.f32.mxu0 %v38806_v29  ;;  %22607 = vmatprep.mubr.f32.mxu1 %v38955_v53  ;;  %v37622_v29 = vand.u32 4294901760, %v33859_v58 }
 0x33d   : > { %v4609_v52 = vsub.f32 %v33859_v58, %v37622_v29 }
 0x33e   : > { %24765 = vmatmul.mubr.f32.gmra.mrb[20].mxu0 %v32714_v11  ;;  %22608 = vmatmul.mubr.f32.gmra.mrb[22].mxu1 %v38956_v0  ;;  %v33869_v11 = vsub.f32 %v33696_v13, %v39015_v10  ;;  %v37627_v13 = vand.u32 4294901760, %v33640_v61  ;;  %v39018_v10 = vld [vmem:[#allocation420_spill] sm:$0xff] }
 0x33f   : > { %24767 = vmatprep.mubr.f32.mxu0 %v32726_v47  ;;  %22610 = vmatprep.mubr.f32.mxu1 %v38957_v49  ;;  %v33874_v47 = vsub.f32 %v4400_v56, %v33854_v22  ;;  %v4610_v29 = vand.u32 4294901760, %v4609_v52 }
 0x340   : > { %v33881_v20 = vpack.c.bf16 %v33869_v11, %v33864_v25  ;;  %v4944_v45 = vsub.f32 %v33640_v61, %v37627_v13  ;;  %v37634_v13 = vand.u32 4294901760, %v33700_v32  ;;  %v37635_v61 = vand.u32 4294901760, %v33702_v9 }
 0x341   : > { %39016 = vst [vmem:[#allocation445_spill] sm:$0xff] %v33874_v47  ;;  %v37631_v56 = vand.u32 4294901760, %v33874_v47 }
 0x342   : > { %24768 = vmatmul.mubr.f32.gmra.mrb[22].mxu0 %v32746_v54  ;;  %22611 = vmatmul.mubr.f32.gmra.mrb[24].mxu1 %v38958_v17  ;;  %v39019_v54 = vld [vmem:[#allocation403_spill] sm:$0xff]  ;;  %v4945_v60 = vand.u32 4294901760, %v4944_v45  ;;  %v4958_v45 = vsub.f32 %v33700_v32, %v37634_v13  ;;  %v4965_v52 = vsub.f32 %v33702_v9, %v37635_v61  ;;  %v39030_v61 = vld [vmem:[#allocation209_spill] sm:$0xff]  ;;  %v39033_v9 = vld [vmem:[#allocation332_spill] sm:$0xff] }
 0x343   : > { %24770 = vmatprep.mubr.f32.mxu0 %v32758_v43  ;;  %22613 = vmatprep.mubr.f32.mxu1 %v39017_v3  ;;  %v39021_v43 = vld [vmem:[#allocation404_spill] sm:$0xff]  ;;  %v39034_v32 = vand.u32 4294901760, %v39033_v9 }
 0x346   : > { %24771 = vmatmul.mubr.f32.gmra.mrb[24].mxu0 %v39018_v10  ;;  %22614 = vmatmul.mubr.f32.gmra.mrb[26].mxu1 %v39019_v54  ;;  %v4951_v10 = vsub.f32 %v33642_v48, %v37629_v21  ;;  %v39026_v21 = vld [vmem:[#allocation17_spill] sm:$0xff]  ;;  %v37638_v48 = vand.u32 4294901760, %v33761_v36 }
 0x347   : > { %24773 = vmatprep.mubr.f32.mxu0 %v39020_v19  ;;  %22616 = vmatprep.mubr.f32.mxu1 %v39021_v43  ;;  %v4619_v19 = vsub.f32 %v33874_v47, %v37631_v56  ;;  %v37641_v56 = vand.u32 4294901760, %v33766_v1  ;;  %v39027_v47 = vld [vmem:[#allocation317_spill] sm:$0xff] }
 0x348   : > { %v4952_v58 = vand.u32 4294901760, %v4951_v10  ;;  %v39028_v10 = vld [vmem:[#allocation320_spill] sm:$0xff] }
 0x34a   : > { %24774 = vmatmul.mubr.f32.gmra.mrb[26].mxu0 %v39022_v4  ;;  %22617 = vmatmul.mubr.f32.gmra.mrb[28].mxu1 %v39023_v27  ;;  %v4620_v4 = vand.u32 4294901760, %v4619_v19  ;;  %v4972_v19 = vsub.f32 %v33761_v36, %v37638_v48  ;;  %v4959_v36 = vand.u32 4294901760, %v4958_v45  ;;  %v39040_v45 = vld [vmem:[#allocation224_spill] sm:$0xff] }
 0x34b   : > { %24776 = vmatprep.mubr.f32.mxu0 %v39024_v38  ;;  %22619 = vmatprep.mubr.f32.mxu1 %v39025_v39  ;;  %v26402_v38 = vpack.c.bf16 %v4952_v58, %v4945_v60  ;;  %v39029_v60 = vld [vmem:[#allocation346_spill] sm:$0xff]  ;;  %v39035_v39 = vld [vmem:[#allocation353_spill] sm:$0xff]  ;;  %v39037_v58 = vld [vmem:[#allocation356_spill] sm:$0xff] }
 0x34e   : > { %24777 = vmatmul.mubr.f32.gmra.mrb[28].mxu0 %v39026_v21  ;;  %22620 = vmatmul.mubr.f32.gmra.mrb[30].mxu1 %v38964_v31  ;;  %v4966_v31 = vand.u32 4294901760, %v4965_v52 }
 0x34f   : > { %24779 = vmatprep.mubr.f32.mxu0 %v39027_v47  ;;  %22654 = vmatprep.mubr.f32.mxu1 %v4610_v29  ;;  %v4979_v29 = vsub.f32 %v33766_v1, %v37641_v56  ;;  %v39036_v56 = vld [vmem:[#allocation213_spill] sm:$0xff] }
 0x352   : > { %24780 = vmatmul.mubr.f32.gmra.mrb[30].mxu0 %v39028_v10  ;;  %22655 = vmatmul.mubr.f32.vlgmr.msra.gmra.mrb[0].mxu1 %v4620_v4  ;;  %v39031_v4 = vld [vmem:[#allocation179_spill] sm:$0xff] }
 0x353   : > { %24814 = vmatprep.mubr.f32.mxu0 %v39029_v60  ;;  %26401 = vmatpush3.bf16.msra.mxu1 %v33792_v24  ;;  %v39032_v21 = vand.u32 4294901760, %v39031_v4  ;;  %v4973_v60 = vand.u32 4294901760, %v4972_v19  ;;  %v4980_v24 = vand.u32 4294901760, %v4979_v29  ;;  %v39039_v4 = vand.u32 4294901760, %v33810_v14  ;;  %v39043_v19 = vld [vmem:[#allocation196_spill] sm:$0xff] }
 0x354   : > { %22657 = vmatprep.mubr.f32.mxu1 %v39030_v61  ;;  %26403 = vmatprep.subr.bf16.mxu1 %v26402_v38  ;;  %v39038_v61 = vand.u32 4294901760, %v33805_v37  ;;  %v39044_v29 = vand.u32 4294901760, %v39043_v19 }
 0x355   : > { %v27266_v48 = vpack.c.bf16 %v39034_v32, %v39032_v21  ;;  %v4993_v32 = vsub.f32 %v33810_v14, %v39039_v4  ;;  %v39047_v4 = vld [vmem:[#allocation358_spill] sm:$0xff] }
 0x356   : > { %24815 = vmatmul.mubr.f32.vlgmr.msra.gmra.mrb[0].mxu0 %v39035_v39  ;;  %22658 = vmatmul.mubr.f32.gmra.mrb[2].mxu1 %v39036_v56  ;;  %v4986_v13 = vsub.f32 %v33805_v37, %v39038_v61  ;;  %v26406_v56 = vpack.c.bf16 %v4966_v31, %v4959_v36  ;;  %v39045_v39 = vld [vmem:[#allocation357_spill] sm:$0xff]  ;;  %v26410_v37 = vpack.c.bf16 %v4980_v24, %v4973_v60  ;;  %v39049_v36 = vand.u32 4294901760, %v33839_v28 }
 0x357   : > { %27265 = vmatpush3.bf16.msra.mxu0 %v33800_v23  ;;  %24817 = vmatprep.mubr.f32.mxu0 %v39037_v58  ;;  %v39041_v23 = vld [vmem:[#allocation8_spill] sm:$0xff]  ;;  %v39046_v61 = vld [vmem:[#allocation225_spill] sm:$0xff]  ;;  %v4994_v21 = vand.u32 4294901760, %v4993_v32  ;;  %v39051_v24 = vand.u32 4294901760, %v33729_v55 }
 0x358   : > { %22660 = vmatprep.mubr.f32.mxu1 %v39040_v45  ;;  %27267 = vmatprep.subr.bf16.mxu0 %v27266_v48  ;;  %v39042_v52 = vand.u32 4294901760, %v39041_v23  ;;  %v4987_v9 = vand.u32 4294901760, %v4986_v13  ;;  %v39048_v45 = vand.u32 4294901760, %v33834_v7  ;;  %v39050_v23 = vld [vmem:[#allocation227_spill] sm:$0xff]  ;;  %v39052_v13 = vand.u32 4294901760, %v33734_v26  ;;  %v39058_v60 = vld [vmem:[#allocation241_spill] sm:$0xff] }
 0x359   : > { %26405 = vmatpush3.bf16.msra.mxu1 %v26402_v38  ;;  %v5007_v38 = vsub.f32 %v33839_v28, %v39049_v36 }
 0x35a   : > { %v27270_v58 = vpack.c.bf16 %v39044_v29, %v39042_v52  ;;  %24818 = vmatmul.mubr.f32.gmra.mrb[2].mxu0 %v39045_v39  ;;  %22661 = vmatmul.mubr.f32.gmra.mrb[4].mxu1 %v39046_v61  ;;  %v5000_v31 = vsub.f32 %v33834_v7, %v39048_v45  ;;  %v33972_v32 = vsub.f32 %v33734_v26, %v39052_v13  ;;  %v39053_v45 = vld [vmem:[#allocation221_spill] sm:$0xff]  ;;  %v39055_v29 = vld [vmem:[#allocation27_spill] sm:$0xff]  ;;  %v39057_v52 = vld [vmem:[#allocation206_spill] sm:$0xff]  ;;  %v39061_v26 = vand.u32 4294901760, %v33864_v25 }
 0x35b   : > { %24820 = vmatprep.mubr.f32.mxu0 %v39047_v4  ;;  %27269 = vmatpush3.bf16.msra.mxu0 %v27266_v48  ;;  %v33967_v48 = vsub.f32 %v33729_v55, %v39051_v24  ;;  %v39054_v19 = vand.u32 4294901760, %v39053_v45  ;;  %v39056_v36 = vand.u32 4294901760, %v39055_v29  ;;  %v39059_v39 = vld [vmem:[#allocation364_spill] sm:$0xff]  ;;  %v39060_v55 = vld [vmem:[#allocation246_spill] sm:$0xff]  ;;  %v26414_v24 = vpack.c.bf16 %v4994_v21, %v4987_v9 }
 0x35c   : > { %22663 = vmatprep.mubr.f32.mxu1 %v39050_v23  ;;  %26407 = vmatprep.subr.bf16.mxu1 %v26406_v56  ;;  %v5001_v23 = vand.u32 4294901760, %v5000_v31  ;;  %v5008_v61 = vand.u32 4294901760, %v5007_v38  ;;  %v39062_v13 = vand.u32 4294901760, %v33869_v11  ;;  %v39065_v21 = vld [vmem:[#allocation4_spill] sm:$0xff]  ;;  %v39067_v38 = vld [vmem:[#allocation177_spill] sm:$0xff] }
 0x35d   : > { %27271 = vmatprep.subr.bf16.mxu0 %v27270_v58  ;;  %26409 = vmatpush3.bf16.msra.mxu1 %v26406_v56  ;;  %v27274_v4 = vpack.c.bf16 %v39056_v36, %v39054_v19  ;;  %v5014_v56 = vsub.f32 %v33864_v25, %v39061_v26  ;;  %v39063_v36 = vld [vmem:[#allocation315_spill] sm:$0xff]  ;;  %v39066_v31 = vand.u32 4294901760, %v39065_v21  ;;  %v39069_v26 = vld [vmem:[#allocation178_spill] sm:$0xff]  ;;  %v39072_v21 = vand.u32 4294901760, %v33972_v32 }
 0x35e   : > { %24821 = vmatmul.mubr.f32.gmra.mrb[4].mxu0 %v39057_v52  ;;  %22664 = vmatmul.mubr.f32.gmra.mrb[6].mxu1 %v39058_v60  ;;  %v5021_v45 = vsub.f32 %v33869_v11, %v39062_v13  ;;  %v39064_v9 = vand.u32 4294901760, %v39063_v36  ;;  %v39070_v52 = vld [vmem:[#allocation22_spill] sm:$0xff]  ;;  %v26418_v13 = vpack.c.bf16 %v5008_v61, %v5001_v23  ;;  %v39079_v23 = vld [vmem:[#allocation183_spill] sm:$0xff]  ;;  %v39161_v60 = vld [vmem:[#allocation108_spill] sm:$0xff] }
 0x35f   : > { %24823 = vmatprep.mubr.f32.mxu0 %v39059_v39  ;;  %22666 = vmatprep.mubr.f32.mxu1 %v39060_v55  ;;  %v39068_v39 = vld [vmem:[#allocation247_spill] sm:$0xff]  ;;  %v5015_v19 = vand.u32 4294901760, %v5014_v56  ;;  %v39077_v61 = vld [vmem:[#allocation182_spill] sm:$0xff]  ;;  %v39080_v56 = vld [vmem:[#allocation68_spill] sm:$0xff] }
 0x360   : > { %27273 = vmatpush3.bf16.msra.mxu0 %v27270_v58  ;;  %26411 = vmatprep.subr.bf16.mxu1 %v26410_v37  ;;  %v27278_v58 = vpack.c.bf16 %v39066_v31, %v39064_v9  ;;  %v5022_v29 = vand.u32 4294901760, %v5021_v45  ;;  %v5035_v9 = vsub.f32 %v33972_v32, %v39072_v21  ;;  %v39073_v31 = vld [vmem:[#allocation6_spill] sm:$0xff]  ;;  %v39083_v55 = vld [vmem:[#allocation437_spill] sm:$0xff] }
 0x361   : > { %27275 = vmatprep.subr.bf16.mxu0 %v27274_v4  ;;  %26413 = vmatpush3.bf16.msra.mxu1 %v26410_v37  ;;  %v39071_v37 = vand.u32 4294901760, %v33967_v48 }
 0x362   : > { %24824 = vmatmul.mubr.f32.gmra.mrb[6].mxu0 %v39067_v38  ;;  %22667 = vmatmul.mubr.f32.gmra.mrb[8].mxu1 %v39068_v39  ;;  %v39074_v38 = vand.u32 4294901760, %v39073_v31  ;;  %v26422_v45 = vpack.c.bf16 %v5022_v29, %v5015_v19  ;;  %v5036_v21 = vand.u32 4294901760, %v5035_v9  ;;  %v39089_v29 = vld [vmem:[#allocation325_spill] sm:$0xff] }
 0x363   : > { %24826 = vmatprep.mubr.f32.mxu0 %v39069_v26  ;;  %22669 = vmatprep.mubr.f32.mxu1 %v39070_v52  ;;  %v5028_v36 = vsub.f32 %v33967_v48, %v39071_v37  ;;  %v39075_v26 = vld [vmem:[#allocation435_spill] sm:$0xff] }
 0x364   : > { %27277 = vmatpush3.bf16.msra.mxu0 %v27274_v4  ;;  %26415 = vmatprep.subr.bf16.mxu1 %v26414_v24  ;;  %v39076_v39 = vand.u32 4294901760, %v39075_v26  ;;  %v39078_v4 = vld [vmem:[#allocation30_spill] sm:$0xff]  ;;  %v39084_v26 = vand.u32 4294901760, %v39083_v55  ;;  %v39093_v55 = vld [vmem:[#allocation205_spill] sm:$0xff] }
 0x365   : > { %27279 = vmatprep.subr.bf16.mxu0 %v27278_v58  ;;  %26417 = vmatpush3.bf16.msra.mxu1 %v26414_v24  ;;  %v5029_v37 = vand.u32 4294901760, %v5028_v36  ;;  %v39081_v24 = vld [vmem:[#allocation436_spill] sm:$0xff] }
 0x366   : > { %v27282_v52 = vpack.c.bf16 %v39076_v39, %v39074_v38  ;;  %24827 = vmatmul.mubr.f32.gmra.mrb[8].mxu0 %v39077_v61  ;;  %22670 = vmatmul.mubr.f32.gmra.mrb[10].mxu1 %v39078_v4  ;;  %v39082_v31 = vand.u32 4294901760, %v39081_v24  ;;  %v39085_v38 = vld [vmem:[#allocation191_spill] sm:$0xff]  ;;  %v39086_v61 = vld [vmem:[#allocation250_spill] sm:$0xff] }
 0x367   : > { %24829 = vmatprep.mubr.f32.mxu0 %v39079_v23  ;;  %22672 = vmatprep.mubr.f32.mxu1 %v39080_v56  ;;  %v39087_v4 = vld [vmem:[#allocation383_spill] sm:$0xff]  ;;  %v39088_v23 = vld [vmem:[#allocation252_spill] sm:$0xff]  ;;  %v26426_v19 = vpack.c.bf16 %v5036_v21, %v5029_v37  ;;  %v39094_v24 = vld [vmem:[#allocation254_spill] sm:$0xff] }
 0x368   : > { %27281 = vmatpush3.bf16.msra.mxu0 %v27278_v58  ;;  %26419 = vmatprep.subr.bf16.mxu1 %v26418_v13  ;;  %v27286_v39 = vpack.c.bf16 %v39084_v26, %v39082_v31  ;;  %v39090_v58 = vand.u32 4294901760, %v39089_v29  ;;  %v39095_v31 = vld [vmem:[#allocation389_spill] sm:$0xff]  ;;  %v39096_v26 = vld [vmem:[#allocation263_spill] sm:$0xff]  ;;  %v39101_v29 = vld [vmem:[#allocation236_spill] sm:$0xff] }
 0x369   : > { %27283 = vmatprep.subr.bf16.mxu0 %v27282_v52  ;;  %26421 = vmatpush3.bf16.msra.mxu1 %v26418_v13  ;;  %v39091_v13 = vld [vmem:[#allocation185_spill] sm:$0xff]  ;;  %v39099_v37 = vld [vmem:[#allocation395_spill] sm:$0xff]  ;;  %v39160_v56 = vld [vmem:[#allocation260_spill] sm:$0xff] }
 0x36a   : > { %24830 = vmatmul.mubr.f32.gmra.mrb[10].mxu0 %v39085_v38  ;;  %22673 = vmatmul.mubr.f32.gmra.mrb[12].mxu1 %v39086_v61  ;;  %v39092_v36 = vand.u32 4294901760, %v39091_v13  ;;  %v39100_v21 = vld [vmem:[#allocation273_spill] sm:$0xff]  ;;  %v39105_v13 = vld [vmem:[#allocation406_spill] sm:$0xff] }
 0x36b   : > { %24832 = vmatprep.mubr.f32.mxu0 %v39087_v4  ;;  %22675 = vmatprep.mubr.f32.mxu1 %v39088_v23  ;;  %v39152_v38 = vld [vmem:[#allocation238_spill] sm:$0xff]  ;;  %v39156_v23 = vld [vmem:[#allocation255_spill] sm:$0xff]  ;;  %v39157_v61 = vld [vmem:[#allocation373_spill] sm:$0xff] }
 0x36c   : > { %27285 = vmatpush3.bf16.msra.mxu0 %v27282_v52  ;;  %26423 = vmatprep.subr.bf16.mxu1 %v26422_v45  ;;  %v27290_v9 = vpack.c.bf16 %v39092_v36, %v39090_v58  ;;  %v39097_v52 = vld [vmem:[#allocation217_spill] sm:$0xff]  ;;  %v39102_v58 = vld [vmem:[#allocation176_spill] sm:$0xff]  ;;  %v39106_v36 = vld [vmem:[#allocation2_spill] sm:$0xff] }
 0x36d   : > { %27287 = vmatprep.subr.bf16.mxu0 %v27286_v39  ;;  %26425 = vmatpush3.bf16.msra.mxu1 %v26422_v45  ;;  %v39098_v45 = vld [vmem:[#allocation270_spill] sm:$0xff] }
 0x36e   : > { %24833 = vmatmul.mubr.f32.gmra.mrb[12].mxu0 %v39093_v55  ;;  %22676 = vmatmul.mubr.f32.gmra.mrb[14].mxu1 %v39094_v24  ;;  %v39147_v55 = vld [vmem:[#allocation215_spill] sm:$0xff] }
 0x36f   : > { %24835 = vmatprep.mubr.f32.mxu0 %v39095_v31  ;;  %22678 = vmatprep.mubr.f32.mxu1 %v39096_v26  ;;  %v39110_v31 = vld [vmem:[#allocation288_spill] sm:$0xff] }
 0x370   : > { %27289 = vmatpush3.bf16.msra.mxu0 %v27286_v39  ;;  %26427 = vmatprep.subr.bf16.mxu1 %v26426_v19  ;;  %v39103_v39 = vld [vmem:[#allocation401_spill] sm:$0xff] }
 0x371   : > { %27291 = vmatprep.subr.bf16.mxu0 %v27290_v9  ;;  %26429 = vmatpush3.bf16.msra.mxu1 %v26426_v19  ;;  %v39104_v19 = vld [vmem:[#allocation279_spill] sm:$0xff] }
 0x372   : > { %24836 = vmatmul.mubr.f32.gmra.mrb[14].mxu0 %v39097_v52  ;;  %22679 = vmatmul.mubr.f32.gmra.mrb[16].mxu1 %v39098_v45  ;;  %v39108_v52 = vld [vmem:[#allocation282_spill] sm:$0xff]  ;;  %v34119_v45 = vld [vmem:[%s36498_s1 + $0x388] sm:$0xff] }
 0x373   : > { %24838 = vmatprep.mubr.f32.mxu0 %v39099_v37  ;;  %22681 = vmatprep.mubr.f32.mxu1 %v39100_v21  ;;  %v39107_v37 = vld [vmem:[#allocation409_spill] sm:$0xff]  ;;  %v39111_v21 = vld [vmem:[#allocation415_spill] sm:$0xff]  ;;  %v14671_v26 = vand.u32 4294901760, %v34119_v45 }
 0x374   : > { %27293 = vmatpush3.bf16.msra.mxu0 %v27290_v9  ;;  %26431 = vmatprep.subr.bf16.mxu1 %v33605_v15  ;;  %v39109_v9 = vld [vmem:[#allocation412_spill] sm:$0xff] }
 0x375   : > { %27295 = vmatprep.subr.bf16.mxu0 %v38953_v62 }
 0x376   : > { %24839 = vmatmul.mubr.f32.gmra.mrb[16].mxu0 %v39101_v29  ;;  %22682 = vmatmul.mubr.f32.gmra.mrb[18].mxu1 %v39102_v58  ;;  %v39112_v29 = vld [vmem:[#allocation289_spill] sm:$0xff]  ;;  %v39113_v58 = vld [vmem:[#allocation419_spill] sm:$0xff] }
 0x377   : > { %24841 = vmatprep.mubr.f32.mxu0 %v39103_v39  ;;  %22684 = vmatprep.mubr.f32.mxu1 %v39104_v19  ;;  %v39114_v39 = vld [vmem:[#allocation296_spill] sm:$0xff]  ;;  %v39115_v19 = vld [vmem:[#allocation422_spill] sm:$0xff] }
 0x37a   : > { %24842 = vmatmul.mubr.f32.gmra.mrb[18].mxu0 %v39105_v13  ;;  %22685 = vmatmul.mubr.f32.gmra.mrb[20].mxu1 %v39106_v36  ;;  %v39116_v13 = vld [vmem:[#allocation300_spill] sm:$0xff]  ;;  %v39117_v36 = vld [vmem:[#allocation425_spill] sm:$0xff] }
 0x37b   : > { %24844 = vmatprep.mubr.f32.mxu0 %v39107_v37  ;;  %22687 = vmatprep.mubr.f32.mxu1 %v39108_v52  ;;  %v39118_v37 = vld [vmem:[#allocation303_spill] sm:$0xff]  ;;  %v39119_v52 = vld [vmem:[#allocation428_spill] sm:$0xff] }
 0x37e   : > { %24845 = vmatmul.mubr.f32.gmra.mrb[20].mxu0 %v39109_v9  ;;  %22688 = vmatmul.mubr.f32.gmra.mrb[22].mxu1 %v39110_v31  ;;  %v39120_v9 = vld [vmem:[#allocation306_spill] sm:$0xff] }
 0x37f   : > { %24847 = vmatprep.mubr.f32.mxu0 %v39111_v21  ;;  %22690 = vmatprep.mubr.f32.mxu1 %v39112_v29  ;;  %v39121_v31 = vld [vmem:[#allocation430_spill] sm:$0xff]  ;;  %v39122_v21 = vld [vmem:[#allocation308_spill] sm:$0xff] }
 0x380   : > { %v39123_v29 = vld [vmem:[#allocation316_spill] sm:$0xff] }
 0x382   : > { %24848 = vmatmul.mubr.f32.gmra.mrb[22].mxu0 %v39113_v58  ;;  %22691 = vmatmul.mubr.f32.gmra.mrb[24].mxu1 %v39114_v39  ;;  %v39124_v58 = vld [vmem:[#allocation310_spill] sm:$0xff]  ;;  %v39125_v39 = vld [vmem:[#allocation319_spill] sm:$0xff] }
 0x383   : > { %24850 = vmatprep.mubr.f32.mxu0 %v39115_v19  ;;  %22693 = vmatprep.mubr.f32.mxu1 %v39116_v13  ;;  %v39126_v19 = vld [vmem:[#allocation311_spill] sm:$0xff]  ;;  %v39145_v13 = vld [vmem:[#allocation214_spill] sm:$0xff] }
 0x386   : > { %24851 = vmatmul.mubr.f32.gmra.mrb[24].mxu0 %v39117_v36  ;;  %22694 = vmatmul.mubr.f32.gmra.mrb[26].mxu1 %v39118_v37  ;;  %v39127_v36 = vand.u32 4294901760, %v39027_v47  ;;  %v39132_v47 = vld [vmem:[#allocation337_spill] sm:$0xff]  ;;  %v39144_v37 = vld [vmem:[#allocation342_spill] sm:$0xff] }
 0x387   : > { %24853 = vmatprep.mubr.f32.mxu0 %v39119_v52  ;;  %22696 = vmatprep.mubr.f32.mxu1 %v39120_v9  ;;  %v39128_v52 = vand.u32 4294901760, %v39028_v10  ;;  %v39133_v10 = vld [vmem:[#allocation188_spill] sm:$0xff] }
 0x388   : > { %v39142_v9 = vld [vmem:[#allocation212_spill] sm:$0xff] }
 0x38a   : > { %24854 = vmatmul.mubr.f32.gmra.mrb[26].mxu0 %v39121_v31  ;;  %22697 = vmatmul.mubr.f32.gmra.mrb[28].mxu1 %v39122_v21  ;;  %v39129_v31 = vld [vmem:[#allocation330_spill] sm:$0xff] }
 0x38b   : > { %24856 = vmatprep.mubr.f32.mxu0 %v39123_v29  ;;  %22699 = vmatprep.mubr.f32.mxu1 %v39124_v58  ;;  %v39130_v29 = vld [vmem:[#allocation186_spill] sm:$0xff]  ;;  %v39138_v58 = vld [vmem:[#allocation195_spill] sm:$0xff] }
 0x38c   : > { %v39140_v21 = vld [vmem:[#allocation202_spill] sm:$0xff] }
 0x38e   : > { %24857 = vmatmul.mubr.f32.gmra.mrb[28].mxu0 %v39125_v39  ;;  %22700 = vmatmul.mubr.f32.gmra.mrb[30].mxu1 %v39126_v19  ;;  %v39131_v39 = vld [vmem:[#allocation187_spill] sm:$0xff] }
 0x38f   : > { %24859 = vmatprep.mubr.f32.mxu0 %v39127_v36  ;;  %22734 = vmatprep.mubr.f32.mxu1 %v33845_v16  ;;  %v39135_v36 = vld [vmem:[#allocation338_spill] sm:$0xff]  ;;  %v39137_v19 = vld [vmem:[#allocation339_spill] sm:$0xff] }
 0x392   : > { %24860 = vmatmul.mubr.f32.gmra.mrb[30].mxu0 %v39128_v52  ;;  %22735 = vmatmul.mubr.f32.vlgmr.msra.gmra.mrb[0].mxu1 %v33854_v22  ;;  %v39134_v52 = vld [vmem:[#allocation174_spill] sm:$0xff] }
 0x393   : > { %24894 = vmatprep.mubr.f32.mxu0 %v39129_v31  ;;  %26433 = vmatpush3.bf16.msra.mxu1 %v33605_v15  ;;  %v39136_v15 = vld [vmem:[#allocation193_spill] sm:$0xff] }
 0x394   : > { %22737 = vmatprep.mubr.f32.mxu1 %v39130_v29  ;;  %26435 = vmatprep.subr.bf16.mxu1 %v33650_v5  ;;  %v39187_v29 = vld [vmem:[#allocation199_spill] sm:$0xff] }
 0x396   : > { %24895 = vmatmul.mubr.f32.vlgmr.msra.gmra.mrb[0].mxu0 %v38935_v63  ;;  %22738 = vmatmul.mubr.f32.gmra.mrb[2].mxu1 %v39131_v39 }
 0x397   : > { %27297 = vmatpush3.bf16.msra.mxu0 %v38953_v62  ;;  %24897 = vmatprep.mubr.f32.mxu0 %v39132_v47  ;;  %v39139_v62 = vld [vmem:[#allocation322_spill] sm:$0xff] }
 0x398   : > { %22740 = vmatprep.mubr.f32.mxu1 %v39133_v10  ;;  %27299 = vmatprep.subr.bf16.mxu0 %v39134_v52 }
 0x399   : > { %26437 = vmatpush3.bf16.msra.mxu1 %v33650_v5  ;;  %v39141_v5 = vld [vmem:[#allocation341_spill] sm:$0xff] }
 0x39a   : > { %24898 = vmatmul.mubr.f32.gmra.mrb[2].mxu0 %v39135_v36  ;;  %22741 = vmatmul.mubr.f32.gmra.mrb[4].mxu1 %v39136_v15  ;;  %v34202_v15 = vsub.f32 %v34119_v45, %v14671_v26  ;;  %v39185_v45 = vld [vmem:[#allocation194_spill] sm:$0xff] }
 0x39b   : > { %24900 = vmatprep.mubr.f32.mxu0 %v39137_v19  ;;  %27301 = vmatpush3.bf16.msra.mxu0 %v39134_v52  ;;  %v39143_v52 = vld [vmem:[#allocation181_spill] sm:$0xff] }
 0x39c   : > { %22743 = vmatprep.mubr.f32.mxu1 %v39138_v58  ;;  %26439 = vmatprep.subr.bf16.mxu1 %v33712_v46  ;;  %39183 = vst [vmem:[#allocation179_spill] sm:$0xff] %v34202_v15 }
 0x39d   : > { %27303 = vmatprep.subr.bf16.mxu0 %v39139_v62  ;;  %26441 = vmatpush3.bf16.msra.mxu1 %v33712_v46  ;;  %v39146_v46 = vld [vmem:[#allocation343_spill] sm:$0xff] }
 0x39e   : > { %24901 = vmatmul.mubr.f32.gmra.mrb[4].mxu0 %v38940_v44  ;;  %22744 = vmatmul.mubr.f32.gmra.mrb[6].mxu1 %v39140_v21 }
 0x39f   : > { %24903 = vmatprep.mubr.f32.mxu0 %v39141_v5  ;;  %22746 = vmatprep.mubr.f32.mxu1 %v39142_v9  ;;  %v39180_v9 = vld [vmem:[#allocation374_spill] sm:$0xff] }
 0x3a0   : > { %27305 = vmatpush3.bf16.msra.mxu0 %v39139_v62  ;;  %26443 = vmatprep.subr.bf16.mxu1 %v33774_v6  ;;  %v39148_v62 = vld [vmem:[#allocation223_spill] sm:$0xff] }
 0x3a1   : > { %27307 = vmatprep.subr.bf16.mxu0 %v39143_v52  ;;  %26445 = vmatpush3.bf16.msra.mxu1 %v33774_v6  ;;  %v39149_v6 = vld [vmem:[#allocation226_spill] sm:$0xff] }
 0x3a2   : > { %24904 = vmatmul.mubr.f32.gmra.mrb[6].mxu0 %v39144_v37  ;;  %22747 = vmatmul.mubr.f32.gmra.mrb[8].mxu1 %v39145_v13  ;;  %v34190_v13 = vld [vmem:[%s36498_s1 + $0x3a8] sm:$0xff] }
 0x3a3   : > { %24906 = vmatprep.mubr.f32.mxu0 %v39146_v46  ;;  %22749 = vmatprep.mubr.f32.mxu1 %v39147_v55  ;;  %v34185_v55 = vld [vmem:[%s36498_s1 + $0x3a0] sm:$0xff]  ;;  %v14683_v39 = vand.u32 4294901760, %v34190_v13 }
 0x3a4   : > { %27309 = vmatpush3.bf16.msra.mxu0 %v39143_v52  ;;  %26447 = vmatprep.subr.bf16.mxu1 %v33818_v33  ;;  %v39150_v52 = vld [vmem:[#allocation228_spill] sm:$0xff]  ;;  %v14680_v10 = vand.u32 4294901760, %v34185_v55 }
 0x3a5   : > { %27311 = vmatprep.subr.bf16.mxu0 %v38988_v57  ;;  %26449 = vmatpush3.bf16.msra.mxu1 %v33818_v33  ;;  %v34114_v33 = vld [vmem:[%s36498_s1 + $0x380] sm:$0xff] }
 0x3a6   : > { %24907 = vmatmul.mubr.f32.gmra.mrb[8].mxu0 %v38944_v12  ;;  %22750 = vmatmul.mubr.f32.gmra.mrb[10].mxu1 %v39148_v62  ;;  %v14668_v4 = vand.u32 4294901760, %v34114_v33  ;;  %v39177_v62 = vld [vmem:[#allocation21_spill] sm:$0xff] }
 0x3a7   : > { %24909 = vmatprep.mubr.f32.mxu0 %v38945_v51  ;;  %22752 = vmatprep.mubr.f32.mxu1 %v39149_v6 }
 0x3a8   : > { %27313 = vmatpush3.bf16.msra.mxu0 %v38988_v57  ;;  %26451 = vmatprep.subr.bf16.mxu1 %v33850_v40  ;;  %v39151_v57 = vld [vmem:[#allocation230_spill] sm:$0xff]  ;;  %v34137_v24 = vpack.c.bf16 %v14671_v26, %v14668_v4  ;;  %v34199_v58 = vsub.f32 %v34114_v33, %v14668_v4  ;;  %v34216_v4 = vld [vmem:[%s36498_s1 + $0x3b8] sm:$0xff] }
 0x3a9   : > { %27315 = vmatprep.subr.bf16.mxu0 %v38996_v34  ;;  %26453 = vmatpush3.bf16.msra.mxu1 %v33850_v40  ;;  %v26458_v40 = vpack.c.bf16 %v33972_v32, %v33967_v48  ;;  %v39188_v33 = vld [vmem:[#allocation201_spill] sm:$0xff] }
 0x3aa   : > { %24910 = vmatmul.mubr.f32.gmra.mrb[10].mxu0 %v38946_v41  ;;  %22753 = vmatmul.mubr.f32.gmra.mrb[12].mxu1 %v39150_v52  ;;  %39154 = vst [vmem:[#allocation317_spill] sm:$0xff] %v34137_v24  ;;  %v39176_v52 = vld [vmem:[#allocation444_spill] sm:$0xff]  ;;  %39182 = vst [vmem:[#allocation209_spill] sm:$0xff] %v34199_v58  ;;  %v34220_v26 = vpack.c.bf16 %v34202_v15, %v34199_v58 }
 0x3ab   : > { %24912 = vmatprep.mubr.f32.mxu0 %v38947_v2  ;;  %22755 = vmatprep.mubr.f32.mxu1 %v39151_v57  ;;  %v39174_v57 = vld [vmem:[#allocation292_spill] sm:$0xff] }
 0x3ac   : > { %27317 = vmatpush3.bf16.msra.mxu0 %v38996_v34  ;;  %26455 = vmatprep.subr.bf16.mxu1 %v33881_v20  ;;  %v39153_v34 = vld [vmem:[#allocation249_spill] sm:$0xff] }
 0x3ad   : > { %27319 = vmatprep.subr.bf16.mxu0 %v33128_v8  ;;  %26457 = vmatpush3.bf16.msra.mxu1 %v33881_v20  ;;  %v39155_v20 = vld [vmem:[#allocation253_spill] sm:$0xff] }
 0x3ae   : > { %24913 = vmatmul.mubr.f32.gmra.mrb[12].mxu0 %v38948_v59  ;;  %22756 = vmatmul.mubr.f32.gmra.mrb[14].mxu1 %v39152_v38  ;;  %v39172_v38 = vld [vmem:[#allocation287_spill] sm:$0xff] }
 0x3af   : > { %24915 = vmatprep.mubr.f32.mxu0 %v38949_v42  ;;  %22758 = vmatprep.mubr.f32.mxu1 %v39153_v34  ;;  %v39170_v34 = vld [vmem:[#allocation285_spill] sm:$0xff] }
 0x3b0   : > { %27321 = vmatpush3.bf16.msra.mxu0 %v33128_v8  ;;  %26459 = vmatprep.subr.bf16.mxu1 %v26458_v40  ;;  %v39158_v8 = vld [vmem:[#allocation256_spill] sm:$0xff] }
 0x3b1   : > { %27323 = vmatprep.subr.bf16.mxu0 %v33162_v30  ;;  %26461 = vmatpush3.bf16.msra.mxu1 %v26458_v40  ;;  %v39159_v40 = vld [vmem:[#allocation259_spill] sm:$0xff] }
 0x3b2   : > { %24916 = vmatmul.mubr.f32.gmra.mrb[14].mxu0 %v38951_v18  ;;  %22759 = vmatmul.mubr.f32.gmra.mrb[16].mxu1 %v39155_v20  ;;  %v39168_v20 = vld [vmem:[#allocation280_spill] sm:$0xff] }
 0x3b3   : > { %24918 = vmatprep.mubr.f32.mxu0 %v38952_v50  ;;  %22761 = vmatprep.mubr.f32.mxu1 %v39156_v23  ;;  %v39163_v23 = vld [vmem:[#allocation127_spill] sm:$0xff] }
 0x3b4   : > { %27325 = vmatpush3.bf16.msra.mxu0 %v33162_v30  ;;  %26463 = vmatprep.subr.bf16.mxu1 %v39157_v61  ;;  %v39162_v30 = vld [vmem:[#allocation265_spill] sm:$0xff] }
 0x3b5   : > { %27327 = vmatprep.subr.bf16.mxu0 %v34137_v24 }
 0x3b6   : > { %24919 = vmatmul.mubr.f32.gmra.mrb[16].mxu0 %v38954_v35  ;;  %22762 = vmatmul.mubr.f32.gmra.mrb[18].mxu1 %v39158_v8  ;;  %v39164_v8 = vld [vmem:[#allocation269_spill] sm:$0xff] }
 0x3b7   : > { %24921 = vmatprep.mubr.f32.mxu0 %v38955_v53  ;;  %22764 = vmatprep.mubr.f32.mxu1 %v39159_v40  ;;  %v39165_v40 = vld [vmem:[#allocation272_spill] sm:$0xff] }
 0x3ba   : > { %24922 = vmatmul.mubr.f32.gmra.mrb[18].mxu0 %v38956_v0  ;;  %22765 = vmatmul.mubr.f32.gmra.mrb[20].mxu1 %v39160_v56  ;;  %v39166_v56 = vld [vmem:[#allocation278_spill] sm:$0xff] }
 0x3bb   : > { %24924 = vmatprep.mubr.f32.mxu0 %v38957_v49  ;;  %22767 = vmatprep.mubr.f32.mxu1 %v39161_v60  ;;  %v39167_v60 = vld [vmem:[#allocation411_spill] sm:$0xff] }
 0x3be   : > { %24925 = vmatmul.mubr.f32.gmra.mrb[20].mxu0 %v38958_v17  ;;  %22768 = vmatmul.mubr.f32.gmra.mrb[22].mxu1 %v39162_v30  ;;  %v39169_v30 = vld [vmem:[#allocation417_spill] sm:$0xff] }
 0x3bf   : > { %24927 = vmatprep.mubr.f32.mxu0 %v39017_v3  ;;  %22770 = vmatprep.mubr.f32.mxu1 %v39163_v23  ;;  %v39171_v23 = vld [vmem:[#allocation10_spill] sm:$0xff] }
 0x3c2   : > { %24928 = vmatmul.mubr.f32.gmra.mrb[22].mxu0 %v39019_v54  ;;  %22771 = vmatmul.mubr.f32.gmra.mrb[24].mxu1 %v39164_v8  ;;  %v39173_v8 = vld [vmem:[#allocation327_spill] sm:$0xff] }
 0x3c3   : > { %24930 = vmatprep.mubr.f32.mxu0 %v39021_v43  ;;  %22773 = vmatprep.mubr.f32.mxu1 %v39165_v40  ;;  %v19036_v40 = vld [vmem:[%s36498_s1 + $0x390] sm:$0xff] }
 0x3c6   : > { %24931 = vmatmul.mubr.f32.gmra.mrb[24].mxu0 %v39023_v27  ;;  %22774 = vmatmul.mubr.f32.gmra.mrb[26].mxu1 %v39166_v56  ;;  %v19037_v56 = vld [vmem:[%s36498_s1 + $0x398] sm:$0xff] }
 0x3c7   : > { %24933 = vmatprep.mubr.f32.mxu0 %v39167_v60  ;;  %22776 = vmatprep.mubr.f32.mxu1 %v39168_v20  ;;  %v39175_v20 = vld [vmem:[#allocation14_spill] sm:$0xff]  ;;  %v14677_v6 = vand.u32 4294901760, %v19037_v56 }
 0x3ca   : > { %24934 = vmatmul.mubr.f32.gmra.mrb[26].mxu0 %v39169_v30  ;;  %22777 = vmatmul.mubr.f32.gmra.mrb[28].mxu1 %v39170_v34  ;;  %v14674_v34 = vand.u32 4294901760, %v19036_v40 }
 0x3cb   : > { %24936 = vmatprep.mubr.f32.mxu0 %v39171_v23  ;;  %22779 = vmatprep.mubr.f32.mxu1 %v39172_v38  ;;  %v39178_v38 = vld [vmem:[#allocation445_spill] sm:$0xff] }
 0x3cc   : > { %v34196_v21 = vpack.c.bf16 %v14677_v6, %v14674_v34 }
 0x3ce   : > { %24937 = vmatmul.mubr.f32.gmra.mrb[28].mxu0 %v39173_v8  ;;  %22780 = vmatmul.mubr.f32.gmra.mrb[30].mxu1 %v39174_v57  ;;  %v39179_v57 = vld [vmem:[#allocation189_spill] sm:$0xff]  ;;  %39181 = vst [vmem:[#allocation320_spill] sm:$0xff] %v34196_v21 }
 0x3cf   : > { %24939 = vmatprep.mubr.f32.mxu0 %v39175_v20  ;;  %22814 = vmatprep.mubr.f32.mxu1 %v39176_v52 }
 0x3d2   : > { %24940 = vmatmul.mubr.f32.gmra.mrb[30].mxu0 %v39177_v62  ;;  %22815 = vmatmul.mubr.f32.vlgmr.msra.gmra.mrb[0].mxu1 %v39178_v38 }
 0x3d3   : > { %24974 = vmatprep.mubr.f32.mxu0 %v39129_v31  ;;  %26465 = vmatpush3.bf16.msra.mxu1 %v39157_v61  ;;  %v39184_v31 = vld [vmem:[#allocation192_spill] sm:$0xff] }
 0x3d4   : > { %22817 = vmatprep.mubr.f32.mxu1 %v39179_v57  ;;  %26467 = vmatprep.subr.bf16.mxu1 %v39180_v9  ;;  %v34211_v57 = vld [vmem:[%s36498_s1 + $0x3b0] sm:$0xff] }
 0x3d6   : > { %24975 = vmatmul.mubr.f32.vlgmr.msra.gmra.mrb[0].mxu0 %v38935_v63  ;;  %22818 = vmatmul.mubr.f32.gmra.mrb[2].mxu1 %v39184_v31  ;;  %v34227_v31 = vpack.c.bf16 %v14683_v39, %v14680_v10  ;;  %v39189_v63 = vld [vmem:[#allocation323_spill] sm:$0xff] }
 0x3d7   : > { %27329 = vmatpush3.bf16.msra.mxu0 %v34137_v24  ;;  %24977 = vmatprep.mubr.f32.mxu0 %v39132_v47  ;;  %v34236_v47 = vld [vmem:[%s36498_s1 + $0x3c0] sm:$0xff]  ;;  %v39190_v24 = vand.u32 4294901760, %v34211_v57 }
 0x3d8   : > { %22820 = vmatprep.mubr.f32.mxu1 %v39185_v45  ;;  %27331 = vmatprep.subr.bf16.mxu0 %v34196_v21  ;;  %39186 = vst [vmem:[#allocation332_spill] sm:$0xff] %v34227_v31  ;;  %v34241_v45 = vld [vmem:[%s36498_s1 + $0x3c8] sm:$0xff] }
 0x3d9   : > { %26469 = vmatpush3.bf16.msra.mxu1 %v39180_v9  ;;  %v39191_v9 = vand.u32 4294901760, %v34216_v4 }
 0x3da   : > { %24978 = vmatmul.mubr.f32.gmra.mrb[2].mxu0 %v39135_v36  ;;  %22821 = vmatmul.mubr.f32.gmra.mrb[4].mxu1 %v39187_v29  ;;  %v34247_v36 = vsub.f32 %v19036_v40, %v14674_v34  ;;  %v34249_v29 = vsub.f32 %v19037_v56, %v14677_v6  ;;  %v39193_v34 = vld [vmem:[#allocation211_spill] sm:$0xff]  ;;  %v34266_v56 = vld [vmem:[%s36498_s1 + $0x3d0] sm:$0xff]  ;;  %v34271_v6 = vld [vmem:[%s36498_s1 + $0x3d8] sm:$0xff] }
 0x3db   : > { %24980 = vmatprep.mubr.f32.mxu0 %v39137_v19  ;;  %27333 = vmatpush3.bf16.msra.mxu0 %v34196_v21  ;;  %v34257_v22 = vpack.c.bf16 %v39191_v9, %v39190_v24  ;;  %v37660_v19 = vand.u32 4294901760, %v34236_v47  ;;  %v39194_v9 = vld [vmem:[#allocation219_spill] sm:$0xff]  ;;  %v39195_v40 = vld [vmem:[#allocation438_spill] sm:$0xff]  ;;  %v39197_v21 = vld [vmem:[#allocation220_spill] sm:$0xff] }
 0x3dc   : > { %22823 = vmatprep.mubr.f32.mxu1 %v39188_v33  ;;  %26471 = vmatprep.subr.bf16.mxu1 %v39189_v63  ;;  %v37659_v33 = vand.u32 4294901760, %v34241_v45  ;;  %v34275_v24 = vpack.c.bf16 %v34249_v29, %v34247_v36 }
 0x3dd   : > { %27335 = vmatprep.subr.bf16.mxu0 %v34227_v31  ;;  %26473 = vmatpush3.bf16.msra.mxu1 %v39189_v63  ;;  %39192 = vst [vmem:[#allocation213_spill] sm:$0xff] %v34257_v22  ;;  %v34313_v63 = vsub.f32 %v34190_v13, %v14683_v39  ;;  %v34330_v39 = vld [vmem:[%s36498_s1 + $0x3f0] sm:$0xff]  ;;  %v34335_v13 = vld [vmem:[%s36498_s1 + $0x3f8] sm:$0xff] }
 0x3de   : > { %24981 = vmatmul.mubr.f32.gmra.mrb[4].mxu0 %v38940_v44  ;;  %22824 = vmatmul.mubr.f32.gmra.mrb[6].mxu1 %v39193_v34  ;;  %v34287_v34 = vpack.c.bf16 %v37659_v33, %v37660_v19  ;;  %v39198_v33 = vld [vmem:[#allocation222_spill] sm:$0xff]  ;;  %v39199_v19 = vld [vmem:[#allocation439_spill] sm:$0xff] }
 0x3df   : > { %24983 = vmatprep.mubr.f32.mxu0 %v39141_v5  ;;  %22826 = vmatprep.mubr.f32.mxu1 %v39194_v9  ;;  %v34294_v9 = vld [vmem:[%s36498_s1 + $0x3e0] sm:$0xff] }
 0x3e0   : > { %27337 = vmatpush3.bf16.msra.mxu0 %v34227_v31  ;;  %26475 = vmatprep.subr.bf16.mxu1 %v39195_v40  ;;  %39196 = vst [vmem:[#allocation8_spill] sm:$0xff] %v34287_v34  ;;  %v34299_v31 = vld [vmem:[%s36498_s1 + $0x3e8] sm:$0xff]  ;;  %v39206_v44 = vand.u32 4294901760, %v34294_v9 }
 0x3e1   : > { %27339 = vmatprep.subr.bf16.mxu0 %v34257_v22  ;;  %26477 = vmatpush3.bf16.msra.mxu1 %v39195_v40  ;;  %v34310_v40 = vsub.f32 %v34185_v55, %v14680_v10  ;;  %v39203_v55 = vld [vmem:[#allocation233_spill] sm:$0xff]  ;;  %v39204_v10 = vld [vmem:[#allocation234_spill] sm:$0xff]  ;;  %v39207_v5 = vand.u32 4294901760, %v34299_v31 }
 0x3e2   : > { %24984 = vmatmul.mubr.f32.gmra.mrb[6].mxu0 %v39144_v37  ;;  %22827 = vmatmul.mubr.f32.gmra.mrb[8].mxu1 %v39197_v21  ;;  %v39201_v21 = vand.u32 4294901760, %v34271_v6 }
 0x3e3   : > { %24986 = vmatprep.mubr.f32.mxu0 %v39146_v46  ;;  %22829 = vmatprep.mubr.f32.mxu1 %v39198_v33  ;;  %v39200_v33 = vand.u32 4294901760, %v34266_v56 }
 0x3e4   : > { %27341 = vmatpush3.bf16.msra.mxu0 %v34257_v22  ;;  %26479 = vmatprep.subr.bf16.mxu1 %v39199_v19 }
 0x3e5   : > { %27343 = vmatprep.subr.bf16.mxu0 %v34287_v34  ;;  %26481 = vmatpush3.bf16.msra.mxu1 %v39199_v19  ;;  %v34321_v46 = vpack.c.bf16 %v39201_v21, %v39200_v33  ;;  %v34339_v21 = vpack.c.bf16 %v34313_v63, %v34310_v40  ;;  %v39205_v33 = vld [vmem:[#allocation442_spill] sm:$0xff] }
 0x3e6   : > { %24987 = vmatmul.mubr.f32.gmra.mrb[8].mxu0 %v38944_v12  ;;  %22830 = vmatmul.mubr.f32.gmra.mrb[10].mxu1 %v39203_v55  ;;  %v34349_v55 = vpack.c.bf16 %v39207_v5, %v39206_v44  ;;  %v39210_v44 = vld [vmem:[#allocation237_spill] sm:$0xff]  ;;  %v39211_v5 = vld [vmem:[#allocation239_spill] sm:$0xff]  ;;  %v39212_v12 = vld [vmem:[#allocation184_spill] sm:$0xff] }
 0x3e7   : > { %39202 = vst [vmem:[#allocation196_spill] sm:$0xff] %v34321_v46  ;;  %24989 = vmatprep.mubr.f32.mxu0 %v38945_v51  ;;  %22832 = vmatprep.mubr.f32.mxu1 %v39204_v10  ;;  %v39208_v10 = vand.u32 4294901760, %v34199_v58  ;;  %v39213_v51 = vand.u32 4294901760, %v34211_v57 }
 0x3e8   : > { %27345 = vmatpush3.bf16.msra.mxu0 %v34287_v34  ;;  %26483 = vmatprep.subr.bf16.mxu1 %v39205_v33  ;;  %v39209_v34 = vand.u32 4294901760, %v34202_v15 }
 0x3e9   : > { %27347 = vmatprep.subr.bf16.mxu0 %v34321_v46  ;;  %26485 = vmatpush3.bf16.msra.mxu1 %v39205_v33  ;;  %v15072_v37 = vsub.f32 %v34199_v58, %v39208_v10  ;;  %v34370_v10 = vsub.f32 %v34211_v57, %v39213_v51  ;;  %v39214_v58 = vand.u32 4294901760, %v34216_v4  ;;  %v39217_v51 = vld [vmem:[#allocation244_spill] sm:$0xff]  ;;  %v39218_v57 = vld [vmem:[#allocation251_spill] sm:$0xff] }
 0x3ea   : > { %v15079_v22 = vsub.f32 %v34202_v15, %v39209_v34  ;;  %24990 = vmatmul.mubr.f32.gmra.mrb[10].mxu0 %v38946_v41  ;;  %22833 = vmatmul.mubr.f32.gmra.mrb[12].mxu1 %v39210_v44  ;;  %v39216_v44 = vand.u32 4294901760, %v34335_v13 }
 0x3eb   : > { %24992 = vmatprep.mubr.f32.mxu0 %v38947_v2  ;;  %22835 = vmatprep.mubr.f32.mxu1 %v39211_v5  ;;  %v34375_v34 = vsub.f32 %v34216_v4, %v39214_v58  ;;  %v39215_v5 = vand.u32 4294901760, %v34330_v39  ;;  %v15073_v41 = vand.u32 4294901760, %v15072_v37  ;;  %v39219_v4 = vld [vmem:[#allocation443_spill] sm:$0xff]  ;;  %v39222_v37 = vld [vmem:[#allocation321_spill] sm:$0xff] }
 0x3ec   : > { %27349 = vmatpush3.bf16.msra.mxu0 %v34321_v46  ;;  %26487 = vmatprep.subr.bf16.mxu1 %v39212_v12  ;;  %v15080_v15 = vand.u32 4294901760, %v15079_v22  ;;  %v39223_v22 = vand.u32 4294901760, %v39222_v37  ;;  %v39228_v37 = vld [vmem:[#allocation107_spill] sm:$0xff] }
 0x3ed   : > { %27351 = vmatprep.subr.bf16.mxu0 %v34349_v55  ;;  %26489 = vmatpush3.bf16.msra.mxu1 %v39212_v12  ;;  %v34383_v2 = vpack.c.bf16 %v39216_v44, %v39215_v5  ;;  %v34389_v58 = vpack.c.bf16 %v34375_v34, %v34370_v10  ;;  %v39220_v44 = vld [vmem:[#allocation15_spill] sm:$0xff] }
 0x3ee   : > { %24993 = vmatmul.mubr.f32.gmra.mrb[12].mxu0 %v38948_v59  ;;  %22836 = vmatmul.mubr.f32.gmra.mrb[14].mxu1 %v39217_v51  ;;  %v39221_v5 = vand.u32 4294901760, %v39220_v44  ;;  %v34403_v51 = vpack.c.bf16 %v15080_v15, %v15073_v41  ;;  %v39226_v44 = vand.u32 4294901760, %v34236_v47  ;;  %v39227_v41 = vand.u32 4294901760, %v34241_v45  ;;  %v39380_v59 = vld [vmem:[#allocation92_spill] sm:$0xff] }
 0x3ef   : > { %24995 = vmatprep.mubr.f32.mxu0 %v38949_v42  ;;  %22838 = vmatprep.mubr.f32.mxu1 %v39218_v57  ;;  %v39224_v42 = vld [vmem:[#allocation88_spill] sm:$0xff]  ;;  %v39225_v57 = vld [vmem:[#allocation258_spill] sm:$0xff] }
 0x3f0   : > { %27353 = vmatpush3.bf16.msra.mxu0 %v34349_v55  ;;  %26491 = vmatprep.subr.bf16.mxu1 %v39219_v4  ;;  %v34399_v46 = vpack.c.bf16 %v39223_v22, %v39221_v5  ;;  %v34414_v5 = vsub.f32 %v34236_v47, %v39226_v44  ;;  %v34419_v15 = vsub.f32 %v34241_v45, %v39227_v41  ;;  %v39230_v47 = vld [vmem:[#allocation264_spill] sm:$0xff]  ;;  %v39231_v45 = vld [vmem:[#allocation266_spill] sm:$0xff]  ;;  %v39232_v44 = vand.u32 4294901760, %v34266_v56 }
 0x3f1   : > { %27355 = vmatprep.subr.bf16.mxu0 %v34383_v2  ;;  %26493 = vmatpush3.bf16.msra.mxu1 %v39219_v4 }
 0x3f2   : > { %24996 = vmatmul.mubr.f32.gmra.mrb[14].mxu0 %v38951_v18  ;;  %22839 = vmatmul.mubr.f32.gmra.mrb[16].mxu1 %v39224_v42  ;;  %v34426_v22 = vpack.c.bf16 %v34419_v15, %v34414_v5  ;;  %v34437_v41 = vsub.f32 %v34266_v56, %v39232_v44  ;;  %v39237_v56 = vld [vmem:[#allocation276_spill] sm:$0xff]  ;;  %v39379_v18 = vld [vmem:[#allocation238_spill] sm:$0xff] }
 0x3f3   : > { %24998 = vmatprep.mubr.f32.mxu0 %v38952_v50  ;;  %22841 = vmatprep.mubr.f32.mxu1 %v39225_v57  ;;  %v39229_v57 = vld [vmem:[#allocation262_spill] sm:$0xff]  ;;  %v39378_v50 = vld [vmem:[#allocation91_spill] sm:$0xff] }
 0x3f4   : > { %27357 = vmatpush3.bf16.msra.mxu0 %v34383_v2  ;;  %26495 = vmatprep.subr.bf16.mxu1 %v34399_v46 }
 0x3f5   : > { %27359 = vmatprep.subr.bf16.mxu0 %v34403_v51 }
 0x3f6   : > { %24999 = vmatmul.mubr.f32.gmra.mrb[16].mxu0 %v38954_v35  ;;  %22842 = vmatmul.mubr.f32.gmra.mrb[18].mxu1 %v39228_v37  ;;  %v39233_v37 = vand.u32 4294901760, %v34271_v6 }
 0x3f7   : > { %25001 = vmatprep.mubr.f32.mxu0 %v38955_v53  ;;  %22844 = vmatprep.mubr.f32.mxu1 %v39229_v57  ;;  %v39235_v57 = vld [vmem:[#allocation147_spill] sm:$0xff] }
 0x3f8   : > { %v34442_v42 = vsub.f32 %v34271_v6, %v39233_v37  ;;  %v39238_v6 = vld [vmem:[#allocation277_spill] sm:$0xff]  ;;  %v39239_v37 = vand.u32 4294901760, %v34294_v9 }
 0x3fa   : > { %25002 = vmatmul.mubr.f32.gmra.mrb[18].mxu0 %v38956_v0  ;;  %22845 = vmatmul.mubr.f32.gmra.mrb[20].mxu1 %v39230_v47  ;;  %39234 = vst [vmem:[#allocation221_spill] sm:$0xff] %v34442_v42  ;;  %v34448_v47 = vpack.c.bf16 %v34442_v42, %v34437_v41  ;;  %v34459_v44 = vsub.f32 %v34294_v9, %v39239_v37  ;;  %v37682_v9 = vand.u32 4294901760, %v34247_v36  ;;  %v37685_v37 = vand.u32 4294901760, %v34249_v29  ;;  %v39377_v0 = vld [vmem:[#allocation230_spill] sm:$0xff] }
 0x3fb   : > { %25004 = vmatprep.mubr.f32.mxu0 %v38957_v49  ;;  %22847 = vmatprep.mubr.f32.mxu1 %v39231_v45  ;;  %v39236_v45 = vld [vmem:[#allocation148_spill] sm:$0xff] }
 0x3fc   : > { %39240 = vst [vmem:[#allocation27_spill] sm:$0xff] %v34459_v44 }
 0x3fe   : > { %25005 = vmatmul.mubr.f32.gmra.mrb[20].mxu0 %v38958_v17  ;;  %22848 = vmatmul.mubr.f32.gmra.mrb[22].mxu1 %v39235_v57  ;;  %v39241_v57 = vand.u32 4294901760, %v34299_v31 }
 0x3ff   : > { %25007 = vmatprep.mubr.f32.mxu0 %v39017_v3  ;;  %22850 = vmatprep.mubr.f32.mxu1 %v39236_v45  ;;  %v39243_v45 = vld [vmem:[#allocation284_spill] sm:$0xff] }
 0x400   : > { %v34464_v17 = vsub.f32 %v34299_v31, %v39241_v57  ;;  %v39245_v31 = vld [vmem:[#allocation291_spill] sm:$0xff]  ;;  %v39246_v57 = vld [vmem:[#allocation294_spill] sm:$0xff] }
 0x402   : > { %25008 = vmatmul.mubr.f32.gmra.mrb[22].mxu0 %v39019_v54  ;;  %22851 = vmatmul.mubr.f32.gmra.mrb[24].mxu1 %v39237_v56  ;;  %39242 = vst [vmem:[#allocation315_spill] sm:$0xff] %v34464_v17  ;;  %v34470_v56 = vpack.c.bf16 %v34464_v17, %v34459_v44 }
 0x403   : > { %25010 = vmatprep.mubr.f32.mxu0 %v39021_v43  ;;  %22853 = vmatprep.mubr.f32.mxu1 %v39238_v6  ;;  %v39244_v6 = vld [vmem:[#allocation286_spill] sm:$0xff] }
 0x406   : > { %25011 = vmatmul.mubr.f32.gmra.mrb[24].mxu0 %v39023_v27  ;;  %22854 = vmatmul.mubr.f32.gmra.mrb[26].mxu1 %v39243_v45  ;;  %v15086_v45 = vsub.f32 %v34247_v36, %v37682_v9  ;;  %v39256_v9 = vld [vmem:[#allocation46_spill] sm:$0xff] }
 0x407   : > { %25013 = vmatprep.mubr.f32.mxu0 %v39167_v60  ;;  %22856 = vmatprep.mubr.f32.mxu1 %v39244_v6  ;;  %v15093_v6 = vsub.f32 %v34249_v29, %v37685_v37  ;;  %v39251_v37 = vld [vmem:[#allocation314_spill] sm:$0xff] }
 0x408   : > { %v39252_v54 = vand.u32 4294901760, %v39251_v37  ;;  %v15087_v3 = vand.u32 4294901760, %v15086_v45 }
 0x409   : > { %v15094_v27 = vand.u32 4294901760, %v15093_v6 }
 0x40a   : > { %25014 = vmatmul.mubr.f32.gmra.mrb[26].mxu0 %v39169_v30  ;;  %22857 = vmatmul.mubr.f32.gmra.mrb[28].mxu1 %v39245_v31  ;;  %v39247_v30 = vld [vmem:[#allocation298_spill] sm:$0xff]  ;;  %v37689_v31 = vand.u32 4294901760, %v34370_v10 }
 0x40b   : > { %25016 = vmatprep.mubr.f32.mxu0 %v39171_v23  ;;  %22859 = vmatprep.mubr.f32.mxu1 %v39246_v57  ;;  %v39248_v57 = vand.u32 4294901760, %v39176_v52  ;;  %v39249_v23 = vld [vmem:[#allocation18_spill] sm:$0xff]  ;;  %v27362_v45 = vpack.c.bf16 %v15094_v27, %v15087_v3 }
 0x40c   : > { %v39250_v43 = vand.u32 4294901760, %v39249_v23 }
 0x40e   : > { %25017 = vmatmul.mubr.f32.gmra.mrb[28].mxu0 %v39173_v8  ;;  %22860 = vmatmul.mubr.f32.gmra.mrb[30].mxu1 %v39247_v30  ;;  %v26498_v60 = vpack.c.bf16 %v39252_v54, %v39250_v43  ;;  %v39253_v8 = vand.u32 4294901760, %v34310_v40  ;;  %v15114_v54 = vsub.f32 %v34370_v10, %v37689_v31  ;;  %v39257_v43 = vand.u32 4294901760, %v34375_v34  ;;  %v39262_v31 = vld [vmem:[#allocation440_spill] sm:$0xff] }
 0x40f   : > { %25019 = vmatprep.mubr.f32.mxu0 %v39175_v20  ;;  %22894 = vmatprep.mubr.f32.mxu1 %v39248_v57  ;;  %v39254_v20 = vand.u32 4294901760, %v34313_v63  ;;  %v39255_v57 = vand.u32 4294901760, %v39178_v38  ;;  %v37691_v38 = vand.u32 4294901760, %v34419_v15 }
 0x410   : > { %v15100_v30 = vsub.f32 %v34310_v40, %v39253_v8  ;;  %v15121_v23 = vsub.f32 %v34375_v34, %v39257_v43  ;;  %v39258_v8 = vld [vmem:[#allocation197_spill] sm:$0xff]  ;;  %v39263_v43 = vand.u32 4294901760, %v39262_v31  ;;  %v15115_v27 = vand.u32 4294901760, %v15114_v54  ;;  %v39269_v54 = vld [vmem:[#allocation207_spill] sm:$0xff] }
 0x411   : > { %v15107_v52 = vsub.f32 %v34313_v63, %v39254_v20  ;;  %v39259_v20 = vld [vmem:[#allocation47_spill] sm:$0xff] }
 0x412   : > { %25020 = vmatmul.mubr.f32.gmra.mrb[30].mxu0 %v39177_v62  ;;  %22895 = vmatmul.mubr.f32.vlgmr.msra.gmra.mrb[0].mxu1 %v39255_v57  ;;  %v15101_v6 = vand.u32 4294901760, %v15100_v30  ;;  %v39261_v57 = vld [vmem:[#allocation49_spill] sm:$0xff]  ;;  %v15122_v3 = vand.u32 4294901760, %v15121_v23  ;;  %v39266_v62 = vld [vmem:[#allocation200_spill] sm:$0xff]  ;;  %v39267_v30 = vand.u32 4294901760, %v34414_v5  ;;  %v39270_v23 = vld [vmem:[#allocation62_spill] sm:$0xff] }
 0x413   : > { %25054 = vmatprep.mubr.f32.mxu0 %v39256_v9  ;;  %26497 = vmatpush3.bf16.msra.mxu1 %v34399_v46  ;;  %v15108_v37 = vand.u32 4294901760, %v15107_v52  ;;  %v39260_v46 = vld [vmem:[#allocation198_spill] sm:$0xff]  ;;  %v39264_v9 = vld [vmem:[#allocation441_spill] sm:$0xff] }
 0x414   : > { %22897 = vmatprep.mubr.f32.mxu1 %v39258_v8  ;;  %26499 = vmatprep.subr.bf16.mxu1 %v26498_v60  ;;  %v39265_v8 = vand.u32 4294901760, %v39264_v9  ;;  %v15128_v52 = vsub.f32 %v34414_v5, %v39267_v30  ;;  %v39273_v30 = vand.u32 4294901760, %v33766_v1 }
 0x415   : > { %v27366_v9 = vpack.c.bf16 %v15108_v37, %v15101_v6  ;;  %v39276_v37 = vand.u32 4294901760, %v34442_v42 }
 0x416   : > { %25055 = vmatmul.mubr.f32.vlgmr.msra.gmra.mrb[0].mxu0 %v39259_v20  ;;  %22898 = vmatmul.mubr.f32.gmra.mrb[2].mxu1 %v39260_v46  ;;  %v26502_v49 = vpack.c.bf16 %v39265_v8, %v39263_v43  ;;  %v39268_v43 = vld [vmem:[#allocation51_spill] sm:$0xff]  ;;  %v39271_v8 = vld [vmem:[#allocation12_spill] sm:$0xff]  ;;  %v15129_v46 = vand.u32 4294901760, %v15128_v52 }
 0x417   : > { %27361 = vmatpush3.bf16.msra.mxu0 %v34403_v51  ;;  %25057 = vmatprep.mubr.f32.mxu0 %v39261_v57  ;;  %v15135_v51 = vsub.f32 %v34419_v15, %v37691_v38  ;;  %v39272_v57 = vand.u32 4294901760, %v39271_v8  ;;  %v39274_v38 = vld [vmem:[#allocation210_spill] sm:$0xff] }
 0x418   : > { %22900 = vmatprep.mubr.f32.mxu1 %v39266_v62  ;;  %27363 = vmatprep.subr.bf16.mxu0 %v27362_v45  ;;  %v27370_v62 = vpack.c.bf16 %v15122_v3, %v15115_v27  ;;  %v39279_v3 = vand.u32 4294901760, %v34335_v13  ;;  %v39282_v8 = vld [vmem:[#allocation218_spill] sm:$0xff] }
 0x419   : > { %26501 = vmatpush3.bf16.msra.mxu1 %v26498_v60  ;;  %v26506_v20 = vpack.c.bf16 %v39273_v30, %v39272_v57  ;;  %v15136_v31 = vand.u32 4294901760, %v15135_v51  ;;  %v39275_v60 = vand.u32 4294901760, %v34437_v41  ;;  %v39277_v57 = vand.u32 4294901760, %v34330_v39  ;;  %v39281_v51 = vld [vmem:[#allocation64_spill] sm:$0xff]  ;;  %v39283_v30 = vld [vmem:[#allocation66_spill] sm:$0xff] }
 0x41a   : > { %25058 = vmatmul.mubr.f32.gmra.mrb[2].mxu0 %v39268_v43  ;;  %22901 = vmatmul.mubr.f32.gmra.mrb[4].mxu1 %v39269_v54  ;;  %v34560_v52 = vsub.f32 %v34335_v13, %v39279_v3  ;;  %v39288_v13 = vand.u32 4294901760, %v34459_v44  ;;  %v39375_v54 = vld [vmem:[#allocation228_spill] sm:$0xff] }
 0x41b   : > { %25060 = vmatprep.mubr.f32.mxu0 %v39270_v23  ;;  %27365 = vmatpush3.bf16.msra.mxu0 %v27362_v45  ;;  %v15142_v6 = vsub.f32 %v34437_v41, %v39275_v60  ;;  %v15149_v23 = vsub.f32 %v34442_v42, %v39276_v37  ;;  %v34555_v27 = vsub.f32 %v34330_v39, %v39277_v57  ;;  %v39285_v60 = vld [vmem:[#allocation318_spill] sm:$0xff]  ;;  %v39287_v39 = vand.u32 4294901760, %v33810_v14  ;;  %v39291_v14 = vld [vmem:[#allocation231_spill] sm:$0xff] }
 0x41c   : > { %22903 = vmatprep.mubr.f32.mxu1 %v39274_v38  ;;  %26503 = vmatprep.subr.bf16.mxu1 %v26502_v49  ;;  %39280 = vst [vmem:[#allocation6_spill] sm:$0xff] %v34560_v52  ;;  %v39286_v37 = vand.u32 4294901760, %v39285_v60  ;;  %v27374_v1 = vpack.c.bf16 %v15136_v31, %v15129_v46  ;;  %v15156_v3 = vsub.f32 %v34459_v44, %v39288_v13  ;;  %v37692_v60 = vand.u32 4294901760, %v34560_v52  ;;  %v39292_v46 = vld [vmem:[#allocation81_spill] sm:$0xff]  ;;  %v39293_v31 = vld [vmem:[#allocation232_spill] sm:$0xff]  ;;  %v39374_v38 = vld [vmem:[#allocation79_spill] sm:$0xff] }
 0x41d   : > { %27367 = vmatprep.subr.bf16.mxu0 %v27366_v9  ;;  %26505 = vmatpush3.bf16.msra.mxu1 %v26502_v49  ;;  %39278 = vst [vmem:[#allocation4_spill] sm:$0xff] %v34555_v27  ;;  %v39284_v49 = vld [vmem:[#allocation229_spill] sm:$0xff]  ;;  %v15143_v45 = vand.u32 4294901760, %v15142_v6  ;;  %v15150_v43 = vand.u32 4294901760, %v15149_v23  ;;  %v39295_v23 = vand.u32 4294901760, %v33839_v28  ;;  %v39299_v28 = vld [vmem:[#allocation242_spill] sm:$0xff]  ;;  %v27418_v35 = vpack.c.bf16 %v34560_v52, %v34555_v27 }
 0x41e   : > { %25061 = vmatmul.mubr.f32.gmra.mrb[4].mxu0 %v39281_v51  ;;  %22904 = vmatmul.mubr.f32.gmra.mrb[6].mxu1 %v39282_v8  ;;  %v26510_v57 = vpack.c.bf16 %v39287_v39, %v39286_v37  ;;  %v15157_v37 = vand.u32 4294901760, %v15156_v3  ;;  %v39373_v8 = vld [vmem:[#allocation226_spill] sm:$0xff] }
 0x41f   : > { %25063 = vmatprep.mubr.f32.mxu0 %v39283_v30  ;;  %22906 = vmatprep.mubr.f32.mxu1 %v39284_v49  ;;  %v39289_v30 = vand.u32 4294901760, %v34464_v17  ;;  %v39290_v49 = vld [vmem:[#allocation70_spill] sm:$0xff] }
 0x420   : > { %27369 = vmatpush3.bf16.msra.mxu0 %v27366_v9  ;;  %26507 = vmatprep.subr.bf16.mxu1 %v26506_v20  ;;  %v37693_v9 = vand.u32 4294901760, %v34555_v27 }
 0x421   : > { %27371 = vmatprep.subr.bf16.mxu0 %v27370_v62  ;;  %26509 = vmatpush3.bf16.msra.mxu1 %v26506_v20  ;;  %v15163_v51 = vsub.f32 %v34464_v17, %v39289_v30  ;;  %v39294_v20 = vand.u32 4294901760, %v33834_v7  ;;  %v27378_v30 = vpack.c.bf16 %v15150_v43, %v15143_v45  ;;  %v39298_v7 = vld [vmem:[#allocation85_spill] sm:$0xff]  ;;  %v39300_v43 = vand.u32 4294901760, %v33864_v25  ;;  %v39413_v17 = vld [vmem:[#allocation292_spill] sm:$0xff] }
 0x422   : > { %25064 = vmatmul.mubr.f32.gmra.mrb[6].mxu0 %v39290_v49  ;;  %22907 = vmatmul.mubr.f32.gmra.mrb[8].mxu1 %v39291_v14  ;;  %v15170_v13 = vsub.f32 %v34555_v27, %v37693_v9  ;;  %v39297_v49 = vld [vmem:[#allocation240_spill] sm:$0xff]  ;;  %v39301_v45 = vand.u32 4294901760, %v33869_v11  ;;  %v39304_v9 = vld [vmem:[#allocation101_spill] sm:$0xff]  ;;  %v39306_v25 = vand.u32 4294901760, %v33967_v48  ;;  %v39307_v11 = vand.u32 4294901760, %v33972_v32  ;;  %v39312_v48 = vld [vmem:[#allocation110_spill] sm:$0xff] }
 0x423   : > { %25066 = vmatprep.mubr.f32.mxu0 %v39292_v46  ;;  %22909 = vmatprep.mubr.f32.mxu1 %v39293_v31  ;;  %v26514_v6 = vpack.c.bf16 %v39295_v23, %v39294_v20  ;;  %v15164_v39 = vand.u32 4294901760, %v15163_v51  ;;  %v15177_v46 = vsub.f32 %v34560_v52, %v37692_v60  ;;  %v39302_v23 = vld [vmem:[#allocation90_spill] sm:$0xff]  ;;  %v39303_v60 = vld [vmem:[#allocation243_spill] sm:$0xff]  ;;  %v39313_v32 = vld [vmem:[#allocation257_spill] sm:$0xff] }
 0x424   : > { %27373 = vmatpush3.bf16.msra.mxu0 %v27370_v62  ;;  %26511 = vmatprep.subr.bf16.mxu1 %v26510_v57  ;;  %v39296_v62 = vld [vmem:[#allocation83_spill] sm:$0xff]  ;;  %v26518_v51 = vpack.c.bf16 %v39301_v45, %v39300_v43  ;;  %v15171_v3 = vand.u32 4294901760, %v15170_v13  ;;  %v39315_v43 = vld [vmem:[#allocation261_spill] sm:$0xff]  ;;  %v39412_v27 = vld [vmem:[#allocation168_spill] sm:$0xff] }
 0x425   : > { %27375 = vmatprep.subr.bf16.mxu0 %v27374_v1  ;;  %26513 = vmatpush3.bf16.msra.mxu1 %v26510_v57  ;;  %v27382_v57 = vpack.c.bf16 %v15164_v39, %v15157_v37  ;;  %v15178_v20 = vand.u32 4294901760, %v15177_v46  ;;  %v39308_v46 = vld [vmem:[#allocation103_spill] sm:$0xff]  ;;  %v39309_v37 = vld [vmem:[#allocation248_spill] sm:$0xff]  ;;  %v39310_v39 = vld [vmem:[#allocation105_spill] sm:$0xff] }
 0x426   : > { %25067 = vmatmul.mubr.f32.gmra.mrb[8].mxu0 %v39296_v62  ;;  %22910 = vmatmul.mubr.f32.gmra.mrb[10].mxu1 %v39297_v49  ;;  %v39311_v13 = vld [vmem:[#allocation87_spill] sm:$0xff]  ;;  %v29516_v45 = vld [vmem:[%s29796_s27 + $0x198] sm:$0xff]  ;;  %v39362_v62 = vld [vmem:[#allocation202_spill] sm:$0xff] }
 0x427   : > { %25069 = vmatprep.mubr.f32.mxu0 %v39298_v7  ;;  %22912 = vmatprep.mubr.f32.mxu1 %v39299_v28  ;;  %v39305_v7 = vld [vmem:[#allocation245_spill] sm:$0xff]  ;;  %v39365_v28 = vld [vmem:[#allocation438_spill] sm:$0xff]  ;;  %v39369_v31 = vld [vmem:[#allocation215_spill] sm:$0xff] }
 0x428   : > { %27377 = vmatpush3.bf16.msra.mxu0 %v27374_v1  ;;  %26515 = vmatprep.subr.bf16.mxu1 %v26514_v6  ;;  %v26522_v1 = vpack.c.bf16 %v39307_v11, %v39306_v25  ;;  %v252_v25 = vld [vmem:[%s29796_s27 + $0x1a8] sm:$0x3]  ;;  %v39317_v11 = vld [vmem:[#allocation128_spill] sm:$0xff]  ;;  %v39367_v49 = vld [vmem:[#allocation214_spill] sm:$0xff] }
 0x429   : > { %27379 = vmatprep.subr.bf16.mxu0 %v27378_v30  ;;  %26517 = vmatpush3.bf16.msra.mxu1 %v26514_v6  ;;  %v27386_v6 = vpack.c.bf16 %v15178_v20, %v15171_v3  ;;  %v29517_v3 = vld [vmem:[%s29796_s27 + $0x1a0] sm:$0xff]  ;;  %v39371_v14 = vld [vmem:[#allocation223_spill] sm:$0xff] }
 0x42a   : > { %25070 = vmatmul.mubr.f32.gmra.mrb[10].mxu0 %v39302_v23  ;;  %22913 = vmatmul.mubr.f32.gmra.mrb[12].mxu1 %v39303_v60  ;;  %v14644_v20 = vrot.slane %v29517_v3, 1  ;;  %v39322_v3 = vld [vmem:[#allocation141_spill] sm:$0xff]  ;;  %v39364_v60 = vld [vmem:[#allocation212_spill] sm:$0xff] }
 0x42b   : > { %25072 = vmatprep.mubr.f32.mxu0 %v39304_v9  ;;  %22915 = vmatprep.mubr.f32.mxu1 %v39305_v7  ;;  %v39338_v9 = vld [vmem:[#allocation172_spill] sm:$0xff]  ;;  %v39341_v23 = vld [vmem:[#allocation293_spill] sm:$0xff] }
 0x42c   : > { %27381 = vmatpush3.bf16.msra.mxu0 %v27378_v30  ;;  %26519 = vmatprep.subr.bf16.mxu1 %v26518_v51  ;;  %v39314_v30 = vld [vmem:[#allocation121_spill] sm:$0xff] }
 0x42d   : > { %27383 = vmatprep.subr.bf16.mxu0 %v27382_v57  ;;  %26521 = vmatpush3.bf16.msra.mxu1 %v26518_v51  ;;  %v14643_v51 = vrot.slane %v29516_v45, 1  ;;  %v39321_v45 = vld [vmem:[#allocation268_spill] sm:$0xff] }
 0x42e   : > { %25073 = vmatmul.mubr.f32.gmra.mrb[12].mxu0 %v39308_v46  ;;  %22916 = vmatmul.mubr.f32.gmra.mrb[14].mxu1 %v39309_v37  ;;  %v39343_v37 = vld [vmem:[#allocation167_spill] sm:$0xff] }
 0x42f   : > { %25075 = vmatprep.mubr.f32.mxu0 %v39310_v39  ;;  %22918 = vmatprep.mubr.f32.mxu1 %v39311_v13  ;;  %v39320_v39 = vld [vmem:[#allocation130_spill] sm:$0xff] }
 0x430   : > { %27385 = vmatpush3.bf16.msra.mxu0 %v27382_v57  ;;  %26523 = vmatprep.subr.bf16.mxu1 %v26522_v1  ;;  %v39316_v57 = vld [vmem:[#allocation123_spill] sm:$0xff] }
 0x431   : > { %27387 = vmatprep.subr.bf16.mxu0 %v27386_v6  ;;  %26525 = vmatpush3.bf16.msra.mxu1 %v26522_v1  ;;  %v39318_v1 = vld [vmem:[#allocation125_spill] sm:$0xff] }
 0x432   : > { %25076 = vmatmul.mubr.f32.gmra.mrb[14].mxu0 %v39312_v48  ;;  %22919 = vmatmul.mubr.f32.gmra.mrb[16].mxu1 %v39313_v32  ;;  %v39319_v48 = vld [vmem:[#allocation267_spill] sm:$0xff] }
 0x433   : > { %25078 = vmatprep.mubr.f32.mxu0 %v39314_v30  ;;  %22921 = vmatprep.mubr.f32.mxu1 %v39315_v43  ;;  %v14646_v30 = vrot.slane %v252_v25, 1  ;;  %v39323_v43 = vld [vmem:[#allocation271_spill] sm:$0xff]  ;;  %v39328_v25 = vld [vmem:[#allocation145_spill] sm:$0xff] }
 0x434   : > { %27389 = vmatpush3.bf16.msra.mxu0 %v27386_v6  ;;  %26527 = vmatprep.subr.bf16.mxu1 %v39157_v61  ;;  %v14645_v6 = vsel %vm317_vm0, %v14643_v51, %v14644_v20  ;;  %v39329_v51 = vld [vmem:[#allocation275_spill] sm:$0xff] }
 0x435   : > { %27391 = vmatprep.subr.bf16.mxu0 %v34220_v26  ;;  %v34630_v46 = vand.u32 4294901760, %v14645_v6 }
 0x436   : > { %25079 = vmatmul.mubr.f32.gmra.mrb[16].mxu0 %v39316_v57  ;;  %22922 = vmatmul.mubr.f32.gmra.mrb[18].mxu1 %v39317_v11  ;;  %v14647_v57 = vsel %vm317_vm0, %v14644_v20, %v14646_v30  ;;  %v39325_v11 = vld [vmem:[#allocation143_spill] sm:$0xff]  ;;  %v39332_v30 = vld [vmem:[#allocation161_spill] sm:$0xff] }
 0x437   : > { %25081 = vmatprep.mubr.f32.mxu0 %v39318_v1  ;;  %22924 = vmatprep.mubr.f32.mxu1 %v39319_v48  ;;  %39324 = vst [vmem:[#allocation435_spill] sm:$0xff] %v34630_v46  ;;  %v39326_v1 = vld [vmem:[#allocation274_spill] sm:$0xff]  ;;  %v34635_v48 = vand.u32 4294901760, %v14647_v57  ;;  %v39333_v20 = vld [vmem:[#allocation283_spill] sm:$0xff] }
 0x439   : > { %39327 = vst [vmem:[#allocation436_spill] sm:$0xff] %v34635_v48 }
 0x43a   : > { %25082 = vmatmul.mubr.f32.gmra.mrb[18].mxu0 %v39320_v39  ;;  %22925 = vmatmul.mubr.f32.gmra.mrb[20].mxu1 %v39321_v45  ;;  %v34640_v39 = vsub.f32 %v14645_v6, %v34630_v46  ;;  %v34645_v45 = vsub.f32 %v14647_v57, %v34635_v48  ;;  %v39337_v6 = vld [vmem:[#allocation290_spill] sm:$0xff]  ;;  %v39340_v57 = vld [vmem:[#allocation165_spill] sm:$0xff] }
 0x43b   : > { %25084 = vmatprep.mubr.f32.mxu0 %v39322_v3  ;;  %22927 = vmatprep.mubr.f32.mxu1 %v39323_v43  ;;  %v39330_v3 = vld [vmem:[#allocation150_spill] sm:$0xff]  ;;  %v39331_v43 = vld [vmem:[#allocation281_spill] sm:$0xff] }
 0x43e   : > { %25085 = vmatmul.mubr.f32.gmra.mrb[20].mxu0 %v39325_v11  ;;  %22928 = vmatmul.mubr.f32.gmra.mrb[22].mxu1 %v39326_v1  ;;  %v39334_v11 = vld [vmem:[#allocation171_spill] sm:$0xff]  ;;  %v39335_v1 = vld [vmem:[#allocation169_spill] sm:$0xff] }
 0x43f   : > { %25087 = vmatprep.mubr.f32.mxu0 %v39328_v25  ;;  %22930 = vmatprep.mubr.f32.mxu1 %v39329_v51  ;;  %v8965_v32 = vsub.f32 %v39335_v1, %v39334_v11  ;;  %v37694_v25 = vand.u32 4294901760, %v34640_v39  ;;  %v39336_v51 = vld [vmem:[#allocation163_spill] sm:$0xff]  ;;  %v39410_v11 = vld [vmem:[#allocation166_spill] sm:$0xff] }
 0x442   : > { %25088 = vmatmul.mubr.f32.gmra.mrb[22].mxu0 %v39330_v3  ;;  %22931 = vmatmul.mubr.f32.gmra.mrb[24].mxu1 %v39331_v43  ;;  %v39339_v3 = vld [vmem:[#allocation170_spill] sm:$0xff]  ;;  %v37695_v43 = vand.u32 4294901760, %v34645_v45 }
 0x443   : > { %25090 = vmatprep.mubr.f32.mxu0 %v39332_v30  ;;  %22933 = vmatprep.mubr.f32.mxu1 %v39333_v20  ;;  %v8975_v13 = vsub.f32 %v39339_v3, %v39338_v9  ;;  %v34659_v30 = vand.u32 4294901760, %v8965_v32  ;;  %v15051_v20 = vsub.f32 %v34640_v39, %v37694_v25  ;;  %v39408_v9 = vld [vmem:[#allocation159_spill] sm:$0xff] }
 0x444   : > { %v15061_v7 = vsub.f32 %v34645_v45, %v37695_v43  ;;  %v39350_v43 = vld [vmem:[#allocation186_spill] sm:$0xff] }
 0x445   : > { %39342 = vst [vmem:[#allocation437_spill] sm:$0xff] %v34659_v30  ;;  %v15052_v32 = vand.u32 4294901760, %v15051_v20  ;;  %v39352_v20 = vld [vmem:[#allocation33_spill] sm:$0xff] }
 0x446   : > { %25091 = vmatmul.mubr.f32.gmra.mrb[24].mxu0 %v39336_v51  ;;  %22934 = vmatmul.mubr.f32.gmra.mrb[26].mxu1 %v39337_v6  ;;  %v39344_v51 = vld [vmem:[#allocation297_spill] sm:$0xff]  ;;  %v34666_v6 = vand.u32 4294901760, %v8975_v13  ;;  %v15062_v25 = vand.u32 4294901760, %v15061_v7  ;;  %v39348_v13 = vld [vmem:[#allocation175_spill] sm:$0xff] }
 0x447   : > { %25093 = vmatprep.mubr.f32.mxu0 %v39340_v57  ;;  %22936 = vmatprep.mubr.f32.mxu1 %v39341_v23  ;;  %v39346_v57 = vld [vmem:[#allocation301_spill] sm:$0xff]  ;;  %v39347_v23 = vld [vmem:[#allocation304_spill] sm:$0xff]  ;;  %v39354_v7 = vld [vmem:[#allocation35_spill] sm:$0xff] }
 0x448   : > { %39345 = vst [vmem:[#allocation325_spill] sm:$0xff] %v34666_v6 }
 0x44a   : > { %25094 = vmatmul.mubr.f32.gmra.mrb[26].mxu0 %v39343_v37  ;;  %22937 = vmatmul.mubr.f32.gmra.mrb[28].mxu1 %v39344_v51  ;;  %v39349_v37 = vld [vmem:[#allocation29_spill] sm:$0xff]  ;;  %v39360_v51 = vld [vmem:[#allocation323_spill] sm:$0xff] }
 0x44b   : > { %25096 = vmatprep.mubr.f32.mxu0 %v34659_v30  ;;  %22939 = vmatprep.mubr.f32.mxu1 %v39346_v57  ;;  %v39351_v30 = vld [vmem:[#allocation374_spill] sm:$0xff]  ;;  %v39359_v57 = vld [vmem:[#allocation195_spill] sm:$0xff] }
 0x44e   : > { %25097 = vmatmul.mubr.f32.gmra.mrb[28].mxu0 %v34666_v6  ;;  %22940 = vmatmul.mubr.f32.gmra.mrb[30].mxu1 %v39347_v23  ;;  %v39353_v6 = vld [vmem:[#allocation187_spill] sm:$0xff]  ;;  %v39358_v23 = vld [vmem:[#allocation48_spill] sm:$0xff] }
 0x44f   : > { %25099 = vmatprep.mubr.f32.mxu0 %v15052_v32  ;;  %22974 = vmatprep.mubr.f32.mxu1 %v33845_v16  ;;  %v39355_v32 = vld [vmem:[#allocation188_spill] sm:$0xff] }
 0x452   : > { %25100 = vmatmul.mubr.f32.gmra.mrb[30].mxu0 %v15062_v25  ;;  %22975 = vmatmul.mubr.f32.vlgmr.msra.gmra.mrb[0].mxu1 %v39348_v13  ;;  %v39356_v25 = vld [vmem:[#allocation41_spill] sm:$0xff] }
 0x453   : > { %25134 = vmatprep.mubr.f32.mxu0 %v39349_v37  ;;  %26529 = vmatpush3.bf16.msra.mxu1 %v39157_v61  ;;  %v39357_v61 = vld [vmem:[#allocation193_spill] sm:$0xff]  ;;  %v39406_v37 = vld [vmem:[#allocation152_spill] sm:$0xff] }
 0x454   : > { %22977 = vmatprep.mubr.f32.mxu1 %v39350_v43  ;;  %26531 = vmatprep.subr.bf16.mxu1 %v39351_v30 }
 0x456   : > { %25135 = vmatmul.mubr.f32.vlgmr.msra.gmra.mrb[0].mxu0 %v39352_v20  ;;  %22978 = vmatmul.mubr.f32.gmra.mrb[2].mxu1 %v39353_v6  ;;  %v39404_v20 = vld [vmem:[#allocation151_spill] sm:$0xff] }
 0x457   : > { %27393 = vmatpush3.bf16.msra.mxu0 %v34220_v26  ;;  %25137 = vmatprep.mubr.f32.mxu0 %v39354_v7  ;;  %v39361_v26 = vld [vmem:[#allocation52_spill] sm:$0xff]  ;;  %v39402_v7 = vld [vmem:[#allocation146_spill] sm:$0xff] }
 0x458   : > { %22980 = vmatprep.mubr.f32.mxu1 %v39355_v32  ;;  %27395 = vmatprep.subr.bf16.mxu0 %v34275_v24 }
 0x459   : > { %26533 = vmatpush3.bf16.msra.mxu1 %v39351_v30  ;;  %v39363_v30 = vld [vmem:[#allocation53_spill] sm:$0xff] }
 0x45a   : > { %25138 = vmatmul.mubr.f32.gmra.mrb[2].mxu0 %v39356_v25  ;;  %22981 = vmatmul.mubr.f32.gmra.mrb[4].mxu1 %v39357_v61  ;;  %v39400_v25 = vld [vmem:[#allocation139_spill] sm:$0xff] }
 0x45b   : > { %25140 = vmatprep.mubr.f32.mxu0 %v39358_v23  ;;  %27397 = vmatpush3.bf16.msra.mxu0 %v34275_v24  ;;  %v39366_v24 = vld [vmem:[#allocation60_spill] sm:$0xff] }
 0x45c   : > { %22983 = vmatprep.mubr.f32.mxu1 %v39359_v57  ;;  %26535 = vmatprep.subr.bf16.mxu1 %v39360_v51  ;;  %v39398_v23 = vld [vmem:[#allocation132_spill] sm:$0xff] }
 0x45d   : > { %27399 = vmatprep.subr.bf16.mxu0 %v34339_v21  ;;  %26537 = vmatpush3.bf16.msra.mxu1 %v39360_v51  ;;  %v39368_v51 = vld [vmem:[#allocation67_spill] sm:$0xff] }
 0x45e   : > { %25141 = vmatmul.mubr.f32.gmra.mrb[4].mxu0 %v39361_v26  ;;  %22984 = vmatmul.mubr.f32.gmra.mrb[6].mxu1 %v39362_v62  ;;  %v39397_v26 = vld [vmem:[#allocation265_spill] sm:$0xff] }
 0x45f   : > { %25143 = vmatprep.mubr.f32.mxu0 %v39363_v30  ;;  %22986 = vmatprep.mubr.f32.mxu1 %v39364_v60  ;;  %v39395_v30 = vld [vmem:[#allocation108_spill] sm:$0xff] }
 0x460   : > { %27401 = vmatpush3.bf16.msra.mxu0 %v34339_v21  ;;  %26539 = vmatprep.subr.bf16.mxu1 %v39365_v28  ;;  %v39370_v21 = vld [vmem:[#allocation71_spill] sm:$0xff] }
 0x461   : > { %27403 = vmatprep.subr.bf16.mxu0 %v34389_v58  ;;  %26541 = vmatpush3.bf16.msra.mxu1 %v39365_v28  ;;  %v39372_v28 = vld [vmem:[#allocation72_spill] sm:$0xff] }
 0x462   : > { %25144 = vmatmul.mubr.f32.gmra.mrb[6].mxu0 %v39366_v24  ;;  %22987 = vmatmul.mubr.f32.gmra.mrb[8].mxu1 %v39367_v49  ;;  %v39393_v24 = vld [vmem:[#allocation260_spill] sm:$0xff] }
 0x463   : > { %25146 = vmatprep.mubr.f32.mxu0 %v39368_v51  ;;  %22989 = vmatprep.mubr.f32.mxu1 %v39369_v31  ;;  %v39390_v51 = vld [vmem:[#allocation112_spill] sm:$0xff] }
 0x464   : > { %27405 = vmatpush3.bf16.msra.mxu0 %v34389_v58  ;;  %26543 = vmatprep.subr.bf16.mxu1 %v39199_v19  ;;  %v34728_v58 = vld [vmem:[%s36498_s1 + $0x188] sm:$0xff] }
 0x465   : > { %27407 = vmatprep.subr.bf16.mxu0 %v34426_v22  ;;  %26545 = vmatpush3.bf16.msra.mxu1 %v39199_v19  ;;  %v34723_v19 = vld [vmem:[%s36498_s1 + $0x180] sm:$0xff]  ;;  %v6552_v53 = vand.u32 4294901760, %v34728_v58 }
 0x466   : > { %25147 = vmatmul.mubr.f32.gmra.mrb[8].mxu0 %v39370_v21  ;;  %22990 = vmatmul.mubr.f32.gmra.mrb[10].mxu1 %v39371_v14  ;;  %v39389_v21 = vld [vmem:[#allocation256_spill] sm:$0xff] }
 0x467   : > { %25149 = vmatprep.mubr.f32.mxu0 %v39372_v28  ;;  %22992 = vmatprep.mubr.f32.mxu1 %v39373_v8  ;;  %v39386_v28 = vld [vmem:[#allocation255_spill] sm:$0xff] }
 0x468   : > { %27409 = vmatpush3.bf16.msra.mxu0 %v34426_v22  ;;  %26547 = vmatprep.subr.bf16.mxu1 %v39205_v33  ;;  %v39376_v22 = vld [vmem:[#allocation86_spill] sm:$0xff] }
 0x469   : > { %27411 = vmatprep.subr.bf16.mxu0 %v34448_v47  ;;  %26549 = vmatpush3.bf16.msra.mxu1 %v39205_v33  ;;  %v6549_v33 = vand.u32 4294901760, %v34723_v19 }
 0x46a   : > { %25150 = vmatmul.mubr.f32.gmra.mrb[10].mxu0 %v39374_v38  ;;  %22993 = vmatmul.mubr.f32.gmra.mrb[12].mxu1 %v39375_v54  ;;  %v39384_v38 = vld [vmem:[#allocation253_spill] sm:$0xff] }
 0x46b   : > { %25152 = vmatprep.mubr.f32.mxu0 %v39376_v22  ;;  %22995 = vmatprep.mubr.f32.mxu1 %v39377_v0  ;;  %v34748_v22 = vpack.c.bf16 %v6552_v53, %v6549_v33  ;;  %v34800_v42 = vsub.f32 %v34723_v19, %v6549_v33 }
 0x46c   : > { %27413 = vmatpush3.bf16.msra.mxu0 %v34448_v47  ;;  %26551 = vmatprep.subr.bf16.mxu1 %v39212_v12  ;;  %v39381_v47 = vld [vmem:[#allocation249_spill] sm:$0xff] }
 0x46d   : > { %27415 = vmatprep.subr.bf16.mxu0 %v34470_v56  ;;  %26553 = vmatpush3.bf16.msra.mxu1 %v39212_v12  ;;  %39382 = vst [vmem:[#allocation185_spill] sm:$0xff] %v34748_v22  ;;  %v39383_v12 = vld [vmem:[#allocation99_spill] sm:$0xff] }
 0x46e   : > { %25153 = vmatmul.mubr.f32.gmra.mrb[12].mxu0 %v39378_v50  ;;  %22996 = vmatmul.mubr.f32.gmra.mrb[14].mxu1 %v39379_v18  ;;  %v39385_v50 = vld [vmem:[#allocation106_spill] sm:$0xff] }
 0x46f   : > { %25155 = vmatprep.mubr.f32.mxu0 %v39380_v59  ;;  %22998 = vmatprep.mubr.f32.mxu1 %v39381_v47  ;;  %v39387_v59 = vld [vmem:[#allocation317_spill] sm:$0xff] }
 0x470   : > { %27417 = vmatpush3.bf16.msra.mxu0 %v34470_v56  ;;  %26555 = vmatprep.subr.bf16.mxu1 %v39219_v4  ;;  %v39388_v56 = vld [vmem:[#allocation111_spill] sm:$0xff] }
 0x471   : > { %27419 = vmatprep.subr.bf16.mxu0 %v27418_v35  ;;  %26557 = vmatpush3.bf16.msra.mxu1 %v39219_v4  ;;  %v39391_v4 = vld [vmem:[#allocation259_spill] sm:$0xff] }
 0x472   : > { %25156 = vmatmul.mubr.f32.gmra.mrb[14].mxu0 %v39383_v12  ;;  %22999 = vmatmul.mubr.f32.gmra.mrb[16].mxu1 %v39384_v38  ;;  %v39392_v12 = vld [vmem:[#allocation119_spill] sm:$0xff] }
 0x473   : > { %25158 = vmatprep.mubr.f32.mxu0 %v39385_v50  ;;  %23001 = vmatprep.mubr.f32.mxu1 %v39386_v28  ;;  %v39394_v50 = vld [vmem:[#allocation126_spill] sm:$0xff] }
 0x474   : > { %27421 = vmatpush3.bf16.msra.mxu0 %v27418_v35  ;;  %26559 = vmatprep.subr.bf16.mxu1 %v34748_v22  ;;  %v39396_v35 = vld [vmem:[#allocation131_spill] sm:$0xff] }
 0x475   : > { %27423 = vmatprep.subr.bf16.mxu0 %v39387_v59 }
 0x476   : > { %25159 = vmatmul.mubr.f32.gmra.mrb[16].mxu0 %v39388_v56  ;;  %23002 = vmatmul.mubr.f32.gmra.mrb[18].mxu1 %v39389_v21  ;;  %v39399_v56 = vld [vmem:[#allocation127_spill] sm:$0xff] }
 0x477   : > { %25161 = vmatprep.mubr.f32.mxu0 %v39390_v51  ;;  %23004 = vmatprep.mubr.f32.mxu1 %v39391_v4  ;;  %v39401_v51 = vld [vmem:[#allocation269_spill] sm:$0xff] }
 0x47a   : > { %25162 = vmatmul.mubr.f32.gmra.mrb[18].mxu0 %v39392_v12  ;;  %23005 = vmatmul.mubr.f32.gmra.mrb[20].mxu1 %v39393_v24  ;;  %v39403_v12 = vld [vmem:[#allocation272_spill] sm:$0xff] }
 0x47b   : > { %25164 = vmatprep.mubr.f32.mxu0 %v39394_v50  ;;  %23007 = vmatprep.mubr.f32.mxu1 %v39395_v30  ;;  %v39405_v50 = vld [vmem:[#allocation278_spill] sm:$0xff] }
 0x47e   : > { %25165 = vmatmul.mubr.f32.gmra.mrb[20].mxu0 %v39396_v35  ;;  %23008 = vmatmul.mubr.f32.gmra.mrb[22].mxu1 %v39397_v26  ;;  %v39407_v35 = vld [vmem:[#allocation280_spill] sm:$0xff] }
 0x47f   : > { %25167 = vmatprep.mubr.f32.mxu0 %v39398_v23  ;;  %23010 = vmatprep.mubr.f32.mxu1 %v39399_v56  ;;  %v18972_v23 = vld [vmem:[%s36498_s1 + $0x190] sm:$0xff] }
 0x480   : > { %v6555_v52 = vand.u32 4294901760, %v18972_v23 }
 0x482   : > { %25168 = vmatmul.mubr.f32.gmra.mrb[22].mxu0 %v39400_v25  ;;  %23011 = vmatmul.mubr.f32.gmra.mrb[24].mxu1 %v39401_v51  ;;  %v18973_v25 = vld [vmem:[%s36498_s1 + $0x198] sm:$0xff] }
 0x483   : > { %25170 = vmatprep.mubr.f32.mxu0 %v39402_v7  ;;  %23013 = vmatprep.mubr.f32.mxu1 %v39403_v12  ;;  %v39409_v7 = vld [vmem:[#allocation285_spill] sm:$0xff] }
 0x486   : > { %25171 = vmatmul.mubr.f32.gmra.mrb[24].mxu0 %v39404_v20  ;;  %23014 = vmatmul.mubr.f32.gmra.mrb[26].mxu1 %v39405_v50  ;;  %v39411_v20 = vld [vmem:[#allocation287_spill] sm:$0xff] }
 0x487   : > { %25173 = vmatprep.mubr.f32.mxu0 %v39406_v37  ;;  %23016 = vmatprep.mubr.f32.mxu1 %v39407_v35  ;;  %v6558_v37 = vand.u32 4294901760, %v18973_v25 }
 0x489   : > { %v34791_v44 = vpack.c.bf16 %v6558_v37, %v6555_v52 }
 0x48a   : > { %25174 = vmatmul.mubr.f32.gmra.mrb[26].mxu0 %v39408_v9  ;;  %23017 = vmatmul.mubr.f32.gmra.mrb[28].mxu1 %v39409_v7  ;;  %v18974_v9 = vld [vmem:[%s36498_s1 + $0x1a0] sm:$0xff] }
 0x48b   : > { %25176 = vmatprep.mubr.f32.mxu0 %v39410_v11  ;;  %23019 = vmatprep.mubr.f32.mxu1 %v39411_v20  ;;  %39414 = vst [vmem:[#allocation174_spill] sm:$0xff] %v34791_v44  ;;  %v18975_v11 = vld [vmem:[%s36498_s1 + $0x1a8] sm:$0xff]  ;;  %v6561_v19 = vand.u32 4294901760, %v18974_v9 }
 0x48c   : > { %v6564_v33 = vand.u32 4294901760, %v18975_v11 }
 0x48e   : > { %25177 = vmatmul.mubr.f32.gmra.mrb[28].mxu0 %v39412_v27  ;;  %23020 = vmatmul.mubr.f32.gmra.mrb[30].mxu1 %v39413_v17  ;;  %v34803_v27 = vsub.f32 %v34728_v58, %v6552_v53  ;;  %v34818_v53 = vld [vmem:[%s36498_s1 + $0x1b0] sm:$0xff] }
 0x48f   : > { %25179 = vmatprep.mubr.f32.mxu0 %v34630_v46  ;;  %23054 = vmatprep.mubr.f32.mxu1 %v33845_v16  ;;  %v39416_v16 = vld [vmem:[#allocation32_spill] sm:$0xff] }
 0x490   : > { %39415 = vst [vmem:[#allocation322_spill] sm:$0xff] %v34803_v27  ;;  %v34811_v46 = vpack.c.bf16 %v34803_v27, %v34800_v42  ;;  %v39418_v58 = vld [vmem:[#allocation36_spill] sm:$0xff] }
 0x492   : > { %25180 = vmatmul.mubr.f32.gmra.mrb[30].mxu0 %v34635_v48  ;;  %23055 = vmatmul.mubr.f32.vlgmr.msra.gmra.mrb[0].mxu1 %v39348_v13  ;;  %39417 = vst [vmem:[#allocation181_spill] sm:$0xff] %v34811_v46  ;;  %v34823_v13 = vld [vmem:[%s36498_s1 + $0x1b8] sm:$0xff]  ;;  %v34831_v48 = vpack.c.bf16 %v6564_v33, %v6561_v19  ;;  %v39423_v46 = vld [vmem:[#allocation50_spill] sm:$0xff] }
 0x493   : > { %25214 = vmatprep.mubr.f32.mxu0 %v39416_v16  ;;  %26561 = vmatpush3.bf16.msra.mxu1 %v34748_v22  ;;  %v39420_v16 = vld [vmem:[#allocation320_spill] sm:$0xff] }
 0x494   : > { %23057 = vmatprep.mubr.f32.mxu1 %v39350_v43  ;;  %26563 = vmatprep.subr.bf16.mxu1 %v34791_v44  ;;  %v39419_v43 = vld [vmem:[#allocation39_spill] sm:$0xff]  ;;  %39421 = vst [vmem:[#allocation373_spill] sm:$0xff] %v34831_v48 }
 0x496   : > { %25215 = vmatmul.mubr.f32.vlgmr.msra.gmra.mrb[0].mxu0 %v39418_v58  ;;  %23058 = vmatmul.mubr.f32.gmra.mrb[2].mxu1 %v39353_v6  ;;  %v34839_v6 = vld [vmem:[%s36498_s1 + $0x1c0] sm:$0xff]  ;;  %v34846_v58 = vsub.f32 %v18972_v23, %v6555_v52  ;;  %v39425_v52 = vand.u32 4294901760, %v34818_v53  ;;  %v39426_v23 = vand.u32 4294901760, %v34823_v13 }
 0x497   : > { %27425 = vmatpush3.bf16.msra.mxu0 %v39387_v59  ;;  %25217 = vmatprep.mubr.f32.mxu0 %v39419_v43  ;;  %v34844_v43 = vld [vmem:[%s36498_s1 + $0x1c8] sm:$0xff] }
 0x498   : > { %23060 = vmatprep.mubr.f32.mxu1 %v39355_v32  ;;  %27427 = vmatprep.subr.bf16.mxu0 %v39420_v16  ;;  %v34848_v32 = vsub.f32 %v18973_v25, %v6558_v37  ;;  %v39422_v59 = vld [vmem:[#allocation43_spill] sm:$0xff]  ;;  %v34864_v37 = vpack.c.bf16 %v39426_v23, %v39425_v52  ;;  %v37727_v25 = vand.u32 4294901760, %v34839_v6  ;;  %v39430_v23 = vld [vmem:[#allocation58_spill] sm:$0xff] }
 0x499   : > { %26565 = vmatpush3.bf16.msra.mxu1 %v34791_v44  ;;  %v39429_v52 = vld [vmem:[#allocation55_spill] sm:$0xff] }
 0x49a   : > { %25218 = vmatmul.mubr.f32.gmra.mrb[2].mxu0 %v39422_v59  ;;  %23061 = vmatmul.mubr.f32.gmra.mrb[4].mxu1 %v39357_v61  ;;  %v34856_v22 = vpack.c.bf16 %v34848_v32, %v34846_v58  ;;  %39427 = vst [vmem:[#allocation444_spill] sm:$0xff] %v34864_v37  ;;  %v39428_v59 = vld [vmem:[#allocation332_spill] sm:$0xff]  ;;  %v34878_v61 = vld [vmem:[%s36498_s1 + $0x1d8] sm:$0xff]  ;;  %v39433_v44 = vld [vmem:[#allocation63_spill] sm:$0xff] }
 0x49b   : > { %25220 = vmatprep.mubr.f32.mxu0 %v39423_v46  ;;  %27429 = vmatpush3.bf16.msra.mxu0 %v39420_v16  ;;  %v37726_v46 = vand.u32 4294901760, %v34844_v43  ;;  %v34935_v16 = vld [vmem:[%s36498_s1 + $0x1f0] sm:$0xff] }
 0x49c   : > { %39424 = vst [vmem:[#allocation14_spill] sm:$0xff] %v34856_v22  ;;  %23063 = vmatprep.mubr.f32.mxu1 %v39359_v57  ;;  %26567 = vmatprep.subr.bf16.mxu1 %v34831_v48  ;;  %v34873_v57 = vld [vmem:[%s36498_s1 + $0x1d0] sm:$0xff] }
 0x49d   : > { %27431 = vmatprep.subr.bf16.mxu0 %v39428_v59  ;;  %26569 = vmatpush3.bf16.msra.mxu1 %v34831_v48  ;;  %v34890_v48 = vpack.c.bf16 %v37726_v46, %v37727_v25  ;;  %v34906_v46 = vsub.f32 %v18974_v9, %v6561_v19  ;;  %v34908_v25 = vsub.f32 %v18975_v11, %v6564_v33  ;;  %v39435_v9 = vand.u32 4294901760, %v34873_v57 }
 0x49e   : > { %25221 = vmatmul.mubr.f32.gmra.mrb[4].mxu0 %v39429_v52  ;;  %23064 = vmatmul.mubr.f32.gmra.mrb[6].mxu1 %v39362_v62  ;;  %v39432_v62 = vld [vmem:[#allocation213_spill] sm:$0xff]  ;;  %v39436_v11 = vand.u32 4294901760, %v34878_v61 }
 0x49f   : > { %25223 = vmatprep.mubr.f32.mxu0 %v39430_v23  ;;  %23066 = vmatprep.mubr.f32.mxu1 %v39364_v60  ;;  %39431 = vst [vmem:[#allocation21_spill] sm:$0xff] %v34890_v48  ;;  %v34897_v23 = vld [vmem:[%s36498_s1 + $0x1e0] sm:$0xff]  ;;  %v34902_v60 = vld [vmem:[%s36498_s1 + $0x1e8] sm:$0xff]  ;;  %v39434_v52 = vld [vmem:[#allocation69_spill] sm:$0xff]  ;;  %v34918_v22 = vpack.c.bf16 %v34908_v25, %v34906_v46 }
 0x4a0   : > { %27433 = vmatpush3.bf16.msra.mxu0 %v39428_v59  ;;  %26571 = vmatprep.subr.bf16.mxu1 %v34864_v37  ;;  %v34926_v19 = vpack.c.bf16 %v39436_v11, %v39435_v9  ;;  %v39438_v9 = vld [vmem:[#allocation74_spill] sm:$0xff]  ;;  %v39439_v11 = vld [vmem:[#allocation77_spill] sm:$0xff]  ;;  %v39440_v59 = vand.u32 4294901760, %v34897_v23  ;;  %v39441_v33 = vand.u32 4294901760, %v34902_v60 }
 0x4a1   : > { %27435 = vmatprep.subr.bf16.mxu0 %v39432_v62  ;;  %26573 = vmatpush3.bf16.msra.mxu1 %v34864_v37  ;;  %v39444_v37 = vld [vmem:[#allocation196_spill] sm:$0xff] }
 0x4a2   : > { %25224 = vmatmul.mubr.f32.gmra.mrb[6].mxu0 %v39433_v44  ;;  %23067 = vmatmul.mubr.f32.gmra.mrb[8].mxu1 %v39367_v49  ;;  %v34940_v44 = vld [vmem:[%s36498_s1 + $0x1f8] sm:$0xff]  ;;  %v39446_v49 = vand.u32 4294901760, %v34823_v13 }
 0x4a3   : > { %25226 = vmatprep.mubr.f32.mxu0 %v39434_v52  ;;  %23069 = vmatprep.mubr.f32.mxu1 %v39369_v31  ;;  %v39437_v52 = vld [vmem:[#allocation8_spill] sm:$0xff]  ;;  %v34950_v31 = vpack.c.bf16 %v39441_v33, %v39440_v59  ;;  %v39445_v59 = vand.u32 4294901760, %v34818_v53 }
 0x4a4   : > { %27437 = vmatpush3.bf16.msra.mxu0 %v39432_v62  ;;  %26575 = vmatprep.subr.bf16.mxu1 %v34890_v48 }
 0x4a5   : > { %27439 = vmatprep.subr.bf16.mxu0 %v39437_v52  ;;  %26577 = vmatpush3.bf16.msra.mxu1 %v34890_v48  ;;  %v34967_v33 = vsub.f32 %v34818_v53, %v39445_v59  ;;  %v39449_v53 = vand.u32 4294901760, %v34935_v16 }
 0x4a6   : > { %25227 = vmatmul.mubr.f32.gmra.mrb[8].mxu0 %v39438_v9  ;;  %23070 = vmatmul.mubr.f32.gmra.mrb[10].mxu1 %v39371_v14  ;;  %v39442_v14 = vand.u32 4294901760, %v34800_v42  ;;  %v34972_v9 = vsub.f32 %v34823_v13, %v39446_v49  ;;  %v39450_v49 = vand.u32 4294901760, %v34940_v44 }
 0x4a7   : > { %25229 = vmatprep.mubr.f32.mxu0 %v39439_v11  ;;  %23072 = vmatprep.mubr.f32.mxu1 %v39373_v8  ;;  %v39443_v8 = vand.u32 4294901760, %v34803_v27 }
 0x4a8   : > { %27441 = vmatpush3.bf16.msra.mxu0 %v39437_v52  ;;  %26579 = vmatprep.subr.bf16.mxu1 %v34926_v19  ;;  %v6953_v11 = vsub.f32 %v34800_v42, %v39442_v14  ;;  %v39447_v52 = vld [vmem:[#allocation82_spill] sm:$0xff]  ;;  %v39448_v14 = vld [vmem:[#allocation89_spill] sm:$0xff]  ;;  %v34988_v13 = vpack.c.bf16 %v39450_v49, %v39449_v53  ;;  %v39455_v49 = vld [vmem:[#allocation179_spill] sm:$0xff] }
 0x4a9   : > { %v6960_v48 = vsub.f32 %v34803_v27, %v39443_v8  ;;  %27443 = vmatprep.subr.bf16.mxu0 %v39444_v37  ;;  %26581 = vmatpush3.bf16.msra.mxu1 %v34926_v19  ;;  %v34980_v8 = vpack.c.bf16 %v34972_v9, %v34967_v33  ;;  %v39460_v27 = vld [vmem:[#allocation109_spill] sm:$0xff] }
 0x4aa   : > { %25230 = vmatmul.mubr.f32.gmra.mrb[10].mxu0 %v39447_v52  ;;  %23073 = vmatmul.mubr.f32.gmra.mrb[12].mxu1 %v39375_v54  ;;  %v6954_v59 = vand.u32 4294901760, %v6953_v11 }
 0x4ab   : > { %25232 = vmatprep.mubr.f32.mxu0 %v39448_v14  ;;  %23075 = vmatprep.mubr.f32.mxu1 %v39377_v0  ;;  %v6961_v52 = vand.u32 4294901760, %v6960_v48  ;;  %v39451_v14 = vld [vmem:[#allocation94_spill] sm:$0xff]  ;;  %v39452_v0 = vld [vmem:[#allocation97_spill] sm:$0xff] }
 0x4ac   : > { %27445 = vmatpush3.bf16.msra.mxu0 %v39444_v37  ;;  %26583 = vmatprep.subr.bf16.mxu1 %v34950_v31  ;;  %v39453_v48 = vld [vmem:[#allocation209_spill] sm:$0xff] }
 0x4ad   : > { %27447 = vmatprep.subr.bf16.mxu0 %v34349_v55  ;;  %26585 = vmatpush3.bf16.msra.mxu1 %v34950_v31  ;;  %v34998_v53 = vpack.c.bf16 %v6961_v52, %v6954_v59  ;;  %v39454_v11 = vand.u32 4294901760, %v39453_v48  ;;  %v39459_v59 = vld [vmem:[#allocation102_spill] sm:$0xff]  ;;  %v39464_v48 = vand.u32 4294901760, %v34878_v61 }
 0x4ae   : > { %25233 = vmatmul.mubr.f32.gmra.mrb[12].mxu0 %v39451_v14  ;;  %23076 = vmatmul.mubr.f32.gmra.mrb[14].mxu1 %v39379_v18  ;;  %v39456_v14 = vand.u32 4294901760, %v39455_v49  ;;  %v39458_v18 = vand.u32 4294901760, %v34844_v43  ;;  %v39466_v49 = vld [vmem:[#allocation122_spill] sm:$0xff] }
 0x4af   : > { %25235 = vmatprep.mubr.f32.mxu0 %v39452_v0  ;;  %23078 = vmatprep.mubr.f32.mxu1 %v39381_v47  ;;  %v39457_v0 = vand.u32 4294901760, %v34839_v6 }
 0x4b0   : > { %27449 = vmatpush3.bf16.msra.mxu0 %v34349_v55  ;;  %26587 = vmatprep.subr.bf16.mxu1 %v34988_v13  ;;  %v35006_v54 = vpack.c.bf16 %v39456_v14, %v39454_v11  ;;  %v35016_v52 = vsub.f32 %v34844_v43, %v39458_v18  ;;  %v39461_v18 = vld [vmem:[#allocation114_spill] sm:$0xff]  ;;  %v39463_v43 = vand.u32 4294901760, %v34873_v57  ;;  %v35041_v11 = vsub.f32 %v34878_v61, %v39464_v48 }
 0x4b1   : > { %27451 = vmatprep.subr.bf16.mxu0 %v34383_v2  ;;  %26589 = vmatpush3.bf16.msra.mxu1 %v34988_v13  ;;  %v35011_v47 = vsub.f32 %v34839_v6, %v39457_v0  ;;  %v39462_v0 = vld [vmem:[#allocation117_spill] sm:$0xff]  ;;  %v39470_v61 = vand.u32 4294901760, %v34897_v23  ;;  %v39472_v48 = vand.u32 4294901760, %v34902_v60 }
 0x4b2   : > { %25236 = vmatmul.mubr.f32.gmra.mrb[14].mxu0 %v39459_v59  ;;  %23079 = vmatmul.mubr.f32.gmra.mrb[16].mxu1 %v39384_v38  ;;  %v35036_v6 = vsub.f32 %v34873_v57, %v39463_v43  ;;  %39465 = vst [vmem:[#allocation445_spill] sm:$0xff] %v35041_v11  ;;  %v39469_v57 = vld [vmem:[#allocation137_spill] sm:$0xff]  ;;  %v39476_v59 = vld [vmem:[#allocation154_spill] sm:$0xff]  ;;  %v39618_v38 = vld [vmem:[#allocation119_spill] sm:$0xff] }
 0x4b3   : > { %25238 = vmatprep.mubr.f32.mxu0 %v39460_v27  ;;  %23081 = vmatprep.mubr.f32.mxu1 %v39386_v28  ;;  %v35024_v14 = vpack.c.bf16 %v35016_v52, %v35011_v47  ;;  %v39468_v27 = vld [vmem:[#allocation134_spill] sm:$0xff]  ;;  %v35058_v43 = vsub.f32 %v34897_v23, %v39470_v61  ;;  %v37748_v23 = vand.u32 4294901760, %v34846_v58  ;;  %v37747_v61 = vand.u32 4294901760, %v34848_v32  ;;  %v39613_v28 = vld [vmem:[#allocation185_spill] sm:$0xff] }
 0x4b4   : > { %27453 = vmatpush3.bf16.msra.mxu0 %v34383_v2  ;;  %26591 = vmatprep.subr.bf16.mxu1 %v34998_v53 }
 0x4b5   : > { %27455 = vmatprep.subr.bf16.mxu0 %v35006_v54  ;;  %39471 = vst [vmem:[#allocation189_spill] sm:$0xff] %v35058_v43 }
 0x4b6   : > { %25239 = vmatmul.mubr.f32.gmra.mrb[16].mxu0 %v39461_v18  ;;  %23082 = vmatmul.mubr.f32.gmra.mrb[18].mxu1 %v39389_v21  ;;  %v39467_v18 = vld [vmem:[#allocation129_spill] sm:$0xff]  ;;  %v39612_v21 = vld [vmem:[#allocation380_spill] sm:$0xff] }
 0x4b7   : > { %25241 = vmatprep.mubr.f32.mxu0 %v39462_v0  ;;  %23084 = vmatprep.mubr.f32.mxu1 %v39391_v4  ;;  %v35049_v0 = vpack.c.bf16 %v35041_v11, %v35036_v6  ;;  %v39611_v4 = vld [vmem:[#allocation106_spill] sm:$0xff] }
 0x4ba   : > { %25242 = vmatmul.mubr.f32.gmra.mrb[18].mxu0 %v39466_v49  ;;  %23085 = vmatmul.mubr.f32.gmra.mrb[20].mxu1 %v39393_v24  ;;  %v39474_v49 = vld [vmem:[#allocation142_spill] sm:$0xff]  ;;  %v39610_v24 = vld [vmem:[#allocation379_spill] sm:$0xff] }
 0x4bb   : > { %25244 = vmatprep.mubr.f32.mxu0 %v39467_v18  ;;  %23087 = vmatprep.mubr.f32.mxu1 %v39395_v30  ;;  %v35063_v18 = vsub.f32 %v34902_v60, %v39472_v48  ;;  %v39477_v60 = vld [vmem:[#allocation157_spill] sm:$0xff]  ;;  %v6967_v48 = vsub.f32 %v34846_v58, %v37748_v23 }
 0x4bd   : > { %39473 = vst [vmem:[#allocation192_spill] sm:$0xff] %v35063_v18 }
 0x4be   : > { %25245 = vmatmul.mubr.f32.gmra.mrb[20].mxu0 %v39468_v27  ;;  %23088 = vmatmul.mubr.f32.gmra.mrb[22].mxu1 %v39397_v26  ;;  %v39475_v27 = vld [vmem:[#allocation149_spill] sm:$0xff]  ;;  %v39606_v26 = vld [vmem:[#allocation92_spill] sm:$0xff] }
 0x4bf   : > { %25247 = vmatprep.mubr.f32.mxu0 %v39469_v57  ;;  %23090 = vmatprep.mubr.f32.mxu1 %v39399_v56  ;;  %v35071_v57 = vpack.c.bf16 %v35063_v18, %v35058_v43  ;;  %v39605_v56 = vld [vmem:[#allocation359_spill] sm:$0xff] }
 0x4c2   : > { %25248 = vmatmul.mubr.f32.gmra.mrb[22].mxu0 %v39474_v49  ;;  %23091 = vmatmul.mubr.f32.gmra.mrb[24].mxu1 %v39401_v51  ;;  %v39478_v49 = vld [vmem:[#allocation162_spill] sm:$0xff]  ;;  %v39486_v51 = vld [vmem:[#allocation40_spill] sm:$0xff] }
 0x4c3   : > { %25250 = vmatprep.mubr.f32.mxu0 %v39475_v27  ;;  %23093 = vmatprep.mubr.f32.mxu1 %v39403_v12  ;;  %v6974_v27 = vsub.f32 %v34848_v32, %v37747_v61  ;;  %v37755_v61 = vand.u32 4294901760, %v34967_v33 }
 0x4c5   : > { %v6995_v23 = vsub.f32 %v34967_v33, %v37755_v61 }
 0x4c6   : > { %25251 = vmatmul.mubr.f32.gmra.mrb[24].mxu0 %v39476_v59  ;;  %23094 = vmatmul.mubr.f32.gmra.mrb[26].mxu1 %v39405_v50  ;;  %v6968_v59 = vand.u32 4294901760, %v6967_v48  ;;  %v37752_v50 = vand.u32 4294901760, %v34908_v25 }
 0x4c7   : > { %25253 = vmatprep.mubr.f32.mxu0 %v39477_v60  ;;  %23096 = vmatprep.mubr.f32.mxu1 %v39407_v35  ;;  %v6975_v60 = vand.u32 4294901760, %v6974_v27  ;;  %v37753_v35 = vand.u32 4294901760, %v34906_v46 }
 0x4c8   : > { %v6988_v48 = vsub.f32 %v34908_v25, %v37752_v50 }
 0x4c9   : > { %v6981_v27 = vsub.f32 %v34906_v46, %v37753_v35  ;;  %v39483_v35 = vld [vmem:[#allocation363_spill] sm:$0xff] }
 0x4ca   : > { %25254 = vmatmul.mubr.f32.gmra.mrb[26].mxu0 %v39478_v49  ;;  %23097 = vmatmul.mubr.f32.gmra.mrb[28].mxu1 %v39409_v7  ;;  %v39479_v49 = vld [vmem:[#allocation355_spill] sm:$0xff]  ;;  %v6989_v12 = vand.u32 4294901760, %v6988_v48  ;;  %v39493_v48 = vand.u32 4294901760, %v34313_v63  ;;  %v39498_v63 = vld [vmem:[#allocation370_spill] sm:$0xff] }
 0x4cb   : > { %25256 = vmatprep.mubr.f32.mxu0 %v39335_v1  ;;  %23099 = vmatprep.mubr.f32.mxu1 %v39411_v20  ;;  %v26594_v1 = vpack.c.bf16 %v6975_v60, %v6968_v59  ;;  %v39485_v20 = vand.u32 4294901760, %v34249_v29  ;;  %v6982_v7 = vand.u32 4294901760, %v6981_v27  ;;  %v39488_v60 = vld [vmem:[#allocation42_spill] sm:$0xff]  ;;  %v39491_v27 = vld [vmem:[#allocation368_spill] sm:$0xff] }
 0x4ce   : > { %25257 = vmatmul.mubr.f32.gmra.mrb[28].mxu0 %v39339_v3  ;;  %23100 = vmatmul.mubr.f32.gmra.mrb[30].mxu1 %v39413_v17  ;;  %v39480_v3 = vld [vmem:[#allocation360_spill] sm:$0xff]  ;;  %v39481_v17 = vand.u32 4294901760, %v34972_v9 }
 0x4cf   : > { %25259 = vmatprep.mubr.f32.mxu0 %v34640_v39  ;;  %23134 = vmatprep.mubr.f32.mxu1 %v39479_v49  ;;  %v39482_v49 = vld [vmem:[#allocation34_spill] sm:$0xff] }
 0x4d0   : > { %v7002_v59 = vsub.f32 %v34972_v9, %v39481_v17  ;;  %v39487_v17 = vld [vmem:[#allocation366_spill] sm:$0xff] }
 0x4d2   : > { %25260 = vmatmul.mubr.f32.gmra.mrb[30].mxu0 %v34645_v45  ;;  %23135 = vmatmul.mubr.f32.vlgmr.msra.gmra.mrb[0].mxu1 %v39480_v3  ;;  %v39484_v3 = vand.u32 4294901760, %v34247_v36  ;;  %v39490_v36 = vand.u32 4294901760, %v35016_v52 }
 0x4d3   : > { %25294 = vmatprep.mubr.f32.mxu0 %v39482_v49  ;;  %26593 = vmatpush3.bf16.msra.mxu1 %v34998_v53  ;;  %v6996_v49 = vand.u32 4294901760, %v6995_v23  ;;  %v7003_v53 = vand.u32 4294901760, %v7002_v59  ;;  %v26598_v23 = vpack.c.bf16 %v6989_v12, %v6982_v7  ;;  %v37762_v12 = vand.u32 4294901760, %v35058_v43 }
 0x4d4   : > { %23137 = vmatprep.mubr.f32.mxu1 %v39483_v35  ;;  %26595 = vmatprep.subr.bf16.mxu1 %v26594_v1  ;;  %v27458_v61 = vpack.c.bf16 %v39485_v20, %v39484_v3  ;;  %v39489_v35 = vand.u32 4294901760, %v35011_v47  ;;  %v7016_v29 = vsub.f32 %v35016_v52, %v39490_v36  ;;  %v37763_v20 = vand.u32 4294901760, %v35036_v6  ;;  %v39495_v3 = vld [vmem:[#allocation369_spill] sm:$0xff] }
 0x4d6   : > { %25295 = vmatmul.mubr.f32.vlgmr.msra.gmra.mrb[0].mxu0 %v39486_v51  ;;  %23138 = vmatmul.mubr.f32.gmra.mrb[2].mxu1 %v39487_v17  ;;  %v7009_v50 = vsub.f32 %v35011_v47, %v39489_v35  ;;  %v26602_v17 = vpack.c.bf16 %v7003_v53, %v6996_v49  ;;  %v39496_v35 = vld [vmem:[#allocation54_spill] sm:$0xff]  ;;  %v7017_v51 = vand.u32 4294901760, %v7016_v29  ;;  %v7023_v7 = vsub.f32 %v35036_v6, %v37763_v20  ;;  %v39604_v20 = vld [vmem:[#allocation91_spill] sm:$0xff] }
 0x4d7   : > { %27457 = vmatpush3.bf16.msra.mxu0 %v35006_v54  ;;  %25297 = vmatprep.mubr.f32.mxu0 %v39488_v60  ;;  %v39492_v54 = vand.u32 4294901760, %v34310_v40  ;;  %v39494_v60 = vld [vmem:[#allocation45_spill] sm:$0xff]  ;;  %v37761_v49 = vand.u32 4294901760, %v35063_v18  ;;  %v39499_v53 = vand.u32 4294901760, %v34935_v16 }
 0x4d8   : > { %23140 = vmatprep.mubr.f32.mxu1 %v39491_v27  ;;  %27459 = vmatprep.subr.bf16.mxu0 %v27458_v61  ;;  %v7010_v36 = vand.u32 4294901760, %v7009_v50  ;;  %v39503_v27 = vand.u32 4294901760, %v34370_v10  ;;  %v7037_v10 = vsub.f32 %v35058_v43, %v37762_v12 }
 0x4d9   : > { %26597 = vmatpush3.bf16.msra.mxu1 %v26594_v1  ;;  %v27462_v59 = vpack.c.bf16 %v39493_v48, %v39492_v54  ;;  %v39497_v1 = vand.u32 4294901760, %v35041_v11  ;;  %v35152_v50 = vsub.f32 %v34935_v16, %v39499_v53  ;;  %v39504_v54 = vand.u32 4294901760, %v34375_v34  ;;  %v39508_v16 = vld [vmem:[#allocation376_spill] sm:$0xff] }
 0x4da   : > { %25298 = vmatmul.mubr.f32.gmra.mrb[2].mxu0 %v39494_v60  ;;  %23141 = vmatmul.mubr.f32.gmra.mrb[4].mxu1 %v39495_v3  ;;  %v39505_v60 = vld [vmem:[#allocation59_spill] sm:$0xff]  ;;  %v7044_v34 = vsub.f32 %v35063_v18, %v37761_v49 }
 0x4db   : > { %25300 = vmatprep.mubr.f32.mxu0 %v39496_v35  ;;  %27461 = vmatpush3.bf16.msra.mxu0 %v27458_v61  ;;  %v7030_v40 = vsub.f32 %v35041_v11, %v39497_v1  ;;  %39500 = vst [vmem:[#allocation439_spill] sm:$0xff] %v35152_v50  ;;  %v39501_v61 = vand.u32 4294901760, %v34940_v44  ;;  %v27466_v48 = vpack.c.bf16 %v39504_v54, %v39503_v27  ;;  %v39506_v3 = vld [vmem:[#allocation375_spill] sm:$0xff]  ;;  %v39507_v35 = vld [vmem:[#allocation61_spill] sm:$0xff]  ;;  %v39514_v27 = vld [vmem:[#allocation190_spill] sm:$0xff] }
 0x4dc   : > { %23143 = vmatprep.mubr.f32.mxu1 %v39498_v63  ;;  %26599 = vmatprep.subr.bf16.mxu1 %v26598_v23  ;;  %v26606_v1 = vpack.c.bf16 %v7017_v51, %v7010_v36  ;;  %v7024_v63 = vand.u32 4294901760, %v7023_v7  ;;  %v39509_v51 = vand.u32 4294901760, %v34414_v5  ;;  %v39510_v36 = vand.u32 4294901760, %v34419_v15  ;;  %v39511_v7 = vld [vmem:[#allocation65_spill] sm:$0xff] }
 0x4dd   : > { %v35157_v29 = vsub.f32 %v34940_v44, %v39501_v61  ;;  %27463 = vmatprep.subr.bf16.mxu0 %v27462_v59  ;;  %26601 = vmatpush3.bf16.msra.mxu1 %v26598_v23  ;;  %v7031_v53 = vand.u32 4294901760, %v7030_v40  ;;  %v37760_v44 = vand.u32 4294901760, %v35152_v50  ;;  %v39512_v40 = vld [vmem:[#allocation381_spill] sm:$0xff] }
 0x4de   : > { %25301 = vmatmul.mubr.f32.gmra.mrb[4].mxu0 %v39505_v60  ;;  %23144 = vmatmul.mubr.f32.gmra.mrb[6].mxu1 %v39506_v3  ;;  %v39513_v61 = vld [vmem:[#allocation73_spill] sm:$0xff]  ;;  %v7038_v60 = vand.u32 4294901760, %v7037_v10  ;;  %v7045_v3 = vand.u32 4294901760, %v7044_v34  ;;  %v39521_v10 = vld [vmem:[#allocation388_spill] sm:$0xff] }
 0x4df   : > { %39502 = vst [vmem:[#allocation442_spill] sm:$0xff] %v35157_v29  ;;  %25303 = vmatprep.mubr.f32.mxu0 %v39507_v35  ;;  %23146 = vmatprep.mubr.f32.mxu1 %v39508_v16  ;;  %v37759_v23 = vand.u32 4294901760, %v35157_v29  ;;  %v26610_v54 = vpack.c.bf16 %v7031_v53, %v7024_v63  ;;  %v7051_v5 = vsub.f32 %v35152_v50, %v37760_v44  ;;  %v39516_v35 = vld [vmem:[#allocation221_spill] sm:$0xff]  ;;  %v39518_v63 = vld [vmem:[#allocation78_spill] sm:$0xff]  ;;  %v39520_v53 = vld [vmem:[#allocation80_spill] sm:$0xff] }
 0x4e0   : > { %27465 = vmatpush3.bf16.msra.mxu0 %v27462_v59  ;;  %26603 = vmatprep.subr.bf16.mxu1 %v26602_v17  ;;  %v27470_v59 = vpack.c.bf16 %v39510_v36, %v39509_v51  ;;  %v39517_v16 = vand.u32 4294901760, %v39516_v35  ;;  %v26614_v34 = vpack.c.bf16 %v7045_v3, %v7038_v60  ;;  %v39527_v35 = vld [vmem:[#allocation216_spill] sm:$0xff]  ;;  %v39532_v3 = vld [vmem:[#allocation6_spill] sm:$0xff] }
 0x4e1   : > { %27467 = vmatprep.subr.bf16.mxu0 %v27466_v48  ;;  %26605 = vmatpush3.bf16.msra.mxu1 %v26602_v17  ;;  %v7058_v15 = vsub.f32 %v35157_v29, %v37759_v23  ;;  %v39515_v17 = vand.u32 4294901760, %v34437_v41  ;;  %v7052_v36 = vand.u32 4294901760, %v7051_v5  ;;  %v39530_v60 = vld [vmem:[#allocation4_spill] sm:$0xff]  ;;  %v39533_v5 = vand.u32 4294901760, %v39532_v3  ;;  %v35304_v23 = vld [vmem:[%s36498_s1 + $0x408] sm:$0xff]  ;;  %v39603_v44 = vld [vmem:[#allocation354_spill] sm:$0xff] }
 0x4e2   : > { %25304 = vmatmul.mubr.f32.gmra.mrb[6].mxu0 %v39511_v7  ;;  %23147 = vmatmul.mubr.f32.gmra.mrb[8].mxu1 %v39512_v40  ;;  %v39524_v40 = vld [vmem:[#allocation315_spill] sm:$0xff]  ;;  %v39553_v3 = vld [vmem:[#allocation424_spill] sm:$0xff]  ;;  %v16701_v12 = vand.u32 4294901760, %v35304_v23 }
 0x4e3   : > { %25306 = vmatprep.mubr.f32.mxu0 %v39513_v61  ;;  %23149 = vmatprep.mubr.f32.mxu1 %v39514_v27  ;;  %v27474_v51 = vpack.c.bf16 %v39517_v16, %v39515_v17  ;;  %v7059_v7 = vand.u32 4294901760, %v7058_v15  ;;  %v39525_v61 = vand.u32 4294901760, %v39524_v40  ;;  %v39526_v17 = vld [vmem:[#allocation84_spill] sm:$0xff]  ;;  %v39528_v16 = vld [vmem:[#allocation93_spill] sm:$0xff] }
 0x4e4   : > { %27469 = vmatpush3.bf16.msra.mxu0 %v27466_v48  ;;  %26607 = vmatprep.subr.bf16.mxu1 %v26606_v1  ;;  %v39519_v48 = vld [vmem:[#allocation204_spill] sm:$0xff]  ;;  %v39543_v40 = vld [vmem:[#allocation317_spill] sm:$0xff]  ;;  %v35387_v18 = vsub.f32 %v35304_v23, %v16701_v12 }
 0x4e5   : > { %27471 = vmatprep.subr.bf16.mxu0 %v27470_v59  ;;  %26609 = vmatpush3.bf16.msra.mxu1 %v26606_v1  ;;  %v39522_v1 = vld [vmem:[#allocation27_spill] sm:$0xff]  ;;  %v39650_v23 = vld [vmem:[#allocation348_spill] sm:$0xff] }
 0x4e6   : > { %25307 = vmatmul.mubr.f32.gmra.mrb[8].mxu0 %v39518_v63  ;;  %23150 = vmatmul.mubr.f32.gmra.mrb[10].mxu1 %v39519_v48  ;;  %v39523_v41 = vand.u32 4294901760, %v39522_v1  ;;  %v39529_v63 = vld [vmem:[#allocation394_spill] sm:$0xff]  ;;  %v39537_v1 = vld [vmem:[#allocation400_spill] sm:$0xff]  ;;  %39647 = vst [vmem:[#allocation15_spill] sm:$0xff] %v35387_v18 }
 0x4e7   : > { %25309 = vmatprep.mubr.f32.mxu0 %v39520_v53  ;;  %23152 = vmatprep.mubr.f32.mxu1 %v39521_v10  ;;  %v39534_v48 = vld [vmem:[#allocation98_spill] sm:$0xff]  ;;  %v39535_v53 = vld [vmem:[#allocation235_spill] sm:$0xff]  ;;  %v39536_v10 = vld [vmem:[#allocation100_spill] sm:$0xff] }
 0x4e8   : > { %27473 = vmatpush3.bf16.msra.mxu0 %v27470_v59  ;;  %26611 = vmatprep.subr.bf16.mxu1 %v26610_v54  ;;  %v27478_v27 = vpack.c.bf16 %v39525_v61, %v39523_v41  ;;  %v26618_v59 = vpack.c.bf16 %v7059_v7, %v7052_v36  ;;  %v39540_v36 = vld [vmem:[#allocation113_spill] sm:$0xff]  ;;  %v39541_v7 = vld [vmem:[#allocation408_spill] sm:$0xff]  ;;  %v39544_v61 = vld [vmem:[#allocation118_spill] sm:$0xff] }
 0x4e9   : > { %27475 = vmatprep.subr.bf16.mxu0 %v27474_v51  ;;  %26613 = vmatpush3.bf16.msra.mxu1 %v26610_v54  ;;  %v39531_v54 = vand.u32 4294901760, %v39530_v60  ;;  %v39542_v41 = vld [vmem:[#allocation181_spill] sm:$0xff] }
 0x4ea   : > { %25310 = vmatmul.mubr.f32.gmra.mrb[10].mxu0 %v39526_v17  ;;  %23153 = vmatmul.mubr.f32.gmra.mrb[12].mxu1 %v39527_v35  ;;  %v39545_v17 = vld [vmem:[#allocation173_spill] sm:$0xff]  ;;  %v39547_v35 = vld [vmem:[#allocation414_spill] sm:$0xff] }
 0x4eb   : > { %25312 = vmatprep.mubr.f32.mxu0 %v39528_v16  ;;  %23155 = vmatprep.mubr.f32.mxu1 %v39529_v63  ;;  %v27482_v15 = vpack.c.bf16 %v39533_v5, %v39531_v54  ;;  %v39548_v16 = vld [vmem:[#allocation124_spill] sm:$0xff]  ;;  %v39549_v63 = vld [vmem:[#allocation418_spill] sm:$0xff]  ;;  %v39551_v60 = vld [vmem:[#allocation421_spill] sm:$0xff] }
 0x4ec   : > { %27477 = vmatpush3.bf16.msra.mxu0 %v27474_v51  ;;  %26615 = vmatprep.subr.bf16.mxu1 %v26614_v34  ;;  %v39538_v51 = vld [vmem:[#allocation104_spill] sm:$0xff]  ;;  %v39552_v54 = vld [vmem:[#allocation138_spill] sm:$0xff] }
 0x4ed   : > { %27479 = vmatprep.subr.bf16.mxu0 %v27478_v27  ;;  %26617 = vmatpush3.bf16.msra.mxu1 %v26614_v34  ;;  %v39539_v34 = vld [vmem:[#allocation405_spill] sm:$0xff]  ;;  %v39554_v5 = vld [vmem:[#allocation140_spill] sm:$0xff] }
 0x4ee   : > { %25313 = vmatmul.mubr.f32.gmra.mrb[12].mxu0 %v39534_v48  ;;  %23156 = vmatmul.mubr.f32.gmra.mrb[14].mxu1 %v39535_v53  ;;  %v39556_v48 = vld [vmem:[#allocation144_spill] sm:$0xff]  ;;  %v39557_v53 = vld [vmem:[#allocation429_spill] sm:$0xff] }
 0x4ef   : > { %25315 = vmatprep.mubr.f32.mxu0 %v39536_v10  ;;  %23158 = vmatprep.mubr.f32.mxu1 %v39537_v1  ;;  %v39558_v10 = vld [vmem:[#allocation153_spill] sm:$0xff]  ;;  %v39559_v1 = vld [vmem:[#allocation431_spill] sm:$0xff] }
 0x4f0   : > { %27481 = vmatpush3.bf16.msra.mxu0 %v27478_v27  ;;  %26619 = vmatprep.subr.bf16.mxu1 %v26618_v59  ;;  %v39546_v27 = vld [vmem:[#allocation120_spill] sm:$0xff] }
 0x4f1   : > { %27483 = vmatprep.subr.bf16.mxu0 %v27482_v15  ;;  %26621 = vmatpush3.bf16.msra.mxu1 %v26618_v59  ;;  %v39550_v59 = vld [vmem:[#allocation133_spill] sm:$0xff] }
 0x4f2   : > { %25316 = vmatmul.mubr.f32.gmra.mrb[14].mxu0 %v39538_v51  ;;  %23159 = vmatmul.mubr.f32.gmra.mrb[16].mxu1 %v39539_v34  ;;  %v39560_v51 = vld [vmem:[#allocation158_spill] sm:$0xff]  ;;  %v39561_v34 = vld [vmem:[#allocation432_spill] sm:$0xff] }
 0x4f3   : > { %25318 = vmatprep.mubr.f32.mxu0 %v39540_v36  ;;  %23161 = vmatprep.mubr.f32.mxu1 %v39541_v7  ;;  %v39562_v36 = vld [vmem:[#allocation160_spill] sm:$0xff]  ;;  %v39563_v7 = vld [vmem:[#allocation433_spill] sm:$0xff] }
 0x4f4   : > { %27485 = vmatpush3.bf16.msra.mxu0 %v27482_v15  ;;  %26623 = vmatprep.subr.bf16.mxu1 %v39542_v41  ;;  %v39555_v15 = vld [vmem:[#allocation427_spill] sm:$0xff] }
 0x4f5   : > { %27487 = vmatprep.subr.bf16.mxu0 %v39543_v40 }
 0x4f6   : > { %25319 = vmatmul.mubr.f32.gmra.mrb[16].mxu0 %v39544_v61  ;;  %23162 = vmatmul.mubr.f32.gmra.mrb[18].mxu1 %v39545_v17  ;;  %v39564_v61 = vld [vmem:[#allocation164_spill] sm:$0xff]  ;;  %v39565_v17 = vld [vmem:[#allocation434_spill] sm:$0xff] }
 0x4f7   : > { %25321 = vmatprep.mubr.f32.mxu0 %v39546_v27  ;;  %23164 = vmatprep.mubr.f32.mxu1 %v39547_v35  ;;  %v39566_v27 = vld [vmem:[#allocation171_spill] sm:$0xff]  ;;  %v39567_v35 = vld [vmem:[#allocation328_spill] sm:$0xff] }
 0x4fa   : > { %25322 = vmatmul.mubr.f32.gmra.mrb[18].mxu0 %v39548_v16  ;;  %23165 = vmatmul.mubr.f32.gmra.mrb[20].mxu1 %v39549_v63  ;;  %v39568_v16 = vld [vmem:[#allocation172_spill] sm:$0xff]  ;;  %v39569_v63 = vld [vmem:[#allocation329_spill] sm:$0xff] }
 0x4fb   : > { %25324 = vmatprep.mubr.f32.mxu0 %v39550_v59  ;;  %23167 = vmatprep.mubr.f32.mxu1 %v39551_v60  ;;  %v39570_v59 = vand.u32 4294901760, %v34640_v39  ;;  %v39571_v60 = vld [vmem:[#allocation324_spill] sm:$0xff]  ;;  %v39579_v39 = vld [vmem:[#allocation35_spill] sm:$0xff] }
 0x4fe   : > { %25325 = vmatmul.mubr.f32.gmra.mrb[20].mxu0 %v39552_v54  ;;  %23168 = vmatmul.mubr.f32.gmra.mrb[22].mxu1 %v39553_v3  ;;  %v39572_v54 = vand.u32 4294901760, %v34645_v45  ;;  %v39573_v3 = vld [vmem:[#allocation326_spill] sm:$0xff]  ;;  %v39580_v45 = vld [vmem:[#allocation337_spill] sm:$0xff] }
 0x4ff   : > { %25327 = vmatprep.mubr.f32.mxu0 %v39554_v5  ;;  %23170 = vmatprep.mubr.f32.mxu1 %v39555_v15  ;;  %v39574_v5 = vld [vmem:[#allocation29_spill] sm:$0xff]  ;;  %v39575_v15 = vld [vmem:[#allocation330_spill] sm:$0xff] }
 0x502   : > { %25328 = vmatmul.mubr.f32.gmra.mrb[22].mxu0 %v39556_v48  ;;  %23171 = vmatmul.mubr.f32.gmra.mrb[24].mxu1 %v39557_v53  ;;  %v39576_v48 = vld [vmem:[#allocation14_spill] sm:$0xff]  ;;  %v39577_v53 = vld [vmem:[#allocation33_spill] sm:$0xff] }
 0x503   : > { %25330 = vmatprep.mubr.f32.mxu0 %v39558_v10  ;;  %23173 = vmatprep.mubr.f32.mxu1 %v39559_v1  ;;  %v39578_v10 = vld [vmem:[#allocation334_spill] sm:$0xff]  ;;  %v39581_v1 = vld [vmem:[#allocation320_spill] sm:$0xff] }
 0x506   : > { %25331 = vmatmul.mubr.f32.gmra.mrb[24].mxu0 %v39560_v51  ;;  %23174 = vmatmul.mubr.f32.gmra.mrb[26].mxu1 %v39561_v34  ;;  %v39582_v51 = vld [vmem:[#allocation41_spill] sm:$0xff]  ;;  %v39584_v34 = vld [vmem:[#allocation48_spill] sm:$0xff] }
 0x507   : > { %25333 = vmatprep.mubr.f32.mxu0 %v39562_v36  ;;  %23176 = vmatprep.mubr.f32.mxu1 %v39563_v7  ;;  %v39585_v36 = vld [vmem:[#allocation339_spill] sm:$0xff]  ;;  %v39587_v7 = vld [vmem:[#allocation52_spill] sm:$0xff] }
 0x50a   : > { %25334 = vmatmul.mubr.f32.gmra.mrb[26].mxu0 %v39564_v61  ;;  %23177 = vmatmul.mubr.f32.gmra.mrb[28].mxu1 %v39565_v17  ;;  %v39588_v61 = vld [vmem:[#allocation340_spill] sm:$0xff]  ;;  %v39589_v17 = vld [vmem:[#allocation53_spill] sm:$0xff] }
 0x50b   : > { %25336 = vmatprep.mubr.f32.mxu0 %v39566_v27  ;;  %23179 = vmatprep.mubr.f32.mxu1 %v39567_v35  ;;  %v39590_v27 = vld [vmem:[#allocation341_spill] sm:$0xff]  ;;  %v39591_v35 = vld [vmem:[#allocation60_spill] sm:$0xff] }
 0x50e   : > { %25337 = vmatmul.mubr.f32.gmra.mrb[28].mxu0 %v39568_v16  ;;  %23180 = vmatmul.mubr.f32.gmra.mrb[30].mxu1 %v39569_v63  ;;  %v39592_v16 = vld [vmem:[#allocation342_spill] sm:$0xff]  ;;  %v39594_v63 = vld [vmem:[#allocation343_spill] sm:$0xff] }
 0x50f   : > { %25339 = vmatprep.mubr.f32.mxu0 %v39570_v59  ;;  %23214 = vmatprep.mubr.f32.mxu1 %v39571_v60  ;;  %v39595_v59 = vld [vmem:[#allocation8_spill] sm:$0xff]  ;;  %v35370_v60 = vld [vmem:[%s36498_s1 + $0x420] sm:$0xff] }
 0x510   : > { %v16710_v43 = vand.u32 4294901760, %v35370_v60 }
 0x512   : > { %25340 = vmatmul.mubr.f32.gmra.mrb[30].mxu0 %v39572_v54  ;;  %23215 = vmatmul.mubr.f32.vlgmr.msra.gmra.mrb[0].mxu1 %v39573_v3  ;;  %v39596_v54 = vld [vmem:[#allocation71_spill] sm:$0xff]  ;;  %v39642_v3 = vld [vmem:[#allocation436_spill] sm:$0xff] }
 0x513   : > { %25374 = vmatprep.mubr.f32.mxu0 %v39574_v5  ;;  %26625 = vmatpush3.bf16.msra.mxu1 %v39542_v41  ;;  %v39583_v41 = vld [vmem:[#allocation338_spill] sm:$0xff] }
 0x514   : > { %23217 = vmatprep.mubr.f32.mxu1 %v39575_v15  ;;  %26627 = vmatprep.subr.bf16.mxu1 %v39576_v48 }
 0x516   : > { %25375 = vmatmul.mubr.f32.vlgmr.msra.gmra.mrb[0].mxu0 %v39577_v53  ;;  %23218 = vmatmul.mubr.f32.gmra.mrb[2].mxu1 %v39578_v10  ;;  %v39641_v10 = vld [vmem:[#allocation331_spill] sm:$0xff] }
 0x517   : > { %27489 = vmatpush3.bf16.msra.mxu0 %v39543_v40  ;;  %25377 = vmatprep.mubr.f32.mxu0 %v39579_v39  ;;  %v39586_v40 = vld [vmem:[#allocation332_spill] sm:$0xff] }
 0x518   : > { %23220 = vmatprep.mubr.f32.mxu1 %v39580_v45  ;;  %27491 = vmatprep.subr.bf16.mxu0 %v39581_v1  ;;  %v39639_v45 = vld [vmem:[#allocation327_spill] sm:$0xff] }
 0x519   : > { %26629 = vmatpush3.bf16.msra.mxu1 %v39576_v48  ;;  %v39597_v48 = vld [vmem:[#allocation345_spill] sm:$0xff] }
 0x51a   : > { %25378 = vmatmul.mubr.f32.gmra.mrb[2].mxu0 %v39582_v51  ;;  %23221 = vmatmul.mubr.f32.gmra.mrb[4].mxu1 %v39583_v41  ;;  %v39637_v41 = vld [vmem:[#allocation10_spill] sm:$0xff] }
 0x51b   : > { %25380 = vmatprep.mubr.f32.mxu0 %v39584_v34  ;;  %27493 = vmatpush3.bf16.msra.mxu0 %v39581_v1  ;;  %v39599_v1 = vld [vmem:[#allocation351_spill] sm:$0xff] }
 0x51c   : > { %23223 = vmatprep.mubr.f32.mxu1 %v39585_v36  ;;  %26631 = vmatprep.subr.bf16.mxu1 %v34918_v22  ;;  %v39635_v36 = vld [vmem:[#allocation417_spill] sm:$0xff] }
 0x51d   : > { %27495 = vmatprep.subr.bf16.mxu0 %v39586_v40  ;;  %26633 = vmatpush3.bf16.msra.mxu1 %v34918_v22  ;;  %v39593_v22 = vld [vmem:[#allocation67_spill] sm:$0xff] }
 0x51e   : > { %25381 = vmatmul.mubr.f32.gmra.mrb[4].mxu0 %v39587_v7  ;;  %23224 = vmatmul.mubr.f32.gmra.mrb[6].mxu1 %v39588_v61  ;;  %v39633_v61 = vld [vmem:[#allocation411_spill] sm:$0xff] }
 0x51f   : > { %25383 = vmatprep.mubr.f32.mxu0 %v39589_v17  ;;  %23226 = vmatprep.mubr.f32.mxu1 %v39590_v27  ;;  %v39631_v27 = vld [vmem:[#allocation180_spill] sm:$0xff] }
 0x520   : > { %27497 = vmatpush3.bf16.msra.mxu0 %v39586_v40  ;;  %26635 = vmatprep.subr.bf16.mxu1 %v34980_v8  ;;  %v39601_v40 = vld [vmem:[#allocation352_spill] sm:$0xff] }
 0x521   : > { %27499 = vmatprep.subr.bf16.mxu0 %v39432_v62  ;;  %26637 = vmatpush3.bf16.msra.mxu1 %v34980_v8  ;;  %v39598_v8 = vld [vmem:[#allocation72_spill] sm:$0xff] }
 0x522   : > { %25384 = vmatmul.mubr.f32.gmra.mrb[6].mxu0 %v39591_v35  ;;  %23227 = vmatmul.mubr.f32.gmra.mrb[8].mxu1 %v39592_v16  ;;  %v39629_v16 = vld [vmem:[#allocation404_spill] sm:$0xff] }
 0x523   : > { %25386 = vmatprep.mubr.f32.mxu0 %v39593_v22  ;;  %23229 = vmatprep.mubr.f32.mxu1 %v39594_v63  ;;  %v39627_v63 = vld [vmem:[#allocation403_spill] sm:$0xff] }
 0x524   : > { %27501 = vmatpush3.bf16.msra.mxu0 %v39432_v62  ;;  %26639 = vmatprep.subr.bf16.mxu1 %v35024_v14  ;;  %v39600_v62 = vld [vmem:[#allocation79_spill] sm:$0xff] }
 0x525   : > { %27503 = vmatprep.subr.bf16.mxu0 %v39595_v59  ;;  %26641 = vmatpush3.bf16.msra.mxu1 %v35024_v14  ;;  %v35299_v14 = vld [vmem:[%s36498_s1 + $0x400] sm:$0xff] }
 0x526   : > { %25387 = vmatmul.mubr.f32.gmra.mrb[8].mxu0 %v39596_v54  ;;  %23230 = vmatmul.mubr.f32.gmra.mrb[10].mxu1 %v39597_v48  ;;  %v16698_v49 = vand.u32 4294901760, %v35299_v14  ;;  %v39625_v48 = vld [vmem:[#allocation398_spill] sm:$0xff] }
 0x527   : > { %25389 = vmatprep.mubr.f32.mxu0 %v39598_v8  ;;  %23232 = vmatprep.mubr.f32.mxu1 %v39599_v1  ;;  %v39624_v1 = vld [vmem:[#allocation132_spill] sm:$0xff] }
 0x528   : > { %27505 = vmatpush3.bf16.msra.mxu0 %v39595_v59  ;;  %26643 = vmatprep.subr.bf16.mxu1 %v35049_v0  ;;  %v39602_v59 = vld [vmem:[#allocation86_spill] sm:$0xff]  ;;  %v35322_v30 = vpack.c.bf16 %v16701_v12, %v16698_v49 }
 0x529   : > { %27507 = vmatprep.subr.bf16.mxu0 %v39444_v37  ;;  %26645 = vmatpush3.bf16.msra.mxu1 %v35049_v0  ;;  %v26650_v0 = vpack.c.bf16 %v35157_v29, %v35152_v50  ;;  %v35375_v29 = vld [vmem:[%s36498_s1 + $0x428] sm:$0xff] }
 0x52a   : > { %25390 = vmatmul.mubr.f32.gmra.mrb[10].mxu0 %v39600_v62  ;;  %23233 = vmatmul.mubr.f32.gmra.mrb[12].mxu1 %v39601_v40  ;;  %39608 = vst [vmem:[#allocation184_spill] sm:$0xff] %v35322_v30  ;;  %v39623_v40 = vld [vmem:[#allocation397_spill] sm:$0xff]  ;;  %v16713_v11 = vand.u32 4294901760, %v35375_v29 }
 0x52b   : > { %25392 = vmatprep.mubr.f32.mxu0 %v39602_v59  ;;  %23235 = vmatprep.mubr.f32.mxu1 %v39603_v44  ;;  %v39620_v44 = vld [vmem:[#allocation126_spill] sm:$0xff] }
 0x52c   : > { %27509 = vmatpush3.bf16.msra.mxu0 %v39444_v37  ;;  %26647 = vmatprep.subr.bf16.mxu1 %v35071_v57  ;;  %v39607_v37 = vld [vmem:[#allocation203_spill] sm:$0xff] }
 0x52d   : > { %27511 = vmatprep.subr.bf16.mxu0 %v34349_v55  ;;  %26649 = vmatpush3.bf16.msra.mxu1 %v35071_v57  ;;  %v39609_v57 = vld [vmem:[#allocation99_spill] sm:$0xff] }
 0x52e   : > { %25393 = vmatmul.mubr.f32.gmra.mrb[12].mxu0 %v39604_v20  ;;  %23236 = vmatmul.mubr.f32.gmra.mrb[14].mxu1 %v39605_v56  ;;  %v39617_v56 = vld [vmem:[#allocation386_spill] sm:$0xff] }
 0x52f   : > { %25395 = vmatprep.mubr.f32.mxu0 %v39606_v26  ;;  %23238 = vmatprep.mubr.f32.mxu1 %v39607_v37  ;;  %v39615_v37 = vld [vmem:[#allocation385_spill] sm:$0xff] }
 0x530   : > { %27513 = vmatpush3.bf16.msra.mxu0 %v34349_v55  ;;  %26651 = vmatprep.subr.bf16.mxu1 %v26650_v0  ;;  %v39614_v55 = vld [vmem:[#allocation111_spill] sm:$0xff] }
 0x531   : > { %27515 = vmatprep.subr.bf16.mxu0 %v34383_v2  ;;  %26653 = vmatpush3.bf16.msra.mxu1 %v26650_v0  ;;  %v39616_v0 = vld [vmem:[#allocation112_spill] sm:$0xff] }
 0x532   : > { %25396 = vmatmul.mubr.f32.gmra.mrb[14].mxu0 %v39609_v57  ;;  %23239 = vmatmul.mubr.f32.gmra.mrb[16].mxu1 %v39610_v24  ;;  %v39619_v24 = vld [vmem:[#allocation391_spill] sm:$0xff] }
 0x533   : > { %25398 = vmatprep.mubr.f32.mxu0 %v39611_v4  ;;  %23241 = vmatprep.mubr.f32.mxu1 %v39612_v21  ;;  %v39621_v21 = vld [vmem:[#allocation392_spill] sm:$0xff] }
 0x534   : > { %27517 = vmatpush3.bf16.msra.mxu0 %v34383_v2  ;;  %26655 = vmatprep.subr.bf16.mxu1 %v39613_v28  ;;  %v39622_v2 = vld [vmem:[#allocation131_spill] sm:$0xff] }
 0x535   : > { %27519 = vmatprep.subr.bf16.mxu0 %v35322_v30 }
 0x536   : > { %25399 = vmatmul.mubr.f32.gmra.mrb[16].mxu0 %v39614_v55  ;;  %23242 = vmatmul.mubr.f32.gmra.mrb[18].mxu1 %v39615_v37  ;;  %v39626_v37 = vld [vmem:[#allocation139_spill] sm:$0xff] }
 0x537   : > { %25401 = vmatprep.mubr.f32.mxu0 %v39616_v0  ;;  %23244 = vmatprep.mubr.f32.mxu1 %v39617_v56  ;;  %v39628_v56 = vld [vmem:[#allocation146_spill] sm:$0xff] }
 0x53a   : > { %25402 = vmatmul.mubr.f32.gmra.mrb[18].mxu0 %v39618_v38  ;;  %23245 = vmatmul.mubr.f32.gmra.mrb[20].mxu1 %v39619_v24  ;;  %v39630_v24 = vld [vmem:[#allocation151_spill] sm:$0xff] }
 0x53b   : > { %25404 = vmatprep.mubr.f32.mxu0 %v39620_v44  ;;  %23247 = vmatprep.mubr.f32.mxu1 %v39621_v21  ;;  %v39632_v21 = vld [vmem:[#allocation152_spill] sm:$0xff] }
 0x53e   : > { %25405 = vmatmul.mubr.f32.gmra.mrb[20].mxu0 %v39622_v2  ;;  %23248 = vmatmul.mubr.f32.gmra.mrb[22].mxu1 %v39623_v40  ;;  %v39634_v40 = vld [vmem:[#allocation159_spill] sm:$0xff] }
 0x53f   : > { %25407 = vmatprep.mubr.f32.mxu0 %v39624_v1  ;;  %23250 = vmatprep.mubr.f32.mxu1 %v39625_v48  ;;  %v39636_v48 = vld [vmem:[#allocation166_spill] sm:$0xff] }
 0x542   : > { %25408 = vmatmul.mubr.f32.gmra.mrb[22].mxu0 %v39626_v37  ;;  %23251 = vmatmul.mubr.f32.gmra.mrb[24].mxu1 %v39627_v63  ;;  %v39638_v63 = vld [vmem:[#allocation168_spill] sm:$0xff] }
 0x543   : > { %25410 = vmatprep.mubr.f32.mxu0 %v39628_v56  ;;  %23253 = vmatprep.mubr.f32.mxu1 %v39629_v16  ;;  %v19052_v16 = vld [vmem:[%s36498_s1 + $0x410] sm:$0xff] }
 0x546   : > { %25411 = vmatmul.mubr.f32.gmra.mrb[24].mxu0 %v39630_v24  ;;  %23254 = vmatmul.mubr.f32.gmra.mrb[26].mxu1 %v39631_v27  ;;  %v19053_v27 = vld [vmem:[%s36498_s1 + $0x418] sm:$0xff] }
 0x547   : > { %25413 = vmatprep.mubr.f32.mxu0 %v39632_v21  ;;  %23256 = vmatprep.mubr.f32.mxu1 %v39633_v61  ;;  %v39640_v61 = vld [vmem:[#allocation435_spill] sm:$0xff]  ;;  %v16707_v15 = vand.u32 4294901760, %v19053_v27 }
 0x54a   : > { %25414 = vmatmul.mubr.f32.gmra.mrb[26].mxu0 %v39634_v40  ;;  %23257 = vmatmul.mubr.f32.gmra.mrb[28].mxu1 %v39635_v36  ;;  %v16704_v36 = vand.u32 4294901760, %v19052_v16 }
 0x54b   : > { %25416 = vmatprep.mubr.f32.mxu0 %v39636_v48  ;;  %23259 = vmatprep.mubr.f32.mxu1 %v39637_v41  ;;  %v39643_v41 = vld [vmem:[#allocation333_spill] sm:$0xff] }
 0x54c   : > { %v35381_v50 = vpack.c.bf16 %v16707_v15, %v16704_v36 }
 0x54e   : > { %25417 = vmatmul.mubr.f32.gmra.mrb[28].mxu0 %v39638_v63  ;;  %23260 = vmatmul.mubr.f32.gmra.mrb[30].mxu1 %v39639_v45  ;;  %v39645_v45 = vld [vmem:[#allocation174_spill] sm:$0xff]  ;;  %39646 = vst [vmem:[#allocation443_spill] sm:$0xff] %v35381_v50 }
 0x54f   : > { %25419 = vmatprep.mubr.f32.mxu0 %v39640_v61  ;;  %23294 = vmatprep.mubr.f32.mxu1 %v39641_v10  ;;  %v39644_v10 = vld [vmem:[#allocation336_spill] sm:$0xff] }
 0x552   : > { %25420 = vmatmul.mubr.f32.gmra.mrb[30].mxu0 %v39642_v3  ;;  %23295 = vmatmul.mubr.f32.vlgmr.msra.gmra.mrb[0].mxu1 %v39643_v41  ;;  %v35384_v41 = vsub.f32 %v35299_v14, %v16698_v49  ;;  %v35401_v49 = vld [vmem:[%s36498_s1 + $0x438] sm:$0xff]  ;;  %v39653_v14 = vld [vmem:[#allocation350_spill] sm:$0xff] }
 0x553   : > { %25454 = vmatprep.mubr.f32.mxu0 %v39574_v5  ;;  %26657 = vmatpush3.bf16.msra.mxu1 %v39613_v28  ;;  %v39648_v5 = vld [vmem:[#allocation347_spill] sm:$0xff]  ;;  %v39652_v28 = vld [vmem:[#allocation349_spill] sm:$0xff] }
 0x554   : > { %23297 = vmatprep.mubr.f32.mxu1 %v39644_v10  ;;  %26659 = vmatprep.subr.bf16.mxu1 %v39645_v45  ;;  %v35396_v10 = vld [vmem:[%s36498_s1 + $0x430] sm:$0xff]  ;;  %v35405_v12 = vpack.c.bf16 %v35387_v18, %v35384_v41 }
 0x556   : > { %25455 = vmatmul.mubr.f32.vlgmr.msra.gmra.mrb[0].mxu0 %v39577_v53  ;;  %23298 = vmatmul.mubr.f32.gmra.mrb[2].mxu1 %v39648_v5  ;;  %39649 = vst [vmem:[#allocation321_spill] sm:$0xff] %v35405_v12  ;;  %v35412_v5 = vpack.c.bf16 %v16713_v11, %v16710_v43  ;;  %v39654_v53 = vld [vmem:[#allocation373_spill] sm:$0xff] }
 0x557   : > { %27521 = vmatpush3.bf16.msra.mxu0 %v35322_v30  ;;  %25457 = vmatprep.mubr.f32.mxu0 %v39579_v39  ;;  %v35421_v39 = vld [vmem:[%s36498_s1 + $0x440] sm:$0xff]  ;;  %v39655_v30 = vand.u32 4294901760, %v35396_v10 }
 0x558   : > { %23300 = vmatprep.mubr.f32.mxu1 %v39650_v23  ;;  %27523 = vmatprep.subr.bf16.mxu0 %v35381_v50  ;;  %39651 = vst [vmem:[#allocation18_spill] sm:$0xff] %v35412_v5  ;;  %v35426_v23 = vld [vmem:[%s36498_s1 + $0x448] sm:$0xff] }
 0x559   : > { %26661 = vmatpush3.bf16.msra.mxu1 %v39645_v45  ;;  %v39656_v45 = vand.u32 4294901760, %v35401_v49 }
 0x55a   : > { %25458 = vmatmul.mubr.f32.gmra.mrb[2].mxu0 %v39582_v51  ;;  %23301 = vmatmul.mubr.f32.gmra.mrb[4].mxu1 %v39652_v28  ;;  %v35432_v51 = vsub.f32 %v19052_v16, %v16704_v36  ;;  %v35434_v28 = vsub.f32 %v19053_v27, %v16707_v15  ;;  %v39657_v36 = vld [vmem:[#allocation361_spill] sm:$0xff]  ;;  %v35451_v15 = vld [vmem:[%s36498_s1 + $0x450] sm:$0xff] }
 0x55b   : > { %25460 = vmatprep.mubr.f32.mxu0 %v39584_v34  ;;  %27525 = vmatpush3.bf16.msra.mxu0 %v35381_v50  ;;  %v35442_v12 = vpack.c.bf16 %v39656_v45, %v39655_v30  ;;  %v37794_v34 = vand.u32 4294901760, %v35421_v39  ;;  %v35456_v27 = vld [vmem:[%s36498_s1 + $0x458] sm:$0xff]  ;;  %v39658_v45 = vld [vmem:[#allocation362_spill] sm:$0xff]  ;;  %v39659_v16 = vld [vmem:[#allocation444_spill] sm:$0xff] }
 0x55c   : > { %23303 = vmatprep.mubr.f32.mxu1 %v39653_v14  ;;  %26663 = vmatprep.subr.bf16.mxu1 %v39654_v53  ;;  %v37793_v14 = vand.u32 4294901760, %v35426_v23  ;;  %v35460_v30 = vpack.c.bf16 %v35434_v28, %v35432_v51  ;;  %v39661_v50 = vld [vmem:[#allocation365_spill] sm:$0xff] }
 0x55d   : > { %27527 = vmatprep.subr.bf16.mxu0 %v35412_v5  ;;  %26665 = vmatpush3.bf16.msra.mxu1 %v39654_v53  ;;  %v35498_v53 = vsub.f32 %v35375_v29, %v16713_v11  ;;  %v35515_v11 = vld [vmem:[%s36498_s1 + $0x470] sm:$0xff]  ;;  %v35520_v29 = vld [vmem:[%s36498_s1 + $0x478] sm:$0xff] }
 0x55e   : > { %25461 = vmatmul.mubr.f32.gmra.mrb[4].mxu0 %v39587_v7  ;;  %23304 = vmatmul.mubr.f32.gmra.mrb[6].mxu1 %v39657_v36  ;;  %v35472_v36 = vpack.c.bf16 %v37793_v14, %v37794_v34  ;;  %v39662_v14 = vld [vmem:[#allocation367_spill] sm:$0xff]  ;;  %v39663_v34 = vld [vmem:[#allocation21_spill] sm:$0xff] }
 0x55f   : > { %25463 = vmatprep.mubr.f32.mxu0 %v39589_v17  ;;  %23306 = vmatprep.mubr.f32.mxu1 %v39658_v45  ;;  %v35479_v45 = vld [vmem:[%s36498_s1 + $0x460] sm:$0xff]  ;;  %v39675_v17 = vand.u32 4294901760, %v35401_v49 }
 0x560   : > { %27529 = vmatpush3.bf16.msra.mxu0 %v35412_v5  ;;  %26667 = vmatprep.subr.bf16.mxu1 %v39659_v16  ;;  %39660 = vst [vmem:[#allocation314_spill] sm:$0xff] %v35472_v36  ;;  %v35484_v5 = vld [vmem:[%s36498_s1 + $0x468] sm:$0xff] }
 0x561   : > { %27531 = vmatprep.subr.bf16.mxu0 %v35442_v12  ;;  %26669 = vmatpush3.bf16.msra.mxu1 %v39659_v16  ;;  %v35495_v16 = vsub.f32 %v35370_v60, %v16710_v43  ;;  %v39666_v43 = vld [vmem:[#allocation371_spill] sm:$0xff] }
 0x562   : > { %25464 = vmatmul.mubr.f32.gmra.mrb[6].mxu0 %v39591_v35  ;;  %23307 = vmatmul.mubr.f32.gmra.mrb[8].mxu1 %v39661_v50  ;;  %v39664_v50 = vand.u32 4294901760, %v35451_v15  ;;  %v39671_v35 = vand.u32 4294901760, %v35387_v18 }
 0x563   : > { %25466 = vmatprep.mubr.f32.mxu0 %v39593_v22  ;;  %23309 = vmatprep.mubr.f32.mxu1 %v39662_v14  ;;  %v39665_v14 = vand.u32 4294901760, %v35456_v27  ;;  %v35524_v60 = vpack.c.bf16 %v35498_v53, %v35495_v16 }
 0x564   : > { %27533 = vmatpush3.bf16.msra.mxu0 %v35442_v12  ;;  %26671 = vmatprep.subr.bf16.mxu1 %v39663_v34 }
 0x565   : > { %27535 = vmatprep.subr.bf16.mxu0 %v35472_v36  ;;  %26673 = vmatpush3.bf16.msra.mxu1 %v39663_v34  ;;  %v35506_v22 = vpack.c.bf16 %v39665_v14, %v39664_v50  ;;  %v39667_v50 = vld [vmem:[#allocation372_spill] sm:$0xff]  ;;  %v39668_v14 = vand.u32 4294901760, %v35479_v45 }
 0x566   : > { %25467 = vmatmul.mubr.f32.gmra.mrb[8].mxu0 %v39596_v54  ;;  %23310 = vmatmul.mubr.f32.gmra.mrb[10].mxu1 %v39666_v43  ;;  %v39669_v43 = vand.u32 4294901760, %v35484_v5 }
 0x567   : > { %25469 = vmatprep.mubr.f32.mxu0 %v39598_v8  ;;  %23312 = vmatprep.mubr.f32.mxu1 %v39667_v50  ;;  %v39670_v50 = vand.u32 4294901760, %v35384_v41  ;;  %v39674_v8 = vand.u32 4294901760, %v35396_v10 }
 0x568   : > { %27537 = vmatpush3.bf16.msra.mxu0 %v35472_v36  ;;  %26675 = vmatprep.subr.bf16.mxu1 %v34926_v19  ;;  %v35534_v7 = vpack.c.bf16 %v39669_v43, %v39668_v14  ;;  %v17109_v36 = vsub.f32 %v35387_v18, %v39671_v35  ;;  %v39672_v14 = vld [vmem:[#allocation377_spill] sm:$0xff]  ;;  %v39673_v43 = vld [vmem:[#allocation378_spill] sm:$0xff]  ;;  %v35560_v35 = vsub.f32 %v35401_v49, %v39675_v17  ;;  %v39680_v49 = vand.u32 4294901760, %v34800_v42 }
 0x569   : > { %27539 = vmatprep.subr.bf16.mxu0 %v35506_v22  ;;  %26677 = vmatpush3.bf16.msra.mxu1 %v34926_v19  ;;  %v17102_v54 = vsub.f32 %v35384_v41, %v39670_v50  ;;  %v35555_v50 = vsub.f32 %v35396_v10, %v39674_v8  ;;  %v39678_v8 = vld [vmem:[#allocation382_spill] sm:$0xff]  ;;  %v39679_v10 = vld [vmem:[#allocation384_spill] sm:$0xff]  ;;  %v39685_v42 = vand.u32 4294901760, %v35421_v39 }
 0x56a   : > { %25470 = vmatmul.mubr.f32.gmra.mrb[10].mxu0 %v39600_v62  ;;  %23313 = vmatmul.mubr.f32.gmra.mrb[12].mxu1 %v39672_v14  ;;  %v39676_v14 = vand.u32 4294901760, %v35515_v11  ;;  %v17110_v18 = vand.u32 4294901760, %v17109_v36 }
 0x56b   : > { %25472 = vmatprep.mubr.f32.mxu0 %v39602_v59  ;;  %23315 = vmatprep.mubr.f32.mxu1 %v39673_v43  ;;  %v39677_v43 = vand.u32 4294901760, %v35520_v29  ;;  %v17103_v62 = vand.u32 4294901760, %v17102_v54  ;;  %v35574_v17 = vpack.c.bf16 %v35560_v35, %v35555_v50  ;;  %v39681_v54 = vld [vmem:[#allocation322_spill] sm:$0xff] }
 0x56c   : > { %27541 = vmatpush3.bf16.msra.mxu0 %v35506_v22  ;;  %26679 = vmatprep.subr.bf16.mxu1 %v34950_v31  ;;  %v39682_v36 = vand.u32 4294901760, %v39681_v54  ;;  %v39687_v54 = vld [vmem:[#allocation393_spill] sm:$0xff] }
 0x56d   : > { %27543 = vmatprep.subr.bf16.mxu0 %v35534_v7  ;;  %26681 = vmatpush3.bf16.msra.mxu1 %v34950_v31  ;;  %v35568_v59 = vpack.c.bf16 %v39677_v43, %v39676_v14  ;;  %v35588_v43 = vpack.c.bf16 %v17110_v18, %v17103_v62  ;;  %v39686_v18 = vand.u32 4294901760, %v35426_v23 }
 0x56e   : > { %25473 = vmatmul.mubr.f32.gmra.mrb[12].mxu0 %v39604_v20  ;;  %23316 = vmatmul.mubr.f32.gmra.mrb[14].mxu1 %v39678_v8  ;;  %v35584_v14 = vpack.c.bf16 %v39682_v36, %v39680_v49  ;;  %v39683_v8 = vld [vmem:[#allocation387_spill] sm:$0xff]  ;;  %v35599_v49 = vsub.f32 %v35421_v39, %v39685_v42  ;;  %v39836_v20 = vld [vmem:[#allocation260_spill] sm:$0xff] }
 0x56f   : > { %25475 = vmatprep.mubr.f32.mxu0 %v39606_v26  ;;  %23318 = vmatprep.mubr.f32.mxu1 %v39679_v10  ;;  %v39684_v10 = vld [vmem:[#allocation390_spill] sm:$0xff]  ;;  %v35604_v62 = vsub.f32 %v35426_v23, %v39686_v18  ;;  %v39689_v39 = vld [vmem:[#allocation399_spill] sm:$0xff]  ;;  %v39692_v18 = vand.u32 4294901760, %v35456_v27 }
 0x570   : > { %27545 = vmatpush3.bf16.msra.mxu0 %v35534_v7  ;;  %26683 = vmatprep.subr.bf16.mxu1 %v34988_v13  ;;  %v39690_v23 = vld [vmem:[#allocation402_spill] sm:$0xff]  ;;  %v39834_v26 = vld [vmem:[#allocation3_spill] sm:$0xff] }
 0x571   : > { %27547 = vmatprep.subr.bf16.mxu0 %v35568_v59  ;;  %26685 = vmatpush3.bf16.msra.mxu1 %v34988_v13  ;;  %v35611_v36 = vpack.c.bf16 %v35604_v62, %v35599_v49 }
 0x572   : > { %25476 = vmatmul.mubr.f32.gmra.mrb[14].mxu0 %v39609_v57  ;;  %23319 = vmatmul.mubr.f32.gmra.mrb[16].mxu1 %v39683_v8  ;;  %v39688_v8 = vld [vmem:[#allocation396_spill] sm:$0xff] }
 0x573   : > { %25478 = vmatprep.mubr.f32.mxu0 %v39611_v4  ;;  %23321 = vmatprep.mubr.f32.mxu1 %v39684_v10  ;;  %v39691_v10 = vand.u32 4294901760, %v35451_v15  ;;  %v39832_v4 = vld [vmem:[#allocation259_spill] sm:$0xff]  ;;  %v39833_v57 = vld [vmem:[#allocation380_spill] sm:$0xff] }
 0x574   : > { %27549 = vmatpush3.bf16.msra.mxu0 %v35568_v59  ;;  %26687 = vmatprep.subr.bf16.mxu1 %v35584_v14 }
 0x575   : > { %27551 = vmatprep.subr.bf16.mxu0 %v35588_v43  ;;  %v35622_v42 = vsub.f32 %v35451_v15, %v39691_v10  ;;  %v39695_v15 = vld [vmem:[#allocation413_spill] sm:$0xff]  ;;  %v39697_v10 = vand.u32 4294901760, %v35479_v45 }
 0x576   : > { %25479 = vmatmul.mubr.f32.gmra.mrb[16].mxu0 %v39614_v55  ;;  %23322 = vmatmul.mubr.f32.gmra.mrb[18].mxu1 %v39687_v54  ;;  %v35627_v54 = vsub.f32 %v35456_v27, %v39692_v18  ;;  %v39696_v27 = vld [vmem:[#allocation416_spill] sm:$0xff]  ;;  %v39829_v55 = vld [vmem:[#allocation203_spill] sm:$0xff] }
 0x577   : > { %25481 = vmatprep.mubr.f32.mxu0 %v39616_v0  ;;  %23324 = vmatprep.mubr.f32.mxu1 %v39688_v8  ;;  %v39693_v8 = vld [vmem:[#allocation407_spill] sm:$0xff]  ;;  %v35644_v18 = vsub.f32 %v35479_v45, %v39697_v10  ;;  %v37810_v45 = vand.u32 4294901760, %v35432_v51  ;;  %v37812_v10 = vand.u32 4294901760, %v35434_v28 }
 0x578   : > { %v39828_v0 = vld [vmem:[#allocation255_spill] sm:$0xff] }
 0x57a   : > { %25482 = vmatmul.mubr.f32.gmra.mrb[18].mxu0 %v39618_v38  ;;  %23325 = vmatmul.mubr.f32.gmra.mrb[20].mxu1 %v39689_v39  ;;  %v35633_v39 = vpack.c.bf16 %v35627_v54, %v35622_v42  ;;  %v39827_v38 = vld [vmem:[#allocation359_spill] sm:$0xff] }
 0x57b   : > { %25484 = vmatprep.mubr.f32.mxu0 %v39620_v44  ;;  %23327 = vmatprep.mubr.f32.mxu1 %v39690_v23  ;;  %v39694_v23 = vld [vmem:[#allocation410_spill] sm:$0xff] }
 0x57c   : > { %v39825_v44 = vld [vmem:[#allocation354_spill] sm:$0xff] }
 0x57e   : > { %25485 = vmatmul.mubr.f32.gmra.mrb[20].mxu0 %v39622_v2  ;;  %23328 = vmatmul.mubr.f32.gmra.mrb[22].mxu1 %v39693_v8  ;;  %v39698_v8 = vand.u32 4294901760, %v35484_v5 }
 0x57f   : > { %25487 = vmatprep.mubr.f32.mxu0 %v39624_v1  ;;  %23330 = vmatprep.mubr.f32.mxu1 %v39694_v23  ;;  %v39699_v23 = vld [vmem:[#allocation420_spill] sm:$0xff] }
 0x580   : > { %v35649_v2 = vsub.f32 %v35484_v5, %v39698_v8  ;;  %v39701_v5 = vld [vmem:[#allocation426_spill] sm:$0xff]  ;;  %v39702_v8 = vld [vmem:[#allocation208_spill] sm:$0xff] }
 0x581   : > { %v39823_v1 = vld [vmem:[#allocation352_spill] sm:$0xff] }
 0x582   : > { %25488 = vmatmul.mubr.f32.gmra.mrb[22].mxu0 %v39626_v37  ;;  %23331 = vmatmul.mubr.f32.gmra.mrb[24].mxu1 %v39695_v15  ;;  %v35655_v15 = vpack.c.bf16 %v35649_v2, %v35644_v18 }
 0x583   : > { %25490 = vmatprep.mubr.f32.mxu0 %v39628_v56  ;;  %23333 = vmatprep.mubr.f32.mxu1 %v39696_v27  ;;  %v39700_v27 = vld [vmem:[#allocation423_spill] sm:$0xff] }
 0x586   : > { %25491 = vmatmul.mubr.f32.gmra.mrb[24].mxu0 %v39630_v24  ;;  %23334 = vmatmul.mubr.f32.gmra.mrb[26].mxu1 %v39699_v23  ;;  %v17116_v23 = vsub.f32 %v35432_v51, %v37810_v45  ;;  %v39707_v24 = vand.u32 4294901760, %v35495_v16  ;;  %v39710_v45 = vld [vmem:[#allocation224_spill] sm:$0xff] }
 0x587   : > { %25493 = vmatprep.mubr.f32.mxu0 %v39632_v21  ;;  %23336 = vmatprep.mubr.f32.mxu1 %v39700_v27  ;;  %v17123_v27 = vsub.f32 %v35434_v28, %v37812_v10  ;;  %v39706_v10 = vand.u32 4294901760, %v34848_v32 }
 0x588   : > { %v17117_v21 = vand.u32 4294901760, %v17116_v23  ;;  %v37817_v23 = vand.u32 4294901760, %v35604_v62 }
 0x589   : > { %v17124_v37 = vand.u32 4294901760, %v17123_v27 }
 0x58a   : > { %25494 = vmatmul.mubr.f32.gmra.mrb[26].mxu0 %v39634_v40  ;;  %23337 = vmatmul.mubr.f32.gmra.mrb[28].mxu1 %v39701_v5  ;;  %v39703_v40 = vld [vmem:[#allocation17_spill] sm:$0xff]  ;;  %v39704_v5 = vld [vmem:[#allocation335_spill] sm:$0xff] }
 0x58b   : > { %25496 = vmatprep.mubr.f32.mxu0 %v39636_v48  ;;  %23339 = vmatprep.mubr.f32.mxu1 %v39702_v8  ;;  %v37816_v8 = vand.u32 4294901760, %v35555_v50  ;;  %v39705_v48 = vand.u32 4294901760, %v34846_v58  ;;  %v39711_v58 = vand.u32 4294901760, %v35560_v35 }
 0x58d   : > { %v26690_v56 = vpack.c.bf16 %v39706_v10, %v39705_v48  ;;  %v17144_v32 = vsub.f32 %v35555_v50, %v37816_v8  ;;  %v39712_v48 = vld [vmem:[#allocation346_spill] sm:$0xff]  ;;  %v27554_v10 = vpack.c.bf16 %v17124_v37, %v17117_v21 }
 0x58e   : > { %25497 = vmatmul.mubr.f32.gmra.mrb[28].mxu0 %v39638_v63  ;;  %23340 = vmatmul.mubr.f32.gmra.mrb[30].mxu1 %v39703_v40  ;;  %v17130_v63 = vsub.f32 %v35495_v16, %v39707_v24  ;;  %v39708_v40 = vand.u32 4294901760, %v35498_v53  ;;  %v17151_v24 = vsub.f32 %v35560_v35, %v39711_v58  ;;  %v39716_v58 = vand.u32 4294901760, %v34906_v46 }
 0x58f   : > { %25499 = vmatprep.mubr.f32.mxu0 %v39640_v61  ;;  %23374 = vmatprep.mubr.f32.mxu1 %v39704_v5  ;;  %v39709_v5 = vld [vmem:[#allocation344_spill] sm:$0xff]  ;;  %v17145_v21 = vand.u32 4294901760, %v17144_v32  ;;  %v39721_v32 = vld [vmem:[#allocation357_spill] sm:$0xff] }
 0x590   : > { %v17137_v61 = vsub.f32 %v35498_v53, %v39708_v40  ;;  %v17131_v27 = vand.u32 4294901760, %v17130_v63  ;;  %v39713_v40 = vld [vmem:[#allocation225_spill] sm:$0xff]  ;;  %v17152_v37 = vand.u32 4294901760, %v17151_v24  ;;  %v39719_v63 = vand.u32 4294901760, %v35599_v49  ;;  %v39722_v24 = vld [vmem:[#allocation246_spill] sm:$0xff] }
 0x592   : > { %25500 = vmatmul.mubr.f32.gmra.mrb[30].mxu0 %v39642_v3  ;;  %23375 = vmatmul.mubr.f32.vlgmr.msra.gmra.mrb[0].mxu1 %v39709_v5  ;;  %v39715_v5 = vld [vmem:[#allocation227_spill] sm:$0xff]  ;;  %v39718_v3 = vld [vmem:[#allocation356_spill] sm:$0xff] }
 0x593   : > { %25534 = vmatprep.mubr.f32.mxu0 %v39710_v45  ;;  %26689 = vmatpush3.bf16.msra.mxu1 %v35584_v14  ;;  %v17138_v45 = vand.u32 4294901760, %v17137_v61  ;;  %v39714_v14 = vld [vmem:[#allocation353_spill] sm:$0xff]  ;;  %v17158_v61 = vsub.f32 %v35599_v49, %v39719_v63  ;;  %v39725_v63 = vld [vmem:[#allocation358_spill] sm:$0xff] }
 0x594   : > { %23377 = vmatprep.mubr.f32.mxu1 %v39712_v48  ;;  %26691 = vmatprep.subr.bf16.mxu1 %v26690_v56  ;;  %v39717_v48 = vand.u32 4294901760, %v34908_v25 }
 0x595   : > { %v27558_v25 = vpack.c.bf16 %v17138_v45, %v17131_v27  ;;  %v39726_v27 = vand.u32 4294901760, %v35627_v54 }
 0x596   : > { %25535 = vmatmul.mubr.f32.vlgmr.msra.gmra.mrb[0].mxu0 %v39713_v40  ;;  %23378 = vmatmul.mubr.f32.gmra.mrb[2].mxu1 %v39714_v14  ;;  %v26694_v8 = vpack.c.bf16 %v39717_v48, %v39716_v58  ;;  %v37824_v40 = vand.u32 4294901760, %v35622_v42  ;;  %v39720_v14 = vld [vmem:[#allocation241_spill] sm:$0xff]  ;;  %v27562_v48 = vpack.c.bf16 %v17152_v37, %v17145_v21  ;;  %v39728_v37 = vand.u32 4294901760, %v35520_v29 }
 0x597   : > { %27553 = vmatpush3.bf16.msra.mxu0 %v35588_v43  ;;  %25537 = vmatprep.mubr.f32.mxu0 %v39715_v5  ;;  %v17165_v43 = vsub.f32 %v35604_v62, %v37817_v23  ;;  %v39724_v5 = vand.u32 4294901760, %v34972_v9  ;;  %v17159_v23 = vand.u32 4294901760, %v17158_v61  ;;  %v17179_v45 = vsub.f32 %v35627_v54, %v39726_v27 }
 0x598   : > { %23380 = vmatprep.mubr.f32.mxu1 %v39718_v3  ;;  %27555 = vmatprep.subr.bf16.mxu0 %v27554_v10  ;;  %v39723_v3 = vand.u32 4294901760, %v34967_v33  ;;  %v37823_v33 = vand.u32 4294901760, %v35644_v18  ;;  %v37822_v9 = vand.u32 4294901760, %v35649_v2  ;;  %v35743_v61 = vsub.f32 %v35520_v29, %v39728_v37  ;;  %v39735_v37 = vld [vmem:[#allocation30_spill] sm:$0xff] }
 0x599   : > { %26693 = vmatpush3.bf16.msra.mxu1 %v26690_v56  ;;  %v17166_v46 = vand.u32 4294901760, %v17165_v43  ;;  %v17172_v56 = vsub.f32 %v35622_v42, %v37824_v40  ;;  %v39729_v43 = vld [vmem:[#allocation247_spill] sm:$0xff]  ;;  %v17180_v27 = vand.u32 4294901760, %v17179_v45 }
 0x59a   : > { %25538 = vmatmul.mubr.f32.gmra.mrb[2].mxu0 %v39720_v14  ;;  %23381 = vmatmul.mubr.f32.gmra.mrb[4].mxu1 %v39721_v32  ;;  %v26698_v58 = vpack.c.bf16 %v39724_v5, %v39723_v3  ;;  %v39730_v14 = vld [vmem:[#allocation206_spill] sm:$0xff]  ;;  %v17186_v29 = vsub.f32 %v35644_v18, %v37823_v33  ;;  %v39819_v33 = vld [vmem:[#allocation345_spill] sm:$0xff]  ;;  %v39821_v40 = vld [vmem:[#allocation351_spill] sm:$0xff] }
 0x59b   : > { %25540 = vmatprep.mubr.f32.mxu0 %v39722_v24  ;;  %27557 = vmatpush3.bf16.msra.mxu0 %v27554_v10  ;;  %v39727_v10 = vand.u32 4294901760, %v35515_v11  ;;  %v39731_v32 = vld [vmem:[#allocation22_spill] sm:$0xff]  ;;  %v39733_v24 = vand.u32 4294901760, %v35011_v47  ;;  %v27566_v5 = vpack.c.bf16 %v17166_v46, %v17159_v23  ;;  %v37820_v47 = vand.u32 4294901760, %v35743_v61  ;;  %v39737_v23 = vld [vmem:[#allocation68_spill] sm:$0xff] }
 0x59c   : > { %23383 = vmatprep.mubr.f32.mxu1 %v39725_v63  ;;  %26695 = vmatprep.subr.bf16.mxu1 %v26694_v8  ;;  %v17173_v63 = vand.u32 4294901760, %v17172_v56  ;;  %v39738_v46 = vld [vmem:[#allocation178_spill] sm:$0xff]  ;;  %v39740_v56 = vld [vmem:[#allocation445_spill] sm:$0xff] }
 0x59d   : > { %27559 = vmatprep.subr.bf16.mxu0 %v27558_v25  ;;  %26697 = vmatpush3.bf16.msra.mxu1 %v26694_v8  ;;  %v35738_v21 = vsub.f32 %v35515_v11, %v39727_v10  ;;  %v39732_v8 = vld [vmem:[#allocation364_spill] sm:$0xff]  ;;  %v39734_v11 = vand.u32 4294901760, %v35016_v52  ;;  %v17193_v10 = vsub.f32 %v35649_v2, %v37822_v9  ;;  %v39736_v52 = vld [vmem:[#allocation177_spill] sm:$0xff]  ;;  %v39741_v45 = vand.u32 4294901760, %v39740_v56  ;;  %v39750_v56 = vld [vmem:[#allocation254_spill] sm:$0xff] }
 0x59e   : > { %25541 = vmatmul.mubr.f32.gmra.mrb[4].mxu0 %v39729_v43  ;;  %23384 = vmatmul.mubr.f32.gmra.mrb[6].mxu1 %v39730_v14  ;;  %v27570_v14 = vpack.c.bf16 %v17180_v27, %v17173_v63  ;;  %v39748_v27 = vld [vmem:[#allocation192_spill] sm:$0xff]  ;;  %v39817_v9 = vld [vmem:[#allocation343_spill] sm:$0xff] }
 0x59f   : > { %25543 = vmatprep.mubr.f32.mxu0 %v39731_v32  ;;  %23386 = vmatprep.mubr.f32.mxu1 %v39732_v8  ;;  %v26702_v3 = vpack.c.bf16 %v39734_v11, %v39733_v24  ;;  %v17187_v32 = vand.u32 4294901760, %v17186_v29  ;;  %v17194_v8 = vand.u32 4294901760, %v17193_v10  ;;  %v17207_v11 = vsub.f32 %v35743_v61, %v37820_v47  ;;  %v39813_v47 = vld [vmem:[#allocation444_spill] sm:$0xff] }
 0x5a0   : > { %27561 = vmatpush3.bf16.msra.mxu0 %v27558_v25  ;;  %26699 = vmatprep.subr.bf16.mxu1 %v26698_v58  ;;  %v37821_v25 = vand.u32 4294901760, %v35738_v21  ;;  %v39749_v29 = vand.u32 4294901760, %v39748_v27  ;;  %v39763_v27 = vld [vmem:[#allocation217_spill] sm:$0xff] }
 0x5a1   : > { %27563 = vmatprep.subr.bf16.mxu0 %v27562_v48  ;;  %26701 = vmatpush3.bf16.msra.mxu1 %v26698_v58  ;;  %v39739_v58 = vand.u32 4294901760, %v35036_v6  ;;  %v39744_v6 = vld [vmem:[#allocation252_spill] sm:$0xff] }
 0x5a2   : > { %25544 = vmatmul.mubr.f32.gmra.mrb[6].mxu0 %v39735_v37  ;;  %23387 = vmatmul.mubr.f32.gmra.mrb[8].mxu1 %v39736_v52  ;;  %v17200_v24 = vsub.f32 %v35738_v21, %v37821_v25  ;;  %v39743_v37 = vld [vmem:[#allocation182_spill] sm:$0xff]  ;;  %v39745_v52 = vld [vmem:[#allocation183_spill] sm:$0xff] }
 0x5a3   : > { %25546 = vmatprep.mubr.f32.mxu0 %v39737_v23  ;;  %23389 = vmatprep.mubr.f32.mxu1 %v39738_v46  ;;  %v26706_v43 = vpack.c.bf16 %v39741_v45, %v39739_v58  ;;  %v27574_v23 = vpack.c.bf16 %v17194_v8, %v17187_v32  ;;  %v17208_v58 = vand.u32 4294901760, %v17207_v11  ;;  %v39751_v45 = vld [vmem:[#allocation191_spill] sm:$0xff]  ;;  %v39758_v32 = vld [vmem:[#allocation270_spill] sm:$0xff]  ;;  %v39759_v8 = vld [vmem:[#allocation205_spill] sm:$0xff] }
 0x5a4   : > { %27565 = vmatpush3.bf16.msra.mxu0 %v27562_v48  ;;  %26703 = vmatprep.subr.bf16.mxu1 %v26702_v3  ;;  %v39742_v48 = vld [vmem:[#allocation250_spill] sm:$0xff]  ;;  %v17201_v46 = vand.u32 4294901760, %v17200_v24  ;;  %v39760_v24 = vld [vmem:[#allocation273_spill] sm:$0xff] }
 0x5a5   : > { %27567 = vmatprep.subr.bf16.mxu0 %v27566_v5  ;;  %26705 = vmatpush3.bf16.msra.mxu1 %v26702_v3  ;;  %v39746_v3 = vld [vmem:[#allocation189_spill] sm:$0xff]  ;;  %v39815_v25 = vld [vmem:[#allocation342_spill] sm:$0xff] }
 0x5a6   : > { %25547 = vmatmul.mubr.f32.gmra.mrb[8].mxu0 %v39742_v48  ;;  %23390 = vmatmul.mubr.f32.gmra.mrb[10].mxu1 %v39743_v37  ;;  %v39747_v63 = vand.u32 4294901760, %v39746_v3  ;;  %v39752_v48 = vld [vmem:[#allocation263_spill] sm:$0xff]  ;;  %v39761_v11 = vld [vmem:[#allocation389_spill] sm:$0xff] }
 0x5a7   : > { %25549 = vmatprep.mubr.f32.mxu0 %v39744_v6  ;;  %23392 = vmatprep.mubr.f32.mxu1 %v39745_v52  ;;  %v39753_v37 = vld [vmem:[#allocation383_spill] sm:$0xff]  ;;  %v39756_v52 = vld [vmem:[#allocation442_spill] sm:$0xff] }
 0x5a8   : > { %27569 = vmatpush3.bf16.msra.mxu0 %v27566_v5  ;;  %26707 = vmatprep.subr.bf16.mxu1 %v26706_v43  ;;  %v26710_v10 = vpack.c.bf16 %v39749_v29, %v39747_v63  ;;  %v39754_v5 = vld [vmem:[#allocation439_spill] sm:$0xff]  ;;  %v39757_v3 = vand.u32 4294901760, %v39756_v52  ;;  %v39771_v52 = vld [vmem:[#allocation401_spill] sm:$0xff] }
 0x5a9   : > { %27571 = vmatprep.subr.bf16.mxu0 %v27570_v14  ;;  %26709 = vmatpush3.bf16.msra.mxu1 %v26706_v43  ;;  %v39755_v6 = vand.u32 4294901760, %v39754_v5  ;;  %v27578_v43 = vpack.c.bf16 %v17208_v58, %v17201_v46  ;;  %v39764_v29 = vld [vmem:[#allocation279_spill] sm:$0xff]  ;;  %v29518_v46 = vld [vmem:[%s29796_s27 + $0x198] sm:$0xff]  ;;  %v39769_v5 = vld [vmem:[#allocation236_spill] sm:$0xff] }
 0x5aa   : > { %25550 = vmatmul.mubr.f32.gmra.mrb[10].mxu0 %v39750_v56  ;;  %23393 = vmatmul.mubr.f32.gmra.mrb[12].mxu1 %v39751_v45  ;;  %v16673_v58 = vrot.slane %v29518_v46, 2  ;;  %v29519_v56 = vld [vmem:[%s29796_s27 + $0x1a0] sm:$0xff] }
 0x5ab   : > { %25552 = vmatprep.mubr.f32.mxu0 %v39752_v48  ;;  %23395 = vmatprep.mubr.f32.mxu1 %v39753_v37  ;;  %v26714_v63 = vpack.c.bf16 %v39757_v3, %v39755_v6  ;;  %v16674_v45 = vrot.slane %v29519_v56, 2  ;;  %v39766_v48 = vld [vmem:[#allocation185_spill] sm:$0xff]  ;;  %v39768_v37 = vld [vmem:[#allocation2_spill] sm:$0xff]  ;;  %v29520_v3 = vld [vmem:[%s29796_s27 + $0x1a8] sm:$0x3] }
 0x5ac   : > { %27573 = vmatpush3.bf16.msra.mxu0 %v27570_v14  ;;  %26711 = vmatprep.subr.bf16.mxu1 %v26710_v10  ;;  %v39762_v14 = vld [vmem:[#allocation176_spill] sm:$0xff]  ;;  %v39770_v6 = vld [vmem:[#allocation282_spill] sm:$0xff] }
 0x5ad   : > { %27575 = vmatprep.subr.bf16.mxu0 %v27574_v23  ;;  %26713 = vmatpush3.bf16.msra.mxu1 %v26710_v10  ;;  %v39765_v10 = vld [vmem:[#allocation395_spill] sm:$0xff]  ;;  %v39779_v56 = vld [vmem:[#allocation300_spill] sm:$0xff] }
 0x5ae   : > { %25553 = vmatmul.mubr.f32.gmra.mrb[12].mxu0 %v39758_v32  ;;  %23396 = vmatmul.mubr.f32.gmra.mrb[14].mxu1 %v39759_v8  ;;  %v39772_v32 = vld [vmem:[#allocation288_spill] sm:$0xff]  ;;  %v39773_v8 = vld [vmem:[#allocation406_spill] sm:$0xff] }
 0x5af   : > { %25555 = vmatprep.mubr.f32.mxu0 %v39760_v24  ;;  %23398 = vmatprep.mubr.f32.mxu1 %v39761_v11  ;;  %v39774_v24 = vld [vmem:[#allocation289_spill] sm:$0xff] }
 0x5b0   : > { %27577 = vmatpush3.bf16.msra.mxu0 %v27574_v23  ;;  %26715 = vmatprep.subr.bf16.mxu1 %v26714_v63  ;;  %v39767_v23 = vld [vmem:[#allocation321_spill] sm:$0xff] }
 0x5b1   : > { %27579 = vmatprep.subr.bf16.mxu0 %v27578_v43  ;;  %26717 = vmatpush3.bf16.msra.mxu1 %v26714_v63  ;;  %v16676_v63 = vrot.slane %v29520_v3, 2  ;;  %v39775_v11 = vld [vmem:[#allocation409_spill] sm:$0xff]  ;;  %v39784_v3 = vld [vmem:[#allocation422_spill] sm:$0xff] }
 0x5b2   : > { %25556 = vmatmul.mubr.f32.gmra.mrb[14].mxu0 %v39762_v14  ;;  %23399 = vmatmul.mubr.f32.gmra.mrb[16].mxu1 %v39763_v27 }
 0x5b3   : > { %25558 = vmatprep.mubr.f32.mxu0 %v39764_v29  ;;  %23401 = vmatprep.mubr.f32.mxu1 %v39765_v10  ;;  %v16677_v27 = vsel %vm4395_vm1, %v16674_v45, %v16676_v63  ;;  %v39777_v29 = vld [vmem:[#allocation296_spill] sm:$0xff] }
 0x5b4   : > { %27581 = vmatpush3.bf16.msra.mxu0 %v27578_v43  ;;  %26719 = vmatprep.subr.bf16.mxu1 %v39766_v48  ;;  %v16675_v43 = vsel %vm4395_vm1, %v16673_v58, %v16674_v45  ;;  %v39778_v10 = vld [vmem:[#allocation412_spill] sm:$0xff]  ;;  %v35818_v46 = vand.u32 4294901760, %v16677_v27  ;;  %v39780_v58 = vld [vmem:[#allocation415_spill] sm:$0xff]  ;;  %v39783_v45 = vld [vmem:[#allocation306_spill] sm:$0xff] }
 0x5b5   : > { %27583 = vmatprep.subr.bf16.mxu0 %v39767_v23  ;;  %v35813_v14 = vand.u32 4294901760, %v16675_v43 }
 0x5b6   : > { %25559 = vmatmul.mubr.f32.gmra.mrb[16].mxu0 %v39768_v37  ;;  %23402 = vmatmul.mubr.f32.gmra.mrb[18].mxu1 %v39769_v5  ;;  %v39781_v5 = vld [vmem:[#allocation303_spill] sm:$0xff] }
 0x5b7   : > { %25561 = vmatprep.mubr.f32.mxu0 %v39770_v6  ;;  %23404 = vmatprep.mubr.f32.mxu1 %v39771_v52  ;;  %39776 = vst [vmem:[#allocation197_spill] sm:$0xff] %v35813_v14  ;;  %v35823_v37 = vsub.f32 %v16675_v43, %v35813_v14  ;;  %v39782_v6 = vld [vmem:[#allocation419_spill] sm:$0xff]  ;;  %v35828_v52 = vsub.f32 %v16677_v27, %v35818_v46 }
 0x5b9   : > { %v37819_v63 = vand.u32 4294901760, %v35823_v37  ;;  %v37818_v43 = vand.u32 4294901760, %v35828_v52 }
 0x5ba   : > { %25562 = vmatmul.mubr.f32.gmra.mrb[18].mxu0 %v39772_v32  ;;  %23405 = vmatmul.mubr.f32.gmra.mrb[20].mxu1 %v39773_v8  ;;  %v39785_v32 = vld [vmem:[#allocation308_spill] sm:$0xff]  ;;  %v39786_v8 = vld [vmem:[#allocation425_spill] sm:$0xff] }
 0x5bb   : > { %25564 = vmatprep.mubr.f32.mxu0 %v39774_v24  ;;  %23407 = vmatprep.mubr.f32.mxu1 %v39775_v11  ;;  %v39787_v24 = vld [vmem:[#allocation310_spill] sm:$0xff]  ;;  %v39788_v11 = vld [vmem:[#allocation428_spill] sm:$0xff]  ;;  %v17081_v27 = vsub.f32 %v35823_v37, %v37819_v63  ;;  %v39812_v63 = vld [vmem:[#allocation341_spill] sm:$0xff] }
 0x5be   : > { %25565 = vmatmul.mubr.f32.gmra.mrb[20].mxu0 %v39777_v29  ;;  %23408 = vmatmul.mubr.f32.gmra.mrb[22].mxu1 %v39778_v10  ;;  %v39789_v29 = vld [vmem:[#allocation311_spill] sm:$0xff]  ;;  %v39790_v10 = vld [vmem:[#allocation430_spill] sm:$0xff] }
 0x5bf   : > { %25567 = vmatprep.mubr.f32.mxu0 %v39779_v56  ;;  %23410 = vmatprep.mubr.f32.mxu1 %v39780_v58  ;;  %v17091_v56 = vsub.f32 %v35828_v52, %v37818_v43  ;;  %v39791_v58 = vld [vmem:[#allocation312_spill] sm:$0xff] }
 0x5c0   : > { %v39810_v43 = vld [vmem:[#allocation340_spill] sm:$0xff] }
 0x5c2   : > { %25568 = vmatmul.mubr.f32.gmra.mrb[22].mxu0 %v39781_v5  ;;  %23411 = vmatmul.mubr.f32.gmra.mrb[24].mxu1 %v39782_v6  ;;  %v39792_v5 = vld [vmem:[#allocation316_spill] sm:$0xff]  ;;  %v17082_v6 = vand.u32 4294901760, %v17081_v27  ;;  %v39800_v27 = vld [vmem:[#allocation193_spill] sm:$0xff] }
 0x5c3   : > { %25570 = vmatprep.mubr.f32.mxu0 %v39783_v45  ;;  %23413 = vmatprep.mubr.f32.mxu1 %v39784_v3  ;;  %v39793_v45 = vld [vmem:[#allocation313_spill] sm:$0xff]  ;;  %v39794_v3 = vld [vmem:[#allocation319_spill] sm:$0xff] }
 0x5c6   : > { %25571 = vmatmul.mubr.f32.gmra.mrb[24].mxu0 %v39785_v32  ;;  %23414 = vmatmul.mubr.f32.gmra.mrb[26].mxu1 %v39786_v8  ;;  %v17092_v32 = vand.u32 4294901760, %v17091_v56  ;;  %v39795_v8 = vld [vmem:[#allocation324_spill] sm:$0xff]  ;;  %v39802_v56 = vld [vmem:[#allocation195_spill] sm:$0xff] }
 0x5c7   : > { %25573 = vmatprep.mubr.f32.mxu0 %v39787_v24  ;;  %23416 = vmatprep.mubr.f32.mxu1 %v39788_v11  ;;  %v39796_v24 = vld [vmem:[#allocation326_spill] sm:$0xff]  ;;  %v39797_v11 = vld [vmem:[#allocation188_spill] sm:$0xff] }
 0x5ca   : > { %25574 = vmatmul.mubr.f32.gmra.mrb[26].mxu0 %v39789_v29  ;;  %23417 = vmatmul.mubr.f32.gmra.mrb[28].mxu1 %v39790_v10  ;;  %v39798_v29 = vld [vmem:[#allocation330_spill] sm:$0xff] }
 0x5cb   : > { %25576 = vmatprep.mubr.f32.mxu0 %v39791_v58  ;;  %23419 = vmatprep.mubr.f32.mxu1 %v39792_v5  ;;  %v39799_v10 = vld [vmem:[#allocation174_spill] sm:$0xff]  ;;  %v39803_v5 = vld [vmem:[#allocation337_spill] sm:$0xff] }
 0x5cc   : > { %v39801_v58 = vld [vmem:[#allocation334_spill] sm:$0xff] }
 0x5ce   : > { %25577 = vmatmul.mubr.f32.gmra.mrb[28].mxu0 %v39793_v45  ;;  %23420 = vmatmul.mubr.f32.gmra.mrb[30].mxu1 %v39794_v3  ;;  %v39806_v45 = vld [vmem:[#allocation212_spill] sm:$0xff]  ;;  %v39807_v3 = vld [vmem:[#allocation339_spill] sm:$0xff] }
 0x5cf   : > { %25579 = vmatprep.mubr.f32.mxu0 %v17082_v6  ;;  %23454 = vmatprep.mubr.f32.mxu1 %v39795_v8  ;;  %v39804_v6 = vld [vmem:[#allocation202_spill] sm:$0xff] }
 0x5d2   : > { %25580 = vmatmul.mubr.f32.gmra.mrb[30].mxu0 %v17092_v32  ;;  %23455 = vmatmul.mubr.f32.vlgmr.msra.gmra.mrb[0].mxu1 %v39796_v24  ;;  %v39808_v32 = vld [vmem:[#allocation373_spill] sm:$0xff] }
 0x5d3   : > { %25614 = vmatprep.mubr.f32.mxu0 %v39797_v11  ;;  %26721 = vmatpush3.bf16.msra.mxu1 %v39766_v48  ;;  %v39805_v48 = vld [vmem:[#allocation338_spill] sm:$0xff] }
 0x5d4   : > { %23457 = vmatprep.mubr.f32.mxu1 %v39798_v29  ;;  %26723 = vmatprep.subr.bf16.mxu1 %v39799_v10 }
 0x5d6   : > { %25615 = vmatmul.mubr.f32.vlgmr.msra.gmra.mrb[0].mxu0 %v39800_v27  ;;  %23458 = vmatmul.mubr.f32.gmra.mrb[2].mxu1 %v39801_v58 }
 0x5d7   : > { %27585 = vmatpush3.bf16.msra.mxu0 %v39767_v23  ;;  %25617 = vmatprep.mubr.f32.mxu0 %v39802_v56  ;;  %v39809_v23 = vld [vmem:[#allocation214_spill] sm:$0xff]  ;;  %v39860_v56 = vld [vmem:[#allocation299_spill] sm:$0xff] }
 0x5d8   : > { %23460 = vmatprep.mubr.f32.mxu1 %v39803_v5  ;;  %27587 = vmatprep.subr.bf16.mxu0 %v35460_v30 }
 0x5d9   : > { %26725 = vmatpush3.bf16.msra.mxu1 %v39799_v10  ;;  %v39811_v10 = vld [vmem:[#allocation215_spill] sm:$0xff] }
 0x5da   : > { %25618 = vmatmul.mubr.f32.gmra.mrb[2].mxu0 %v39804_v6  ;;  %23461 = vmatmul.mubr.f32.gmra.mrb[4].mxu1 %v39805_v48  ;;  %v39858_v6 = vld [vmem:[#allocation295_spill] sm:$0xff] }
 0x5db   : > { %25620 = vmatprep.mubr.f32.mxu0 %v39806_v45  ;;  %27589 = vmatpush3.bf16.msra.mxu0 %v35460_v30  ;;  %v39814_v30 = vld [vmem:[#allocation223_spill] sm:$0xff]  ;;  %v39856_v45 = vld [vmem:[#allocation292_spill] sm:$0xff] }
 0x5dc   : > { %23463 = vmatprep.mubr.f32.mxu1 %v39807_v3  ;;  %26727 = vmatprep.subr.bf16.mxu1 %v39808_v32 }
 0x5dd   : > { %27591 = vmatprep.subr.bf16.mxu0 %v35524_v60  ;;  %26729 = vmatpush3.bf16.msra.mxu1 %v39808_v32  ;;  %v39816_v32 = vld [vmem:[#allocation226_spill] sm:$0xff] }
 0x5de   : > { %25621 = vmatmul.mubr.f32.gmra.mrb[4].mxu0 %v39809_v23  ;;  %23464 = vmatmul.mubr.f32.gmra.mrb[6].mxu1 %v39810_v43  ;;  %v39854_v23 = vld [vmem:[#allocation287_spill] sm:$0xff] }
 0x5df   : > { %25623 = vmatprep.mubr.f32.mxu0 %v39811_v10  ;;  %23466 = vmatprep.mubr.f32.mxu1 %v39812_v63  ;;  %v39852_v10 = vld [vmem:[#allocation285_spill] sm:$0xff] }
 0x5e0   : > { %27593 = vmatpush3.bf16.msra.mxu0 %v35524_v60  ;;  %26731 = vmatprep.subr.bf16.mxu1 %v39813_v47  ;;  %v39818_v60 = vld [vmem:[#allocation228_spill] sm:$0xff] }
 0x5e1   : > { %27595 = vmatprep.subr.bf16.mxu0 %v35574_v17  ;;  %26733 = vmatpush3.bf16.msra.mxu1 %v39813_v47  ;;  %v39820_v47 = vld [vmem:[#allocation230_spill] sm:$0xff] }
 0x5e2   : > { %25624 = vmatmul.mubr.f32.gmra.mrb[6].mxu0 %v39814_v30  ;;  %23467 = vmatmul.mubr.f32.gmra.mrb[8].mxu1 %v39815_v25  ;;  %v39850_v30 = vld [vmem:[#allocation280_spill] sm:$0xff] }
 0x5e3   : > { %25626 = vmatprep.mubr.f32.mxu0 %v39816_v32  ;;  %23469 = vmatprep.mubr.f32.mxu1 %v39817_v9  ;;  %v39848_v32 = vld [vmem:[#allocation278_spill] sm:$0xff] }
 0x5e4   : > { %27597 = vmatpush3.bf16.msra.mxu0 %v35574_v17  ;;  %26735 = vmatprep.subr.bf16.mxu1 %v39663_v34  ;;  %v39822_v17 = vld [vmem:[#allocation238_spill] sm:$0xff] }
 0x5e5   : > { %27599 = vmatprep.subr.bf16.mxu0 %v35611_v36  ;;  %26737 = vmatpush3.bf16.msra.mxu1 %v39663_v34  ;;  %v39824_v34 = vld [vmem:[#allocation249_spill] sm:$0xff] }
 0x5e6   : > { %25627 = vmatmul.mubr.f32.gmra.mrb[8].mxu0 %v39818_v60  ;;  %23470 = vmatmul.mubr.f32.gmra.mrb[10].mxu1 %v39819_v33  ;;  %v39846_v60 = vld [vmem:[#allocation272_spill] sm:$0xff] }
 0x5e7   : > { %25629 = vmatprep.mubr.f32.mxu0 %v39820_v47  ;;  %23472 = vmatprep.mubr.f32.mxu1 %v39821_v40  ;;  %v39845_v47 = vld [vmem:[#allocation397_spill] sm:$0xff] }
 0x5e8   : > { %27601 = vmatpush3.bf16.msra.mxu0 %v35611_v36  ;;  %26739 = vmatprep.subr.bf16.mxu1 %v34926_v19  ;;  %v27610_v36 = vpack.c.bf16 %v35743_v61, %v35738_v21 }
 0x5e9   : > { %27603 = vmatprep.subr.bf16.mxu0 %v35633_v39  ;;  %26741 = vmatpush3.bf16.msra.mxu1 %v34926_v19  ;;  %v39826_v19 = vld [vmem:[#allocation253_spill] sm:$0xff] }
 0x5ea   : > { %25630 = vmatmul.mubr.f32.gmra.mrb[10].mxu0 %v39822_v17  ;;  %23473 = vmatmul.mubr.f32.gmra.mrb[12].mxu1 %v39823_v1  ;;  %v39843_v17 = vld [vmem:[#allocation392_spill] sm:$0xff] }
 0x5eb   : > { %25632 = vmatprep.mubr.f32.mxu0 %v39824_v34  ;;  %23475 = vmatprep.mubr.f32.mxu1 %v39825_v44  ;;  %v39841_v34 = vld [vmem:[#allocation391_spill] sm:$0xff] }
 0x5ec   : > { %27605 = vmatpush3.bf16.msra.mxu0 %v35633_v39  ;;  %26743 = vmatprep.subr.bf16.mxu1 %v34950_v31  ;;  %v39830_v39 = vld [vmem:[#allocation256_spill] sm:$0xff] }
 0x5ed   : > { %27607 = vmatprep.subr.bf16.mxu0 %v35655_v15  ;;  %26745 = vmatpush3.bf16.msra.mxu1 %v34950_v31  ;;  %v39831_v31 = vld [vmem:[#allocation379_spill] sm:$0xff] }
 0x5ee   : > { %25633 = vmatmul.mubr.f32.gmra.mrb[12].mxu0 %v39826_v19  ;;  %23476 = vmatmul.mubr.f32.gmra.mrb[14].mxu1 %v39827_v38  ;;  %v39838_v19 = vld [vmem:[#allocation108_spill] sm:$0xff] }
 0x5ef   : > { %25635 = vmatprep.mubr.f32.mxu0 %v39828_v0  ;;  %23478 = vmatprep.mubr.f32.mxu1 %v39829_v55  ;;  %v39835_v0 = vld [vmem:[#allocation184_spill] sm:$0xff] }
 0x5f0   : > { %27609 = vmatpush3.bf16.msra.mxu0 %v35655_v15  ;;  %26747 = vmatprep.subr.bf16.mxu1 %v34988_v13  ;;  %v39837_v15 = vld [vmem:[#allocation385_spill] sm:$0xff] }
 0x5f1   : > { %27611 = vmatprep.subr.bf16.mxu0 %v27610_v36  ;;  %26749 = vmatpush3.bf16.msra.mxu1 %v34988_v13  ;;  %v39839_v13 = vld [vmem:[#allocation386_spill] sm:$0xff] }
 0x5f2   : > { %25636 = vmatmul.mubr.f32.gmra.mrb[14].mxu0 %v39830_v39  ;;  %23479 = vmatmul.mubr.f32.gmra.mrb[16].mxu1 %v39831_v31  ;;  %v39840_v39 = vld [vmem:[#allocation265_spill] sm:$0xff] }
 0x5f3   : > { %25638 = vmatprep.mubr.f32.mxu0 %v39832_v4  ;;  %23481 = vmatprep.mubr.f32.mxu1 %v39833_v57  ;;  %v39842_v4 = vld [vmem:[#allocation127_spill] sm:$0xff] }
 0x5f4   : > { %27613 = vmatpush3.bf16.msra.mxu0 %v27610_v36  ;;  %26751 = vmatprep.subr.bf16.mxu1 %v39834_v26  ;;  %v39844_v36 = vld [vmem:[#allocation269_spill] sm:$0xff] }
 0x5f5   : > { %27615 = vmatprep.subr.bf16.mxu0 %v39835_v0 }
 0x5f6   : > { %25639 = vmatmul.mubr.f32.gmra.mrb[16].mxu0 %v39836_v20  ;;  %23482 = vmatmul.mubr.f32.gmra.mrb[18].mxu1 %v39837_v15  ;;  %v39847_v20 = vld [vmem:[#allocation398_spill] sm:$0xff] }
 0x5f7   : > { %25641 = vmatprep.mubr.f32.mxu0 %v39838_v19  ;;  %23484 = vmatprep.mubr.f32.mxu1 %v39839_v13  ;;  %v39849_v19 = vld [vmem:[#allocation403_spill] sm:$0xff] }
 0x5fa   : > { %25642 = vmatmul.mubr.f32.gmra.mrb[18].mxu0 %v39840_v39  ;;  %23485 = vmatmul.mubr.f32.gmra.mrb[20].mxu1 %v39841_v34  ;;  %v39851_v39 = vld [vmem:[#allocation404_spill] sm:$0xff] }
 0x5fb   : > { %25644 = vmatprep.mubr.f32.mxu0 %v39842_v4  ;;  %23487 = vmatprep.mubr.f32.mxu1 %v39843_v17  ;;  %v39853_v4 = vld [vmem:[#allocation180_spill] sm:$0xff] }
 0x5fe   : > { %25645 = vmatmul.mubr.f32.gmra.mrb[20].mxu0 %v39844_v36  ;;  %23488 = vmatmul.mubr.f32.gmra.mrb[22].mxu1 %v39845_v47  ;;  %v39855_v36 = vld [vmem:[#allocation411_spill] sm:$0xff] }
 0x5ff   : > { %25647 = vmatprep.mubr.f32.mxu0 %v39846_v60  ;;  %23490 = vmatprep.mubr.f32.mxu1 %v39847_v20  ;;  %v39857_v60 = vld [vmem:[#allocation417_spill] sm:$0xff] }
 0x602   : > { %25648 = vmatmul.mubr.f32.gmra.mrb[22].mxu0 %v39848_v32  ;;  %23491 = vmatmul.mubr.f32.gmra.mrb[24].mxu1 %v39849_v19  ;;  %v39859_v32 = vld [vmem:[#allocation10_spill] sm:$0xff] }
 0x603   : > { %25650 = vmatprep.mubr.f32.mxu0 %v39850_v30  ;;  %23493 = vmatprep.mubr.f32.mxu1 %v39851_v39  ;;  %v39861_v30 = vld [vmem:[#allocation327_spill] sm:$0xff] }
 0x606   : > { %25651 = vmatmul.mubr.f32.gmra.mrb[24].mxu0 %v39852_v10  ;;  %23494 = vmatmul.mubr.f32.gmra.mrb[26].mxu1 %v39853_v4 }
 0x607   : > { %25653 = vmatprep.mubr.f32.mxu0 %v39854_v23  ;;  %23496 = vmatprep.mubr.f32.mxu1 %v39855_v36  ;;  %v39862_v23 = vld [vmem:[#allocation194_spill] sm:$0xff] }
 0x60a   : > { %25654 = vmatmul.mubr.f32.gmra.mrb[26].mxu0 %v39856_v45  ;;  %23497 = vmatmul.mubr.f32.gmra.mrb[28].mxu1 %v39857_v60  ;;  %v39864_v45 = vld [vmem:[#allocation199_spill] sm:$0xff] }
 0x60b   : > { %25656 = vmatprep.mubr.f32.mxu0 %v39858_v6  ;;  %23499 = vmatprep.mubr.f32.mxu1 %v39859_v32  ;;  %v39863_v6 = vld [vmem:[#allocation5_spill] sm:$0xff] }
 0x60e   : > { %25657 = vmatmul.mubr.f32.gmra.mrb[28].mxu0 %v39860_v56  ;;  %23500 = vmatmul.mubr.f32.gmra.mrb[30].mxu1 %v39861_v30 }
 0x60f   : > { %25659 = vmatprep.mubr.f32.mxu0 %v35813_v14  ;;  %23534 = vmatprep.mubr.f32.mxu1 %v39795_v8  ;;  %v39865_v14 = vld [vmem:[#allocation201_spill] sm:$0xff]  ;;  %v39866_v8 = vld [vmem:[#allocation443_spill] sm:$0xff] }
 0x612   : > { %25660 = vmatmul.mubr.f32.gmra.mrb[30].mxu0 %v35818_v46  ;;  %23535 = vmatmul.mubr.f32.vlgmr.msra.gmra.mrb[0].mxu1 %v39796_v24  ;;  %v39867_v24 = vld [vmem:[#allocation211_spill] sm:$0xff] }
 0x613   : > { %25694 = vmatprep.mubr.f32.mxu0 %v39862_v23  ;;  %26753 = vmatpush3.bf16.msra.mxu1 %v39834_v26  ;;  %v39868_v26 = vld [vmem:[#allocation219_spill] sm:$0xff] }
 0x614   : > { %23537 = vmatprep.mubr.f32.mxu1 %v39798_v29  ;;  %26755 = vmatprep.subr.bf16.mxu1 %v39863_v6  ;;  %v39869_v29 = vld [vmem:[#allocation7_spill] sm:$0xff] }
 0x615   : > { %v39879_v23 = vld [vmem:[#allocation239_spill] sm:$0xff] }
 0x616   : > { %25695 = vmatmul.mubr.f32.vlgmr.msra.gmra.mrb[0].mxu0 %v39864_v45  ;;  %23538 = vmatmul.mubr.f32.gmra.mrb[2].mxu1 %v39801_v58  ;;  %v39870_v58 = vld [vmem:[#allocation18_spill] sm:$0xff] }
 0x617   : > { %27617 = vmatpush3.bf16.msra.mxu0 %v39835_v0  ;;  %25697 = vmatprep.mubr.f32.mxu0 %v39865_v14  ;;  %v39871_v14 = vld [vmem:[#allocation220_spill] sm:$0xff]  ;;  %v39875_v45 = vld [vmem:[#allocation234_spill] sm:$0xff] }
 0x618   : > { %23540 = vmatprep.mubr.f32.mxu1 %v39803_v5  ;;  %27619 = vmatprep.subr.bf16.mxu0 %v39866_v8  ;;  %v39872_v5 = vld [vmem:[#allocation222_spill] sm:$0xff] }
 0x619   : > { %26757 = vmatpush3.bf16.msra.mxu1 %v39863_v6  ;;  %v39873_v6 = vld [vmem:[#allocation9_spill] sm:$0xff] }
 0x61a   : > { %25698 = vmatmul.mubr.f32.gmra.mrb[2].mxu0 %v39867_v24  ;;  %23541 = vmatmul.mubr.f32.gmra.mrb[4].mxu1 %v39805_v48  ;;  %v39874_v48 = vld [vmem:[#allocation233_spill] sm:$0xff] }
 0x61b   : > { %25700 = vmatprep.mubr.f32.mxu0 %v39868_v26  ;;  %27621 = vmatpush3.bf16.msra.mxu0 %v39866_v8 }
 0x61c   : > { %23543 = vmatprep.mubr.f32.mxu1 %v39807_v3  ;;  %26759 = vmatprep.subr.bf16.mxu1 %v39869_v29  ;;  %v39878_v3 = vld [vmem:[#allocation237_spill] sm:$0xff] }
 0x61d   : > { %27623 = vmatprep.subr.bf16.mxu0 %v39870_v58  ;;  %26761 = vmatpush3.bf16.msra.mxu1 %v39869_v29  ;;  %v39883_v29 = vld [vmem:[#allocation24_spill] sm:$0xff] }
 0x61e   : > { %25701 = vmatmul.mubr.f32.gmra.mrb[4].mxu0 %v39871_v14  ;;  %23544 = vmatmul.mubr.f32.gmra.mrb[6].mxu1 %v39810_v43  ;;  %v39876_v43 = vld [vmem:[#allocation11_spill] sm:$0xff]  ;;  %v39884_v14 = vand.u32 4294901760, %v39883_v29 }
 0x61f   : > { %25703 = vmatprep.mubr.f32.mxu0 %v39872_v5  ;;  %23546 = vmatprep.mubr.f32.mxu1 %v39812_v63  ;;  %v39877_v63 = vld [vmem:[#allocation314_spill] sm:$0xff] }
 0x620   : > { %27625 = vmatpush3.bf16.msra.mxu0 %v39870_v58  ;;  %26763 = vmatprep.subr.bf16.mxu1 %v39873_v6  ;;  %v8993_v5 = vsub.f32 %v39883_v29, %v39884_v14  ;;  %v39894_v14 = vld [vmem:[#allocation107_spill] sm:$0xff] }
 0x621   : > { %27627 = vmatprep.subr.bf16.mxu0 %v35442_v12  ;;  %26765 = vmatpush3.bf16.msra.mxu1 %v39873_v6  ;;  %v39887_v6 = vld [vmem:[#allocation26_spill] sm:$0xff] }
 0x622   : > { %25704 = vmatmul.mubr.f32.gmra.mrb[6].mxu0 %v39874_v48  ;;  %23547 = vmatmul.mubr.f32.gmra.mrb[8].mxu1 %v39815_v25  ;;  %v39880_v25 = vld [vmem:[#allocation13_spill] sm:$0xff] }
 0x623   : > { %25706 = vmatprep.mubr.f32.mxu0 %v39875_v45  ;;  %23549 = vmatprep.mubr.f32.mxu1 %v39817_v9  ;;  %v39881_v9 = vld [vmem:[#allocation20_spill] sm:$0xff]  ;;  %v8994_v45 = vand.u32 4294901760, %v8993_v5  ;;  %v39898_v5 = vld [vmem:[#allocation147_spill] sm:$0xff] }
 0x624   : > { %27629 = vmatpush3.bf16.msra.mxu0 %v35442_v12  ;;  %26767 = vmatprep.subr.bf16.mxu1 %v39876_v43  ;;  %v39882_v24 = vand.u32 4294901760, %v39881_v9 }
 0x625   : > { %27631 = vmatprep.subr.bf16.mxu0 %v39877_v63  ;;  %26769 = vmatpush3.bf16.msra.mxu1 %v39876_v43  ;;  %v39888_v43 = vld [vmem:[#allocation88_spill] sm:$0xff] }
 0x626   : > { %25707 = vmatmul.mubr.f32.gmra.mrb[8].mxu0 %v39878_v3  ;;  %23550 = vmatmul.mubr.f32.gmra.mrb[10].mxu1 %v39819_v33  ;;  %v8986_v26 = vsub.f32 %v39881_v9, %v39882_v24  ;;  %v39885_v33 = vld [vmem:[#allocation244_spill] sm:$0xff]  ;;  %v39889_v3 = vld [vmem:[#allocation258_spill] sm:$0xff] }
 0x627   : > { %25709 = vmatprep.mubr.f32.mxu0 %v39879_v23  ;;  %23552 = vmatprep.mubr.f32.mxu1 %v39821_v40  ;;  %v39886_v40 = vld [vmem:[#allocation251_spill] sm:$0xff]  ;;  %v39891_v23 = vand.u32 4294901760, %v35384_v41  ;;  %v39897_v41 = vld [vmem:[#allocation266_spill] sm:$0xff] }
 0x628   : > { %27633 = vmatpush3.bf16.msra.mxu0 %v39877_v63  ;;  %26771 = vmatprep.subr.bf16.mxu1 %v39880_v25  ;;  %v8987_v48 = vand.u32 4294901760, %v8986_v26 }
 0x629   : > { %27635 = vmatprep.subr.bf16.mxu0 %v35506_v22  ;;  %26773 = vmatpush3.bf16.msra.mxu1 %v39880_v25  ;;  %v39892_v25 = vld [vmem:[#allocation15_spill] sm:$0xff] }
 0x62a   : > { %25710 = vmatmul.mubr.f32.gmra.mrb[10].mxu0 %v39885_v33  ;;  %23553 = vmatmul.mubr.f32.gmra.mrb[12].mxu1 %v39823_v1  ;;  %v26782_v1 = vpack.c.bf16 %v8994_v45, %v8987_v48  ;;  %v39893_v24 = vand.u32 4294901760, %v39892_v25  ;;  %v39901_v33 = vld [vmem:[#allocation277_spill] sm:$0xff]  ;;  %v39910_v45 = vld [vmem:[#allocation298_spill] sm:$0xff] }
 0x62b   : > { %25712 = vmatprep.mubr.f32.mxu0 %v39886_v40  ;;  %23555 = vmatprep.mubr.f32.mxu1 %v39825_v44  ;;  %v39890_v44 = vld [vmem:[#allocation28_spill] sm:$0xff] }
 0x62c   : > { %27637 = vmatpush3.bf16.msra.mxu0 %v35506_v22  ;;  %26775 = vmatprep.subr.bf16.mxu1 %v39887_v6  ;;  %v27646_v26 = vpack.c.bf16 %v39893_v24, %v39891_v23  ;;  %v39916_v24 = vld [vmem:[#allocation57_spill] sm:$0xff] }
 0x62d   : > { %27639 = vmatprep.subr.bf16.mxu0 %v35534_v7  ;;  %26777 = vmatpush3.bf16.msra.mxu1 %v39887_v6  ;;  %v39908_v6 = vld [vmem:[#allocation38_spill] sm:$0xff] }
 0x62e   : > { %25713 = vmatmul.mubr.f32.gmra.mrb[12].mxu0 %v39888_v43  ;;  %23556 = vmatmul.mubr.f32.gmra.mrb[14].mxu1 %v39827_v38  ;;  %v39895_v38 = vld [vmem:[#allocation262_spill] sm:$0xff]  ;;  %v39909_v48 = vand.u32 4294901760, %v39908_v6 }
 0x62f   : > { %25715 = vmatprep.mubr.f32.mxu0 %v39889_v3  ;;  %23558 = vmatprep.mubr.f32.mxu1 %v39829_v55  ;;  %v39896_v55 = vld [vmem:[#allocation264_spill] sm:$0xff]  ;;  %v39912_v3 = vld [vmem:[#allocation305_spill] sm:$0xff] }
 0x630   : > { %27641 = vmatpush3.bf16.msra.mxu0 %v35534_v7  ;;  %26779 = vmatprep.subr.bf16.mxu1 %v39890_v44 }
 0x631   : > { %27643 = vmatprep.subr.bf16.mxu0 %v35568_v59  ;;  %26781 = vmatpush3.bf16.msra.mxu1 %v39890_v44  ;;  %v39914_v44 = vld [vmem:[#allocation56_spill] sm:$0xff] }
 0x632   : > { %25716 = vmatmul.mubr.f32.gmra.mrb[14].mxu0 %v39894_v14  ;;  %23559 = vmatmul.mubr.f32.gmra.mrb[16].mxu1 %v39831_v31  ;;  %v39899_v31 = vld [vmem:[#allocation148_spill] sm:$0xff]  ;;  %v39915_v23 = vand.u32 4294901760, %v39914_v44 }
 0x633   : > { %25718 = vmatprep.mubr.f32.mxu0 %v39895_v38  ;;  %23561 = vmatprep.mubr.f32.mxu1 %v39833_v57  ;;  %v39900_v57 = vld [vmem:[#allocation276_spill] sm:$0xff] }
 0x634   : > { %27645 = vmatpush3.bf16.msra.mxu0 %v35568_v59  ;;  %26783 = vmatprep.subr.bf16.mxu1 %v26782_v1  ;;  %v9014_v25 = vsub.f32 %v39914_v44, %v39915_v23 }
 0x635   : > { %27647 = vmatprep.subr.bf16.mxu0 %v27646_v26 }
 0x636   : > { %25719 = vmatmul.mubr.f32.gmra.mrb[16].mxu0 %v39896_v55  ;;  %23562 = vmatmul.mubr.f32.gmra.mrb[18].mxu1 %v39837_v15  ;;  %v39902_v15 = vld [vmem:[#allocation284_spill] sm:$0xff] }
 0x637   : > { %25721 = vmatprep.mubr.f32.mxu0 %v39897_v41  ;;  %23564 = vmatprep.mubr.f32.mxu1 %v39839_v13  ;;  %v39903_v13 = vld [vmem:[#allocation286_spill] sm:$0xff]  ;;  %v39919_v55 = vld [vmem:[#allocation200_spill] sm:$0xff] }
 0x63a   : > { %25722 = vmatmul.mubr.f32.gmra.mrb[18].mxu0 %v39898_v5  ;;  %23565 = vmatmul.mubr.f32.gmra.mrb[20].mxu1 %v39841_v34  ;;  %v39904_v34 = vld [vmem:[#allocation291_spill] sm:$0xff]  ;;  %v39920_v5 = vld [vmem:[#allocation46_spill] sm:$0xff] }
 0x63b   : > { %25724 = vmatprep.mubr.f32.mxu0 %v39899_v31  ;;  %23567 = vmatprep.mubr.f32.mxu1 %v39843_v17  ;;  %v39905_v17 = vld [vmem:[#allocation294_spill] sm:$0xff]  ;;  %v39921_v31 = vand.u32 4294901760, %v35432_v51  ;;  %v39930_v51 = vld [vmem:[#allocation49_spill] sm:$0xff] }
 0x63e   : > { %25725 = vmatmul.mubr.f32.gmra.mrb[20].mxu0 %v39900_v57  ;;  %23568 = vmatmul.mubr.f32.gmra.mrb[22].mxu1 %v39845_v47  ;;  %v39906_v47 = vld [vmem:[#allocation37_spill] sm:$0xff]  ;;  %v39922_v57 = vand.u32 4294901760, %v35434_v28 }
 0x63f   : > { %25727 = vmatprep.mubr.f32.mxu0 %v39901_v33  ;;  %23570 = vmatprep.mubr.f32.mxu1 %v39847_v20  ;;  %v39907_v40 = vand.u32 4294901760, %v39906_v47 }
 0x640   : > { %v27650_v33 = vpack.c.bf16 %v39922_v57, %v39921_v31  ;;  %v39942_v57 = vld [vmem:[#allocation116_spill] sm:$0xff] }
 0x641   : > { %v9000_v20 = vsub.f32 %v39906_v47, %v39907_v40 }
 0x642   : > { %25728 = vmatmul.mubr.f32.gmra.mrb[22].mxu0 %v39902_v15  ;;  %23571 = vmatmul.mubr.f32.gmra.mrb[24].mxu1 %v39849_v19  ;;  %v9007_v19 = vsub.f32 %v39908_v6, %v39909_v48  ;;  %v39923_v15 = vld [vmem:[#allocation75_spill] sm:$0xff] }
 0x643   : > { %25730 = vmatprep.mubr.f32.mxu0 %v39903_v13  ;;  %23573 = vmatprep.mubr.f32.mxu1 %v39851_v39  ;;  %v39911_v39 = vld [vmem:[#allocation302_spill] sm:$0xff]  ;;  %v39924_v13 = vand.u32 4294901760, %v39923_v15  ;;  %v39927_v48 = vld [vmem:[#allocation207_spill] sm:$0xff] }
 0x644   : > { %v9008_v43 = vand.u32 4294901760, %v9007_v19  ;;  %v39929_v19 = vld [vmem:[#allocation210_spill] sm:$0xff] }
 0x646   : > { %25731 = vmatmul.mubr.f32.gmra.mrb[24].mxu0 %v39904_v34  ;;  %23574 = vmatmul.mubr.f32.gmra.mrb[26].mxu1 %v39853_v4  ;;  %v9001_v4 = vand.u32 4294901760, %v9000_v20  ;;  %v9028_v34 = vsub.f32 %v39923_v15, %v39924_v13  ;;  %v39943_v13 = vand.u32 4294901760, %v39942_v57 }
 0x647   : > { %25733 = vmatprep.mubr.f32.mxu0 %v39905_v17  ;;  %23576 = vmatprep.mubr.f32.mxu1 %v39855_v36  ;;  %v39913_v36 = vld [vmem:[#allocation31_spill] sm:$0xff]  ;;  %v39925_v17 = vld [vmem:[#allocation76_spill] sm:$0xff] }
 0x648   : > { %v26786_v38 = vpack.c.bf16 %v9008_v43, %v9001_v4  ;;  %v39926_v40 = vand.u32 4294901760, %v39925_v17  ;;  %v9029_v28 = vand.u32 4294901760, %v9028_v34  ;;  %v39931_v4 = vld [vmem:[#allocation95_spill] sm:$0xff]  ;;  %v39944_v34 = vld [vmem:[#allocation62_spill] sm:$0xff] }
 0x649   : > { %v39932_v43 = vand.u32 4294901760, %v39931_v4 }
 0x64a   : > { %25734 = vmatmul.mubr.f32.gmra.mrb[26].mxu0 %v39910_v45  ;;  %23577 = vmatmul.mubr.f32.gmra.mrb[28].mxu1 %v39857_v60  ;;  %v39917_v60 = vand.u32 4294901760, %v39916_v24  ;;  %v9035_v20 = vsub.f32 %v39925_v17, %v39926_v40 }
 0x64b   : > { %25736 = vmatprep.mubr.f32.mxu0 %v39911_v39  ;;  %23579 = vmatprep.mubr.f32.mxu1 %v39859_v32  ;;  %v39918_v32 = vld [vmem:[#allocation44_spill] sm:$0xff] }
 0x64c   : > { %v9021_v14 = vsub.f32 %v39916_v24, %v39917_v60  ;;  %v9036_v39 = vand.u32 4294901760, %v9035_v20  ;;  %v39935_v60 = vand.u32 4294901760, %v35495_v16  ;;  %v39945_v20 = vand.u32 4294901760, %v35555_v50 }
 0x64e   : > { %25737 = vmatmul.mubr.f32.gmra.mrb[28].mxu0 %v39912_v3  ;;  %23580 = vmatmul.mubr.f32.gmra.mrb[30].mxu1 %v39861_v30  ;;  %v9015_v30 = vand.u32 4294901760, %v9014_v25  ;;  %v9022_v41 = vand.u32 4294901760, %v9021_v14  ;;  %v9042_v3 = vsub.f32 %v39931_v4, %v39932_v43  ;;  %v39950_v43 = vld [vmem:[#allocation66_spill] sm:$0xff] }
 0x64f   : > { %25739 = vmatprep.mubr.f32.mxu0 %v35823_v37  ;;  %23614 = vmatprep.mubr.f32.mxu1 %v39913_v36  ;;  %v39933_v36 = vld [vmem:[#allocation96_spill] sm:$0xff] }
 0x650   : > { %v26790_v45 = vpack.c.bf16 %v9022_v41, %v9015_v30  ;;  %v39934_v23 = vand.u32 4294901760, %v39933_v36  ;;  %v39939_v30 = vld [vmem:[#allocation229_spill] sm:$0xff]  ;;  %v39940_v41 = vld [vmem:[#allocation115_spill] sm:$0xff]  ;;  %v9043_v16 = vand.u32 4294901760, %v9042_v3  ;;  %v39953_v3 = vld [vmem:[#allocation136_spill] sm:$0xff] }
 0x652   : > { %25740 = vmatmul.mubr.f32.gmra.mrb[30].mxu0 %v35828_v52  ;;  %23615 = vmatmul.mubr.f32.vlgmr.msra.gmra.mrb[0].mxu1 %v39918_v32  ;;  %v9049_v25 = vsub.f32 %v39933_v36, %v39934_v23  ;;  %v39937_v32 = vld [vmem:[#allocation218_spill] sm:$0xff] }
 0x653   : > { %25774 = vmatprep.mubr.f32.mxu0 %v39919_v55  ;;  %26785 = vmatpush3.bf16.msra.mxu1 %v26782_v1  ;;  %v39928_v1 = vld [vmem:[#allocation47_spill] sm:$0xff] }
 0x654   : > { %23617 = vmatprep.mubr.f32.mxu1 %v39920_v5  ;;  %26787 = vmatprep.subr.bf16.mxu1 %v26786_v38  ;;  %v39938_v55 = vld [vmem:[#allocation51_spill] sm:$0xff]  ;;  %v39941_v5 = vand.u32 4294901760, %v39940_v41  ;;  %v9050_v40 = vand.u32 4294901760, %v9049_v25 }
 0x656   : > { %25775 = vmatmul.mubr.f32.vlgmr.msra.gmra.mrb[0].mxu0 %v39927_v48  ;;  %23618 = vmatmul.mubr.f32.gmra.mrb[2].mxu1 %v39928_v1  ;;  %v9056_v31 = vsub.f32 %v39940_v41, %v39941_v5  ;;  %v39947_v1 = vld [vmem:[#allocation231_spill] sm:$0xff]  ;;  %v39959_v5 = vld [vmem:[#allocation242_spill] sm:$0xff] }
 0x657   : > { %27649 = vmatpush3.bf16.msra.mxu0 %v27646_v26  ;;  %25777 = vmatprep.mubr.f32.mxu0 %v39929_v19  ;;  %v39936_v26 = vand.u32 4294901760, %v35498_v53  ;;  %v26794_v53 = vpack.c.bf16 %v9036_v39, %v9029_v28  ;;  %v39948_v19 = vld [vmem:[#allocation64_spill] sm:$0xff]  ;;  %v26798_v28 = vpack.c.bf16 %v9050_v40, %v9043_v16  ;;  %v39951_v39 = vld [vmem:[#allocation135_spill] sm:$0xff] }
 0x658   : > { %23620 = vmatprep.mubr.f32.mxu1 %v39930_v51  ;;  %27651 = vmatprep.subr.bf16.mxu0 %v27650_v33  ;;  %v39949_v51 = vld [vmem:[#allocation232_spill] sm:$0xff]  ;;  %v9057_v23 = vand.u32 4294901760, %v9056_v31  ;;  %v39960_v31 = vld [vmem:[#allocation81_spill] sm:$0xff]  ;;  %v39961_v16 = vld [vmem:[#allocation155_spill] sm:$0xff] }
 0x659   : > { %26789 = vmatpush3.bf16.msra.mxu1 %v26786_v38  ;;  %v27654_v14 = vpack.c.bf16 %v39936_v26, %v39935_v60  ;;  %v9063_v38 = vsub.f32 %v39942_v57, %v39943_v13  ;;  %v39955_v26 = vand.u32 4294901760, %v35599_v49  ;;  %v39963_v40 = vld [vmem:[#allocation156_spill] sm:$0xff] }
 0x65a   : > { %25778 = vmatmul.mubr.f32.gmra.mrb[2].mxu0 %v39937_v32  ;;  %23621 = vmatmul.mubr.f32.gmra.mrb[4].mxu1 %v39938_v55  ;;  %v39956_v32 = vand.u32 4294901760, %v35604_v62  ;;  %v39964_v62 = vand.u32 4294901760, %v39963_v40 }
 0x65b   : > { %25780 = vmatprep.mubr.f32.mxu0 %v39939_v30  ;;  %27653 = vmatpush3.bf16.msra.mxu0 %v27650_v33  ;;  %v39946_v33 = vand.u32 4294901760, %v35560_v35  ;;  %v9064_v60 = vand.u32 4294901760, %v9063_v38  ;;  %v39954_v35 = vand.u32 4294901760, %v39953_v3  ;;  %v39957_v30 = vld [vmem:[#allocation240_spill] sm:$0xff] }
 0x65c   : > { %23623 = vmatprep.mubr.f32.mxu1 %v39944_v34  ;;  %26791 = vmatprep.subr.bf16.mxu1 %v26790_v45  ;;  %v27662_v55 = vpack.c.bf16 %v39956_v32, %v39955_v26  ;;  %v39975_v26 = vld [vmem:[#allocation87_spill] sm:$0xff]  ;;  %v39976_v32 = vld [vmem:[#allocation101_spill] sm:$0xff] }
 0x65d   : > { %27655 = vmatprep.subr.bf16.mxu0 %v27654_v14  ;;  %26793 = vmatpush3.bf16.msra.mxu1 %v26790_v45  ;;  %v27658_v48 = vpack.c.bf16 %v39946_v33, %v39945_v20  ;;  %v39952_v45 = vand.u32 4294901760, %v39951_v39  ;;  %v9077_v25 = vsub.f32 %v39953_v3, %v39954_v35  ;;  %v26802_v13 = vpack.c.bf16 %v9064_v60, %v9057_v23  ;;  %v39970_v23 = vld [vmem:[#allocation85_spill] sm:$0xff]  ;;  %v39973_v35 = vld [vmem:[#allocation248_spill] sm:$0xff] }
 0x65e   : > { %25781 = vmatmul.mubr.f32.gmra.mrb[4].mxu0 %v39947_v1  ;;  %23624 = vmatmul.mubr.f32.gmra.mrb[6].mxu1 %v39948_v19  ;;  %v9091_v20 = vsub.f32 %v39963_v40, %v39964_v62  ;;  %v39965_v33 = vand.u32 4294901760, %v35622_v42  ;;  %v39966_v1 = vand.u32 4294901760, %v35627_v54  ;;  %v39971_v42 = vand.u32 4294901760, %v35644_v18  ;;  %v39988_v62 = vld [vmem:[#allocation123_spill] sm:$0xff] }
 0x65f   : > { %25783 = vmatprep.mubr.f32.mxu0 %v39949_v51  ;;  %23626 = vmatprep.mubr.f32.mxu1 %v39950_v43  ;;  %v9070_v50 = vsub.f32 %v39951_v39, %v39952_v45  ;;  %v9078_v34 = vand.u32 4294901760, %v9077_v25  ;;  %v39967_v51 = vld [vmem:[#allocation243_spill] sm:$0xff]  ;;  %v39969_v43 = vld [vmem:[#allocation245_spill] sm:$0xff]  ;;  %v39972_v54 = vand.u32 4294901760, %v35649_v2  ;;  %v39974_v25 = vld [vmem:[#allocation90_spill] sm:$0xff]  ;;  %v39978_v18 = vand.u32 4294901760, %v35743_v61 }
 0x660   : > { %27657 = vmatpush3.bf16.msra.mxu0 %v27654_v14  ;;  %26795 = vmatprep.subr.bf16.mxu1 %v26794_v53  ;;  %v39958_v14 = vld [vmem:[#allocation70_spill] sm:$0xff]  ;;  %v27666_v19 = vpack.c.bf16 %v39966_v1, %v39965_v33  ;;  %v39979_v2 = vld [vmem:[#allocation257_spill] sm:$0xff]  ;;  %v39985_v61 = vld [vmem:[#allocation267_spill] sm:$0xff] }
 0x661   : > { %27659 = vmatprep.subr.bf16.mxu0 %v27658_v48  ;;  %26797 = vmatpush3.bf16.msra.mxu1 %v26794_v53  ;;  %v9071_v38 = vand.u32 4294901760, %v9070_v50  ;;  %v39962_v53 = vand.u32 4294901760, %v39961_v16  ;;  %v9092_v50 = vand.u32 4294901760, %v9091_v20  ;;  %v39989_v20 = vld [vmem:[#allocation271_spill] sm:$0xff]  ;;  %v39992_v33 = vld [vmem:[#allocation130_spill] sm:$0xff] }
 0x662   : > { %25784 = vmatmul.mubr.f32.gmra.mrb[6].mxu0 %v39957_v30  ;;  %23627 = vmatmul.mubr.f32.gmra.mrb[8].mxu1 %v39958_v14  ;;  %v39977_v30 = vand.u32 4294901760, %v35738_v21  ;;  %v39984_v21 = vld [vmem:[#allocation110_spill] sm:$0xff]  ;;  %v39993_v1 = vld [vmem:[#allocation275_spill] sm:$0xff] }
 0x663   : > { %25786 = vmatprep.mubr.f32.mxu0 %v39959_v5  ;;  %23629 = vmatprep.mubr.f32.mxu1 %v39960_v31  ;;  %v9084_v49 = vsub.f32 %v39961_v16, %v39962_v53  ;;  %v26806_v60 = vpack.c.bf16 %v9078_v34, %v9071_v38  ;;  %v39980_v5 = vld [vmem:[#allocation103_spill] sm:$0xff]  ;;  %v39981_v31 = vld [vmem:[#allocation261_spill] sm:$0xff]  ;;  %v26814_v38 = vpack.c.bf16 %v39883_v29, %v39881_v9  ;;  %v39983_v34 = vld [vmem:[#allocation128_spill] sm:$0xff] }
 0x664   : > { %27661 = vmatpush3.bf16.msra.mxu0 %v27658_v48  ;;  %26799 = vmatprep.subr.bf16.mxu1 %v26798_v28  ;;  %v39968_v48 = vld [vmem:[#allocation83_spill] sm:$0xff]  ;;  %v27674_v14 = vpack.c.bf16 %v39978_v18, %v39977_v30  ;;  %v39986_v53 = vld [vmem:[#allocation121_spill] sm:$0xff]  ;;  %v39991_v29 = vld [vmem:[#allocation274_spill] sm:$0xff] }
 0x665   : > { %27663 = vmatprep.subr.bf16.mxu0 %v27662_v55  ;;  %26801 = vmatpush3.bf16.msra.mxu1 %v26798_v28  ;;  %v9085_v45 = vand.u32 4294901760, %v9084_v49  ;;  %v27670_v28 = vpack.c.bf16 %v39972_v54, %v39971_v42  ;;  %v39987_v49 = vld [vmem:[#allocation268_spill] sm:$0xff]  ;;  %v39990_v9 = vld [vmem:[#allocation125_spill] sm:$0xff] }
 0x666   : > { %25787 = vmatmul.mubr.f32.gmra.mrb[8].mxu0 %v39967_v51  ;;  %23630 = vmatmul.mubr.f32.gmra.mrb[10].mxu1 %v39968_v48  ;;  %v39995_v51 = vld [vmem:[#allocation281_spill] sm:$0xff]  ;;  %v39996_v48 = vld [vmem:[#allocation143_spill] sm:$0xff] }
 0x667   : > { %25789 = vmatprep.mubr.f32.mxu0 %v39969_v43  ;;  %23632 = vmatprep.mubr.f32.mxu1 %v39970_v23  ;;  %v39997_v43 = vld [vmem:[#allocation283_spill] sm:$0xff]  ;;  %v39998_v23 = vld [vmem:[#allocation145_spill] sm:$0xff] }
 0x668   : > { %27665 = vmatpush3.bf16.msra.mxu0 %v27662_v55  ;;  %26803 = vmatprep.subr.bf16.mxu1 %v26802_v13  ;;  %v26810_v55 = vpack.c.bf16 %v9092_v50, %v9085_v45  ;;  %v40000_v45 = vld [vmem:[#allocation150_spill] sm:$0xff]  ;;  %v40001_v50 = vld [vmem:[#allocation293_spill] sm:$0xff] }
 0x669   : > { %27667 = vmatprep.subr.bf16.mxu0 %v27666_v19  ;;  %26805 = vmatpush3.bf16.msra.mxu1 %v26802_v13  ;;  %v39982_v13 = vld [vmem:[#allocation105_spill] sm:$0xff] }
 0x66a   : > { %25790 = vmatmul.mubr.f32.gmra.mrb[10].mxu0 %v39973_v35  ;;  %23633 = vmatmul.mubr.f32.gmra.mrb[12].mxu1 %v39974_v25  ;;  %v40002_v42 = vld [vmem:[#allocation161_spill] sm:$0xff] }
 0x66b   : > { %25792 = vmatprep.mubr.f32.mxu0 %v39975_v26  ;;  %23635 = vmatprep.mubr.f32.mxu1 %v39976_v32  ;;  %v40003_v54 = vld [vmem:[#allocation297_spill] sm:$0xff]  ;;  %v40007_v26 = vld [vmem:[#allocation304_spill] sm:$0xff]  ;;  %v40008_v32 = vld [vmem:[#allocation167_spill] sm:$0xff] }
 0x66c   : > { %27669 = vmatpush3.bf16.msra.mxu0 %v27666_v19  ;;  %26807 = vmatprep.subr.bf16.mxu1 %v26806_v60  ;;  %v39994_v19 = vld [vmem:[#allocation141_spill] sm:$0xff] }
 0x66d   : > { %27671 = vmatprep.subr.bf16.mxu0 %v27670_v28  ;;  %26809 = vmatpush3.bf16.msra.mxu1 %v26806_v60  ;;  %v39999_v60 = vld [vmem:[#allocation290_spill] sm:$0xff]  ;;  %v40005_v35 = vld [vmem:[#allocation301_spill] sm:$0xff] }
 0x66e   : > { %25793 = vmatmul.mubr.f32.gmra.mrb[12].mxu0 %v39979_v2  ;;  %23636 = vmatmul.mubr.f32.gmra.mrb[14].mxu1 %v39980_v5  ;;  %v40006_v25 = vld [vmem:[#allocation165_spill] sm:$0xff]  ;;  %v40013_v2 = vand.u32 4294901760, %v35823_v37  ;;  %v40014_v5 = vld [vmem:[#allocation16_spill] sm:$0xff] }
 0x66f   : > { %25795 = vmatprep.mubr.f32.mxu0 %v39981_v31  ;;  %23638 = vmatprep.mubr.f32.mxu1 %v39982_v13  ;;  %v40010_v30 = vld [vmem:[#allocation437_spill] sm:$0xff]  ;;  %v26818_v31 = vpack.c.bf16 %v39908_v6, %v39906_v47  ;;  %v40015_v13 = vand.u32 4294901760, %v35828_v52  ;;  %v40020_v47 = vld [vmem:[#allocation35_spill] sm:$0xff]  ;;  %v26822_v52 = vpack.c.bf16 %v39916_v24, %v39914_v44  ;;  %v40021_v6 = vld [vmem:[#allocation202_spill] sm:$0xff] }
 0x670   : > { %27673 = vmatpush3.bf16.msra.mxu0 %v27670_v28  ;;  %26811 = vmatprep.subr.bf16.mxu1 %v26810_v55  ;;  %v40004_v28 = vld [vmem:[#allocation163_spill] sm:$0xff]  ;;  %v40011_v18 = vld [vmem:[#allocation309_spill] sm:$0xff]  ;;  %v40026_v44 = vld [vmem:[#allocation52_spill] sm:$0xff] }
 0x671   : > { %27675 = vmatprep.subr.bf16.mxu0 %v27674_v14  ;;  %26813 = vmatpush3.bf16.msra.mxu1 %v26810_v55  ;;  %v40009_v55 = vld [vmem:[#allocation307_spill] sm:$0xff]  ;;  %v40018_v37 = vld [vmem:[#allocation33_spill] sm:$0xff] }
 0x672   : > { %25796 = vmatmul.mubr.f32.gmra.mrb[14].mxu0 %v39983_v34  ;;  %23639 = vmatmul.mubr.f32.gmra.mrb[16].mxu1 %v39984_v21  ;;  %v40016_v34 = vld [vmem:[#allocation23_spill] sm:$0xff]  ;;  %v40017_v21 = vld [vmem:[#allocation29_spill] sm:$0xff] }
 0x673   : > { %25798 = vmatprep.mubr.f32.mxu0 %v39985_v61  ;;  %23641 = vmatprep.mubr.f32.mxu1 %v39986_v53  ;;  %v40019_v61 = vld [vmem:[#allocation195_spill] sm:$0xff]  ;;  %v40023_v53 = vld [vmem:[#allocation212_spill] sm:$0xff] }
 0x674   : > { %27677 = vmatpush3.bf16.msra.mxu0 %v27674_v14  ;;  %26815 = vmatprep.subr.bf16.mxu1 %v26814_v38  ;;  %v40012_v14 = vld [vmem:[#allocation325_spill] sm:$0xff]  ;;  %v40027_v24 = vld [vmem:[#allocation215_spill] sm:$0xff] }
 0x675   : > { %27679 = vmatprep.subr.bf16.mxu0 %v39835_v0 }
 0x676   : > { %25799 = vmatmul.mubr.f32.gmra.mrb[16].mxu0 %v39987_v49  ;;  %23642 = vmatmul.mubr.f32.gmra.mrb[18].mxu1 %v39988_v62  ;;  %v40024_v49 = vld [vmem:[#allocation48_spill] sm:$0xff]  ;;  %v40025_v62 = vld [vmem:[#allocation214_spill] sm:$0xff] }
 0x677   : > { %25801 = vmatprep.mubr.f32.mxu0 %v39989_v20  ;;  %23644 = vmatprep.mubr.f32.mxu1 %v39990_v9  ;;  %v40028_v20 = vld [vmem:[#allocation53_spill] sm:$0xff]  ;;  %v40031_v9 = vld [vmem:[#allocation226_spill] sm:$0xff] }
 0x67a   : > { %25802 = vmatmul.mubr.f32.gmra.mrb[18].mxu0 %v39991_v29  ;;  %23645 = vmatmul.mubr.f32.gmra.mrb[20].mxu1 %v39992_v33  ;;  %v40032_v29 = vld [vmem:[#allocation67_spill] sm:$0xff]  ;;  %v40035_v33 = vld [vmem:[#allocation230_spill] sm:$0xff] }
 0x67b   : > { %25804 = vmatprep.mubr.f32.mxu0 %v39993_v1  ;;  %23647 = vmatprep.mubr.f32.mxu1 %v39994_v19  ;;  %v40036_v1 = vld [vmem:[#allocation72_spill] sm:$0xff]  ;;  %v40039_v19 = vld [vmem:[#allocation249_spill] sm:$0xff] }
 0x67e   : > { %25805 = vmatmul.mubr.f32.gmra.mrb[20].mxu0 %v39995_v51  ;;  %23648 = vmatmul.mubr.f32.gmra.mrb[22].mxu1 %v39996_v48  ;;  %v40040_v51 = vld [vmem:[#allocation86_spill] sm:$0xff]  ;;  %v40043_v48 = vld [vmem:[#allocation255_spill] sm:$0xff] }
 0x67f   : > { %25807 = vmatprep.mubr.f32.mxu0 %v39997_v43  ;;  %23650 = vmatprep.mubr.f32.mxu1 %v39998_v23  ;;  %v40044_v43 = vld [vmem:[#allocation92_spill] sm:$0xff]  ;;  %v40048_v23 = vld [vmem:[#allocation106_spill] sm:$0xff] }
 0x682   : > { %25808 = vmatmul.mubr.f32.gmra.mrb[22].mxu0 %v39999_v60  ;;  %23651 = vmatmul.mubr.f32.gmra.mrb[24].mxu1 %v40000_v45  ;;  %v40049_v60 = vld [vmem:[#allocation260_spill] sm:$0xff]  ;;  %v40050_v45 = vld [vmem:[#allocation111_spill] sm:$0xff] }
 0x683   : > { %25810 = vmatprep.mubr.f32.mxu0 %v40001_v50  ;;  %23653 = vmatprep.mubr.f32.mxu1 %v40002_v42  ;;  %v40051_v50 = vld [vmem:[#allocation108_spill] sm:$0xff]  ;;  %v40053_v42 = vld [vmem:[#allocation265_spill] sm:$0xff] }
 0x686   : > { %25811 = vmatmul.mubr.f32.gmra.mrb[24].mxu0 %v40003_v54  ;;  %23654 = vmatmul.mubr.f32.gmra.mrb[26].mxu1 %v40004_v28  ;;  %v40054_v54 = vld [vmem:[#allocation119_spill] sm:$0xff] }
 0x687   : > { %25813 = vmatprep.mubr.f32.mxu0 %v40005_v35  ;;  %23656 = vmatprep.mubr.f32.mxu1 %v40006_v25  ;;  %v40055_v28 = vld [vmem:[#allocation127_spill] sm:$0xff]  ;;  %v40056_v35 = vld [vmem:[#allocation126_spill] sm:$0xff]  ;;  %v40057_v25 = vld [vmem:[#allocation269_spill] sm:$0xff] }
 0x68a   : > { %25814 = vmatmul.mubr.f32.gmra.mrb[26].mxu0 %v40007_v26  ;;  %23657 = vmatmul.mubr.f32.gmra.mrb[28].mxu1 %v40008_v32  ;;  %v40058_v26 = vld [vmem:[#allocation131_spill] sm:$0xff]  ;;  %v40060_v32 = vld [vmem:[#allocation132_spill] sm:$0xff] }
 0x68b   : > { %25816 = vmatprep.mubr.f32.mxu0 %v40009_v55  ;;  %23659 = vmatprep.mubr.f32.mxu1 %v40010_v30  ;;  %v40061_v55 = vld [vmem:[#allocation278_spill] sm:$0xff]  ;;  %v40062_v30 = vld [vmem:[#allocation139_spill] sm:$0xff] }
 0x68e   : > { %25817 = vmatmul.mubr.f32.gmra.mrb[28].mxu0 %v40011_v18  ;;  %23660 = vmatmul.mubr.f32.gmra.mrb[30].mxu1 %v40012_v14  ;;  %v40063_v18 = vld [vmem:[#allocation280_spill] sm:$0xff]  ;;  %v40064_v14 = vld [vmem:[#allocation146_spill] sm:$0xff] }
 0x68f   : > { %25819 = vmatprep.mubr.f32.mxu0 %v40013_v2  ;;  %23694 = vmatprep.mubr.f32.mxu1 %v40014_v5  ;;  %v40065_v2 = vld [vmem:[#allocation151_spill] sm:$0xff] }
 0x690   : > { %v40066_v5 = vld [vmem:[#allocation287_spill] sm:$0xff] }
 0x692   : > { %25820 = vmatmul.mubr.f32.gmra.mrb[30].mxu0 %v40015_v13  ;;  %23695 = vmatmul.mubr.f32.vlgmr.msra.gmra.mrb[0].mxu1 %v40016_v34  ;;  %v40068_v13 = vld [vmem:[#allocation292_spill] sm:$0xff]  ;;  %v40069_v34 = vld [vmem:[#allocation159_spill] sm:$0xff] }
 0x693   : > { %25854 = vmatprep.mubr.f32.mxu0 %v39797_v11  ;;  %26817 = vmatpush3.bf16.msra.mxu1 %v26814_v38  ;;  %v40022_v38 = vld [vmem:[#allocation41_spill] sm:$0xff] }
 0x694   : > { %23697 = vmatprep.mubr.f32.mxu1 %v40017_v21  ;;  %26819 = vmatprep.subr.bf16.mxu1 %v26818_v31  ;;  %v40070_v21 = vld [vmem:[#allocation295_spill] sm:$0xff] }
 0x696   : > { %25855 = vmatmul.mubr.f32.vlgmr.msra.gmra.mrb[0].mxu0 %v39800_v27  ;;  %23698 = vmatmul.mubr.f32.gmra.mrb[2].mxu1 %v40018_v37  ;;  %v40071_v37 = vld [vmem:[#allocation166_spill] sm:$0xff] }
 0x697   : > { %27681 = vmatpush3.bf16.msra.mxu0 %v39835_v0  ;;  %25857 = vmatprep.mubr.f32.mxu0 %v40019_v61  ;;  %v26826_v0 = vpack.c.bf16 %v39925_v17, %v39923_v15  ;;  %v40029_v15 = vld [vmem:[#allocation223_spill] sm:$0xff]  ;;  %v40030_v17 = vld [vmem:[#allocation60_spill] sm:$0xff] }
 0x698   : > { %23700 = vmatprep.mubr.f32.mxu1 %v40020_v47  ;;  %27683 = vmatprep.subr.bf16.mxu0 %v39866_v8  ;;  %v40072_v47 = vld [vmem:[#allocation168_spill] sm:$0xff] }
 0x699   : > { %26821 = vmatpush3.bf16.msra.mxu1 %v26818_v31  ;;  %v40067_v31 = vld [vmem:[#allocation152_spill] sm:$0xff] }
 0x69a   : > { %25858 = vmatmul.mubr.f32.gmra.mrb[2].mxu0 %v40021_v6  ;;  %23701 = vmatmul.mubr.f32.gmra.mrb[4].mxu1 %v40022_v38  ;;  %v40074_v38 = vld [vmem:[#allocation19_spill] sm:$0xff] }
 0x69b   : > { %25860 = vmatprep.mubr.f32.mxu0 %v40023_v53  ;;  %27685 = vmatpush3.bf16.msra.mxu0 %v39866_v8  ;;  %v26830_v8 = vpack.c.bf16 %v39933_v36, %v39931_v4  ;;  %v40033_v4 = vld [vmem:[#allocation228_spill] sm:$0xff]  ;;  %v40034_v36 = vld [vmem:[#allocation71_spill] sm:$0xff] }
 0x69c   : > { %23703 = vmatprep.mubr.f32.mxu1 %v40024_v49  ;;  %26823 = vmatprep.subr.bf16.mxu1 %v26822_v52  ;;  %v40075_v49 = vld [vmem:[#allocation25_spill] sm:$0xff] }
 0x69d   : > { %27687 = vmatprep.subr.bf16.mxu0 %v39870_v58  ;;  %26825 = vmatpush3.bf16.msra.mxu1 %v26822_v52  ;;  %v40073_v52 = vld [vmem:[#allocation197_spill] sm:$0xff] }
 0x69e   : > { %25861 = vmatmul.mubr.f32.gmra.mrb[4].mxu0 %v40025_v62  ;;  %23704 = vmatmul.mubr.f32.gmra.mrb[6].mxu1 %v40026_v44  ;;  %v40077_v44 = vld [vmem:[#allocation36_spill] sm:$0xff] }
 0x69f   : > { %25863 = vmatprep.mubr.f32.mxu0 %v40027_v24  ;;  %23706 = vmatprep.mubr.f32.mxu1 %v40028_v20  ;;  %v40078_v20 = vld [vmem:[#allocation39_spill] sm:$0xff] }
 0x6a0   : > { %27689 = vmatpush3.bf16.msra.mxu0 %v39870_v58  ;;  %26827 = vmatprep.subr.bf16.mxu1 %v26826_v0  ;;  %v26834_v58 = vpack.c.bf16 %v39942_v57, %v39940_v41  ;;  %v40037_v41 = vld [vmem:[#allocation238_spill] sm:$0xff]  ;;  %v40038_v57 = vld [vmem:[#allocation79_spill] sm:$0xff] }
 0x6a1   : > { %27691 = vmatprep.subr.bf16.mxu0 %v35442_v12  ;;  %26829 = vmatpush3.bf16.msra.mxu1 %v26826_v0  ;;  %v40076_v0 = vld [vmem:[#allocation32_spill] sm:$0xff] }
 0x6a2   : > { %25864 = vmatmul.mubr.f32.gmra.mrb[6].mxu0 %v40029_v15  ;;  %23707 = vmatmul.mubr.f32.gmra.mrb[8].mxu1 %v40030_v17  ;;  %v40080_v17 = vld [vmem:[#allocation50_spill] sm:$0xff] }
 0x6a3   : > { %25866 = vmatprep.mubr.f32.mxu0 %v40031_v9  ;;  %23709 = vmatprep.mubr.f32.mxu1 %v40032_v29  ;;  %v40090_v29 = vld [vmem:[#allocation97_spill] sm:$0xff] }
 0x6a4   : > { %27693 = vmatpush3.bf16.msra.mxu0 %v35442_v12  ;;  %26831 = vmatprep.subr.bf16.mxu1 %v26830_v8  ;;  %v26838_v12 = vpack.c.bf16 %v39953_v3, %v39951_v39  ;;  %v40041_v39 = vld [vmem:[#allocation253_spill] sm:$0xff]  ;;  %v40042_v3 = vld [vmem:[#allocation91_spill] sm:$0xff] }
 0x6a5   : > { %27695 = vmatprep.subr.bf16.mxu0 %v39877_v63  ;;  %26833 = vmatpush3.bf16.msra.mxu1 %v26830_v8  ;;  %v40079_v8 = vld [vmem:[#allocation43_spill] sm:$0xff] }
 0x6a6   : > { %25867 = vmatmul.mubr.f32.gmra.mrb[8].mxu0 %v40033_v4  ;;  %23710 = vmatmul.mubr.f32.gmra.mrb[10].mxu1 %v40034_v36  ;;  %v40093_v36 = vld [vmem:[#allocation114_spill] sm:$0xff] }
 0x6a7   : > { %25869 = vmatprep.mubr.f32.mxu0 %v40035_v33  ;;  %23712 = vmatprep.mubr.f32.mxu1 %v40036_v1  ;;  %v40095_v1 = vld [vmem:[#allocation122_spill] sm:$0xff] }
 0x6a8   : > { %27697 = vmatpush3.bf16.msra.mxu0 %v39877_v63  ;;  %26835 = vmatprep.subr.bf16.mxu1 %v26834_v58  ;;  %v26842_v63 = vpack.c.bf16 %v39963_v40, %v39961_v16  ;;  %v40046_v16 = vld [vmem:[#allocation99_spill] sm:$0xff] }
 0x6a9   : > { %27699 = vmatprep.subr.bf16.mxu0 %v35506_v22  ;;  %26837 = vmatpush3.bf16.msra.mxu1 %v26834_v58  ;;  %v40047_v40 = vld [vmem:[#allocation259_spill] sm:$0xff]  ;;  %v40091_v58 = vld [vmem:[#allocation102_spill] sm:$0xff] }
 0x6aa   : > { %25870 = vmatmul.mubr.f32.gmra.mrb[10].mxu0 %v40037_v41  ;;  %23713 = vmatmul.mubr.f32.gmra.mrb[12].mxu1 %v40038_v57  ;;  %v40098_v57 = vld [vmem:[#allocation137_spill] sm:$0xff] }
 0x6ab   : > { %25872 = vmatprep.mubr.f32.mxu0 %v40039_v19  ;;  %23715 = vmatprep.mubr.f32.mxu1 %v40040_v51  ;;  %v40100_v51 = vld [vmem:[#allocation149_spill] sm:$0xff] }
 0x6ac   : > { %27701 = vmatpush3.bf16.msra.mxu0 %v35506_v22  ;;  %26839 = vmatprep.subr.bf16.mxu1 %v26838_v12  ;;  %v40045_v22 = vld [vmem:[#allocation256_spill] sm:$0xff] }
 0x6ad   : > { %27703 = vmatprep.subr.bf16.mxu0 %v35534_v7  ;;  %26841 = vmatpush3.bf16.msra.mxu1 %v26838_v12  ;;  %v40096_v12 = vld [vmem:[#allocation129_spill] sm:$0xff] }
 0x6ae   : > { %25873 = vmatmul.mubr.f32.gmra.mrb[12].mxu0 %v40041_v39  ;;  %23716 = vmatmul.mubr.f32.gmra.mrb[14].mxu1 %v40042_v3  ;;  %v40103_v3 = vld [vmem:[#allocation162_spill] sm:$0xff] }
 0x6af   : > { %25875 = vmatprep.mubr.f32.mxu0 %v40043_v48  ;;  %23718 = vmatprep.mubr.f32.mxu1 %v40044_v43  ;;  %v40105_v43 = vld [vmem:[#allocation170_spill] sm:$0xff] }
 0x6b0   : > { %27705 = vmatpush3.bf16.msra.mxu0 %v35534_v7  ;;  %26843 = vmatprep.subr.bf16.mxu1 %v26842_v63  ;;  %v40052_v7 = vld [vmem:[#allocation112_spill] sm:$0xff] }
 0x6b1   : > { %27707 = vmatprep.subr.bf16.mxu0 %v35568_v59  ;;  %26845 = vmatpush3.bf16.msra.mxu1 %v26842_v63  ;;  %v40101_v63 = vld [vmem:[#allocation154_spill] sm:$0xff] }
 0x6b2   : > { %25876 = vmatmul.mubr.f32.gmra.mrb[14].mxu0 %v40045_v22  ;;  %23719 = vmatmul.mubr.f32.gmra.mrb[16].mxu1 %v40046_v16 }
 0x6b3   : > { %25878 = vmatprep.mubr.f32.mxu0 %v40047_v40  ;;  %23721 = vmatprep.mubr.f32.mxu1 %v40048_v23  ;;  %v36349_v23 = vld [vmem:[%s36499_s2] ss:$0 sm:$0xff] }
 0x6b4   : > { %27709 = vmatpush3.bf16.msra.mxu0 %v35568_v59  ;;  %v40059_v59 = vld [vmem:[#allocation272_spill] sm:$0xff] }
 0x6b6   : > { %25879 = vmatmul.mubr.f32.gmra.mrb[16].mxu0 %v40049_v60  ;;  %23722 = vmatmul.mubr.f32.gmra.mrb[18].mxu1 %v40050_v45 }
 0x6b7   : > { %25881 = vmatprep.mubr.f32.mxu0 %v40051_v50  ;;  %23724 = vmatprep.mubr.f32.mxu1 %v40052_v7 }
 0x6ba   : > { %25882 = vmatmul.mubr.f32.gmra.mrb[18].mxu0 %v40053_v42  ;;  %23725 = vmatmul.mubr.f32.gmra.mrb[20].mxu1 %v40054_v54 }
 0x6bb   : > { %25884 = vmatprep.mubr.f32.mxu0 %v40055_v28  ;;  %23727 = vmatprep.mubr.f32.mxu1 %v40056_v35 }
 0x6be   : > { %25885 = vmatmul.mubr.f32.gmra.mrb[20].mxu0 %v40057_v25  ;;  %23728 = vmatmul.mubr.f32.gmra.mrb[22].mxu1 %v40058_v26 }
 0x6bf   : > { %25887 = vmatprep.mubr.f32.mxu0 %v40059_v59  ;;  %23730 = vmatprep.mubr.f32.mxu1 %v40060_v32 }
 0x6c2   : > { %25888 = vmatmul.mubr.f32.gmra.mrb[22].mxu0 %v40061_v55  ;;  %23731 = vmatmul.mubr.f32.gmra.mrb[24].mxu1 %v40062_v30 }
 0x6c3   : > { %25890 = vmatprep.mubr.f32.mxu0 %v40063_v18  ;;  %23733 = vmatprep.mubr.f32.mxu1 %v40064_v14 }
 0x6c6   : > { %25891 = vmatmul.mubr.f32.gmra.mrb[24].mxu0 %v39852_v10  ;;  %23734 = vmatmul.mubr.f32.gmra.mrb[26].mxu1 %v40065_v2 }
 0x6c7   : > { %25893 = vmatprep.mubr.f32.mxu0 %v40066_v5  ;;  %23736 = vmatprep.mubr.f32.mxu1 %v40067_v31 }
 0x6ca   : > { %25894 = vmatmul.mubr.f32.gmra.mrb[26].mxu0 %v40068_v13  ;;  %23737 = vmatmul.mubr.f32.gmra.mrb[28].mxu1 %v40069_v34 }
 0x6cb   : > { %25896 = vmatprep.mubr.f32.mxu0 %v40070_v21  ;;  %23739 = vmatprep.mubr.f32.mxu1 %v40071_v37 }
 0x6ce   : > { %25897 = vmatmul.mubr.f32.gmra.mrb[28].mxu0 %v39860_v56  ;;  %23740 = vmatmul.mubr.f32.gmra.mrb[30].mxu1 %v40072_v47 }
 0x6cf   : > { %25899 = vmatprep.mubr.f32.mxu0 %v40073_v52  ;;  %23774 = vmatprep.mubr.f32.mxu1 %v40074_v38 }
 0x6d2   : > { %25900 = vmatmul.mubr.f32.gmra.mrb[30].mxu0 %v35818_v46  ;;  %23775 = vmatmul.mubr.f32.vlgmr.msra.gmra.mrb[0].mxu1 %v40075_v49 }
 0x6d3   : > { %25934 = vmatprep.mubr.f32.mxu0 %v39797_v11  ;;  %23777 = vmatprep.mubr.f32.mxu1 %v40076_v0  ;;  %v40081_v11 = vld [vmem:[#allocation55_spill] sm:$0xff] }
 0x6d6   : > { %25935 = vmatmul.mubr.f32.vlgmr.msra.gmra.mrb[0].mxu0 %v39800_v27  ;;  %23778 = vmatmul.mubr.f32.gmra.mrb[2].mxu1 %v40077_v44  ;;  %v40082_v27 = vld [vmem:[#allocation58_spill] sm:$0xff] }
 0x6d7   : > { %25937 = vmatprep.mubr.f32.mxu0 %v40019_v61  ;;  %23780 = vmatprep.mubr.f32.mxu1 %v40078_v20  ;;  %v40083_v61 = vld [vmem:[#allocation63_spill] sm:$0xff] }
 0x6da   : > { %25938 = vmatmul.mubr.f32.gmra.mrb[2].mxu0 %v40021_v6  ;;  %23781 = vmatmul.mubr.f32.gmra.mrb[4].mxu1 %v40079_v8  ;;  %v40084_v6 = vld [vmem:[#allocation69_spill] sm:$0xff] }
 0x6db   : > { %25940 = vmatprep.mubr.f32.mxu0 %v40023_v53  ;;  %23783 = vmatprep.mubr.f32.mxu1 %v40080_v17  ;;  %v40085_v53 = vld [vmem:[#allocation74_spill] sm:$0xff] }
 0x6de   : > { %25941 = vmatmul.mubr.f32.gmra.mrb[4].mxu0 %v40025_v62  ;;  %23784 = vmatmul.mubr.f32.gmra.mrb[6].mxu1 %v40081_v11  ;;  %v40086_v62 = vld [vmem:[#allocation77_spill] sm:$0xff] }
 0x6df   : > { %25943 = vmatprep.mubr.f32.mxu0 %v40027_v24  ;;  %23786 = vmatprep.mubr.f32.mxu1 %v40082_v27  ;;  %v40087_v24 = vld [vmem:[#allocation82_spill] sm:$0xff] }
 0x6e2   : > { %25944 = vmatmul.mubr.f32.gmra.mrb[6].mxu0 %v40029_v15  ;;  %23787 = vmatmul.mubr.f32.gmra.mrb[8].mxu1 %v40083_v61  ;;  %v40088_v15 = vld [vmem:[#allocation89_spill] sm:$0xff] }
 0x6e3   : > { %25946 = vmatprep.mubr.f32.mxu0 %v40031_v9  ;;  %23789 = vmatprep.mubr.f32.mxu1 %v40084_v6  ;;  %v40089_v9 = vld [vmem:[#allocation94_spill] sm:$0xff] }
 0x6e6   : > { %25947 = vmatmul.mubr.f32.gmra.mrb[8].mxu0 %v40033_v4  ;;  %23790 = vmatmul.mubr.f32.gmra.mrb[10].mxu1 %v40085_v53  ;;  %v40092_v4 = vld [vmem:[#allocation109_spill] sm:$0xff] }
 0x6e7   : > { %25949 = vmatprep.mubr.f32.mxu0 %v40035_v33  ;;  %23792 = vmatprep.mubr.f32.mxu1 %v40086_v62  ;;  %v40094_v33 = vld [vmem:[#allocation117_spill] sm:$0xff] }
 0x6ea   : > { %25950 = vmatmul.mubr.f32.gmra.mrb[10].mxu0 %v40037_v41  ;;  %23793 = vmatmul.mubr.f32.gmra.mrb[12].mxu1 %v40087_v24  ;;  %v40097_v41 = vld [vmem:[#allocation134_spill] sm:$0xff] }
 0x6eb   : > { %25952 = vmatprep.mubr.f32.mxu0 %v40039_v19  ;;  %23795 = vmatprep.mubr.f32.mxu1 %v40088_v15  ;;  %v40099_v19 = vld [vmem:[#allocation142_spill] sm:$0xff] }
 0x6ee   : > { %25953 = vmatmul.mubr.f32.gmra.mrb[12].mxu0 %v40041_v39  ;;  %23796 = vmatmul.mubr.f32.gmra.mrb[14].mxu1 %v40089_v9  ;;  %v40102_v39 = vld [vmem:[#allocation157_spill] sm:$0xff] }
 0x6ef   : > { %25955 = vmatprep.mubr.f32.mxu0 %v40043_v48  ;;  %23798 = vmatprep.mubr.f32.mxu1 %v40090_v29  ;;  %v40104_v48 = vld [vmem:[#allocation169_spill] sm:$0xff] }
 0x6f2   : > { %25956 = vmatmul.mubr.f32.gmra.mrb[14].mxu0 %v40045_v22  ;;  %23799 = vmatmul.mubr.f32.gmra.mrb[16].mxu1 %v40091_v58  ;;  %v18742_v22 = vlaneseq }
 0x6f3   : > { %25958 = vmatprep.mubr.f32.mxu0 %v40047_v40  ;;  %23801 = vmatprep.mubr.f32.mxu1 %v40092_v4 }
 0x6f6   : > { %25959 = vmatmul.mubr.f32.gmra.mrb[16].mxu0 %v40049_v60  ;;  %23802 = vmatmul.mubr.f32.gmra.mrb[18].mxu1 %v40093_v36  ;;  %v36351_v60 = vand.u32 127, %v18742_v22 }
 0x6f7   : > { %25961 = vmatprep.mubr.f32.mxu0 %v40051_v50  ;;  %23804 = vmatprep.mubr.f32.mxu1 %v40094_v33 }
 0x6f8   : > { %vm18744_vm2 = vcmp.ge.s32.totalorder %v36351_v60, 4 }
 0x6fa   : > { %25962 = vmatmul.mubr.f32.gmra.mrb[18].mxu0 %v40053_v42  ;;  %23805 = vmatmul.mubr.f32.gmra.mrb[20].mxu1 %v40095_v1 }
 0x6fb   : > { %25964 = vmatprep.mubr.f32.mxu0 %v40055_v28  ;;  %23807 = vmatprep.mubr.f32.mxu1 %v40096_v12 }
 0x6fe   : > { %25965 = vmatmul.mubr.f32.gmra.mrb[20].mxu0 %v40057_v25  ;;  %23808 = vmatmul.mubr.f32.gmra.mrb[22].mxu1 %v40097_v41 }
 0x6ff   : > { %25967 = vmatprep.mubr.f32.mxu0 %v40059_v59  ;;  %23810 = vmatprep.mubr.f32.mxu1 %v40098_v57 }
 0x702   : > { %25968 = vmatmul.mubr.f32.gmra.mrb[22].mxu0 %v40061_v55  ;;  %23811 = vmatmul.mubr.f32.gmra.mrb[24].mxu1 %v40099_v19 }
 0x703   : > { %25970 = vmatprep.mubr.f32.mxu0 %v40063_v18  ;;  %23813 = vmatprep.mubr.f32.mxu1 %v40100_v51 }
 0x706   : > { %25971 = vmatmul.mubr.f32.gmra.mrb[24].mxu0 %v39852_v10  ;;  %23814 = vmatmul.mubr.f32.gmra.mrb[26].mxu1 %v40101_v63 }
 0x707   : > { %25973 = vmatprep.mubr.f32.mxu0 %v40066_v5  ;;  %23816 = vmatprep.mubr.f32.mxu1 %v40102_v39 }
 0x70a   : > { %25974 = vmatmul.mubr.f32.gmra.mrb[26].mxu0 %v40068_v13  ;;  %23817 = vmatmul.mubr.f32.gmra.mrb[28].mxu1 %v40103_v3 }
 0x70b   : > { %25976 = vmatprep.mubr.f32.mxu0 %v40070_v21  ;;  %23819 = vmatprep.mubr.f32.mxu1 %v40104_v48 }
 0x70e   : > { %25977 = vmatmul.mubr.f32.gmra.mrb[28].mxu0 %v39860_v56  ;;  %23820 = vmatmul.mubr.f32.gmra.mrb[30].mxu1 %v40105_v43 }
 0x70f   : > { %25979 = vmatprep.mubr.f32.mxu0 %v40073_v52 }
 0x712   : > { %25980 = vmatmul.mubr.f32.gmra.mrb[30].mxu0 %v35818_v46 }
 0x7a5   : > { %v23776_v10 = vpop.f32.mrb[0].mxu1 }
 0x7a6   : > { %v9419_v16 = vpop.f32.mrb[1].mxu1 }
 0x7a9   : > { %v25936_v40 = vpop.f32.mrb[0].mxu0  ;;  %v23779_v45 = vpop.f32.mrb[2].mxu1 }
 0x7aa   : > { %v27710_v50 = vadd.f32 %v25936_v40, %v23776_v10  ;;  %v18481_v56 = vpop.f32.mrb[1].mxu0  ;;  %v9433_v7 = vpop.f32.mrb[3].mxu1 }
 0x7ab   : > { %v27711_v42 = vadd.f32 %v18481_v56, %v9419_v16 }
 0x7ac   : > { %v18711_v54 = vadd.f32 %v27710_v50, %v36349_v23 }
 0x7ad   : > { %v18710_v46 = vadd.f32 %v27711_v42, %v36349_v23  ;;  %v25939_v28 = vpop.f32.mrb[2].mxu0  ;;  %v23782_v35 = vpop.f32.mrb[4].mxu1 }
 0x7ae   : > { %v18746_v25 = vmax.f32 %v18711_v54, 0.0  ;;  %v27712_v26 = vadd.f32 %v25939_v28, %v23779_v45  ;;  %v18493_v59 = vpop.f32.mrb[3].mxu0  ;;  %v9447_v32 = vpop.f32.mrb[5].mxu1 }
 0x7af   : > { %v18745_v55 = vmax.f32 %v18710_v46, 0.0  ;;  %v27713_v30 = vadd.f32 %v18493_v59, %v9433_v7 }
 0x7b0   : > { %v18778_v18 = vsel %vm18744_vm2, %v18746_v25, %v18711_v54  ;;  %v18713_v14 = vadd.f32 %v27712_v26, %v36349_v23 }
 0x7b1   : > { %18810 = vst [vmem:[%s36360_s23 + $0x8] sm:$0xff] %v18778_v18  ;;  %v18777_v2 = vsel %vm18744_vm2, %v18745_v55, %v18710_v46  ;;  %v18712_v5 = vadd.f32 %v27713_v30, %v36349_v23  ;;  %v25942_v31 = vpop.f32.mrb[4].mxu0  ;;  %v23785_v13 = vpop.f32.mrb[6].mxu1 }
 0x7b2   : > { %18809 = vst [vmem:[%s36360_s23] sm:$0xff] %v18777_v2  ;;  %v18748_v34 = vmax.f32 %v18713_v14, 0.0  ;;  %v27714_v21 = vadd.f32 %v25942_v31, %v23782_v35  ;;  %v18505_v37 = vpop.f32.mrb[5].mxu0  ;;  %v9461_v47 = vpop.f32.mrb[7].mxu1 }
 0x7b3   : > { %v18747_v52 = vmax.f32 %v18712_v5, 0.0  ;;  %v27715_v38 = vadd.f32 %v18505_v37, %v9447_v32 }
 0x7b4   : > { %v18780_v49 = vsel %vm18744_vm2, %v18748_v34, %v18713_v14  ;;  %v18715_v0 = vadd.f32 %v27714_v21, %v36349_v23 }
 0x7b5   : > { %18812 = vst [vmem:[%s36360_s23 + $0x18] sm:$0xff] %v18780_v49  ;;  %v18779_v44 = vsel %vm18744_vm2, %v18747_v52, %v18712_v5  ;;  %v18714_v20 = vadd.f32 %v27715_v38, %v36349_v23  ;;  %v25945_v8 = vpop.f32.mrb[6].mxu0  ;;  %v23788_v17 = vpop.f32.mrb[8].mxu1 }
 0x7b6   : > { %18811 = vst [vmem:[%s36360_s23 + $0x10] sm:$0xff] %v18779_v44  ;;  %v18750_v11 = vmax.f32 %v18715_v0, 0.0  ;;  %v27716_v27 = vadd.f32 %v25945_v8, %v23785_v13  ;;  %v18517_v61 = vpop.f32.mrb[7].mxu0  ;;  %v9475_v6 = vpop.f32.mrb[9].mxu1 }
 0x7b7   : > { %v18749_v53 = vmax.f32 %v18714_v20, 0.0  ;;  %v27717_v62 = vadd.f32 %v18517_v61, %v9461_v47 }
 0x7b8   : > { %v18782_v24 = vsel %vm18744_vm2, %v18750_v11, %v18715_v0  ;;  %v18717_v15 = vadd.f32 %v27716_v27, %v36349_v23 }
 0x7b9   : > { %18814 = vst [vmem:[%s36360_s23 + $0x28] sm:$0xff] %v18782_v24  ;;  %v18781_v9 = vsel %vm18744_vm2, %v18749_v53, %v18714_v20  ;;  %v18716_v29 = vadd.f32 %v27717_v62, %v36349_v23  ;;  %v25948_v58 = vpop.f32.mrb[8].mxu0  ;;  %v23791_v4 = vpop.f32.mrb[10].mxu1 }
 0x7ba   : > { %18813 = vst [vmem:[%s36360_s23 + $0x20] sm:$0xff] %v18781_v9  ;;  %v18752_v36 = vmax.f32 %v18717_v15, 0.0  ;;  %v27718_v33 = vadd.f32 %v25948_v58, %v23788_v17  ;;  %v18529_v1 = vpop.f32.mrb[9].mxu0  ;;  %v9489_v12 = vpop.f32.mrb[11].mxu1 }
 0x7bb   : > { %v18751_v41 = vmax.f32 %v18716_v29, 0.0  ;;  %v27719_v57 = vadd.f32 %v18529_v1, %v9475_v6 }
 0x7bc   : > { %v18784_v19 = vsel %vm18744_vm2, %v18752_v36, %v18717_v15  ;;  %v18719_v51 = vadd.f32 %v27718_v33, %v36349_v23 }
 0x7bd   : > { %18816 = vst [vmem:[%s36360_s23 + $0x38] sm:$0xff] %v18784_v19  ;;  %v18783_v63 = vsel %vm18744_vm2, %v18751_v41, %v18716_v29  ;;  %v18718_v39 = vadd.f32 %v27719_v57, %v36349_v23  ;;  %v25951_v3 = vpop.f32.mrb[10].mxu0  ;;  %v23794_v48 = vpop.f32.mrb[12].mxu1 }
 0x7be   : > { %18815 = vst [vmem:[%s36360_s23 + $0x30] sm:$0xff] %v18783_v63  ;;  %v18754_v43 = vmax.f32 %v18719_v51, 0.0  ;;  %v27720_v10 = vadd.f32 %v25951_v3, %v23791_v4  ;;  %v18541_v22 = vpop.f32.mrb[11].mxu0  ;;  %v9503_v16 = vpop.f32.mrb[13].mxu1 }
 0x7bf   : > { %v18753_v40 = vmax.f32 %v18718_v39, 0.0  ;;  %v27721_v45 = vadd.f32 %v18541_v22, %v9489_v12 }
 0x7c0   : > { %v18786_v50 = vsel %vm18744_vm2, %v18754_v43, %v18719_v51  ;;  %v18721_v56 = vadd.f32 %v27720_v10, %v36349_v23 }
 0x7c1   : > { %18818 = vst [vmem:[%s36360_s23 + $0x48] sm:$0xff] %v18786_v50  ;;  %v18785_v7 = vsel %vm18744_vm2, %v18753_v40, %v18718_v39  ;;  %v18720_v42 = vadd.f32 %v27721_v45, %v36349_v23  ;;  %v25954_v54 = vpop.f32.mrb[12].mxu0  ;;  %v23797_v46 = vpop.f32.mrb[14].mxu1 }
 0x7c2   : > { %18817 = vst [vmem:[%s36360_s23 + $0x40] sm:$0xff] %v18785_v7  ;;  %v18756_v28 = vmax.f32 %v18721_v56, 0.0  ;;  %v27722_v35 = vadd.f32 %v25954_v54, %v23794_v48  ;;  %v18553_v25 = vpop.f32.mrb[13].mxu0  ;;  %v9517_v26 = vpop.f32.mrb[15].mxu1 }
 0x7c3   : > { %v18755_v59 = vmax.f32 %v18720_v42, 0.0  ;;  %v27723_v32 = vadd.f32 %v18553_v25, %v9503_v16 }
 0x7c4   : > { %v18788_v55 = vsel %vm18744_vm2, %v18756_v28, %v18721_v56  ;;  %v18723_v30 = vadd.f32 %v27722_v35, %v36349_v23 }
 0x7c5   : > { %18820 = vst [vmem:[%s36360_s23 + $0x58] sm:$0xff] %v18788_v55  ;;  %v18787_v18 = vsel %vm18744_vm2, %v18755_v59, %v18720_v42  ;;  %v18722_v14 = vadd.f32 %v27723_v32, %v36349_v23  ;;  %v25957_v2 = vpop.f32.mrb[14].mxu0  ;;  %v23800_v5 = vpop.f32.mrb[16].mxu1 }
 0x7c6   : > { %18819 = vst [vmem:[%s36360_s23 + $0x50] sm:$0xff] %v18787_v18  ;;  %v18758_v31 = vmax.f32 %v18723_v30, 0.0  ;;  %v27724_v13 = vadd.f32 %v25957_v2, %v23797_v46  ;;  %v18565_v34 = vpop.f32.mrb[15].mxu0  ;;  %v9531_v21 = vpop.f32.mrb[17].mxu1 }
 0x7c7   : > { %v18757_v37 = vmax.f32 %v18722_v14, 0.0  ;;  %v27725_v47 = vadd.f32 %v18565_v34, %v9517_v26 }
 0x7c8   : > { %v18790_v52 = vsel %vm18744_vm2, %v18758_v31, %v18723_v30  ;;  %v18725_v38 = vadd.f32 %v27724_v13, %v36349_v23 }
 0x7c9   : > { %18822 = vst [vmem:[%s36360_s23 + $0x68] sm:$0xff] %v18790_v52  ;;  %v18789_v49 = vsel %vm18744_vm2, %v18757_v37, %v18722_v14  ;;  %v18724_v0 = vadd.f32 %v27725_v47, %v36349_v23  ;;  %v25960_v44 = vpop.f32.mrb[16].mxu0  ;;  %v23803_v20 = vpop.f32.mrb[18].mxu1 }
 0x7ca   : > { %18821 = vst [vmem:[%s36360_s23 + $0x60] sm:$0xff] %v18789_v49  ;;  %v18760_v8 = vmax.f32 %v18725_v38, 0.0  ;;  %v27726_v17 = vadd.f32 %v25960_v44, %v23800_v5  ;;  %v18577_v11 = vpop.f32.mrb[17].mxu0  ;;  %v9545_v27 = vpop.f32.mrb[19].mxu1 }
 0x7cb   : > { %v18759_v61 = vmax.f32 %v18724_v0, 0.0  ;;  %v27727_v6 = vadd.f32 %v18577_v11, %v9531_v21 }
 0x7cc   : > { %v18792_v53 = vsel %vm18744_vm2, %v18760_v8, %v18725_v38  ;;  %v18727_v62 = vadd.f32 %v27726_v17, %v36349_v23 }
 0x7cd   : > { %18824 = vst [vmem:[%s36360_s23 + $0x78] sm:$0xff] %v18792_v53  ;;  %v18791_v24 = vsel %vm18744_vm2, %v18759_v61, %v18724_v0  ;;  %v18726_v15 = vadd.f32 %v27727_v6, %v36349_v23  ;;  %v25963_v9 = vpop.f32.mrb[18].mxu0  ;;  %v23806_v29 = vpop.f32.mrb[20].mxu1 }
 0x7ce   : > { %18823 = vst [vmem:[%s36360_s23 + $0x70] sm:$0xff] %v18791_v24  ;;  %v18762_v58 = vmax.f32 %v18727_v62, 0.0  ;;  %v27728_v4 = vadd.f32 %v25963_v9, %v23803_v20  ;;  %v18589_v36 = vpop.f32.mrb[19].mxu0  ;;  %v9559_v33 = vpop.f32.mrb[21].mxu1 }
 0x7cf   : > { %v18761_v1 = vmax.f32 %v18726_v15, 0.0  ;;  %v27729_v12 = vadd.f32 %v18589_v36, %v9545_v27 }
 0x7d0   : > { %v18794_v41 = vsel %vm18744_vm2, %v18762_v58, %v18727_v62  ;;  %v18729_v57 = vadd.f32 %v27728_v4, %v36349_v23 }
 0x7d1   : > { %18826 = vst [vmem:[%s36360_s23 + $0x88] sm:$0xff] %v18794_v41  ;;  %v18793_v19 = vsel %vm18744_vm2, %v18761_v1, %v18726_v15  ;;  %v18728_v51 = vadd.f32 %v27729_v12, %v36349_v23  ;;  %v25966_v63 = vpop.f32.mrb[20].mxu0  ;;  %v23809_v39 = vpop.f32.mrb[22].mxu1 }
 0x7d2   : > { %18825 = vst [vmem:[%s36360_s23 + $0x80] sm:$0xff] %v18793_v19  ;;  %v18764_v3 = vmax.f32 %v18729_v57, 0.0  ;;  %v27730_v48 = vadd.f32 %v25966_v63, %v23806_v29  ;;  %v18601_v43 = vpop.f32.mrb[21].mxu0  ;;  %v9573_v10 = vpop.f32.mrb[23].mxu1 }
 0x7d3   : > { %v18763_v22 = vmax.f32 %v18728_v51, 0.0  ;;  %v27731_v16 = vadd.f32 %v18601_v43, %v9559_v33 }
 0x7d4   : > { %v18796_v40 = vsel %vm18744_vm2, %v18764_v3, %v18729_v57  ;;  %v18731_v45 = vadd.f32 %v27730_v48, %v36349_v23 }
 0x7d5   : > { %18828 = vst [vmem:[%s36360_s23 + $0x98] sm:$0xff] %v18796_v40  ;;  %v18795_v50 = vsel %vm18744_vm2, %v18763_v22, %v18728_v51  ;;  %v18730_v56 = vadd.f32 %v27731_v16, %v36349_v23  ;;  %v25969_v7 = vpop.f32.mrb[22].mxu0  ;;  %v23812_v42 = vpop.f32.mrb[24].mxu1 }
 0x7d6   : > { %18827 = vst [vmem:[%s36360_s23 + $0x90] sm:$0xff] %v18795_v50  ;;  %v18766_v54 = vmax.f32 %v18731_v45, 0.0  ;;  %v27732_v46 = vadd.f32 %v25969_v7, %v23809_v39  ;;  %v18613_v28 = vpop.f32.mrb[23].mxu0  ;;  %v9587_v35 = vpop.f32.mrb[25].mxu1 }
 0x7d7   : > { %v18765_v25 = vmax.f32 %v18730_v56, 0.0  ;;  %v27733_v26 = vadd.f32 %v18613_v28, %v9573_v10 }
 0x7d8   : > { %v18798_v59 = vsel %vm18744_vm2, %v18766_v54, %v18731_v45  ;;  %v18733_v32 = vadd.f32 %v27732_v46, %v36349_v23 }
 0x7d9   : > { %18830 = vst [vmem:[%s36360_s23 + $0xa8] sm:$0xff] %v18798_v59  ;;  %v18797_v55 = vsel %vm18744_vm2, %v18765_v25, %v18730_v56  ;;  %v18732_v30 = vadd.f32 %v27733_v26, %v36349_v23  ;;  %v25972_v18 = vpop.f32.mrb[24].mxu0  ;;  %v23815_v14 = vpop.f32.mrb[26].mxu1 }
 0x7da   : > { %18829 = vst [vmem:[%s36360_s23 + $0xa0] sm:$0xff] %v18797_v55  ;;  %v18768_v2 = vmax.f32 %v18733_v32, 0.0  ;;  %v27734_v5 = vadd.f32 %v25972_v18, %v23812_v42  ;;  %v18625_v31 = vpop.f32.mrb[25].mxu0  ;;  %v9601_v13 = vpop.f32.mrb[27].mxu1 }
 0x7db   : > { %v18767_v34 = vmax.f32 %v18732_v30, 0.0  ;;  %v27735_v21 = vadd.f32 %v18625_v31, %v9587_v35 }
 0x7dc   : > { %v18800_v37 = vsel %vm18744_vm2, %v18768_v2, %v18733_v32  ;;  %v18735_v47 = vadd.f32 %v27734_v5, %v36349_v23 }
 0x7dd   : > { %18832 = vst [vmem:[%s36360_s23 + $0xb8] sm:$0xff] %v18800_v37  ;;  %v18799_v52 = vsel %vm18744_vm2, %v18767_v34, %v18732_v30  ;;  %v18734_v38 = vadd.f32 %v27735_v21, %v36349_v23  ;;  %v25975_v49 = vpop.f32.mrb[26].mxu0  ;;  %v23818_v0 = vpop.f32.mrb[28].mxu1 }
 0x7de   : > { %18831 = vst [vmem:[%s36360_s23 + $0xb0] sm:$0xff] %v18799_v52  ;;  %v18770_v44 = vmax.f32 %v18735_v47, 0.0  ;;  %v27736_v20 = vadd.f32 %v25975_v49, %v23815_v14  ;;  %v18637_v8 = vpop.f32.mrb[27].mxu0  ;;  %v9615_v17 = vpop.f32.mrb[29].mxu1 }
 0x7df   : > { %v18769_v11 = vmax.f32 %v18734_v38, 0.0  ;;  %v27737_v27 = vadd.f32 %v18637_v8, %v9601_v13 }
 0x7e0   : > { %v18802_v61 = vsel %vm18744_vm2, %v18770_v44, %v18735_v47  ;;  %v18737_v6 = vadd.f32 %v27736_v20, %v36349_v23 }
 0x7e1   : > { %18834 = vst [vmem:[%s36360_s23 + $0xc8] sm:$0xff] %v18802_v61  ;;  %v18801_v53 = vsel %vm18744_vm2, %v18769_v11, %v18734_v38  ;;  %v18736_v62 = vadd.f32 %v27737_v27, %v36349_v23  ;;  %v25978_v24 = vpop.f32.mrb[28].mxu0  ;;  %v23821_v15 = vpop.f32.mrb[30].mxu1 }
 0x7e2   : > { %18833 = vst [vmem:[%s36360_s23 + $0xc0] sm:$0xff] %v18801_v53  ;;  %v18772_v9 = vmax.f32 %v18737_v6, 0.0  ;;  %v27738_v29 = vadd.f32 %v25978_v24, %v23818_v0  ;;  %v18649_v58 = vpop.f32.mrb[29].mxu0  ;;  %v9629_v4 = vpop.f32.mrb[31].mxu1 }
 0x7e3   : > { %v18771_v36 = vmax.f32 %v18736_v62, 0.0  ;;  %v27739_v33 = vadd.f32 %v18649_v58, %v9615_v17 }
 0x7e4   : > { %v18804_v1 = vsel %vm18744_vm2, %v18772_v9, %v18737_v6  ;;  %v18739_v12 = vadd.f32 %v27738_v29, %v36349_v23 }
 0x7e5   : > { %18836 = vst [vmem:[%s36360_s23 + $0xd8] sm:$0xff] %v18804_v1  ;;  %v18803_v41 = vsel %vm18744_vm2, %v18771_v36, %v18736_v62  ;;  %v18738_v57 = vadd.f32 %v27739_v33, %v36349_v23  ;;  %v25981_v19 = vpop.f32.mrb[30].mxu0 }
 0x7e6   : > { %18835 = vst [vmem:[%s36360_s23 + $0xd0] sm:$0xff] %v18803_v41  ;;  %v18774_v51 = vmax.f32 %v18739_v12, 0.0  ;;  %v27740_v63 = vadd.f32 %v25981_v19, %v23821_v15  ;;  %v18661_v39 = vpop.f32.mrb[31].mxu0 }
 0x7e7   : > { %v18773_v3 = vmax.f32 %v18738_v57, 0.0  ;;  %v27741_v48 = vadd.f32 %v18661_v39, %v9629_v4 }
 0x7e8   : > { %v18806_v43 = vsel %vm18744_vm2, %v18774_v51, %v18739_v12  ;;  %v18741_v10 = vadd.f32 %v27740_v63, %v36349_v23 }
 0x7e9   : > { %18838 = vst [vmem:[%s36360_s23 + $0xe8] sm:$0xff] %v18806_v43  ;;  %v18805_v22 = vsel %vm18744_vm2, %v18773_v3, %v18738_v57  ;;  %v18740_v16 = vadd.f32 %v27741_v48, %v36349_v23 }
 0x7ea   : > { %18837 = vst [vmem:[%s36360_s23 + $0xe0] sm:$0xff] %v18805_v22  ;;  %v18776_v40 = vmax.f32 %v18741_v10, 0.0 }
 0x7eb   : > { %v18775_v45 = vmax.f32 %v18740_v16, 0.0 }
 0x7ec   : > { %v18808_v50 = vsel %vm18744_vm2, %v18776_v40, %v18741_v10 }
 0x7ed   : > { %18840 = vst [vmem:[%s36360_s23 + $0xf8] sm:$0xff] %v18808_v50  ;;  %v18807_v56 = vsel %vm18744_vm2, %v18775_v45, %v18740_v16 }
 0x7ee   : > { %18839 = vst [vmem:[%s36360_s23 + $0xf0] sm:$0xff] %v18807_v56 }
 0x7ef PF: > { %s13_s14 = sadd.s32 1, %s29543_s14   ;;  %s40106_s12 = smov %s29539_s13 }
 0x7f0   : > { %p10_p5 = scmp.ge.s32.totalorder %s13_s14, 4   ;;  %s40107_s13 = smov %s40109_s15 }
 0x7f2   :  { %12 = sbr.rel (!%p10_p5) target bundleno = 2 (0x2), region = 71 }

</bundles_post_ra>
